<compile_context>
chip_gen: v7x
topology: tpu7x:2x2x1
jax: 0.10.0
libtpu: 0.0.40
codegen_flags: <defaults>
</compile_context>

<pallas_src>
import functools

import jax
import jax.numpy as jnp
import numpy as np
from jax import lax
from jax.experimental import pallas as pl
from jax.experimental.pallas import tpu as pltpu

_LANE = 128
_VMEM_LIMIT_CACHE = [None]


def _vmem_limit_bytes():
    if _VMEM_LIMIT_CACHE[0] is None:
        limit = 32 * 1024 * 1024
        try:
            cap = int(pltpu.get_tpu_info().vmem_capacity_bytes)
            # 3/4 of physical, capped at 96 MiB: v5e/v6e (128 MiB) -> 96 MiB,
            # v7x (64 MiB) -> 48 MiB.
            limit = int(min(96 * 1024 * 1024, max(32 * 1024 * 1024, (cap * 3) // 4)))
        except Exception:
            pass
        _VMEM_LIMIT_CACHE[0] = limit
    return _VMEM_LIMIT_CACHE[0]


def _cparams(n_grid_axes):
    return pltpu.CompilerParams(
        dimension_semantics=("parallel",) * n_grid_axes,
        vmem_limit_bytes=_vmem_limit_bytes())


# ------------------------------ Pallas kernels ------------------------------ #

def _conv1_fused_kernel(x_ref, h_ref, wx_ref, wh_ref, s_ref, b_ref, o_ref):
    """o = relu((x@Wx + h@Wh) * scale + bias)  == relu(bn1(conv1(cat(x,h))))."""
    y = jnp.dot(x_ref[...], wx_ref[...], preferred_element_type=jnp.float32)
    y = y + jnp.dot(h_ref[...], wh_ref[...], preferred_element_type=jnp.float32)
    y = y * s_ref[...] + b_ref[...]
    o_ref[...] = jnp.maximum(y, 0.0).astype(o_ref.dtype)


def _conv3_tail_fused_kernel(z_ref, w3_ref, wh_ref, idx_ref, idh_ref,
                             s3_ref, b3_ref, sh_ref, bh_ref,
                             out_ref, hmid_ref):
    """Fused block tail, one pass over z = relu(bn2(conv2(.))):
         out  = relu(bn3(conv3(z)) + identity)
         hmid = tanh(bn_rla(h + conv_out(bn3(conv3(z)))))
       conv_out folded through bn3:  wh = (W3*s3)@Wout (cols zero-padded to 128),
       bh = (b3@Wout)*s_rla + b_rla,  sh = s_rla.  Padded lanes stay exactly 0."""
    z = z_ref[...]

    y = jnp.dot(z, w3_ref[...], preferred_element_type=jnp.float32)
    y = y * s3_ref[...] + b3_ref[...] + idx_ref[...].astype(jnp.float32)
    out_ref[...] = jnp.maximum(y, 0.0).astype(out_ref.dtype)

    yh = jnp.dot(z, wh_ref[...], preferred_element_type=jnp.float32)
    yh = (yh + idh_ref[...].astype(jnp.float32)) * sh_ref[...] + bh_ref[...]
    hmid_ref[...] = jnp.tanh(yh).astype(hmid_ref.dtype)


def _conv3x3_kernel(n_rows, w_pad, act, x_ref, w_ref, s_ref, b_ref, o_ref):
    """3x3 / stride-1 / pad-1 conv of one image: the zero-padded image is a flat
    ((H+3)*(W+2), Cin) matrix, the 9 taps are matmuls on statically shifted
    contiguous sublane slices (no slice+reshape relayout), accumulated in f32,
    then folded-BN affine (+ optional relu).  Output is kept in the padded-width
    (W+2) layout so stores stay contiguous; the 2 junk columns per row are
    stripped in XLA by the caller."""
    cout = o_ref.shape[-1]
    acc = jnp.zeros((n_rows, cout), jnp.float32)
    for k in range(9):
        ky, kx = divmod(k, 3)
        off = ky * w_pad + kx                        # static shift per tap
        patch = x_ref[0, pl.ds(off, n_rows), :]
        acc = acc + jnp.dot(patch, w_ref[k], preferred_element_type=jnp.float32)
    y = acc * s_ref[...] + b_ref[...]
    if act == "relu":
        y = jnp.maximum(y, 0.0)
    o_ref[0] = y.astype(o_ref.dtype)


# ---------------------------- pallas_call wrappers --------------------------- #

def _pad_rows(a, mp):
    m = a.shape[0]
    return a if mp == m else jnp.pad(a, ((0, mp - m), (0, 0)))


def _pick_tile_m(M, want):
    """Largest multiple of 8 <= want that divides M (avoids pad/slice passes);
    if none exists the caller falls back to padding."""
    want = max(8, min(int(want), M))
    want -= want % 8
    t = want
    while t >= 8:
        if M % t == 0:
            return t
        t -= 8
    return max(8, want)


def conv1_bn_relu(x2d, h2d, wx, wh, scale, bias, out_dtype, tile_m):
    M = x2d.shape[0]
    width = wx.shape[1]
    mp = pl.cdiv(M, tile_m) * tile_m
    x2d = _pad_rows(x2d, mp)
    h2d = _pad_rows(h2d, mp)
    s2 = scale.reshape(1, width).astype(jnp.float32)
    b2 = bias.reshape(1, width).astype(jnp.float32)
    out = pl.pallas_call(
        _conv1_fused_kernel,
        grid=(mp // tile_m,),
        in_specs=[
            pl.BlockSpec((tile_m, x2d.shape[1]), lambda i: (i, 0)),
            pl.BlockSpec((tile_m, h2d.shape[1]), lambda i: (i, 0)),
            pl.BlockSpec(wx.shape, lambda i: (0, 0)),
            pl.BlockSpec(wh.shape, lambda i: (0, 0)),
            pl.BlockSpec((1, width), lambda i: (0, 0)),
            pl.BlockSpec((1, width), lambda i: (0, 0)),
        ],
        out_specs=pl.BlockSpec((tile_m, width), lambda i: (i, 0)),
        out_shape=jax.ShapeDtypeStruct((mp, width), out_dtype),
        compiler_params=_cparams(1),
    )(x2d, h2d, wx, wh, s2, b2)
    return out if mp == M else out[:M]


def conv3_tail_fused(z2d, w3, wheff, ident2d, hres2d, s3, b3, s_rla, bias_h,
                     out_dtype, tile_m):
    M, K = z2d.shape
    outc = w3.shape[1]
    rla_p = wheff.shape[1]
    mp = pl.cdiv(M, tile_m) * tile_m
    z2d = _pad_rows(z2d, mp)
    ident2d = _pad_rows(ident2d, mp)
    hres2d = _pad_rows(hres2d, mp)
    s3_2 = s3.reshape(1, outc).astype(jnp.float32)
    b3_2 = b3.reshape(1, outc).astype(jnp.float32)
    sh_2 = s_rla.reshape(1, rla_p).astype(jnp.float32)
    bh_2 = bias_h.reshape(1, rla_p).astype(jnp.float32)
    out, hmid = pl.pallas_call(
        _conv3_tail_fused_kernel,
        grid=(mp // tile_m,),
        in_specs=[
            pl.BlockSpec((tile_m, K), lambda i: (i, 0)),
            pl.BlockSpec((K, outc), lambda i: (0, 0)),
            pl.BlockSpec((K, rla_p), lambda i: (0, 0)),
            pl.BlockSpec((tile_m, outc), lambda i: (i, 0)),
            pl.BlockSpec((tile_m, rla_p), lambda i: (i, 0)),
            pl.BlockSpec((1, outc), lambda i: (0, 0)),
            pl.BlockSpec((1, outc), lambda i: (0, 0)),
            pl.BlockSpec((1, rla_p), lambda i: (0, 0)),
            pl.BlockSpec((1, rla_p), lambda i: (0, 0)),
        ],
        out_specs=(pl.BlockSpec((tile_m, outc), lambda i: (i, 0)),
                   pl.BlockSpec((tile_m, rla_p), lambda i: (i, 0))),
        out_shape=(jax.ShapeDtypeStruct((mp, outc), out_dtype),
                   jax.ShapeDtypeStruct((mp, rla_p), out_dtype)),
        compiler_params=_cparams(1),
    )(z2d, w3, wheff, ident2d, hres2d, s3_2, b3_2, sh_2, bh_2)
    if mp != M:
        out, hmid = out[:M], hmid[:M]
    return out, hmid


def conv3x3_bn_act(x_nhwc, w9, scale, bias, act, out_dtype):
    N, H, W, Cin = x_nhwc.shape
    Cout = w9.shape[-1]
    Wp = W + 2
    n_rows = H * Wp
    # zero pad: 1 row top, 2 rows bottom (extra bottom row keeps the last
    # shifted tap slice in-bounds), 1 col left/right; then flatten the spatial
    # dims so the 9 taps become contiguous sublane-shifted slices.
    xflat = jnp.pad(x_nhwc, ((0, 0), (1, 2), (1, 1), (0, 0))).reshape(
        N, (H + 3) * Wp, Cin)
    tile_c = _LANE if (Cout % _LANE == 0 and Cout > _LANE) else Cout
    n_ct = Cout // tile_c
    s2 = scale.reshape(1, Cout).astype(jnp.float32)
    b2 = bias.reshape(1, Cout).astype(jnp.float32)
    out = pl.pallas_call(
        functools.partial(_conv3x3_kernel, n_rows, Wp, act),
        grid=(N, n_ct),
        in_specs=[
            # whole padded image (constant across the channel-tile axis, so it
            # is DMA'd once per image)
            pl.BlockSpec((1, (H + 3) * Wp, Cin), lambda n, c: (n, 0, 0)),
            pl.BlockSpec((9, Cin, tile_c), lambda n, c: (0, 0, c)),
            pl.BlockSpec((1, tile_c), lambda n, c: (0, c)),
            pl.BlockSpec((1, tile_c), lambda n, c: (0, c)),
        ],
        out_specs=pl.BlockSpec((1, n_rows, tile_c), lambda n, c: (n, 0, c)),
        out_shape=jax.ShapeDtypeStruct((N, n_rows, Cout), out_dtype),
        compiler_params=_cparams(2),
    )(xflat, w9, s2, b2)
    # strip the 2 junk output columns kept for contiguous in-kernel addressing
    return out.reshape(N, H, Wp, Cout)[:, :, :W, :]


# ---------------------------------- helpers ---------------------------------- #

def fold_bn(gamma, beta, mean, var, eps=1e-5):
    scale = gamma / jnp.sqrt(var + eps)
    return scale, beta - mean * scale


def _w1x1(w_oihw):                      # (O, I, 1, 1) -> (I, O)
    return jnp.transpose(w_oihw[:, :, 0, 0], (1, 0))


def _w3x3_taps(w_oihw):                 # (O, I, 3, 3) -> (9, I, O), (ky, kx) major
    O, I, _, _ = w_oihw.shape
    return jnp.transpose(w_oihw, (2, 3, 1, 0)).reshape(9, I, O)


def _round_up(x, m):
    return ((x + m - 1) // m) * m


# -------------------------------- forward pass -------------------------------- #

def rlaus_bottleneck_forward(params, x_nchw, h_nchw, act_dtype=jnp.bfloat16,
                             tile_m=512):
    N, Cx, H, W = x_nchw.shape
    rla = h_nchw.shape[1]
    rla_p = _round_up(rla, _LANE)            # lane-dense width for the h branch
    M = N * H * W
    tm = _pick_tile_m(M, tile_m)

    x2d = jnp.transpose(x_nchw, (0, 2, 3, 1)).reshape(M, Cx)
    h2d = jnp.transpose(h_nchw, (0, 2, 3, 1)).reshape(M, rla)
    x_act = x2d.astype(act_dtype)
    # h is padded once to a 128-lane multiple; all downstream h loads/stores are
    # lane-dense and the padded columns stay exactly zero.
    h_act = jnp.pad(h2d, ((0, 0), (0, rla_p - rla))).astype(act_dtype)

    s1, b1 = fold_bn(*params["bn1"])
    s2, b2 = fold_bn(*params["bn2"])
    s3, b3 = fold_bn(*params["bn3"])
    srla, brla = fold_bn(*params["bn_rla"])

    w1 = params["conv1_w"][:, :, 0, 0]                           # (width, Cx+rla)
    w1x = jnp.transpose(w1[:, :Cx], (1, 0)).astype(act_dtype)    # x part of concat
    w1h = jnp.pad(jnp.transpose(w1[:, Cx:], (1, 0)),
                  ((0, rla_p - rla), (0, 0))).astype(act_dtype)  # h part, K padded
    w2 = _w3x3_taps(params["conv2_w"]).astype(act_dtype)         # (9, width, width)
    w3 = _w1x1(params["conv3_w"])                                # (width, outc) f32
    wout = _w1x1(params["conv_out_w"])                           # (outc, rla)  f32
    # fold conv_out through the bn3 affine (done once on weights, f32, exact),
    # zero-pad the narrow rla output columns to 128 lanes:
    wheff = jnp.dot(w3 * s3[None, :], wout, precision=lax.Precision.HIGHEST)
    wheff = jnp.pad(wheff, ((0, 0), (0, rla_p - rla)))
    b_out_eff = jnp.dot(b3, wout, precision=lax.Precision.HIGHEST)
    bias_h = jnp.pad(b_out_eff * srla + brla, (0, rla_p - rla))
    srla_p = jnp.pad(srla, (0, rla_p - rla))
    wrec = jnp.pad(_w3x3_taps(params["recurrent_w"]),
                   ((0, 0), (0, rla_p - rla), (0, rla_p - rla))).astype(act_dtype)

    outc = w3.shape[1]
    width = w1x.shape[1]
    assert Cx == outc, "identity residual requires inplanes == planes*expansion"

    # conv1(cat(x,h)) + bn1 + relu    (concat fused into the kernel)
    z1 = conv1_bn_relu(x_act, h_act, w1x, w1h, s1, b1, act_dtype, tm)

    # conv2 3x3 + bn2 + relu          (shifted-matmul taps, no im2col / relayout)
    z2 = conv3x3_bn_act(z1.reshape(N, H, W, width), w2, s2, b2, "relu", act_dtype)
    z2 = z2.reshape(M, width)

    # conv3+bn3+identity+relu  and  conv_out+bn_rla+h+tanh, fused in one pass;
    # both outputs written in act_dtype (bf16 fast path), hmid lane-dense.
    out_final, h_mid = conv3_tail_fused(
        z2, w3.astype(act_dtype), wheff.astype(act_dtype),
        x_act, h_act, s3, b3, srla_p, bias_h, act_dtype, tm)

    # recurrent 3x3 conv (no bn / activation), lane-dense 128-wide channels
    h_new = conv3x3_bn_act(h_mid.reshape(N, H, W, rla_p), wrec,
                           jnp.ones((rla_p,), jnp.float32),
                           jnp.zeros((rla_p,), jnp.float32),
                           "none", act_dtype)

    out_nchw = jnp.transpose(out_final.reshape(N, H, W, outc),
                             (0, 3, 1, 2)).astype(jnp.float32)
    h_out_nchw = jnp.transpose(h_new[:, :, :, :rla],
                               (0, 3, 1, 2)).astype(jnp.float32)
    return out_nchw, h_out_nchw


# ------------------------------ pure-JAX reference ---------------------------- #

def reference_forward(params, x_nchw, h_nchw, eps=1e-5):
    x = jnp.transpose(x_nchw, (0, 2, 3, 1))
    h = jnp.transpose(h_nchw, (0, 2, 3, 1))

    def conv(xx, w_oihw, padding):
        w = jnp.transpose(w_oihw, (2, 3, 1, 0))      # OIHW -> HWIO
        return lax.conv_general_dilated(
            xx, w, (1, 1), padding,
            dimension_numbers=("NHWC", "HWIO", "NHWC"),
            precision=lax.Precision.HIGHEST)

    def bn(xx, p):
        gamma, beta, mean, var = p
        return (xx - mean) / jnp.sqrt(var + eps) * gamma + beta

    identity = x
    cat = jnp.concatenate([x, h], axis=-1)
    out = jax.nn.relu(bn(conv(cat, params["conv1_w"], "VALID"), params["bn1"]))
    out = jax.nn.relu(bn(conv(out, params["conv2_w"], "SAME"), params["bn2"]))
    out = bn(conv(out, params["conv3_w"], "VALID"), params["bn3"])
    y_out = conv(out, params["conv_out_w"], "VALID")
    hh = jnp.tanh(bn(h + y_out, params["bn_rla"]))
    hh = conv(hh, params["recurrent_w"], "SAME")
    outf = jax.nn.relu(out + identity)
    return (jnp.transpose(outf, (0, 3, 1, 2)), jnp.transpose(hh, (0, 3, 1, 2)))


# ----------------------------------- params ----------------------------------- #

def init_params(key, inplanes, planes, rla_channel, base_width=64, groups=1):
    expansion = 4
    width = int(planes * (base_width / 64.0)) * groups
    outc = planes * expansion
    ks = jax.random.split(key, 9)

    def w(k, shape, scale=0.1):
        return scale * jax.random.normal(k, shape, jnp.float32)

    def bn(k, c):
        k1, k2, k3, k4 = jax.random.split(k, 4)
        gamma = 1.0 + 0.1 * jax.random.normal(k1, (c,), jnp.float32)
        beta = 0.1 * jax.random.normal(k2, (c,), jnp.float32)
        mean = 0.05 * jax.random.normal(k3, (c,), jnp.float32)
        var = 1.0 + 0.1 * jnp.abs(jax.random.normal(k4, (c,), jnp.float32))
        return (gamma, beta, mean, var)

    return {
        "conv1_w": w(ks[0], (width, inplanes + rla_channel, 1, 1)),
        "conv2_w": w(ks[1], (width, width, 3, 3)),
        "conv3_w": w(ks[2], (outc, width, 1, 1)),
        "conv_out_w": w(ks[3], (rla_channel, outc, 1, 1)),
        "recurrent_w": w(ks[4], (rla_channel, rla_channel, 3, 3)),
        "bn1": bn(ks[5], width),
        "bn2": bn(ks[6], width),
        "bn3": bn(ks[7], outc),
        "bn_rla": bn(ks[8], rla_channel),
    }


# ------------------------------------ main ------------------------------------ #

if __name__ == "__main__":
    N, H, W = 2, 16, 16
    planes, rla_channel = 4, 8
    inplanes = planes * 4        # required so `out + identity` is shape-valid (no downsample)

    params = init_params(jax.random.PRNGKey(1), inplanes, planes, rla_channel)

    kx, kh = jax.random.split(jax.random.PRNGKey(0))
    x = jax.random.normal(kx, (N, inplanes, H, W), jnp.float32)   # NCHW like PyTorch
    h = jax.random.normal(kh, (N, rla_channel, H, W), jnp.float32)

    out_ref, h_ref = reference_forward(params, x, h)

    # f32 activation path: tight numerical check of the fused kernel math.
    fwd32 = jax.jit(functools.partial(rlaus_bottleneck_forward, act_dtype=jnp.float32))
    out32, h32 = fwd32(params, x, h)
    jax.block_until_ready((out32, h32))
    np.testing.assert_allclose(np.asarray(out32), np.asarray(out_ref), rtol=5e-3, atol=5e-3)
    np.testing.assert_allclose(np.asarray(h32), np.asarray(h_ref), rtol=5e-3, atol=5e-3)

    # bf16 storage path (the performance configuration): looser tolerance since
    # activations/weights are rounded to bf16 at every layer boundary.
    fwd16 = jax.jit(functools.partial(rlaus_bottleneck_forward, act_dtype=jnp.bfloat16))
    out16, h16 = fwd16(params, x, h)
    jax.block_until_ready((out16, h16))
    np.testing.assert_allclose(np.asarray(out16), np.asarray(out_ref), rtol=5e-2, atol=5e-2)
    np.testing.assert_allclose(np.asarray(h16), np.asarray(h_ref), rtol=5e-2, atol=5e-2)

    print("KERNEL_OK")
</pallas_src>

<mosaic_0001>
module attributes {stable_mosaic.version = 11 : i64} {
  func.func @_conv1_fused_kernel(%arg0: i32, %arg1: memref<512x16xf32, #tpu.memory_space<vmem>>, %arg2: memref<512x128xf32, #tpu.memory_space<vmem>>, %arg3: memref<16x4xf32, #tpu.memory_space<vmem>>, %arg4: memref<128x4xf32, #tpu.memory_space<vmem>>, %arg5: memref<1x4xf32, #tpu.memory_space<vmem>>, %arg6: memref<1x4xf32, #tpu.memory_space<vmem>>, %arg7: memref<512x4xf32, #tpu.memory_space<vmem>>) attributes {dimension_semantics = [#tpu.dimension_semantics<parallel>], iteration_bounds = array<i64: 1>, scalar_prefetch = 0 : i64, scratch_operands = 0 : i64, tpu.core_type = #tpu.core_type<tc>, window_params = [{transform_indices = @transform_0, window_bounds = array<i64: 512, 16>}, {transform_indices = @transform_1, window_bounds = array<i64: 512, 128>}, {pipeline_mode = #tpu.pipeline_mode<synchronous>, transform_indices = @transform_2, window_bounds = array<i64: 16, 4>}, {pipeline_mode = #tpu.pipeline_mode<synchronous>, transform_indices = @transform_3, window_bounds = array<i64: 128, 4>}, {pipeline_mode = #tpu.pipeline_mode<synchronous>, transform_indices = @transform_4, window_bounds = array<i64: 1, 4>}, {pipeline_mode = #tpu.pipeline_mode<synchronous>, transform_indices = @transform_5, window_bounds = array<i64: 1, 4>}, {transform_indices = @transform_6, window_bounds = array<i64: 512, 4>}]} {
    %c0 = arith.constant 0 : index
    %c0_0 = arith.constant 0 : index
    %0 = vector.load %arg1[%c0, %c0_0] : memref<512x16xf32, #tpu.memory_space<vmem>>, vector<512x16xf32>
    %c0_1 = arith.constant 0 : index
    %c0_2 = arith.constant 0 : index
    %1 = vector.load %arg3[%c0_1, %c0_2] : memref<16x4xf32, #tpu.memory_space<vmem>>, vector<16x4xf32>
    %cst = arith.constant dense<0.000000e+00> : vector<512x4xf32>
    %2 = tpu.matmul %0, %1, %cst {dimension_numbers = #tpu.dot_dimension_numbers<[1], [0], [0], [1], [0, 0, 1, 1], [], []>} : vector<512x16xf32>, vector<16x4xf32>, vector<512x4xf32> -> vector<512x4xf32>
    %c0_3 = arith.constant 0 : index
    %c0_4 = arith.constant 0 : index
    %3 = vector.load %arg2[%c0_3, %c0_4] : memref<512x128xf32, #tpu.memory_space<vmem>>, vector<512x128xf32>
    %c0_5 = arith.constant 0 : index
    %c0_6 = arith.constant 0 : index
    %4 = vector.load %arg4[%c0_5, %c0_6] : memref<128x4xf32, #tpu.memory_space<vmem>>, vector<128x4xf32>
    %cst_7 = arith.constant dense<0.000000e+00> : vector<512x4xf32>
    %5 = tpu.matmul %3, %4, %cst_7 {dimension_numbers = #tpu.dot_dimension_numbers<[1], [0], [0], [1], [0, 0, 1, 1], [], []>} : vector<512x128xf32>, vector<128x4xf32>, vector<512x4xf32> -> vector<512x4xf32>
    %6 = arith.addf %2, %5 : vector<512x4xf32>
    %c0_8 = arith.constant 0 : index
    %c0_9 = arith.constant 0 : index
    %7 = vector.load %arg5[%c0_8, %c0_9] : memref<1x4xf32, #tpu.memory_space<vmem>>, vector<1x4xf32>
    %8 = vector.broadcast %7 : vector<1x4xf32> to vector<512x4xf32>
    %9 = arith.mulf %6, %8 : vector<512x4xf32>
    %c0_10 = arith.constant 0 : index
    %c0_11 = arith.constant 0 : index
    %10 = vector.load %arg6[%c0_10, %c0_11] : memref<1x4xf32, #tpu.memory_space<vmem>>, vector<1x4xf32>
    %11 = vector.broadcast %10 : vector<1x4xf32> to vector<512x4xf32>
    %12 = arith.addf %9, %11 : vector<512x4xf32>
    %cst_12 = arith.constant 0.000000e+00 : f32
    %13 = vector.broadcast %cst_12 : f32 to vector<512x4xf32>
    %14 = arith.maximumf %12, %13 : vector<512x4xf32>
    %c0_13 = arith.constant 0 : index
    %c0_14 = arith.constant 0 : index
    %15 = vector.load %arg7[%c0_13, %c0_14] : memref<512x4xf32, #tpu.memory_space<vmem>>, vector<512x4xf32>
    tpu.vector_store %arg7[%c0_13, %c0_14], %14 {strides = array<i32>} : memref<512x4xf32, #tpu.memory_space<vmem>>, vector<512x4xf32>,
    return
  }
  func.func @transform_0(%arg0: i32) -> (i32, i32) {
    %c0_i32 = arith.constant 0 : i32
    %c0_i32_0 = arith.constant 0 : i32
    return %arg0, %c0_i32 : i32, i32
  }
  func.func @transform_1(%arg0: i32) -> (i32, i32) {
    %c0_i32 = arith.constant 0 : i32
    %c0_i32_0 = arith.constant 0 : i32
    return %arg0, %c0_i32 : i32, i32
  }
  func.func @transform_2(%arg0: i32) -> (i32, i32) {
    %c0_i32 = arith.constant 0 : i32
    %c0_i32_0 = arith.constant 0 : i32
    %c0_i32_1 = arith.constant 0 : i32
    return %c0_i32, %c0_i32_0 : i32, i32
  }
  func.func @transform_3(%arg0: i32) -> (i32, i32) {
    %c0_i32 = arith.constant 0 : i32
    %c0_i32_0 = arith.constant 0 : i32
    %c0_i32_1 = arith.constant 0 : i32
    return %c0_i32, %c0_i32_0 : i32, i32
  }
  func.func @transform_4(%arg0: i32) -> (i32, i32) {
    %c0_i32 = arith.constant 0 : i32
    %c0_i32_0 = arith.constant 0 : i32
    %c0_i32_1 = arith.constant 0 : i32
    return %c0_i32, %c0_i32_0 : i32, i32
  }
  func.func @transform_5(%arg0: i32) -> (i32, i32) {
    %c0_i32 = arith.constant 0 : i32
    %c0_i32_0 = arith.constant 0 : i32
    %c0_i32_1 = arith.constant 0 : i32
    return %c0_i32, %c0_i32_0 : i32, i32
  }
  func.func @transform_6(%arg0: i32) -> (i32, i32) {
    %c0_i32 = arith.constant 0 : i32
    %c0_i32_0 = arith.constant 0 : i32
    return %arg0, %c0_i32 : i32, i32
  }
}

module attributes {stable_mosaic.version = 11 : i64} {
  func.func @_conv3x3_kernel(%arg0: i32, %arg1: i32, %arg2: memref<1x342x4xf32, #tpu.memory_space<vmem>>, %arg3: memref<9x4x4xf32, #tpu.memory_space<vmem>>, %arg4: memref<1x4xf32, #tpu.memory_space<vmem>>, %arg5: memref<1x4xf32, #tpu.memory_space<vmem>>, %arg6: memref<1x288x4xf32, #tpu.memory_space<vmem>>) attributes {dimension_semantics = [#tpu.dimension_semantics<parallel>, #tpu.dimension_semantics<parallel>], iteration_bounds = array<i64: 2, 1>, scalar_prefetch = 0 : i64, scratch_operands = 0 : i64, tpu.core_type = #tpu.core_type<tc>, window_params = [{transform_indices = @transform_0, window_bounds = array<i64: 1, 342, 4>}, {transform_indices = @transform_1, window_bounds = array<i64: 9, 4, 4>}, {transform_indices = @transform_2, window_bounds = array<i64: 1, 4>}, {transform_indices = @transform_3, window_bounds = array<i64: 1, 4>}, {transform_indices = @transform_4, window_bounds = array<i64: 1, 288, 4>}]} {
    %cst = arith.constant 0.000000e+00 : f32
    %0 = vector.broadcast %cst : f32 to vector<288x4xf32>
    %c0 = arith.constant 0 : index
    %c0_0 = arith.constant 0 : index
    %c0_1 = arith.constant 0 : index
    %1 = vector.load %arg2[%c0, %c0_0, %c0_1] : memref<1x342x4xf32, #tpu.memory_space<vmem>>, vector<1x288x4xf32>
    %2 = vector.shape_cast %1 : vector<1x288x4xf32> to vector<288x4xf32>
    %c0_2 = arith.constant 0 : index
    %c0_3 = arith.constant 0 : index
    %c0_4 = arith.constant 0 : index
    %3 = vector.load %arg3[%c0_2, %c0_3, %c0_4] : memref<9x4x4xf32, #tpu.memory_space<vmem>>, vector<1x4x4xf32>
    %4 = vector.shape_cast %3 : vector<1x4x4xf32> to vector<4x4xf32>
    %cst_5 = arith.constant dense<0.000000e+00> : vector<288x4xf32>
    %5 = tpu.matmul %2, %4, %cst_5 {dimension_numbers = #tpu.dot_dimension_numbers<[1], [0], [0], [1], [0, 0, 1, 1], [], []>} : vector<288x4xf32>, vector<4x4xf32>, vector<288x4xf32> -> vector<288x4xf32>
    %6 = arith.addf %0, %5 : vector<288x4xf32>
    %c0_6 = arith.constant 0 : index
    %c1 = arith.constant 1 : index
    %c0_7 = arith.constant 0 : index
    %7 = vector.load %arg2[%c0_6, %c1, %c0_7] : memref<1x342x4xf32, #tpu.memory_space<vmem>>, vector<1x288x4xf32>
    %8 = vector.shape_cast %7 : vector<1x288x4xf32> to vector<288x4xf32>
    %c1_8 = arith.constant 1 : index
    %c0_9 = arith.constant 0 : index
    %c0_10 = arith.constant 0 : index
    %9 = vector.load %arg3[%c1_8, %c0_9, %c0_10] : memref<9x4x4xf32, #tpu.memory_space<vmem>>, vector<1x4x4xf32>
    %10 = vector.shape_cast %9 : vector<1x4x4xf32> to vector<4x4xf32>
    %cst_11 = arith.constant dense<0.000000e+00> : vector<288x4xf32>
    %11 = tpu.matmul %8, %10, %cst_11 {dimension_numbers = #tpu.dot_dimension_numbers<[1], [0], [0], [1], [0, 0, 1, 1], [], []>} : vector<288x4xf32>, vector<4x4xf32>, vector<288x4xf32> -> vector<288x4xf32>
    %12 = arith.addf %6, %11 : vector<288x4xf32>
    %c0_12 = arith.constant 0 : index
    %c2 = arith.constant 2 : index
    %c0_13 = arith.constant 0 : index
    %13 = vector.load %arg2[%c0_12, %c2, %c0_13] : memref<1x342x4xf32, #tpu.memory_space<vmem>>, vector<1x288x4xf32>
    %14 = vector.shape_cast %13 : vector<1x288x4xf32> to vector<288x4xf32>
    %c2_14 = arith.constant 2 : index
    %c0_15 = arith.constant 0 : index
    %c0_16 = arith.constant 0 : index
    %15 = vector.load %arg3[%c2_14, %c0_15, %c0_16] : memref<9x4x4xf32, #tpu.memory_space<vmem>>, vector<1x4x4xf32>
    %16 = vector.shape_cast %15 : vector<1x4x4xf32> to vector<4x4xf32>
    %cst_17 = arith.constant dense<0.000000e+00> : vector<288x4xf32>
    %17 = tpu.matmul %14, %16, %cst_17 {dimension_numbers = #tpu.dot_dimension_numbers<[1], [0], [0], [1], [0, 0, 1, 1], [], []>} : vector<288x4xf32>, vector<4x4xf32>, vector<288x4xf32> -> vector<288x4xf32>
    %18 = arith.addf %12, %17 : vector<288x4xf32>
    %c0_18 = arith.constant 0 : index
    %c18 = arith.constant 18 : index
    %c0_19 = arith.constant 0 : index
    %19 = vector.load %arg2[%c0_18, %c18, %c0_19] : memref<1x342x4xf32, #tpu.memory_space<vmem>>, vector<1x288x4xf32>
    %20 = vector.shape_cast %19 : vector<1x288x4xf32> to vector<288x4xf32>
    %c3 = arith.constant 3 : index
    %c0_20 = arith.constant 0 : index
    %c0_21 = arith.constant 0 : index
    %21 = vector.load %arg3[%c3, %c0_20, %c0_21] : memref<9x4x4xf32, #tpu.memory_space<vmem>>, vector<1x4x4xf32>
    %22 = vector.shape_cast %21 : vector<1x4x4xf32> to vector<4x4xf32>
    %cst_22 = arith.constant dense<0.000000e+00> : vector<288x4xf32>
    %23 = tpu.matmul %20, %22, %cst_22 {dimension_numbers = #tpu.dot_dimension_numbers<[1], [0], [0], [1], [0, 0, 1, 1], [], []>} : vector<288x4xf32>, vector<4x4xf32>, vector<288x4xf32> -> vector<288x4xf32>
    %24 = arith.addf %18, %23 : vector<288x4xf32>
    %c0_23 = arith.constant 0 : index
    %c19 = arith.constant 19 : index
    %c0_24 = arith.constant 0 : index
    %25 = vector.load %arg2[%c0_23, %c19, %c0_24] : memref<1x342x4xf32, #tpu.memory_space<vmem>>, vector<1x288x4xf32>
    %26 = vector.shape_cast %25 : vector<1x288x4xf32> to vector<288x4xf32>
    %c4 = arith.constant 4 : index
    %c0_25 = arith.constant 0 : index
    %c0_26 = arith.constant 0 : index
    %27 = vector.load %arg3[%c4, %c0_25, %c0_26] : memref<9x4x4xf32, #tpu.memory_space<vmem>>, vector<1x4x4xf32>
    %28 = vector.shape_cast %27 : vector<1x4x4xf32> to vector<4x4xf32>
    %cst_27 = arith.constant dense<0.000000e+00> : vector<288x4xf32>
    %29 = tpu.matmul %26, %28, %cst_27 {dimension_numbers = #tpu.dot_dimension_numbers<[1], [0], [0], [1], [0, 0, 1, 1], [], []>} : vector<288x4xf32>, vector<4x4xf32>, vector<288x4xf32> -> vector<288x4xf32>
    %30 = arith.addf %24, %29 : vector<288x4xf32>
    %c0_28 = arith.constant 0 : index
    %c20 = arith.constant 20 : index
    %c0_29 = arith.constant 0 : index
    %31 = vector.load %arg2[%c0_28, %c20, %c0_29] : memref<1x342x4xf32, #tpu.memory_space<vmem>>, vector<1x288x4xf32>
    %32 = vector.shape_cast %31 : vector<1x288x4xf32> to vector<288x4xf32>
    %c5 = arith.constant 5 : index
    %c0_30 = arith.constant 0 : index
    %c0_31 = arith.constant 0 : index
    %33 = vector.load %arg3[%c5, %c0_30, %c0_31] : memref<9x4x4xf32, #tpu.memory_space<vmem>>, vector<1x4x4xf32>
    %34 = vector.shape_cast %33 : vector<1x4x4xf32> to vector<4x4xf32>
    %cst_32 = arith.constant dense<0.000000e+00> : vector<288x4xf32>
    %35 = tpu.matmul %32, %34, %cst_32 {dimension_numbers = #tpu.dot_dimension_numbers<[1], [0], [0], [1], [0, 0, 1, 1], [], []>} : vector<288x4xf32>, vector<4x4xf32>, vector<288x4xf32> -> vector<288x4xf32>
    %36 = arith.addf %30, %35 : vector<288x4xf32>
    %c0_33 = arith.constant 0 : index
    %c36 = arith.constant 36 : index
    %c0_34 = arith.constant 0 : index
    %37 = vector.load %arg2[%c0_33, %c36, %c0_34] : memref<1x342x4xf32, #tpu.memory_space<vmem>>, vector<1x288x4xf32>
    %38 = vector.shape_cast %37 : vector<1x288x4xf32> to vector<288x4xf32>
    %c6 = arith.constant 6 : index
    %c0_35 = arith.constant 0 : index
    %c0_36 = arith.constant 0 : index
    %39 = vector.load %arg3[%c6, %c0_35, %c0_36] : memref<9x4x4xf32, #tpu.memory_space<vmem>>, vector<1x4x4xf32>
    %40 = vector.shape_cast %39 : vector<1x4x4xf32> to vector<4x4xf32>
    %cst_37 = arith.constant dense<0.000000e+00> : vector<288x4xf32>
    %41 = tpu.matmul %38, %40, %cst_37 {dimension_numbers = #tpu.dot_dimension_numbers<[1], [0], [0], [1], [0, 0, 1, 1], [], []>} : vector<288x4xf32>, vector<4x4xf32>, vector<288x4xf32> -> vector<288x4xf32>
    %42 = arith.addf %36, %41 : vector<288x4xf32>
    %c0_38 = arith.constant 0 : index
    %c37 = arith.constant 37 : index
    %c0_39 = arith.constant 0 : index
    %43 = vector.load %arg2[%c0_38, %c37, %c0_39] : memref<1x342x4xf32, #tpu.memory_space<vmem>>, vector<1x288x4xf32>
    %44 = vector.shape_cast %43 : vector<1x288x4xf32> to vector<288x4xf32>
    %c7 = arith.constant 7 : index
    %c0_40 = arith.constant 0 : index
    %c0_41 = arith.constant 0 : index
    %45 = vector.load %arg3[%c7, %c0_40, %c0_41] : memref<9x4x4xf32, #tpu.memory_space<vmem>>, vector<1x4x4xf32>
    %46 = vector.shape_cast %45 : vector<1x4x4xf32> to vector<4x4xf32>
    %cst_42 = arith.constant dense<0.000000e+00> : vector<288x4xf32>
    %47 = tpu.matmul %44, %46, %cst_42 {dimension_numbers = #tpu.dot_dimension_numbers<[1], [0], [0], [1], [0, 0, 1, 1], [], []>} : vector<288x4xf32>, vector<4x4xf32>, vector<288x4xf32> -> vector<288x4xf32>
    %48 = arith.addf %42, %47 : vector<288x4xf32>
    %c0_43 = arith.constant 0 : index
    %c38 = arith.constant 38 : index
    %c0_44 = arith.constant 0 : index
    %49 = vector.load %arg2[%c0_43, %c38, %c0_44] : memref<1x342x4xf32, #tpu.memory_space<vmem>>, vector<1x288x4xf32>
    %50 = vector.shape_cast %49 : vector<1x288x4xf32> to vector<288x4xf32>
    %c8 = arith.constant 8 : index
    %c0_45 = arith.constant 0 : index
    %c0_46 = arith.constant 0 : index
    %51 = vector.load %arg3[%c8, %c0_45, %c0_46] : memref<9x4x4xf32, #tpu.memory_space<vmem>>, vector<1x4x4xf32>
    %52 = vector.shape_cast %51 : vector<1x4x4xf32> to vector<4x4xf32>
    %cst_47 = arith.constant dense<0.000000e+00> : vector<288x4xf32>
    %53 = tpu.matmul %50, %52, %cst_47 {dimension_numbers = #tpu.dot_dimension_numbers<[1], [0], [0], [1], [0, 0, 1, 1], [], []>} : vector<288x4xf32>, vector<4x4xf32>, vector<288x4xf32> -> vector<288x4xf32>
    %54 = arith.addf %48, %53 : vector<288x4xf32>
    %c0_48 = arith.constant 0 : index
    %c0_49 = arith.constant 0 : index
    %55 = vector.load %arg4[%c0_48, %c0_49] : memref<1x4xf32, #tpu.memory_space<vmem>>, vector<1x4xf32>
    %56 = vector.broadcast %55 : vector<1x4xf32> to vector<288x4xf32>
    %57 = arith.mulf %54, %56 : vector<288x4xf32>
    %c0_50 = arith.constant 0 : index
    %c0_51 = arith.constant 0 : index
    %58 = vector.load %arg5[%c0_50, %c0_51] : memref<1x4xf32, #tpu.memory_space<vmem>>, vector<1x4xf32>
    %59 = vector.broadcast %58 : vector<1x4xf32> to vector<288x4xf32>
    %60 = arith.addf %57, %59 : vector<288x4xf32>
    %cst_52 = arith.constant 0.000000e+00 : f32
    %61 = vector.broadcast %cst_52 : f32 to vector<288x4xf32>
    %62 = arith.maximumf %60, %61 : vector<288x4xf32>
    %c0_53 = arith.constant 0 : index
    %c0_54 = arith.constant 0 : index
    %c0_55 = arith.constant 0 : index
    %63 = vector.load %arg6[%c0_53, %c0_54, %c0_55] : memref<1x288x4xf32, #tpu.memory_space<vmem>>, vector<1x288x4xf32>
    %64 = vector.shape_cast %63 : vector<1x288x4xf32> to vector<288x4xf32>
    %65 = vector.shape_cast %62 : vector<288x4xf32> to vector<1x288x4xf32>
    tpu.vector_store %arg6[%c0_53, %c0_54, %c0_55], %65 {strides = array<i32>} : memref<1x288x4xf32, #tpu.memory_space<vmem>>, vector<1x288x4xf32>,
    return
  }
  func.func @transform_0(%arg0: i32, %arg1: i32) -> (i32, i32, i32) {
    %c0_i32 = arith.constant 0 : i32
    %c0_i32_0 = arith.constant 0 : i32
    %c0_i32_1 = arith.constant 0 : i32
    return %arg0, %c0_i32, %c0_i32_0 : i32, i32, i32
  }
  func.func @transform_1(%arg0: i32, %arg1: i32) -> (i32, i32, i32) {
    %c0_i32 = arith.constant 0 : i32
    %c0_i32_0 = arith.constant 0 : i32
    %c0_i32_1 = arith.constant 0 : i32
    return %c0_i32, %c0_i32_0, %arg1 : i32, i32, i32
  }
  func.func @transform_2(%arg0: i32, %arg1: i32) -> (i32, i32) {
    %c0_i32 = arith.constant 0 : i32
    %c0_i32_0 = arith.constant 0 : i32
    return %c0_i32, %arg1 : i32, i32
  }
  func.func @transform_3(%arg0: i32, %arg1: i32) -> (i32, i32) {
    %c0_i32 = arith.constant 0 : i32
    %c0_i32_0 = arith.constant 0 : i32
    return %c0_i32, %arg1 : i32, i32
  }
  func.func @transform_4(%arg0: i32, %arg1: i32) -> (i32, i32, i32) {
    %c0_i32 = arith.constant 0 : i32
    %c0_i32_0 = arith.constant 0 : i32
    return %arg0, %c0_i32, %arg1 : i32, i32, i32
  }
}

module attributes {stable_mosaic.version = 11 : i64} {
  func.func @_conv3_tail_fused_kernel(%arg0: i32, %arg1: memref<512x4xf32, #tpu.memory_space<vmem>>, %arg2: memref<4x16xf32, #tpu.memory_space<vmem>>, %arg3: memref<4x128xf32, #tpu.memory_space<vmem>>, %arg4: memref<512x16xf32, #tpu.memory_space<vmem>>, %arg5: memref<512x128xf32, #tpu.memory_space<vmem>>, %arg6: memref<1x16xf32, #tpu.memory_space<vmem>>, %arg7: memref<1x16xf32, #tpu.memory_space<vmem>>, %arg8: memref<1x128xf32, #tpu.memory_space<vmem>>, %arg9: memref<1x128xf32, #tpu.memory_space<vmem>>, %arg10: memref<512x16xf32, #tpu.memory_space<vmem>>, %arg11: memref<512x128xf32, #tpu.memory_space<vmem>>) attributes {dimension_semantics = [#tpu.dimension_semantics<parallel>], iteration_bounds = array<i64: 1>, scalar_prefetch = 0 : i64, scratch_operands = 0 : i64, tpu.core_type = #tpu.core_type<tc>, window_params = [{transform_indices = @transform_0, window_bounds = array<i64: 512, 4>}, {pipeline_mode = #tpu.pipeline_mode<synchronous>, transform_indices = @transform_1, window_bounds = array<i64: 4, 16>}, {pipeline_mode = #tpu.pipeline_mode<synchronous>, transform_indices = @transform_2, window_bounds = array<i64: 4, 128>}, {transform_indices = @transform_3, window_bounds = array<i64: 512, 16>}, {transform_indices = @transform_4, window_bounds = array<i64: 512, 128>}, {pipeline_mode = #tpu.pipeline_mode<synchronous>, transform_indices = @transform_5, window_bounds = array<i64: 1, 16>}, {pipeline_mode = #tpu.pipeline_mode<synchronous>, transform_indices = @transform_6, window_bounds = array<i64: 1, 16>}, {pipeline_mode = #tpu.pipeline_mode<synchronous>, transform_indices = @transform_7, window_bounds = array<i64: 1, 128>}, {pipeline_mode = #tpu.pipeline_mode<synchronous>, transform_indices = @transform_8, window_bounds = array<i64: 1, 128>}, {transform_indices = @transform_9, window_bounds = array<i64: 512, 16>}, {transform_indices = @transform_10, window_bounds = array<i64: 512, 128>}]} {
    %c0 = arith.constant 0 : index
    %c0_0 = arith.constant 0 : index
    %0 = vector.load %arg1[%c0, %c0_0] : memref<512x4xf32, #tpu.memory_space<vmem>>, vector<512x4xf32>
    %c0_1 = arith.constant 0 : index
    %c0_2 = arith.constant 0 : index
    %1 = vector.load %arg2[%c0_1, %c0_2] : memref<4x16xf32, #tpu.memory_space<vmem>>, vector<4x16xf32>
    %cst = arith.constant dense<0.000000e+00> : vector<512x16xf32>
    %2 = tpu.matmul %0, %1, %cst {dimension_numbers = #tpu.dot_dimension_numbers<[1], [0], [0], [1], [0, 0, 1, 1], [], []>} : vector<512x4xf32>, vector<4x16xf32>, vector<512x16xf32> -> vector<512x16xf32>
    %c0_3 = arith.constant 0 : index
    %c0_4 = arith.constant 0 : index
    %3 = vector.load %arg6[%c0_3, %c0_4] : memref<1x16xf32, #tpu.memory_space<vmem>>, vector<1x16xf32>
    %4 = vector.broadcast %3 : vector<1x16xf32> to vector<512x16xf32>
    %5 = arith.mulf %2, %4 : vector<512x16xf32>
    %c0_5 = arith.constant 0 : index
    %c0_6 = arith.constant 0 : index
    %6 = vector.load %arg7[%c0_5, %c0_6] : memref<1x16xf32, #tpu.memory_space<vmem>>, vector<1x16xf32>
    %7 = vector.broadcast %6 : vector<1x16xf32> to vector<512x16xf32>
    %8 = arith.addf %5, %7 : vector<512x16xf32>
    %c0_7 = arith.constant 0 : index
    %c0_8 = arith.constant 0 : index
    %9 = vector.load %arg4[%c0_7, %c0_8] : memref<512x16xf32, #tpu.memory_space<vmem>>, vector<512x16xf32>
    %10 = arith.addf %8, %9 : vector<512x16xf32>
    %cst_9 = arith.constant 0.000000e+00 : f32
    %11 = vector.broadcast %cst_9 : f32 to vector<512x16xf32>
    %12 = arith.maximumf %10, %11 : vector<512x16xf32>
    %c0_10 = arith.constant 0 : index
    %c0_11 = arith.constant 0 : index
    %13 = vector.load %arg10[%c0_10, %c0_11] : memref<512x16xf32, #tpu.memory_space<vmem>>, vector<512x16xf32>
    tpu.vector_store %arg10[%c0_10, %c0_11], %12 {strides = array<i32>} : memref<512x16xf32, #tpu.memory_space<vmem>>, vector<512x16xf32>,
    %c0_12 = arith.constant 0 : index
    %c0_13 = arith.constant 0 : index
    %14 = vector.load %arg3[%c0_12, %c0_13] : memref<4x128xf32, #tpu.memory_space<vmem>>, vector<4x128xf32>
    %cst_14 = arith.constant dense<0.000000e+00> : vector<512x128xf32>
    %15 = tpu.matmul %0, %14, %cst_14 {dimension_numbers = #tpu.dot_dimension_numbers<[1], [0], [0], [1], [0, 0, 1, 1], [], []>} : vector<512x4xf32>, vector<4x128xf32>, vector<512x128xf32> -> vector<512x128xf32>
    %c0_15 = arith.constant 0 : index
    %c0_16 = arith.constant 0 : index
    %16 = vector.load %arg5[%c0_15, %c0_16] : memref<512x128xf32, #tpu.memory_space<vmem>>, vector<512x128xf32>
    %17 = arith.addf %15, %16 : vector<512x128xf32>
    %c0_17 = arith.constant 0 : index
    %c0_18 = arith.constant 0 : index
    %18 = vector.load %arg8[%c0_17, %c0_18] : memref<1x128xf32, #tpu.memory_space<vmem>>, vector<1x128xf32>
    %19 = vector.broadcast %18 : vector<1x128xf32> to vector<512x128xf32>
    %20 = arith.mulf %17, %19 : vector<512x128xf32>
    %c0_19 = arith.constant 0 : index
    %c0_20 = arith.constant 0 : index
    %21 = vector.load %arg9[%c0_19, %c0_20] : memref<1x128xf32, #tpu.memory_space<vmem>>, vector<1x128xf32>
    %22 = vector.broadcast %21 : vector<1x128xf32> to vector<512x128xf32>
    %23 = arith.addf %20, %22 : vector<512x128xf32>
    %24 = math.tanh %23 : vector<512x128xf32>
    %c0_21 = arith.constant 0 : index
    %c0_22 = arith.constant 0 : index
    %25 = vector.load %arg11[%c0_21, %c0_22] : memref<512x128xf32, #tpu.memory_space<vmem>>, vector<512x128xf32>
    tpu.vector_store %arg11[%c0_21, %c0_22], %24 {strides = array<i32>} : memref<512x128xf32, #tpu.memory_space<vmem>>, vector<512x128xf32>,
    return
  }
  func.func @transform_0(%arg0: i32) -> (i32, i32) {
    %c0_i32 = arith.constant 0 : i32
    %c0_i32_0 = arith.constant 0 : i32
    return %arg0, %c0_i32 : i32, i32
  }
  func.func @transform_1(%arg0: i32) -> (i32, i32) {
    %c0_i32 = arith.constant 0 : i32
    %c0_i32_0 = arith.constant 0 : i32
    %c0_i32_1 = arith.constant 0 : i32
    return %c0_i32, %c0_i32_0 : i32, i32
  }
  func.func @transform_2(%arg0: i32) -> (i32, i32) {
    %c0_i32 = arith.constant 0 : i32
    %c0_i32_0 = arith.constant 0 : i32
    %c0_i32_1 = arith.constant 0 : i32
    return %c0_i32, %c0_i32_0 : i32, i32
  }
  func.func @transform_3(%arg0: i32) -> (i32, i32) {
    %c0_i32 = arith.constant 0 : i32
    %c0_i32_0 = arith.constant 0 : i32
    return %arg0, %c0_i32 : i32, i32
  }
  func.func @transform_4(%arg0: i32) -> (i32, i32) {
    %c0_i32 = arith.constant 0 : i32
    %c0_i32_0 = arith.constant 0 : i32
    return %arg0, %c0_i32 : i32, i32
  }
  func.func @transform_5(%arg0: i32) -> (i32, i32) {
    %c0_i32 = arith.constant 0 : i32
    %c0_i32_0 = arith.constant 0 : i32
    %c0_i32_1 = arith.constant 0 : i32
    return %c0_i32, %c0_i32_0 : i32, i32
  }
  func.func @transform_6(%arg0: i32) -> (i32, i32) {
    %c0_i32 = arith.constant 0 : i32
    %c0_i32_0 = arith.constant 0 : i32
    %c0_i32_1 = arith.constant 0 : i32
    return %c0_i32, %c0_i32_0 : i32, i32
  }
  func.func @transform_7(%arg0: i32) -> (i32, i32) {
    %c0_i32 = arith.constant 0 : i32
    %c0_i32_0 = arith.constant 0 : i32
    %c0_i32_1 = arith.constant 0 : i32
    return %c0_i32, %c0_i32_0 : i32, i32
  }
  func.func @transform_8(%arg0: i32) -> (i32, i32) {
    %c0_i32 = arith.constant 0 : i32
    %c0_i32_0 = arith.constant 0 : i32
    %c0_i32_1 = arith.constant 0 : i32
    return %c0_i32, %c0_i32_0 : i32, i32
  }
  func.func @transform_9(%arg0: i32) -> (i32, i32) {
    %c0_i32 = arith.constant 0 : i32
    %c0_i32_0 = arith.constant 0 : i32
    return %arg0, %c0_i32 : i32, i32
  }
  func.func @transform_10(%arg0: i32) -> (i32, i32) {
    %c0_i32 = arith.constant 0 : i32
    %c0_i32_0 = arith.constant 0 : i32
    return %arg0, %c0_i32 : i32, i32
  }
}

module attributes {stable_mosaic.version = 11 : i64} {
  func.func @_conv3x3_kernel(%arg0: i32, %arg1: i32, %arg2: memref<1x342x128xf32, #tpu.memory_space<vmem>>, %arg3: memref<9x128x128xf32, #tpu.memory_space<vmem>>, %arg4: memref<1x128xf32, #tpu.memory_space<vmem>>, %arg5: memref<1x128xf32, #tpu.memory_space<vmem>>, %arg6: memref<1x288x128xf32, #tpu.memory_space<vmem>>) attributes {dimension_semantics = [#tpu.dimension_semantics<parallel>, #tpu.dimension_semantics<parallel>], iteration_bounds = array<i64: 2, 1>, scalar_prefetch = 0 : i64, scratch_operands = 0 : i64, tpu.core_type = #tpu.core_type<tc>, window_params = [{transform_indices = @transform_0, window_bounds = array<i64: 1, 342, 128>}, {transform_indices = @transform_1, window_bounds = array<i64: 9, 128, 128>}, {transform_indices = @transform_2, window_bounds = array<i64: 1, 128>}, {transform_indices = @transform_3, window_bounds = array<i64: 1, 128>}, {transform_indices = @transform_4, window_bounds = array<i64: 1, 288, 128>}]} {
    %cst = arith.constant 0.000000e+00 : f32
    %0 = vector.broadcast %cst : f32 to vector<288x128xf32>
    %c0 = arith.constant 0 : index
    %c0_0 = arith.constant 0 : index
    %c0_1 = arith.constant 0 : index
    %1 = vector.load %arg2[%c0, %c0_0, %c0_1] : memref<1x342x128xf32, #tpu.memory_space<vmem>>, vector<1x288x128xf32>
    %2 = vector.shape_cast %1 : vector<1x288x128xf32> to vector<288x128xf32>
    %c0_2 = arith.constant 0 : index
    %c0_3 = arith.constant 0 : index
    %c0_4 = arith.constant 0 : index
    %3 = vector.load %arg3[%c0_2, %c0_3, %c0_4] : memref<9x128x128xf32, #tpu.memory_space<vmem>>, vector<1x128x128xf32>
    %4 = vector.shape_cast %3 : vector<1x128x128xf32> to vector<128x128xf32>
    %cst_5 = arith.constant dense<0.000000e+00> : vector<288x128xf32>
    %5 = tpu.matmul %2, %4, %cst_5 {dimension_numbers = #tpu.dot_dimension_numbers<[1], [0], [0], [1], [0, 0, 1, 1], [], []>} : vector<288x128xf32>, vector<128x128xf32>, vector<288x128xf32> -> vector<288x128xf32>
    %6 = arith.addf %0, %5 : vector<288x128xf32>
    %c0_6 = arith.constant 0 : index
    %c1 = arith.constant 1 : index
    %c0_7 = arith.constant 0 : index
    %7 = vector.load %arg2[%c0_6, %c1, %c0_7] : memref<1x342x128xf32, #tpu.memory_space<vmem>>, vector<1x288x128xf32>
    %8 = vector.shape_cast %7 : vector<1x288x128xf32> to vector<288x128xf32>
    %c1_8 = arith.constant 1 : index
    %c0_9 = arith.constant 0 : index
    %c0_10 = arith.constant 0 : index
    %9 = vector.load %arg3[%c1_8, %c0_9, %c0_10] : memref<9x128x128xf32, #tpu.memory_space<vmem>>, vector<1x128x128xf32>
    %10 = vector.shape_cast %9 : vector<1x128x128xf32> to vector<128x128xf32>
    %cst_11 = arith.constant dense<0.000000e+00> : vector<288x128xf32>
    %11 = tpu.matmul %8, %10, %cst_11 {dimension_numbers = #tpu.dot_dimension_numbers<[1], [0], [0], [1], [0, 0, 1, 1], [], []>} : vector<288x128xf32>, vector<128x128xf32>, vector<288x128xf32> -> vector<288x128xf32>
    %12 = arith.addf %6, %11 : vector<288x128xf32>
    %c0_12 = arith.constant 0 : index
    %c2 = arith.constant 2 : index
    %c0_13 = arith.constant 0 : index
    %13 = vector.load %arg2[%c0_12, %c2, %c0_13] : memref<1x342x128xf32, #tpu.memory_space<vmem>>, vector<1x288x128xf32>
    %14 = vector.shape_cast %13 : vector<1x288x128xf32> to vector<288x128xf32>
    %c2_14 = arith.constant 2 : index
    %c0_15 = arith.constant 0 : index
    %c0_16 = arith.constant 0 : index
    %15 = vector.load %arg3[%c2_14, %c0_15, %c0_16] : memref<9x128x128xf32, #tpu.memory_space<vmem>>, vector<1x128x128xf32>
    %16 = vector.shape_cast %15 : vector<1x128x128xf32> to vector<128x128xf32>
    %cst_17 = arith.constant dense<0.000000e+00> : vector<288x128xf32>
    %17 = tpu.matmul %14, %16, %cst_17 {dimension_numbers = #tpu.dot_dimension_numbers<[1], [0], [0], [1], [0, 0, 1, 1], [], []>} : vector<288x128xf32>, vector<128x128xf32>, vector<288x128xf32> -> vector<288x128xf32>
    %18 = arith.addf %12, %17 : vector<288x128xf32>
    %c0_18 = arith.constant 0 : index
    %c18 = arith.constant 18 : index
    %c0_19 = arith.constant 0 : index
    %19 = vector.load %arg2[%c0_18, %c18, %c0_19] : memref<1x342x128xf32, #tpu.memory_space<vmem>>, vector<1x288x128xf32>
    %20 = vector.shape_cast %19 : vector<1x288x128xf32> to vector<288x128xf32>
    %c3 = arith.constant 3 : index
    %c0_20 = arith.constant 0 : index
    %c0_21 = arith.constant 0 : index
    %21 = vector.load %arg3[%c3, %c0_20, %c0_21] : memref<9x128x128xf32, #tpu.memory_space<vmem>>, vector<1x128x128xf32>
    %22 = vector.shape_cast %21 : vector<1x128x128xf32> to vector<128x128xf32>
    %cst_22 = arith.constant dense<0.000000e+00> : vector<288x128xf32>
    %23 = tpu.matmul %20, %22, %cst_22 {dimension_numbers = #tpu.dot_dimension_numbers<[1], [0], [0], [1], [0, 0, 1, 1], [], []>} : vector<288x128xf32>, vector<128x128xf32>, vector<288x128xf32> -> vector<288x128xf32>
    %24 = arith.addf %18, %23 : vector<288x128xf32>
    %c0_23 = arith.constant 0 : index
    %c19 = arith.constant 19 : index
    %c0_24 = arith.constant 0 : index
    %25 = vector.load %arg2[%c0_23, %c19, %c0_24] : memref<1x342x128xf32, #tpu.memory_space<vmem>>, vector<1x288x128xf32>
    %26 = vector.shape_cast %25 : vector<1x288x128xf32> to vector<288x128xf32>
    %c4 = arith.constant 4 : index
    %c0_25 = arith.constant 0 : index
    %c0_26 = arith.constant 0 : index
    %27 = vector.load %arg3[%c4, %c0_25, %c0_26] : memref<9x128x128xf32, #tpu.memory_space<vmem>>, vector<1x128x128xf32>
    %28 = vector.shape_cast %27 : vector<1x128x128xf32> to vector<128x128xf32>
    %cst_27 = arith.constant dense<0.000000e+00> : vector<288x128xf32>
    %29 = tpu.matmul %26, %28, %cst_27 {dimension_numbers = #tpu.dot_dimension_numbers<[1], [0], [0], [1], [0, 0, 1, 1], [], []>} : vector<288x128xf32>, vector<128x128xf32>, vector<288x128xf32> -> vector<288x128xf32>
    %30 = arith.addf %24, %29 : vector<288x128xf32>
    %c0_28 = arith.constant 0 : index
    %c20 = arith.constant 20 : index
    %c0_29 = arith.constant 0 : index
    %31 = vector.load %arg2[%c0_28, %c20, %c0_29] : memref<1x342x128xf32, #tpu.memory_space<vmem>>, vector<1x288x128xf32>
    %32 = vector.shape_cast %31 : vector<1x288x128xf32> to vector<288x128xf32>
    %c5 = arith.constant 5 : index
    %c0_30 = arith.constant 0 : index
    %c0_31 = arith.constant 0 : index
    %33 = vector.load %arg3[%c5, %c0_30, %c0_31] : memref<9x128x128xf32, #tpu.memory_space<vmem>>, vector<1x128x128xf32>
    %34 = vector.shape_cast %33 : vector<1x128x128xf32> to vector<128x128xf32>
    %cst_32 = arith.constant dense<0.000000e+00> : vector<288x128xf32>
    %35 = tpu.matmul %32, %34, %cst_32 {dimension_numbers = #tpu.dot_dimension_numbers<[1], [0], [0], [1], [0, 0, 1, 1], [], []>} : vector<288x128xf32>, vector<128x128xf32>, vector<288x128xf32> -> vector<288x128xf32>
    %36 = arith.addf %30, %35 : vector<288x128xf32>
    %c0_33 = arith.constant 0 : index
    %c36 = arith.constant 36 : index
    %c0_34 = arith.constant 0 : index
    %37 = vector.load %arg2[%c0_33, %c36, %c0_34] : memref<1x342x128xf32, #tpu.memory_space<vmem>>, vector<1x288x128xf32>
    %38 = vector.shape_cast %37 : vector<1x288x128xf32> to vector<288x128xf32>
    %c6 = arith.constant 6 : index
    %c0_35 = arith.constant 0 : index
    %c0_36 = arith.constant 0 : index
    %39 = vector.load %arg3[%c6, %c0_35, %c0_36] : memref<9x128x128xf32, #tpu.memory_space<vmem>>, vector<1x128x128xf32>
    %40 = vector.shape_cast %39 : vector<1x128x128xf32> to vector<128x128xf32>
    %cst_37 = arith.constant dense<0.000000e+00> : vector<288x128xf32>
    %41 = tpu.matmul %38, %40, %cst_37 {dimension_numbers = #tpu.dot_dimension_numbers<[1], [0], [0], [1], [0, 0, 1, 1], [], []>} : vector<288x128xf32>, vector<128x128xf32>, vector<288x128xf32> -> vector<288x128xf32>
    %42 = arith.addf %36, %41 : vector<288x128xf32>
    %c0_38 = arith.constant 0 : index
    %c37 = arith.constant 37 : index
    %c0_39 = arith.constant 0 : index
    %43 = vector.load %arg2[%c0_38, %c37, %c0_39] : memref<1x342x128xf32, #tpu.memory_space<vmem>>, vector<1x288x128xf32>
    %44 = vector.shape_cast %43 : vector<1x288x128xf32> to vector<288x128xf32>
    %c7 = arith.constant 7 : index
    %c0_40 = arith.constant 0 : index
    %c0_41 = arith.constant 0 : index
    %45 = vector.load %arg3[%c7, %c0_40, %c0_41] : memref<9x128x128xf32, #tpu.memory_space<vmem>>, vector<1x128x128xf32>
    %46 = vector.shape_cast %45 : vector<1x128x128xf32> to vector<128x128xf32>
    %cst_42 = arith.constant dense<0.000000e+00> : vector<288x128xf32>
    %47 = tpu.matmul %44, %46, %cst_42 {dimension_numbers = #tpu.dot_dimension_numbers<[1], [0], [0], [1], [0, 0, 1, 1], [], []>} : vector<288x128xf32>, vector<128x128xf32>, vector<288x128xf32> -> vector<288x128xf32>
    %48 = arith.addf %42, %47 : vector<288x128xf32>
    %c0_43 = arith.constant 0 : index
    %c38 = arith.constant 38 : index
    %c0_44 = arith.constant 0 : index
    %49 = vector.load %arg2[%c0_43, %c38, %c0_44] : memref<1x342x128xf32, #tpu.memory_space<vmem>>, vector<1x288x128xf32>
    %50 = vector.shape_cast %49 : vector<1x288x128xf32> to vector<288x128xf32>
    %c8 = arith.constant 8 : index
    %c0_45 = arith.constant 0 : index
    %c0_46 = arith.constant 0 : index
    %51 = vector.load %arg3[%c8, %c0_45, %c0_46] : memref<9x128x128xf32, #tpu.memory_space<vmem>>, vector<1x128x128xf32>
    %52 = vector.shape_cast %51 : vector<1x128x128xf32> to vector<128x128xf32>
    %cst_47 = arith.constant dense<0.000000e+00> : vector<288x128xf32>
    %53 = tpu.matmul %50, %52, %cst_47 {dimension_numbers = #tpu.dot_dimension_numbers<[1], [0], [0], [1], [0, 0, 1, 1], [], []>} : vector<288x128xf32>, vector<128x128xf32>, vector<288x128xf32> -> vector<288x128xf32>
    %54 = arith.addf %48, %53 : vector<288x128xf32>
    %c0_48 = arith.constant 0 : index
    %c0_49 = arith.constant 0 : index
    %55 = vector.load %arg4[%c0_48, %c0_49] : memref<1x128xf32, #tpu.memory_space<vmem>>, vector<1x128xf32>
    %56 = vector.broadcast %55 : vector<1x128xf32> to vector<288x128xf32>
    %57 = arith.mulf %54, %56 : vector<288x128xf32>
    %c0_50 = arith.constant 0 : index
    %c0_51 = arith.constant 0 : index
    %58 = vector.load %arg5[%c0_50, %c0_51] : memref<1x128xf32, #tpu.memory_space<vmem>>, vector<1x128xf32>
    %59 = vector.broadcast %58 : vector<1x128xf32> to vector<288x128xf32>
    %60 = arith.addf %57, %59 : vector<288x128xf32>
    %c0_52 = arith.constant 0 : index
    %c0_53 = arith.constant 0 : index
    %c0_54 = arith.constant 0 : index
    %61 = vector.load %arg6[%c0_52, %c0_53, %c0_54] : memref<1x288x128xf32, #tpu.memory_space<vmem>>, vector<1x288x128xf32>
    %62 = vector.shape_cast %61 : vector<1x288x128xf32> to vector<288x128xf32>
    %63 = vector.shape_cast %60 : vector<288x128xf32> to vector<1x288x128xf32>
    tpu.vector_store %arg6[%c0_52, %c0_53, %c0_54], %63 {strides = array<i32>} : memref<1x288x128xf32, #tpu.memory_space<vmem>>, vector<1x288x128xf32>,
    return
  }
  func.func @transform_0(%arg0: i32, %arg1: i32) -> (i32, i32, i32) {
    %c0_i32 = arith.constant 0 : i32
    %c0_i32_0 = arith.constant 0 : i32
    %c0_i32_1 = arith.constant 0 : i32
    return %arg0, %c0_i32, %c0_i32_0 : i32, i32, i32
  }
  func.func @transform_1(%arg0: i32, %arg1: i32) -> (i32, i32, i32) {
    %c0_i32 = arith.constant 0 : i32
    %c0_i32_0 = arith.constant 0 : i32
    %c0_i32_1 = arith.constant 0 : i32
    return %c0_i32, %c0_i32_0, %arg1 : i32, i32, i32
  }
  func.func @transform_2(%arg0: i32, %arg1: i32) -> (i32, i32) {
    %c0_i32 = arith.constant 0 : i32
    %c0_i32_0 = arith.constant 0 : i32
    return %c0_i32, %arg1 : i32, i32
  }
  func.func @transform_3(%arg0: i32, %arg1: i32) -> (i32, i32) {
    %c0_i32 = arith.constant 0 : i32
    %c0_i32_0 = arith.constant 0 : i32
    return %c0_i32, %arg1 : i32, i32
  }
  func.func @transform_4(%arg0: i32, %arg1: i32) -> (i32, i32, i32) {
    %c0_i32 = arith.constant 0 : i32
    %c0_i32_0 = arith.constant 0 : i32
    return %arg0, %c0_i32, %arg1 : i32, i32, i32
  }
}

</mosaic_0001>

<bundles_post_ra>
// kernel: rlaus_bottleneck_forward.4
= control target key start
LH: loop header
LB: loop body
LE: loop exit
PB: predicated region body
PF: predicated region fallthrough
CT: control target
= control target key end

     0   :  { %vm554_vm0 = vcmask 130048   ;;  %vm1338_vm1 = vcmask 31744   ;;  %s3043_s3 = inlined_call_operand.vmem [shape: f32[128,4], index: 3, kind: input, shape index: {}]   ;;  %s3044_s2 = inlined_call_operand.vmem [shape: f32[16,4], index: 2, kind: input, shape index: {}]   ;;  %s3045_s0 = inlined_call_operand.vmem [shape: f32[512,16], index: 0, kind: input, shape index: {}]   ;;  %s3046_s1 = inlined_call_operand.vmem [shape: f32[512,128], index: 1, kind: input, shape index: {}]   ;;  %s3047_s4 = inlined_call_operand.vmem [shape: f32[1,4], index: 4, kind: input, shape index: {}]   ;;  %s3048_s5 = inlined_call_operand.vmem [shape: f32[1,4], index: 5, kind: input, shape index: {}]   ;;  %s3049_s6 = inlined_call_operand.vmem [shape: f32[512,4], index: 6, kind: output, shape index: {}]  }
   0x1   :  { %v153_v0 = vld [vmem:[%s3043_s3] sm:$0xff]  ;;  %v154_v1 = vld [vmem:[%s3043_s3 + $0x8] sm:$0xff]  ;;  %v155_v2 = vld [vmem:[%s3043_s3 + $0x10] sm:$0xff] }
   0x2   :  { %v1847_v3 = vpack.c.bf16 %v154_v1, %v153_v0  ;;  %v156_v4 = vld [vmem:[%s3043_s3 + $0x18] sm:$0xff]  ;;  %v157_v6 = vld [vmem:[%s3043_s3 + $0x20] sm:$0xff]  ;;  %v158_v7 = vld [vmem:[%s3043_s3 + $0x28] sm:$0xff] }
   0x3   :  { %v1851_v5 = vpack.c.bf16 %v156_v4, %v155_v2  ;;  %v87_v8 = vld [vmem:[%s3044_s2] sm:$0xff]  ;;  %v1855_v9 = vpack.c.bf16 %v158_v7, %v157_v6  ;;  %v159_v10 = vld [vmem:[%s3043_s3 + $0x30] sm:$0xff]  ;;  %v88_v11 = vld [vmem:[%s3044_s2 + $0x8] sm:$0xff] }
   0x4   :  { %1848 = vmatprep.subr.bf16.mxu1 %v1847_v3  ;;  %v160_v12 = vld [vmem:[%s3043_s3 + $0x38] sm:$0xff]  ;;  %v1879_v13 = vpack.c.bf16 %v88_v11, %v87_v8  ;;  %v23_v14 = vld [vmem:[%s3045_s0] sm:$0xff]  ;;  %v24_v17 = vld [vmem:[%s3045_s0 + $0x8] sm:$0xff] }
   0x5   :  { %1850 = vmatpush3.bf16.msra.mxu1 %v1847_v3  ;;  %v89_v15 = vld [vmem:[%s3046_s1] sm:$0xff]  ;;  %1751 = vmatprep.mubr.msk.f32.mxu0 %vm554_vm0, %v23_v14  ;;  %v1859_v16 = vpack.c.bf16 %v160_v12, %v159_v10  ;;  %v162_v19 = vld [vmem:[%s3043_s3 + $0x48] sm:$0xff]  ;;  %v25_v20 = vld [vmem:[%s3045_s0 + $0x10] sm:$0xff] }
   0x6   :  { %1852 = vmatprep.subr.bf16.mxu1 %v1851_v5  ;;  %1651 = vmatprep.mubr.f32.mxu1 %v89_v15  ;;  %v161_v18 = vld [vmem:[%s3043_s3 + $0x40] sm:$0xff]  ;;  %v26_v22 = vld [vmem:[%s3045_s0 + $0x18] sm:$0xff]  ;;  %v163_v23 = vld [vmem:[%s3043_s3 + $0x50] sm:$0xff] }
   0x7   :  { %1880 = vmatprep.subr.bf16.mxu0 %v1879_v13  ;;  %v1863_v21 = vpack.c.bf16 %v162_v19, %v161_v18  ;;  %v164_v24 = vld [vmem:[%s3043_s3 + $0x58] sm:$0xff]  ;;  %v27_v25 = vld [vmem:[%s3045_s0 + $0x20] sm:$0xff]  ;;  %v28_v27 = vld [vmem:[%s3045_s0 + $0x28] sm:$0xff] }
   0x8   :  { %1882 = vmatpush3.bf16.msra.mxu0 %v1879_v13  ;;  %v1867_v26 = vpack.c.bf16 %v164_v24, %v163_v23  ;;  %v165_v28 = vld [vmem:[%s3043_s3 + $0x60] sm:$0xff]  ;;  %v166_v29 = vld [vmem:[%s3043_s3 + $0x68] sm:$0xff]  ;;  %v29_v30 = vld [vmem:[%s3045_s0 + $0x30] sm:$0xff] }
   0x9   :  { %1854 = vmatpush3.bf16.msra.mxu1 %v1851_v5  ;;  %v1871_v31 = vpack.c.bf16 %v166_v29, %v165_v28  ;;  %v30_v32 = vld [vmem:[%s3045_s0 + $0x38] sm:$0xff]  ;;  %v167_v33 = vld [vmem:[%s3043_s3 + $0x70] sm:$0xff]  ;;  %v31_v35 = vld [vmem:[%s3045_s0 + $0x40] sm:$0xff] }
   0xa   :  { %1856 = vmatprep.subr.bf16.mxu1 %v1855_v9  ;;  %v168_v34 = vld [vmem:[%s3043_s3 + $0x78] sm:$0xff]  ;;  %v32_v37 = vld [vmem:[%s3045_s0 + $0x48] sm:$0xff]  ;;  %v33_v38 = vld [vmem:[%s3045_s0 + $0x50] sm:$0xff] }
   0xb   :  { %1752 = vmatmul.mubr.msk.f32.vlgmr.msra.gmra.mrb[0].mxu0 %vm554_vm0, %v24_v17  ;;  %v1875_v36 = vpack.c.bf16 %v168_v34, %v167_v33  ;;  %v34_v39 = vld [vmem:[%s3045_s0 + $0x58] sm:$0xff]  ;;  %v35_v40 = vld [vmem:[%s3045_s0 + $0x60] sm:$0xff]  ;;  %v90_v41 = vld [vmem:[%s3046_s1 + $0x8] sm:$0xff] }
   0xc   :  { %1754 = vmatprep.mubr.msk.f32.mxu0 %vm554_vm0, %v25_v20  ;;  %v91_v42 = vld [vmem:[%s3046_s1 + $0x10] sm:$0xff]  ;;  %v36_v43 = vld [vmem:[%s3045_s0 + $0x68] sm:$0xff]  ;;  %v92_v45 = vld [vmem:[%s3046_s1 + $0x18] sm:$0xff] }
   0xd   :  { %1858 = vmatpush3.bf16.msra.mxu1 %v1855_v9  ;;  %v37_v44 = vld [vmem:[%s3045_s0 + $0x70] sm:$0xff]  ;;  %v93_v46 = vld [vmem:[%s3046_s1 + $0x20] sm:$0xff]  ;;  %v38_v47 = vld [vmem:[%s3045_s0 + $0x78] sm:$0xff] }
   0xe   :  { %1860 = vmatprep.subr.bf16.mxu1 %v1859_v16  ;;  %v39_v48 = vld [vmem:[%s3045_s0 + $0x80] sm:$0xff]  ;;  %v94_v49 = vld [vmem:[%s3046_s1 + $0x28] sm:$0xff]  ;;  %v95_v50 = vld [vmem:[%s3046_s1 + $0x30] sm:$0xff] }
   0xf   :  { %1755 = vmatmul.mubr.msk.f32.gmra.mrb[2].mxu0 %vm554_vm0, %v26_v22  ;;  %v40_v51 = vld [vmem:[%s3045_s0 + $0x88] sm:$0xff]  ;;  %v41_v52 = vld [vmem:[%s3045_s0 + $0x90] sm:$0xff]  ;;  %v96_v53 = vld [vmem:[%s3046_s1 + $0x38] sm:$0xff] }
  0x10   :  { %1757 = vmatprep.mubr.msk.f32.mxu0 %vm554_vm0, %v27_v25  ;;  %v97_v54 = vld [vmem:[%s3046_s1 + $0x40] sm:$0xff]  ;;  %v42_v55 = vld [vmem:[%s3045_s0 + $0x98] sm:$0xff]  ;;  %v98_v57 = vld [vmem:[%s3046_s1 + $0x48] sm:$0xff] }
  0x11   :  { %1862 = vmatpush3.bf16.msra.mxu1 %v1859_v16  ;;  %v43_v56 = vld [vmem:[%s3045_s0 + $0xa0] sm:$0xff]  ;;  %v99_v58 = vld [vmem:[%s3046_s1 + $0x50] sm:$0xff]  ;;  %v44_v59 = vld [vmem:[%s3045_s0 + $0xa8] sm:$0xff] }
  0x12   :  { %1864 = vmatprep.subr.bf16.mxu1 %v1863_v21  ;;  %v45_v60 = vld [vmem:[%s3045_s0 + $0xb0] sm:$0xff]  ;;  %v100_v61 = vld [vmem:[%s3046_s1 + $0x58] sm:$0xff]  ;;  %v101_v62 = vld [vmem:[%s3046_s1 + $0x60] sm:$0xff] }
  0x13   :  { %1758 = vmatmul.mubr.msk.f32.gmra.mrb[4].mxu0 %vm554_vm0, %v28_v27  ;;  %v46_v63 = vld [vmem:[%s3045_s0 + $0xb8] sm:$0xff]  ;;  %v47_v0 = vld [vmem:[%s3045_s0 + $0xc0] sm:$0xff]  ;;  %v102_v1 = vld [vmem:[%s3046_s1 + $0x68] sm:$0xff] }
  0x14   :  { %1760 = vmatprep.mubr.msk.f32.mxu0 %vm554_vm0, %v29_v30  ;;  %v103_v2 = vld [vmem:[%s3046_s1 + $0x70] sm:$0xff]  ;;  %v48_v3 = vld [vmem:[%s3045_s0 + $0xc8] sm:$0xff]  ;;  %v104_v5 = vld [vmem:[%s3046_s1 + $0x78] sm:$0xff] }
  0x15   :  { %1866 = vmatpush3.bf16.msra.mxu1 %v1863_v21  ;;  %v49_v4 = vld [vmem:[%s3045_s0 + $0xd0] sm:$0xff]  ;;  %v105_v6 = vld [vmem:[%s3046_s1 + $0x80] sm:$0xff]  ;;  %v50_v7 = vld [vmem:[%s3045_s0 + $0xd8] sm:$0xff] }
  0x16   :  { %1868 = vmatprep.subr.bf16.mxu1 %v1867_v26  ;;  %v51_v8 = vld [vmem:[%s3045_s0 + $0xe0] sm:$0xff]  ;;  %v106_v9 = vld [vmem:[%s3046_s1 + $0x88] sm:$0xff]  ;;  %v107_v10 = vld [vmem:[%s3046_s1 + $0x90] sm:$0xff] }
  0x17   :  { %1761 = vmatmul.mubr.msk.f32.gmra.mrb[6].mxu0 %vm554_vm0, %v30_v32  ;;  %v52_v11 = vld [vmem:[%s3045_s0 + $0xe8] sm:$0xff]  ;;  %v53_v12 = vld [vmem:[%s3045_s0 + $0xf0] sm:$0xff]  ;;  %v108_v13 = vld [vmem:[%s3046_s1 + $0x98] sm:$0xff] }
  0x18   :  { %1763 = vmatprep.mubr.msk.f32.mxu0 %vm554_vm0, %v31_v35  ;;  %v109_v14 = vld [vmem:[%s3046_s1 + $0xa0] sm:$0xff]  ;;  %v54_v15 = vld [vmem:[%s3045_s0 + $0xf8] sm:$0xff]  ;;  %v110_v17 = vld [vmem:[%s3046_s1 + $0xa8] sm:$0xff] }
  0x19   :  { %1870 = vmatpush3.bf16.msra.mxu1 %v1867_v26  ;;  %v55_v16 = vld [vmem:[%s3045_s0 + $0x100] sm:$0xff]  ;;  %v111_v18 = vld [vmem:[%s3046_s1 + $0xb0] sm:$0xff]  ;;  %v56_v19 = vld [vmem:[%s3045_s0 + $0x108] sm:$0xff] }
  0x1a   :  { %1872 = vmatprep.subr.bf16.mxu1 %v1871_v31  ;;  %v57_v20 = vld [vmem:[%s3045_s0 + $0x110] sm:$0xff]  ;;  %v112_v21 = vld [vmem:[%s3046_s1 + $0xb8] sm:$0xff]  ;;  %v113_v22 = vld [vmem:[%s3046_s1 + $0xc0] sm:$0xff] }
  0x1b   :  { %1764 = vmatmul.mubr.msk.f32.gmra.mrb[8].mxu0 %vm554_vm0, %v32_v37  ;;  %v58_v23 = vld [vmem:[%s3045_s0 + $0x118] sm:$0xff]  ;;  %v59_v24 = vld [vmem:[%s3045_s0 + $0x120] sm:$0xff]  ;;  %v114_v25 = vld [vmem:[%s3046_s1 + $0xc8] sm:$0xff] }
  0x1c   :  { %1766 = vmatprep.mubr.msk.f32.mxu0 %vm554_vm0, %v33_v38  ;;  %v115_v26 = vld [vmem:[%s3046_s1 + $0xd0] sm:$0xff]  ;;  %v60_v27 = vld [vmem:[%s3045_s0 + $0x128] sm:$0xff]  ;;  %v116_v29 = vld [vmem:[%s3046_s1 + $0xd8] sm:$0xff] }
  0x1d   :  { %1874 = vmatpush3.bf16.msra.mxu1 %v1871_v31  ;;  %v61_v28 = vld [vmem:[%s3045_s0 + $0x130] sm:$0xff]  ;;  %v117_v30 = vld [vmem:[%s3046_s1 + $0xe0] sm:$0xff]  ;;  %v62_v31 = vld [vmem:[%s3045_s0 + $0x138] sm:$0xff] }
  0x1e   :  { %1876 = vmatprep.subr.bf16.mxu1 %v1875_v36  ;;  %v63_v32 = vld [vmem:[%s3045_s0 + $0x140] sm:$0xff]  ;;  %v118_v33 = vld [vmem:[%s3046_s1 + $0xe8] sm:$0xff]  ;;  %v119_v34 = vld [vmem:[%s3046_s1 + $0xf0] sm:$0xff] }
  0x1f   :  { %1767 = vmatmul.mubr.msk.f32.gmra.mrb[10].mxu0 %vm554_vm0, %v34_v39  ;;  %v64_v35 = vld [vmem:[%s3045_s0 + $0x148] sm:$0xff]  ;;  %v120_v37 = vld [vmem:[%s3046_s1 + $0xf8] sm:$0xff]  ;;  %v121_v38 = vld [vmem:[%s3046_s1 + $0x100] sm:$0xff] }
  0x20   :  { %1769 = vmatprep.mubr.msk.f32.mxu0 %vm554_vm0, %v35_v40  ;;  %v66_v39 = vld [vmem:[%s3045_s0 + $0x158] sm:$0xff]  ;;  %v67_v40 = vld [vmem:[%s3045_s0 + $0x160] sm:$0xff] }
  0x21   :  { %1878 = vmatpush3.bf16.msra.mxu1 %v1875_v36  ;;  %v65_v36 = vld [vmem:[%s3045_s0 + $0x150] sm:$0xff] }
  0x23   :  { %1770 = vmatmul.mubr.msk.f32.gmra.mrb[12].mxu0 %vm554_vm0, %v36_v43  ;;  %v68_v43 = vld [vmem:[%s3045_s0 + $0x168] sm:$0xff] }
  0x24   :  { %1652 = vmatmul.mubr.f32.vlgmr.msra.gmra.mrb[0].mxu1 %v90_v41  ;;  %1772 = vmatprep.mubr.msk.f32.mxu0 %vm554_vm0, %v37_v44  ;;  %v122_v41 = vld [vmem:[%s3046_s1 + $0x108] sm:$0xff]  ;;  %v69_v44 = vld [vmem:[%s3045_s0 + $0x170] sm:$0xff] }
  0x25   :  { %1654 = vmatprep.mubr.f32.mxu1 %v91_v42  ;;  %v123_v42 = vld [vmem:[%s3046_s1 + $0x110] sm:$0xff] }
  0x27   :  { %1773 = vmatmul.mubr.msk.f32.gmra.mrb[14].mxu0 %vm554_vm0, %v38_v47  ;;  %v70_v47 = vld [vmem:[%s3045_s0 + $0x178] sm:$0xff] }
  0x28   :  { %1655 = vmatmul.mubr.f32.gmra.mrb[2].mxu1 %v92_v45  ;;  %1775 = vmatprep.mubr.msk.f32.mxu0 %vm554_vm0, %v39_v48  ;;  %v124_v45 = vld [vmem:[%s3046_s1 + $0x118] sm:$0xff]  ;;  %v71_v48 = vld [vmem:[%s3045_s0 + $0x180] sm:$0xff] }
  0x29   :  { %1657 = vmatprep.mubr.f32.mxu1 %v93_v46  ;;  %v125_v46 = vld [vmem:[%s3046_s1 + $0x120] sm:$0xff] }
  0x2b   :  { %1776 = vmatmul.mubr.msk.f32.gmra.mrb[16].mxu0 %vm554_vm0, %v40_v51  ;;  %v72_v51 = vld [vmem:[%s3045_s0 + $0x188] sm:$0xff] }
  0x2c   :  { %1658 = vmatmul.mubr.f32.gmra.mrb[4].mxu1 %v94_v49  ;;  %1778 = vmatprep.mubr.msk.f32.mxu0 %vm554_vm0, %v41_v52  ;;  %v126_v49 = vld [vmem:[%s3046_s1 + $0x128] sm:$0xff]  ;;  %v73_v52 = vld [vmem:[%s3045_s0 + $0x190] sm:$0xff] }
  0x2d   :  { %1660 = vmatprep.mubr.f32.mxu1 %v95_v50  ;;  %v127_v50 = vld [vmem:[%s3046_s1 + $0x130] sm:$0xff] }
  0x2f   :  { %1779 = vmatmul.mubr.msk.f32.gmra.mrb[18].mxu0 %vm554_vm0, %v42_v55  ;;  %v74_v55 = vld [vmem:[%s3045_s0 + $0x198] sm:$0xff] }
  0x30   :  { %1661 = vmatmul.mubr.f32.gmra.mrb[6].mxu1 %v96_v53  ;;  %1781 = vmatprep.mubr.msk.f32.mxu0 %vm554_vm0, %v43_v56  ;;  %v128_v53 = vld [vmem:[%s3046_s1 + $0x138] sm:$0xff]  ;;  %v75_v56 = vld [vmem:[%s3045_s0 + $0x1a0] sm:$0xff] }
  0x31   :  { %1663 = vmatprep.mubr.f32.mxu1 %v97_v54  ;;  %v129_v54 = vld [vmem:[%s3046_s1 + $0x140] sm:$0xff] }
  0x33   :  { %1782 = vmatmul.mubr.msk.f32.gmra.mrb[20].mxu0 %vm554_vm0, %v44_v59  ;;  %v76_v59 = vld [vmem:[%s3045_s0 + $0x1a8] sm:$0xff] }
  0x34   :  { %1664 = vmatmul.mubr.f32.gmra.mrb[8].mxu1 %v98_v57  ;;  %1784 = vmatprep.mubr.msk.f32.mxu0 %vm554_vm0, %v45_v60  ;;  %v130_v57 = vld [vmem:[%s3046_s1 + $0x148] sm:$0xff]  ;;  %v77_v60 = vld [vmem:[%s3045_s0 + $0x1b0] sm:$0xff] }
  0x35   :  { %1666 = vmatprep.mubr.f32.mxu1 %v99_v58  ;;  %v131_v58 = vld [vmem:[%s3046_s1 + $0x150] sm:$0xff] }
  0x37   :  { %1785 = vmatmul.mubr.msk.f32.gmra.mrb[22].mxu0 %vm554_vm0, %v46_v63  ;;  %v78_v63 = vld [vmem:[%s3045_s0 + $0x1b8] sm:$0xff] }
  0x38   :  { %1667 = vmatmul.mubr.f32.gmra.mrb[10].mxu1 %v100_v61  ;;  %1787 = vmatprep.mubr.msk.f32.mxu0 %vm554_vm0, %v47_v0  ;;  %v132_v61 = vld [vmem:[%s3046_s1 + $0x158] sm:$0xff]  ;;  %v79_v0 = vld [vmem:[%s3045_s0 + $0x1c0] sm:$0xff] }
  0x39   :  { %1669 = vmatprep.mubr.f32.mxu1 %v101_v62  ;;  %v133_v62 = vld [vmem:[%s3046_s1 + $0x160] sm:$0xff] }
  0x3b   :  { %1788 = vmatmul.mubr.msk.f32.gmra.mrb[24].mxu0 %vm554_vm0, %v48_v3  ;;  %v80_v3 = vld [vmem:[%s3045_s0 + $0x1c8] sm:$0xff] }
  0x3c   :  { %1670 = vmatmul.mubr.f32.gmra.mrb[12].mxu1 %v102_v1  ;;  %1790 = vmatprep.mubr.msk.f32.mxu0 %vm554_vm0, %v49_v4  ;;  %v134_v1 = vld [vmem:[%s3046_s1 + $0x168] sm:$0xff]  ;;  %v81_v4 = vld [vmem:[%s3045_s0 + $0x1d0] sm:$0xff] }
  0x3d   :  { %1672 = vmatprep.mubr.f32.mxu1 %v103_v2  ;;  %v135_v2 = vld [vmem:[%s3046_s1 + $0x170] sm:$0xff] }
  0x3f   :  { %1791 = vmatmul.mubr.msk.f32.gmra.mrb[26].mxu0 %vm554_vm0, %v50_v7  ;;  %v82_v7 = vld [vmem:[%s3045_s0 + $0x1d8] sm:$0xff] }
  0x40   :  { %1673 = vmatmul.mubr.f32.gmra.mrb[14].mxu1 %v104_v5  ;;  %1793 = vmatprep.mubr.msk.f32.mxu0 %vm554_vm0, %v51_v8  ;;  %v136_v5 = vld [vmem:[%s3046_s1 + $0x178] sm:$0xff]  ;;  %v83_v8 = vld [vmem:[%s3045_s0 + $0x1e0] sm:$0xff] }
  0x41   :  { %1675 = vmatprep.mubr.f32.mxu1 %v105_v6  ;;  %v137_v6 = vld [vmem:[%s3046_s1 + $0x180] sm:$0xff] }
  0x43   :  { %1794 = vmatmul.mubr.msk.f32.gmra.mrb[28].mxu0 %vm554_vm0, %v52_v11  ;;  %v84_v11 = vld [vmem:[%s3045_s0 + $0x1e8] sm:$0xff] }
  0x44   :  { %1676 = vmatmul.mubr.f32.gmra.mrb[16].mxu1 %v106_v9  ;;  %1796 = vmatprep.mubr.msk.f32.mxu0 %vm554_vm0, %v53_v12  ;;  %v138_v9 = vld [vmem:[%s3046_s1 + $0x188] sm:$0xff]  ;;  %v85_v12 = vld [vmem:[%s3045_s0 + $0x1f0] sm:$0xff] }
  0x45   :  { %1678 = vmatprep.mubr.f32.mxu1 %v107_v10  ;;  %v139_v10 = vld [vmem:[%s3046_s1 + $0x190] sm:$0xff] }
  0x47   :  { %1797 = vmatmul.mubr.msk.f32.gmra.mrb[30].mxu0 %vm554_vm0, %v54_v15  ;;  %v86_v15 = vld [vmem:[%s3045_s0 + $0x1f8] sm:$0xff] }
  0x48   :  { %1679 = vmatmul.mubr.f32.gmra.mrb[18].mxu1 %v108_v13  ;;  %1799 = vmatprep.mubr.msk.f32.mxu0 %vm554_vm0, %v55_v16  ;;  %v140_v13 = vld [vmem:[%s3046_s1 + $0x198] sm:$0xff]  ;;  %v142_v16 = vld [vmem:[%s3046_s1 + $0x1a8] sm:$0xff] }
  0x49   :  { %1681 = vmatprep.mubr.f32.mxu1 %v109_v14  ;;  %v141_v14 = vld [vmem:[%s3046_s1 + $0x1a0] sm:$0xff] }
  0x4b   :  { %1800 = vmatmul.mubr.msk.f32.gmra.mrb[32].mxu0 %vm554_vm0, %v56_v19  ;;  %v145_v19 = vld [vmem:[%s3046_s1 + $0x1c0] sm:$0xff] }
  0x4c   :  { %1682 = vmatmul.mubr.f32.gmra.mrb[20].mxu1 %v110_v17  ;;  %1802 = vmatprep.mubr.msk.f32.mxu0 %vm554_vm0, %v57_v20  ;;  %v143_v17 = vld [vmem:[%s3046_s1 + $0x1b0] sm:$0xff]  ;;  %v146_v20 = vld [vmem:[%s3046_s1 + $0x1c8] sm:$0xff] }
  0x4d   :  { %1684 = vmatprep.mubr.f32.mxu1 %v111_v18  ;;  %v144_v18 = vld [vmem:[%s3046_s1 + $0x1b8] sm:$0xff] }
  0x4f   :  { %1803 = vmatmul.mubr.msk.f32.gmra.mrb[34].mxu0 %vm554_vm0, %v58_v23  ;;  %v149_v23 = vld [vmem:[%s3046_s1 + $0x1e0] sm:$0xff] }
  0x50   :  { %1685 = vmatmul.mubr.f32.gmra.mrb[22].mxu1 %v112_v21  ;;  %1805 = vmatprep.mubr.msk.f32.mxu0 %vm554_vm0, %v59_v24  ;;  %v147_v21 = vld [vmem:[%s3046_s1 + $0x1d0] sm:$0xff]  ;;  %v150_v24 = vld [vmem:[%s3046_s1 + $0x1e8] sm:$0xff] }
  0x51   :  { %1687 = vmatprep.mubr.f32.mxu1 %v113_v22  ;;  %v148_v22 = vld [vmem:[%s3046_s1 + $0x1d8] sm:$0xff] }
  0x53   :  { %1806 = vmatmul.mubr.msk.f32.gmra.mrb[36].mxu0 %vm554_vm0, %v60_v27 }
  0x54   :  { %1688 = vmatmul.mubr.f32.gmra.mrb[24].mxu1 %v114_v25  ;;  %1808 = vmatprep.mubr.msk.f32.mxu0 %vm554_vm0, %v61_v28  ;;  %v151_v25 = vld [vmem:[%s3046_s1 + $0x1f0] sm:$0xff] }
  0x55   :  { %1690 = vmatprep.mubr.f32.mxu1 %v115_v26  ;;  %v152_v26 = vld [vmem:[%s3046_s1 + $0x1f8] sm:$0xff] }
  0x57   :  { %1809 = vmatmul.mubr.msk.f32.gmra.mrb[38].mxu0 %vm554_vm0, %v62_v31 }
  0x58   :  { %1691 = vmatmul.mubr.f32.gmra.mrb[26].mxu1 %v116_v29  ;;  %1811 = vmatprep.mubr.msk.f32.mxu0 %vm554_vm0, %v63_v32 }
  0x59   :  { %1693 = vmatprep.mubr.f32.mxu1 %v117_v30 }
  0x5b   :  { %1812 = vmatmul.mubr.msk.f32.gmra.mrb[40].mxu0 %vm554_vm0, %v64_v35 }
  0x5c   :  { %1694 = vmatmul.mubr.f32.gmra.mrb[28].mxu1 %v118_v33  ;;  %1814 = vmatprep.mubr.msk.f32.mxu0 %vm554_vm0, %v65_v36 }
  0x5d   :  { %1696 = vmatprep.mubr.f32.mxu1 %v119_v34 }
  0x5f   :  { %1815 = vmatmul.mubr.msk.f32.gmra.mrb[42].mxu0 %vm554_vm0, %v66_v39 }
  0x60   :  { %1697 = vmatmul.mubr.f32.gmra.mrb[30].mxu1 %v120_v37  ;;  %1817 = vmatprep.mubr.msk.f32.mxu0 %vm554_vm0, %v67_v40  ;;  %v2493_v40 = vld [vmem:[%s3047_s4] ss:$0 sm:$0xff] }
  0x61   :  { %1699 = vmatprep.mubr.f32.mxu1 %v121_v38 }
  0x63   :  { %1818 = vmatmul.mubr.msk.f32.gmra.mrb[44].mxu0 %vm554_vm0, %v68_v43 }
  0x64   :  { %1700 = vmatmul.mubr.f32.gmra.mrb[32].mxu1 %v122_v41  ;;  %1820 = vmatprep.mubr.msk.f32.mxu0 %vm554_vm0, %v69_v44  ;;  %v2500_v44 = vld [vmem:[%s3048_s5] ss:$0 sm:$0xff] }
  0x65   :  { %1702 = vmatprep.mubr.f32.mxu1 %v123_v42 }
  0x67   :  { %1821 = vmatmul.mubr.msk.f32.gmra.mrb[46].mxu0 %vm554_vm0, %v70_v47 }
  0x68   :  { %1703 = vmatmul.mubr.f32.gmra.mrb[34].mxu1 %v124_v45  ;;  %1823 = vmatprep.mubr.msk.f32.mxu0 %vm554_vm0, %v71_v48 }
  0x69   :  { %1705 = vmatprep.mubr.f32.mxu1 %v125_v46 }
  0x6b   :  { %1824 = vmatmul.mubr.msk.f32.gmra.mrb[48].mxu0 %vm554_vm0, %v72_v51 }
  0x6c   :  { %1706 = vmatmul.mubr.f32.gmra.mrb[36].mxu1 %v126_v49  ;;  %1826 = vmatprep.mubr.msk.f32.mxu0 %vm554_vm0, %v73_v52 }
  0x6d   :  { %1708 = vmatprep.mubr.f32.mxu1 %v127_v50 }
  0x6f   :  { %1827 = vmatmul.mubr.msk.f32.gmra.mrb[50].mxu0 %vm554_vm0, %v74_v55 }
  0x70   :  { %1709 = vmatmul.mubr.f32.gmra.mrb[38].mxu1 %v128_v53  ;;  %1829 = vmatprep.mubr.msk.f32.mxu0 %vm554_vm0, %v75_v56 }
  0x71   :  { %1711 = vmatprep.mubr.f32.mxu1 %v129_v54 }
  0x73   :  { %1830 = vmatmul.mubr.msk.f32.gmra.mrb[52].mxu0 %vm554_vm0, %v76_v59 }
  0x74   :  { %1712 = vmatmul.mubr.f32.gmra.mrb[40].mxu1 %v130_v57  ;;  %1832 = vmatprep.mubr.msk.f32.mxu0 %vm554_vm0, %v77_v60 }
  0x75   :  { %1714 = vmatprep.mubr.f32.mxu1 %v131_v58 }
  0x77   :  { %1833 = vmatmul.mubr.msk.f32.gmra.mrb[54].mxu0 %vm554_vm0, %v78_v63 }
  0x78   :  { %1715 = vmatmul.mubr.f32.gmra.mrb[42].mxu1 %v132_v61  ;;  %1835 = vmatprep.mubr.msk.f32.mxu0 %vm554_vm0, %v79_v0 }
  0x79   :  { %1717 = vmatprep.mubr.f32.mxu1 %v133_v62 }
  0x7b   :  { %1836 = vmatmul.mubr.msk.f32.gmra.mrb[56].mxu0 %vm554_vm0, %v80_v3 }
  0x7c   :  { %1718 = vmatmul.mubr.f32.gmra.mrb[44].mxu1 %v134_v1  ;;  %1838 = vmatprep.mubr.msk.f32.mxu0 %vm554_vm0, %v81_v4 }
  0x7d   :  { %1720 = vmatprep.mubr.f32.mxu1 %v135_v2 }
  0x7f   :  { %1839 = vmatmul.mubr.msk.f32.gmra.mrb[58].mxu0 %vm554_vm0, %v82_v7 }
  0x80   :  { %1721 = vmatmul.mubr.f32.gmra.mrb[46].mxu1 %v136_v5  ;;  %1841 = vmatprep.mubr.msk.f32.mxu0 %vm554_vm0, %v83_v8 }
  0x81   :  { %1723 = vmatprep.mubr.f32.mxu1 %v137_v6 }
  0x83   :  { %1842 = vmatmul.mubr.msk.f32.gmra.mrb[60].mxu0 %vm554_vm0, %v84_v11 }
  0x84   :  { %1724 = vmatmul.mubr.f32.gmra.mrb[48].mxu1 %v138_v9  ;;  %1844 = vmatprep.mubr.msk.f32.mxu0 %vm554_vm0, %v85_v12 }
  0x85   :  { %1726 = vmatprep.mubr.f32.mxu1 %v139_v10 }
  0x87   :  { %1845 = vmatmul.mubr.msk.f32.gmra.mrb[62].mxu0 %vm554_vm0, %v86_v15 }
  0x88   :  { %1727 = vmatmul.mubr.f32.gmra.mrb[50].mxu1 %v140_v13 }
  0x89   :  { %1729 = vmatprep.mubr.f32.mxu1 %v141_v14 }
  0x8c   :  { %1730 = vmatmul.mubr.f32.gmra.mrb[52].mxu1 %v142_v16 }
  0x8d   :  { %1732 = vmatprep.mubr.f32.mxu1 %v143_v17 }
  0x90   :  { %1733 = vmatmul.mubr.f32.gmra.mrb[54].mxu1 %v144_v18 }
  0x91   :  { %1735 = vmatprep.mubr.f32.mxu1 %v145_v19 }
  0x94   :  { %1736 = vmatmul.mubr.f32.gmra.mrb[56].mxu1 %v146_v20 }
  0x95   :  { %1738 = vmatprep.mubr.f32.mxu1 %v147_v21 }
  0x98   :  { %1739 = vmatmul.mubr.f32.gmra.mrb[58].mxu1 %v148_v22 }
  0x99   :  { %1741 = vmatprep.mubr.f32.mxu1 %v149_v23 }
  0x9c   :  { %1742 = vmatmul.mubr.f32.gmra.mrb[60].mxu1 %v150_v24 }
  0x9d   :  { %1744 = vmatprep.mubr.f32.mxu1 %v151_v25 }
  0xa0   :  { %1745 = vmatmul.mubr.f32.gmra.mrb[62].mxu1 %v152_v26 }
  0xde   :  { %v1753_v27 = vpop.f32.mrb[0].mxu0 }
  0xdf   :  { %v813_v28 = vpop.f32.mrb[1].mxu0 }
  0xe2   :  { %v1756_v29 = vpop.f32.mrb[2].mxu0 }
  0xe3   :  { %v823_v30 = vpop.f32.mrb[3].mxu0 }
  0xe6   :  { %v1759_v31 = vpop.f32.mrb[4].mxu0 }
  0xe7   :  { %v833_v32 = vpop.f32.mrb[5].mxu0 }
  0xea   :  { %v1762_v33 = vpop.f32.mrb[6].mxu0 }
  0xeb   :  { %v843_v34 = vpop.f32.mrb[7].mxu0 }
  0xee   :  { %v1765_v35 = vpop.f32.mrb[8].mxu0 }
  0xef   :  { %v2484_v36 = vpop.f32.mrb[9].mxu0 }
  0xf2   :  { %v2486_v37 = vpop.f32.mrb[10].mxu0 }
  0xf3   :  { %v2488_v38 = vpop.f32.mrb[11].mxu0 }
  0xf6   :  { %v2495_v43 = vpop.f32.mrb[12].mxu0 }
  0xf7   :  { %v1653_v39 = vpop.f32.mrb[0].mxu1  ;;  %v2502_v46 = vpop.f32.mrb[13].mxu0 }
  0xf8   :  { %v819_v41 = vadd.f32 %v1753_v27, %v1653_v39  ;;  %v235_v42 = vpop.f32.mrb[1].mxu1 }
  0xf9   :  { %v814_v45 = vadd.f32 %v813_v28, %v235_v42 }
  0xfa   :  { %v1140_v47 = vmul.f32 %v2493_v40, %v819_v41  ;;  %v2507_v53 = vpop.f32.mrb[14].mxu0 }
  0xfb   :  { %v1139_v48 = vmul.f32 %v2493_v40, %v814_v45  ;;  %v1656_v49 = vpop.f32.mrb[2].mxu1  ;;  %v2510_v56 = vpop.f32.mrb[15].mxu0 }
  0xfc   :  { %v1211_v50 = vadd.f32 %v2500_v44, %v1140_v47  ;;  %v829_v51 = vadd.f32 %v1756_v29, %v1656_v49  ;;  %v245_v52 = vpop.f32.mrb[3].mxu1 }
  0xfd   :  { %v1210_v54 = vadd.f32 %v2500_v44, %v1139_v48  ;;  %v824_v55 = vadd.f32 %v823_v30, %v245_v52 }
  0xfe   :  { %v1275_v57 = vmax.f32 %v1211_v50, 0.0  ;;  %v1142_v58 = vmul.f32 %v2493_v40, %v829_v51  ;;  %v2519_v1 = vpop.f32.mrb[16].mxu0 }
  0xff   :  { %v1274_v59 = vmax.f32 %v1210_v54, 0.0  ;;  %v1141_v60 = vmul.f32 %v2493_v40, %v824_v55  ;;  %v1659_v61 = vpop.f32.mrb[4].mxu1  ;;  %v2526_v4 = vpop.f32.mrb[17].mxu0 }
 0x100   :  { %1340 = vst.msk [vmem:[%s3049_s6 + $0x8] sm:$0xff] %vm1338_vm1, %v1275_v57  ;;  %v1213_v62 = vadd.f32 %v2500_v44, %v1142_v58  ;;  %v839_v63 = vadd.f32 %v1759_v31, %v1659_v61  ;;  %v255_v0 = vpop.f32.mrb[5].mxu1 }
 0x101   :  { %1339 = vst.msk [vmem:[%s3049_s6] sm:$0xff] %vm1338_vm1, %v1274_v59  ;;  %v1212_v2 = vadd.f32 %v2500_v44, %v1141_v60  ;;  %v834_v3 = vadd.f32 %v833_v32, %v255_v0 }
 0x102   :  { %v1277_v5 = vmax.f32 %v1213_v62, 0.0  ;;  %v1144_v6 = vmul.f32 %v2493_v40, %v839_v63  ;;  %v2535_v13 = vpop.f32.mrb[18].mxu0 }
 0x103   :  { %v1276_v7 = vmax.f32 %v1212_v2, 0.0  ;;  %v1143_v8 = vmul.f32 %v2493_v40, %v834_v3  ;;  %v1662_v9 = vpop.f32.mrb[6].mxu1  ;;  %v2542_v16 = vpop.f32.mrb[19].mxu0 }
 0x104   :  { %1342 = vst.msk [vmem:[%s3049_s6 + $0x18] sm:$0xff] %vm1338_vm1, %v1277_v5  ;;  %v1215_v10 = vadd.f32 %v2500_v44, %v1144_v6  ;;  %v849_v11 = vadd.f32 %v1762_v33, %v1662_v9  ;;  %v265_v12 = vpop.f32.mrb[7].mxu1 }
 0x105   :  { %1341 = vst.msk [vmem:[%s3049_s6 + $0x10] sm:$0xff] %vm1338_vm1, %v1276_v7  ;;  %v1214_v14 = vadd.f32 %v2500_v44, %v1143_v8  ;;  %v844_v15 = vadd.f32 %v843_v34, %v265_v12 }
 0x106   :  { %v1279_v17 = vmax.f32 %v1215_v10, 0.0  ;;  %v1146_v18 = vmul.f32 %v2493_v40, %v849_v11  ;;  %v2551_v25 = vpop.f32.mrb[20].mxu0 }
 0x107   :  { %v1278_v19 = vmax.f32 %v1214_v14, 0.0  ;;  %v1145_v20 = vmul.f32 %v2493_v40, %v844_v15  ;;  %v1665_v21 = vpop.f32.mrb[8].mxu1  ;;  %v2559_v28 = vpop.f32.mrb[21].mxu0 }
 0x108   :  { %1344 = vst.msk [vmem:[%s3049_s6 + $0x28] sm:$0xff] %vm1338_vm1, %v1279_v17  ;;  %v1217_v22 = vadd.f32 %v2500_v44, %v1146_v18  ;;  %v859_v23 = vadd.f32 %v1765_v35, %v1665_v21  ;;  %v275_v24 = vpop.f32.mrb[9].mxu1 }
 0x109   :  { %1343 = vst.msk [vmem:[%s3049_s6 + $0x20] sm:$0xff] %vm1338_vm1, %v1278_v19  ;;  %v1216_v26 = vadd.f32 %v2500_v44, %v1145_v20  ;;  %v854_v27 = vadd.f32 %v2484_v36, %v275_v24 }
 0x10a   :  { %v1281_v29 = vmax.f32 %v1217_v22, 0.0  ;;  %v1148_v30 = vmul.f32 %v2493_v40, %v859_v23  ;;  %v2569_v36 = vpop.f32.mrb[22].mxu0 }
 0x10b   :  { %v1280_v31 = vmax.f32 %v1216_v26, 0.0  ;;  %v1147_v32 = vmul.f32 %v2493_v40, %v854_v27  ;;  %v1668_v33 = vpop.f32.mrb[10].mxu1  ;;  %v2577_v45 = vpop.f32.mrb[23].mxu0 }
 0x10c   :  { %1346 = vst.msk [vmem:[%s3049_s6 + $0x38] sm:$0xff] %vm1338_vm1, %v1281_v29  ;;  %v1219_v34 = vadd.f32 %v2500_v44, %v1148_v30  ;;  %v869_v35 = vadd.f32 %v2486_v37, %v1668_v33  ;;  %v285_v39 = vpop.f32.mrb[11].mxu1 }
 0x10d   :  { %1345 = vst.msk [vmem:[%s3049_s6 + $0x30] sm:$0xff] %vm1338_vm1, %v1280_v31  ;;  %v1218_v41 = vadd.f32 %v2500_v44, %v1147_v32  ;;  %v864_v42 = vadd.f32 %v2488_v38, %v285_v39 }
 0x10e   :  { %v1283_v47 = vmax.f32 %v1219_v34, 0.0  ;;  %v1150_v48 = vmul.f32 %v2493_v40, %v869_v35  ;;  %v2587_v38 = vpop.f32.mrb[24].mxu0 }
 0x10f   :  { %v1282_v49 = vmax.f32 %v1218_v41, 0.0  ;;  %v1149_v37 = vmul.f32 %v2493_v40, %v864_v42  ;;  %v1671_v50 = vpop.f32.mrb[12].mxu1  ;;  %v2595_v58 = vpop.f32.mrb[25].mxu0 }
 0x110   :  { %1348 = vst.msk [vmem:[%s3049_s6 + $0x48] sm:$0xff] %vm1338_vm1, %v1283_v47  ;;  %v1221_v51 = vadd.f32 %v2500_v44, %v1150_v48  ;;  %v879_v52 = vadd.f32 %v2495_v43, %v1671_v50  ;;  %v295_v54 = vpop.f32.mrb[13].mxu1 }
 0x111   :  { %1347 = vst.msk [vmem:[%s3049_s6 + $0x40] sm:$0xff] %vm1338_vm1, %v1282_v49  ;;  %v1220_v55 = vadd.f32 %v2500_v44, %v1149_v37  ;;  %v874_v57 = vadd.f32 %v2502_v46, %v295_v54 }
 0x112   :  { %v1285_v59 = vmax.f32 %v1221_v51, 0.0  ;;  %v1152_v60 = vmul.f32 %v2493_v40, %v879_v52  ;;  %v2605_v46 = vpop.f32.mrb[26].mxu0 }
 0x113   :  { %v1284_v61 = vmax.f32 %v1220_v55, 0.0  ;;  %v1151_v43 = vmul.f32 %v2493_v40, %v874_v57  ;;  %v1674_v62 = vpop.f32.mrb[14].mxu1  ;;  %v2613_v6 = vpop.f32.mrb[27].mxu0 }
 0x114   :  { %1350 = vst.msk [vmem:[%s3049_s6 + $0x58] sm:$0xff] %vm1338_vm1, %v1285_v59  ;;  %v1223_v63 = vadd.f32 %v2500_v44, %v1152_v60  ;;  %v889_v0 = vadd.f32 %v2507_v53, %v1674_v62  ;;  %v305_v2 = vpop.f32.mrb[15].mxu1 }
 0x115   :  { %1349 = vst.msk [vmem:[%s3049_s6 + $0x50] sm:$0xff] %vm1338_vm1, %v1284_v61  ;;  %v1222_v3 = vadd.f32 %v2500_v44, %v1151_v43  ;;  %v884_v5 = vadd.f32 %v2510_v56, %v305_v2 }
 0x116   :  { %v1287_v7 = vmax.f32 %v1223_v63, 0.0  ;;  %v1154_v8 = vmul.f32 %v2493_v40, %v889_v0  ;;  %v2623_v56 = vpop.f32.mrb[28].mxu0 }
 0x117   :  { %v1286_v9 = vmax.f32 %v1222_v3, 0.0  ;;  %v1153_v53 = vmul.f32 %v2493_v40, %v884_v5  ;;  %v1677_v10 = vpop.f32.mrb[16].mxu1  ;;  %v2631_v18 = vpop.f32.mrb[29].mxu0 }
 0x118   :  { %1352 = vst.msk [vmem:[%s3049_s6 + $0x68] sm:$0xff] %vm1338_vm1, %v1287_v7  ;;  %v1225_v11 = vadd.f32 %v2500_v44, %v1154_v8  ;;  %v899_v12 = vadd.f32 %v2519_v1, %v1677_v10  ;;  %v315_v14 = vpop.f32.mrb[17].mxu1 }
 0x119   :  { %1351 = vst.msk [vmem:[%s3049_s6 + $0x60] sm:$0xff] %vm1338_vm1, %v1286_v9  ;;  %v1224_v15 = vadd.f32 %v2500_v44, %v1153_v53  ;;  %v894_v17 = vadd.f32 %v2526_v4, %v315_v14 }
 0x11a   :  { %v1289_v19 = vmax.f32 %v1225_v11, 0.0  ;;  %v1156_v20 = vmul.f32 %v2493_v40, %v899_v12  ;;  %v2641_v4 = vpop.f32.mrb[30].mxu0 }
 0x11b   :  { %v1288_v21 = vmax.f32 %v1224_v15, 0.0  ;;  %v1155_v1 = vmul.f32 %v2493_v40, %v894_v17  ;;  %v1680_v22 = vpop.f32.mrb[18].mxu1  ;;  %v2649_v30 = vpop.f32.mrb[31].mxu0 }
 0x11c   :  { %1354 = vst.msk [vmem:[%s3049_s6 + $0x78] sm:$0xff] %vm1338_vm1, %v1289_v19  ;;  %v1227_v23 = vadd.f32 %v2500_v44, %v1156_v20  ;;  %v909_v24 = vadd.f32 %v2535_v13, %v1680_v22  ;;  %v325_v26 = vpop.f32.mrb[19].mxu1 }
 0x11d   :  { %1353 = vst.msk [vmem:[%s3049_s6 + $0x70] sm:$0xff] %vm1338_vm1, %v1288_v21  ;;  %v1226_v27 = vadd.f32 %v2500_v44, %v1155_v1  ;;  %v904_v29 = vadd.f32 %v2542_v16, %v325_v26 }
 0x11e   :  { %v1291_v31 = vmax.f32 %v1227_v23, 0.0  ;;  %v1158_v32 = vmul.f32 %v2493_v40, %v909_v24  ;;  %v2659_v16 = vpop.f32.mrb[32].mxu0 }
 0x11f   :  { %v1290_v33 = vmax.f32 %v1226_v27, 0.0  ;;  %v1157_v13 = vmul.f32 %v2493_v40, %v904_v29  ;;  %v1683_v34 = vpop.f32.mrb[20].mxu1  ;;  %v2667_v48 = vpop.f32.mrb[33].mxu0 }
 0x120   :  { %1356 = vst.msk [vmem:[%s3049_s6 + $0x88] sm:$0xff] %vm1338_vm1, %v1291_v31  ;;  %v1229_v35 = vadd.f32 %v2500_v44, %v1158_v32  ;;  %v919_v39 = vadd.f32 %v2551_v25, %v1683_v34  ;;  %v335_v41 = vpop.f32.mrb[21].mxu1 }
 0x121   :  { %1355 = vst.msk [vmem:[%s3049_s6 + $0x80] sm:$0xff] %vm1338_vm1, %v1290_v33  ;;  %v1228_v42 = vadd.f32 %v2500_v44, %v1157_v13  ;;  %v914_v47 = vadd.f32 %v2559_v28, %v335_v41 }
 0x122   :  { %v1293_v49 = vmax.f32 %v1229_v35, 0.0  ;;  %v1160_v37 = vmul.f32 %v2493_v40, %v919_v39  ;;  %v2677_v28 = vpop.f32.mrb[34].mxu0 }
 0x123   :  { %v1292_v50 = vmax.f32 %v1228_v42, 0.0  ;;  %v1159_v25 = vmul.f32 %v2493_v40, %v914_v47  ;;  %v1686_v51 = vpop.f32.mrb[22].mxu1  ;;  %v2685_v60 = vpop.f32.mrb[35].mxu0 }
 0x124   :  { %1358 = vst.msk [vmem:[%s3049_s6 + $0x98] sm:$0xff] %vm1338_vm1, %v1293_v49  ;;  %v1231_v52 = vadd.f32 %v2500_v44, %v1160_v37  ;;  %v929_v54 = vadd.f32 %v2569_v36, %v1686_v51  ;;  %v345_v55 = vpop.f32.mrb[23].mxu1 }
 0x125   :  { %1357 = vst.msk [vmem:[%s3049_s6 + $0x90] sm:$0xff] %vm1338_vm1, %v1292_v50  ;;  %v1230_v57 = vadd.f32 %v2500_v44, %v1159_v25  ;;  %v924_v59 = vadd.f32 %v2577_v45, %v345_v55 }
 0x126   :  { %v1295_v61 = vmax.f32 %v1231_v52, 0.0  ;;  %v1162_v43 = vmul.f32 %v2493_v40, %v929_v54  ;;  %v2695_v45 = vpop.f32.mrb[36].mxu0 }
 0x127   :  { %v1294_v62 = vmax.f32 %v1230_v57, 0.0  ;;  %v1161_v36 = vmul.f32 %v2493_v40, %v924_v59  ;;  %v1689_v63 = vpop.f32.mrb[24].mxu1  ;;  %v2703_v8 = vpop.f32.mrb[37].mxu0 }
 0x128   :  { %1360 = vst.msk [vmem:[%s3049_s6 + $0xa8] sm:$0xff] %vm1338_vm1, %v1295_v61  ;;  %v1233_v0 = vadd.f32 %v2500_v44, %v1162_v43  ;;  %v939_v2 = vadd.f32 %v2587_v38, %v1689_v63  ;;  %v355_v3 = vpop.f32.mrb[25].mxu1 }
 0x129   :  { %1359 = vst.msk [vmem:[%s3049_s6 + $0xa0] sm:$0xff] %vm1338_vm1, %v1294_v62  ;;  %v1232_v5 = vadd.f32 %v2500_v44, %v1161_v36  ;;  %v934_v7 = vadd.f32 %v2595_v58, %v355_v3 }
 0x12a   :  { %v1297_v9 = vmax.f32 %v1233_v0, 0.0  ;;  %v1164_v53 = vmul.f32 %v2493_v40, %v939_v2  ;;  %v2713_v58 = vpop.f32.mrb[38].mxu0 }
 0x12b   :  { %v1296_v10 = vmax.f32 %v1232_v5, 0.0  ;;  %v1163_v38 = vmul.f32 %v2493_v40, %v934_v7  ;;  %v1692_v11 = vpop.f32.mrb[26].mxu1  ;;  %v2721_v20 = vpop.f32.mrb[39].mxu0 }
 0x12c   :  { %1362 = vst.msk [vmem:[%s3049_s6 + $0xb8] sm:$0xff] %vm1338_vm1, %v1297_v9  ;;  %v1235_v12 = vadd.f32 %v2500_v44, %v1164_v53  ;;  %v949_v14 = vadd.f32 %v2605_v46, %v1692_v11  ;;  %v365_v15 = vpop.f32.mrb[27].mxu1 }
 0x12d   :  { %1361 = vst.msk [vmem:[%s3049_s6 + $0xb0] sm:$0xff] %vm1338_vm1, %v1296_v10  ;;  %v1234_v17 = vadd.f32 %v2500_v44, %v1163_v38  ;;  %v944_v19 = vadd.f32 %v2613_v6, %v365_v15 }
 0x12e   :  { %v1299_v21 = vmax.f32 %v1235_v12, 0.0  ;;  %v1166_v1 = vmul.f32 %v2493_v40, %v949_v14  ;;  %v2731_v6 = vpop.f32.mrb[40].mxu0 }
 0x12f   :  { %v1298_v22 = vmax.f32 %v1234_v17, 0.0  ;;  %v1165_v46 = vmul.f32 %v2493_v40, %v944_v19  ;;  %v1695_v23 = vpop.f32.mrb[28].mxu1  ;;  %v2739_v32 = vpop.f32.mrb[41].mxu0 }
 0x130   :  { %1364 = vst.msk [vmem:[%s3049_s6 + $0xc8] sm:$0xff] %vm1338_vm1, %v1299_v21  ;;  %v1237_v24 = vadd.f32 %v2500_v44, %v1166_v1  ;;  %v959_v26 = vadd.f32 %v2623_v56, %v1695_v23  ;;  %v375_v27 = vpop.f32.mrb[29].mxu1 }
 0x131   :  { %1363 = vst.msk [vmem:[%s3049_s6 + $0xc0] sm:$0xff] %vm1338_vm1, %v1298_v22  ;;  %v1236_v29 = vadd.f32 %v2500_v44, %v1165_v46  ;;  %v954_v31 = vadd.f32 %v2631_v18, %v375_v27 }
 0x132   :  { %v1301_v33 = vmax.f32 %v1237_v24, 0.0  ;;  %v1168_v13 = vmul.f32 %v2493_v40, %v959_v26  ;;  %v2749_v18 = vpop.f32.mrb[42].mxu0 }
 0x133   :  { %v1300_v34 = vmax.f32 %v1236_v29, 0.0  ;;  %v1167_v56 = vmul.f32 %v2493_v40, %v954_v31  ;;  %v1698_v35 = vpop.f32.mrb[30].mxu1  ;;  %v2757_v37 = vpop.f32.mrb[43].mxu0 }
 0x134   :  { %1366 = vst.msk [vmem:[%s3049_s6 + $0xd8] sm:$0xff] %vm1338_vm1, %v1301_v33  ;;  %v1239_v39 = vadd.f32 %v2500_v44, %v1168_v13  ;;  %v969_v41 = vadd.f32 %v2641_v4, %v1698_v35  ;;  %v385_v42 = vpop.f32.mrb[31].mxu1 }
 0x135   :  { %1365 = vst.msk [vmem:[%s3049_s6 + $0xd0] sm:$0xff] %vm1338_vm1, %v1300_v34  ;;  %v1238_v47 = vadd.f32 %v2500_v44, %v1167_v56  ;;  %v964_v49 = vadd.f32 %v2649_v30, %v385_v42 }
 0x136   :  { %v1303_v50 = vmax.f32 %v1239_v39, 0.0  ;;  %v1170_v25 = vmul.f32 %v2493_v40, %v969_v41  ;;  %v2767_v30 = vpop.f32.mrb[44].mxu0 }
 0x137   :  { %v1302_v51 = vmax.f32 %v1238_v47, 0.0  ;;  %v1169_v4 = vmul.f32 %v2493_v40, %v964_v49  ;;  %v1701_v52 = vpop.f32.mrb[32].mxu1  ;;  %v2775_v43 = vpop.f32.mrb[45].mxu0 }
 0x138   :  { %1368 = vst.msk [vmem:[%s3049_s6 + $0xe8] sm:$0xff] %vm1338_vm1, %v1303_v50  ;;  %v1241_v54 = vadd.f32 %v2500_v44, %v1170_v25  ;;  %v979_v55 = vadd.f32 %v2659_v16, %v1701_v52  ;;  %v395_v57 = vpop.f32.mrb[33].mxu1 }
 0x139   :  { %1367 = vst.msk [vmem:[%s3049_s6 + $0xe0] sm:$0xff] %vm1338_vm1, %v1302_v51  ;;  %v1240_v59 = vadd.f32 %v2500_v44, %v1169_v4  ;;  %v974_v61 = vadd.f32 %v2667_v48, %v395_v57 }
 0x13a   :  { %v1305_v62 = vmax.f32 %v1241_v54, 0.0  ;;  %v1172_v36 = vmul.f32 %v2493_v40, %v979_v55  ;;  %v2785_v48 = vpop.f32.mrb[46].mxu0 }
 0x13b   :  { %v1304_v63 = vmax.f32 %v1240_v59, 0.0  ;;  %v1171_v16 = vmul.f32 %v2493_v40, %v974_v61  ;;  %v1704_v0 = vpop.f32.mrb[34].mxu1  ;;  %v2793_v53 = vpop.f32.mrb[47].mxu0 }
 0x13c   :  { %1370 = vst.msk [vmem:[%s3049_s6 + $0xf8] sm:$0xff] %vm1338_vm1, %v1305_v62  ;;  %v1243_v2 = vadd.f32 %v2500_v44, %v1172_v36  ;;  %v989_v3 = vadd.f32 %v2677_v28, %v1704_v0  ;;  %v405_v5 = vpop.f32.mrb[35].mxu1 }
 0x13d   :  { %1369 = vst.msk [vmem:[%s3049_s6 + $0xf0] sm:$0xff] %vm1338_vm1, %v1304_v63  ;;  %v1242_v7 = vadd.f32 %v2500_v44, %v1171_v16  ;;  %v984_v9 = vadd.f32 %v2685_v60, %v405_v5 }
 0x13e   :  { %v1307_v10 = vmax.f32 %v1243_v2, 0.0  ;;  %v1174_v38 = vmul.f32 %v2493_v40, %v989_v3  ;;  %v2803_v60 = vpop.f32.mrb[48].mxu0 }
 0x13f   :  { %v1306_v11 = vmax.f32 %v1242_v7, 0.0  ;;  %v1173_v28 = vmul.f32 %v2493_v40, %v984_v9  ;;  %v1707_v12 = vpop.f32.mrb[36].mxu1  ;;  %v2811_v1 = vpop.f32.mrb[49].mxu0 }
 0x140   :  { %1372 = vst.msk [vmem:[%s3049_s6 + $0x108] sm:$0xff] %vm1338_vm1, %v1307_v10  ;;  %v1245_v14 = vadd.f32 %v2500_v44, %v1174_v38  ;;  %v999_v15 = vadd.f32 %v2695_v45, %v1707_v12  ;;  %v415_v17 = vpop.f32.mrb[37].mxu1 }
 0x141   :  { %1371 = vst.msk [vmem:[%s3049_s6 + $0x100] sm:$0xff] %vm1338_vm1, %v1306_v11  ;;  %v1244_v19 = vadd.f32 %v2500_v44, %v1173_v28  ;;  %v994_v21 = vadd.f32 %v2703_v8, %v415_v17 }
 0x142   :  { %v1309_v22 = vmax.f32 %v1245_v14, 0.0  ;;  %v1176_v46 = vmul.f32 %v2493_v40, %v999_v15  ;;  %v2821_v8 = vpop.f32.mrb[50].mxu0 }
 0x143   :  { %v1308_v23 = vmax.f32 %v1244_v19, 0.0  ;;  %v1175_v45 = vmul.f32 %v2493_v40, %v994_v21  ;;  %v1710_v24 = vpop.f32.mrb[38].mxu1  ;;  %v2829_v13 = vpop.f32.mrb[51].mxu0 }
 0x144   :  { %1374 = vst.msk [vmem:[%s3049_s6 + $0x118] sm:$0xff] %vm1338_vm1, %v1309_v22  ;;  %v1247_v26 = vadd.f32 %v2500_v44, %v1176_v46  ;;  %v1009_v27 = vadd.f32 %v2713_v58, %v1710_v24  ;;  %v425_v29 = vpop.f32.mrb[39].mxu1 }
 0x145   :  { %1373 = vst.msk [vmem:[%s3049_s6 + $0x110] sm:$0xff] %vm1338_vm1, %v1308_v23  ;;  %v1246_v31 = vadd.f32 %v2500_v44, %v1175_v45  ;;  %v1004_v33 = vadd.f32 %v2721_v20, %v425_v29 }
 0x146   :  { %v1311_v34 = vmax.f32 %v1247_v26, 0.0  ;;  %v1178_v56 = vmul.f32 %v2493_v40, %v1009_v27  ;;  %v2839_v20 = vpop.f32.mrb[52].mxu0 }
 0x147   :  { %v1310_v35 = vmax.f32 %v1246_v31, 0.0  ;;  %v1177_v58 = vmul.f32 %v2493_v40, %v1004_v33  ;;  %v1713_v39 = vpop.f32.mrb[40].mxu1  ;;  %v2847_v25 = vpop.f32.mrb[53].mxu0 }
 0x148   :  { %1376 = vst.msk [vmem:[%s3049_s6 + $0x128] sm:$0xff] %vm1338_vm1, %v1311_v34  ;;  %v1249_v41 = vadd.f32 %v2500_v44, %v1178_v56  ;;  %v1019_v42 = vadd.f32 %v2731_v6, %v1713_v39  ;;  %v435_v47 = vpop.f32.mrb[41].mxu1 }
 0x149   :  { %1375 = vst.msk [vmem:[%s3049_s6 + $0x120] sm:$0xff] %vm1338_vm1, %v1310_v35  ;;  %v1248_v49 = vadd.f32 %v2500_v44, %v1177_v58  ;;  %v1014_v50 = vadd.f32 %v2739_v32, %v435_v47 }
 0x14a   :  { %v1313_v51 = vmax.f32 %v1249_v41, 0.0  ;;  %v1180_v4 = vmul.f32 %v2493_v40, %v1019_v42  ;;  %v2857_v32 = vpop.f32.mrb[54].mxu0 }
 0x14b   :  { %v1312_v52 = vmax.f32 %v1248_v49, 0.0  ;;  %v1179_v6 = vmul.f32 %v2493_v40, %v1014_v50  ;;  %v1716_v54 = vpop.f32.mrb[42].mxu1  ;;  %v2865_v36 = vpop.f32.mrb[55].mxu0 }
 0x14c   :  { %1378 = vst.msk [vmem:[%s3049_s6 + $0x138] sm:$0xff] %vm1338_vm1, %v1313_v51  ;;  %v1251_v55 = vadd.f32 %v2500_v44, %v1180_v4  ;;  %v1029_v57 = vadd.f32 %v2749_v18, %v1716_v54  ;;  %v445_v59 = vpop.f32.mrb[43].mxu1 }
 0x14d   :  { %1377 = vst.msk [vmem:[%s3049_s6 + $0x130] sm:$0xff] %vm1338_vm1, %v1312_v52  ;;  %v1250_v61 = vadd.f32 %v2500_v44, %v1179_v6  ;;  %v1024_v62 = vadd.f32 %v2757_v37, %v445_v59 }
 0x14e   :  { %v1315_v63 = vmax.f32 %v1251_v55, 0.0  ;;  %v1182_v16 = vmul.f32 %v2493_v40, %v1029_v57  ;;  %v2875_v37 = vpop.f32.mrb[56].mxu0 }
 0x14f   :  { %v1314_v0 = vmax.f32 %v1250_v61, 0.0  ;;  %v1181_v18 = vmul.f32 %v2493_v40, %v1024_v62  ;;  %v1719_v2 = vpop.f32.mrb[44].mxu1  ;;  %v2883_v38 = vpop.f32.mrb[57].mxu0 }
 0x150   :  { %1380 = vst.msk [vmem:[%s3049_s6 + $0x148] sm:$0xff] %vm1338_vm1, %v1315_v63  ;;  %v1253_v3 = vadd.f32 %v2500_v44, %v1182_v16  ;;  %v1039_v5 = vadd.f32 %v2767_v30, %v1719_v2  ;;  %v455_v7 = vpop.f32.mrb[45].mxu1 }
 0x151   :  { %1379 = vst.msk [vmem:[%s3049_s6 + $0x140] sm:$0xff] %vm1338_vm1, %v1314_v0  ;;  %v1252_v9 = vadd.f32 %v2500_v44, %v1181_v18  ;;  %v1034_v10 = vadd.f32 %v2775_v43, %v455_v7 }
 0x152   :  { %v1317_v11 = vmax.f32 %v1253_v3, 0.0  ;;  %v1184_v28 = vmul.f32 %v2493_v40, %v1039_v5  ;;  %v2893_v43 = vpop.f32.mrb[58].mxu0 }
 0x153   :  { %v1316_v12 = vmax.f32 %v1252_v9, 0.0  ;;  %v1183_v30 = vmul.f32 %v2493_v40, %v1034_v10  ;;  %v1722_v14 = vpop.f32.mrb[46].mxu1  ;;  %v2901_v46 = vpop.f32.mrb[59].mxu0 }
 0x154   :  { %1382 = vst.msk [vmem:[%s3049_s6 + $0x158] sm:$0xff] %vm1338_vm1, %v1317_v11  ;;  %v1255_v15 = vadd.f32 %v2500_v44, %v1184_v28  ;;  %v1049_v17 = vadd.f32 %v2785_v48, %v1722_v14  ;;  %v465_v19 = vpop.f32.mrb[47].mxu1 }
 0x155   :  { %1381 = vst.msk [vmem:[%s3049_s6 + $0x150] sm:$0xff] %vm1338_vm1, %v1316_v12  ;;  %v1254_v21 = vadd.f32 %v2500_v44, %v1183_v30  ;;  %v1044_v22 = vadd.f32 %v2793_v53, %v465_v19 }
 0x156   :  { %v1319_v23 = vmax.f32 %v1255_v15, 0.0  ;;  %v1186_v45 = vmul.f32 %v2493_v40, %v1049_v17  ;;  %v2911_v53 = vpop.f32.mrb[60].mxu0 }
 0x157   :  { %v1318_v24 = vmax.f32 %v1254_v21, 0.0  ;;  %v1185_v48 = vmul.f32 %v2493_v40, %v1044_v22  ;;  %v1725_v26 = vpop.f32.mrb[48].mxu1  ;;  %v2919_v56 = vpop.f32.mrb[61].mxu0 }
 0x158   :  { %1384 = vst.msk [vmem:[%s3049_s6 + $0x168] sm:$0xff] %vm1338_vm1, %v1319_v23  ;;  %v1257_v27 = vadd.f32 %v2500_v44, %v1186_v45  ;;  %v1059_v29 = vadd.f32 %v2803_v60, %v1725_v26  ;;  %v475_v31 = vpop.f32.mrb[49].mxu1 }
 0x159   :  { %1383 = vst.msk [vmem:[%s3049_s6 + $0x160] sm:$0xff] %vm1338_vm1, %v1318_v24  ;;  %v1256_v33 = vadd.f32 %v2500_v44, %v1185_v48  ;;  %v1054_v34 = vadd.f32 %v2811_v1, %v475_v31 }
 0x15a   :  { %v1321_v35 = vmax.f32 %v1257_v27, 0.0  ;;  %v1188_v58 = vmul.f32 %v2493_v40, %v1059_v29  ;;  %v2929_v1 = vpop.f32.mrb[62].mxu0 }
 0x15b   :  { %v1320_v39 = vmax.f32 %v1256_v33, 0.0  ;;  %v1187_v60 = vmul.f32 %v2493_v40, %v1054_v34  ;;  %v1728_v41 = vpop.f32.mrb[50].mxu1  ;;  %v2937_v4 = vpop.f32.mrb[63].mxu0 }
 0x15c   :  { %1386 = vst.msk [vmem:[%s3049_s6 + $0x178] sm:$0xff] %vm1338_vm1, %v1321_v35  ;;  %v1259_v42 = vadd.f32 %v2500_v44, %v1188_v58  ;;  %v1069_v47 = vadd.f32 %v2821_v8, %v1728_v41  ;;  %v485_v49 = vpop.f32.mrb[51].mxu1 }
 0x15d   :  { %1385 = vst.msk [vmem:[%s3049_s6 + $0x170] sm:$0xff] %vm1338_vm1, %v1320_v39  ;;  %v1258_v50 = vadd.f32 %v2500_v44, %v1187_v60  ;;  %v1064_v51 = vadd.f32 %v2829_v13, %v485_v49 }
 0x15e   :  { %v1323_v52 = vmax.f32 %v1259_v42, 0.0  ;;  %v1190_v6 = vmul.f32 %v2493_v40, %v1069_v47 }
 0x15f   :  { %v1322_v54 = vmax.f32 %v1258_v50, 0.0  ;;  %v1189_v8 = vmul.f32 %v2493_v40, %v1064_v51  ;;  %v1731_v55 = vpop.f32.mrb[52].mxu1 }
 0x160   :  { %1388 = vst.msk [vmem:[%s3049_s6 + $0x188] sm:$0xff] %vm1338_vm1, %v1323_v52  ;;  %v1261_v57 = vadd.f32 %v2500_v44, %v1190_v6  ;;  %v1079_v59 = vadd.f32 %v2839_v20, %v1731_v55  ;;  %v495_v61 = vpop.f32.mrb[53].mxu1 }
 0x161   :  { %1387 = vst.msk [vmem:[%s3049_s6 + $0x180] sm:$0xff] %vm1338_vm1, %v1322_v54  ;;  %v1260_v13 = vadd.f32 %v2500_v44, %v1189_v8  ;;  %v1074_v62 = vadd.f32 %v2847_v25, %v495_v61 }
 0x162   :  { %v1325_v63 = vmax.f32 %v1261_v57, 0.0  ;;  %v1192_v16 = vmul.f32 %v2493_v40, %v1079_v59 }
 0x163   :  { %v1324_v0 = vmax.f32 %v1260_v13, 0.0  ;;  %v1191_v18 = vmul.f32 %v2493_v40, %v1074_v62  ;;  %v1734_v2 = vpop.f32.mrb[54].mxu1 }
 0x164   :  { %1390 = vst.msk [vmem:[%s3049_s6 + $0x198] sm:$0xff] %vm1338_vm1, %v1325_v63  ;;  %v1263_v20 = vadd.f32 %v2500_v44, %v1192_v16  ;;  %v1089_v3 = vadd.f32 %v2857_v32, %v1734_v2  ;;  %v505_v5 = vpop.f32.mrb[55].mxu1 }
 0x165   :  { %1389 = vst.msk [vmem:[%s3049_s6 + $0x190] sm:$0xff] %vm1338_vm1, %v1324_v0  ;;  %v1262_v25 = vadd.f32 %v2500_v44, %v1191_v18  ;;  %v1084_v7 = vadd.f32 %v2865_v36, %v505_v5 }
 0x166   :  { %v1327_v9 = vmax.f32 %v1263_v20, 0.0  ;;  %v1194_v10 = vmul.f32 %v2493_v40, %v1089_v3 }
 0x167   :  { %v1326_v11 = vmax.f32 %v1262_v25, 0.0  ;;  %v1193_v28 = vmul.f32 %v2493_v40, %v1084_v7  ;;  %v1737_v12 = vpop.f32.mrb[56].mxu1 }
 0x168   :  { %1392 = vst.msk [vmem:[%s3049_s6 + $0x1a8] sm:$0xff] %vm1338_vm1, %v1327_v9  ;;  %v1265_v32 = vadd.f32 %v2500_v44, %v1194_v10  ;;  %v1099_v30 = vadd.f32 %v2875_v37, %v1737_v12  ;;  %v515_v14 = vpop.f32.mrb[57].mxu1 }
 0x169   :  { %1391 = vst.msk [vmem:[%s3049_s6 + $0x1a0] sm:$0xff] %vm1338_vm1, %v1326_v11  ;;  %v1264_v36 = vadd.f32 %v2500_v44, %v1193_v28  ;;  %v1094_v15 = vadd.f32 %v2883_v38, %v515_v14 }
 0x16a   :  { %v1329_v17 = vmax.f32 %v1265_v32, 0.0  ;;  %v1196_v19 = vmul.f32 %v2493_v40, %v1099_v30 }
 0x16b   :  { %v1328_v21 = vmax.f32 %v1264_v36, 0.0  ;;  %v1195_v22 = vmul.f32 %v2493_v40, %v1094_v15  ;;  %v1740_v23 = vpop.f32.mrb[58].mxu1 }
 0x16c   :  { %1394 = vst.msk [vmem:[%s3049_s6 + $0x1b8] sm:$0xff] %vm1338_vm1, %v1329_v17  ;;  %v1267_v37 = vadd.f32 %v2500_v44, %v1196_v19  ;;  %v1109_v45 = vadd.f32 %v2893_v43, %v1740_v23  ;;  %v525_v24 = vpop.f32.mrb[59].mxu1 }
 0x16d   :  { %1393 = vst.msk [vmem:[%s3049_s6 + $0x1b0] sm:$0xff] %vm1338_vm1, %v1328_v21  ;;  %v1266_v38 = vadd.f32 %v2500_v44, %v1195_v22  ;;  %v1104_v48 = vadd.f32 %v2901_v46, %v525_v24 }
 0x16e   :  { %v1331_v26 = vmax.f32 %v1267_v37, 0.0  ;;  %v1198_v27 = vmul.f32 %v2493_v40, %v1109_v45 }
 0x16f   :  { %v1330_v29 = vmax.f32 %v1266_v38, 0.0  ;;  %v1197_v31 = vmul.f32 %v2493_v40, %v1104_v48  ;;  %v1743_v33 = vpop.f32.mrb[60].mxu1 }
 0x170   :  { %1396 = vst.msk [vmem:[%s3049_s6 + $0x1c8] sm:$0xff] %vm1338_vm1, %v1331_v26  ;;  %v1269_v43 = vadd.f32 %v2500_v44, %v1198_v27  ;;  %v1119_v34 = vadd.f32 %v2911_v53, %v1743_v33  ;;  %v535_v35 = vpop.f32.mrb[61].mxu1 }
 0x171   :  { %1395 = vst.msk [vmem:[%s3049_s6 + $0x1c0] sm:$0xff] %vm1338_vm1, %v1330_v29  ;;  %v1268_v46 = vadd.f32 %v2500_v44, %v1197_v31  ;;  %v1114_v58 = vadd.f32 %v2919_v56, %v535_v35 }
 0x172   :  { %v1333_v39 = vmax.f32 %v1269_v43, 0.0  ;;  %v1200_v60 = vmul.f32 %v2493_v40, %v1119_v34 }
 0x173   :  { %v1332_v41 = vmax.f32 %v1268_v46, 0.0  ;;  %v1199_v42 = vmul.f32 %v2493_v40, %v1114_v58  ;;  %v1746_v47 = vpop.f32.mrb[62].mxu1 }
 0x174   :  { %1398 = vst.msk [vmem:[%s3049_s6 + $0x1d8] sm:$0xff] %vm1338_vm1, %v1333_v39  ;;  %v1271_v53 = vadd.f32 %v2500_v44, %v1200_v60  ;;  %v1129_v49 = vadd.f32 %v2929_v1, %v1746_v47  ;;  %v545_v50 = vpop.f32.mrb[63].mxu1 }
 0x175   :  { %1397 = vst.msk [vmem:[%s3049_s6 + $0x1d0] sm:$0xff] %vm1338_vm1, %v1332_v41  ;;  %v1270_v56 = vadd.f32 %v2500_v44, %v1199_v42  ;;  %v1124_v51 = vadd.f32 %v2937_v4, %v545_v50 }
 0x176   :  { %v1335_v52 = vmax.f32 %v1271_v53, 0.0  ;;  %v1202_v6 = vmul.f32 %v2493_v40, %v1129_v49 }
 0x177   :  { %v1334_v54 = vmax.f32 %v1270_v56, 0.0  ;;  %v1201_v8 = vmul.f32 %v2493_v40, %v1124_v51 }
 0x178   :  { %1400 = vst.msk [vmem:[%s3049_s6 + $0x1e8] sm:$0xff] %vm1338_vm1, %v1335_v52  ;;  %v1273_v1 = vadd.f32 %v2500_v44, %v1202_v6 }
 0x179   :  { %1399 = vst.msk [vmem:[%s3049_s6 + $0x1e0] sm:$0xff] %vm1338_vm1, %v1334_v54  ;;  %v1272_v4 = vadd.f32 %v2500_v44, %v1201_v8 }
 0x17a   :  { %v1337_v55 = vmax.f32 %v1273_v1, 0.0 }
 0x17b   :  { %v1336_v57 = vmax.f32 %v1272_v4, 0.0 }
 0x17c   :  { %1402 = vst.msk [vmem:[%s3049_s6 + $0x1f8] sm:$0xff] %vm1338_vm1, %v1337_v55 }
 0x17d   :  { %1401 = vst.msk [vmem:[%s3049_s6 + $0x1f0] sm:$0xff] %vm1338_vm1, %v1336_v57 }

// kernel: rlaus_bottleneck_forward.5
= control target key start
LH: loop header
LB: loop body
LE: loop exit
PB: predicated region body
PF: predicated region fallthrough
CT: control target
= control target key end

     0   :  { %s5894_s15 = smov 0   ;;  %s5896_s16 = smov 0   ;;  %s7038_s0 = inlined_call_operand.vmem [shape: f32[2,342,4], index: 0, kind: input, shape index: {}]   ;;  %s7039_s1 = inlined_call_operand.vmem [shape: f32[9,4,4], index: 1, kind: input, shape index: {}]   ;;  %s7040_s2 = inlined_call_operand.vmem [shape: f32[1,4], index: 2, kind: input, shape index: {}]   ;;  %s7041_s3 = inlined_call_operand.vmem [shape: f32[1,4], index: 3, kind: input, shape index: {}]   ;;  %s7042_s4 = inlined_call_operand.vmem [shape: f32[2,288,4], index: 4, kind: output, shape index: {}]  }
   0x1   :  { %s5898_s17 = smov 0  }
   0x2 LB: > { %s26_s18 = sadd.s32 1, %s5863_s16  ;;  %p4344_p0 = scmp.ge.s32.totalorder %s5867_s17, 1  ;;  %s5867_s17 = sphi %s5898_s17, %s14_s17   ;;  %s5863_s16 = sphi %s5896_s16, %s7044_s16   ;;  %s5859_s15 = sphi %s5894_s15, %s7043_s15  }
   0x3   : > { %p28_p1 = scmp.ge.s32.totalorder %s26_s18, 2  ;;  %p201_p2 = scmp.lt.s32.totalorder %s5867_s17, 3 }
   0x5   : > { %s7046_s18 = smov (%p28_p1, %s26_s18), 0  ;;  %p202_p3 = pnand %p4344_p0, %p201_p2 }
   0x6   : > { %v4347_v0 = vld [vmem:[%s7039_s1 + $0x4] sm:$0xf] (!%p202_p3)  ;;  %vm447_vm0 = vcmask (!%p202_p3), 1043456   ;;  %v5918_v1 = vld [vmem:[%s7039_s1 + $0x10] sm:$0xf] (!%p202_p3)  ;;  %p240_p4 = scmp.lt.s32.totalorder (!%p202_p3), %s5859_s15, 1 }
   0x7   : > { %205 = sbr.rel (%p202_p3) target bundleno = 562 (0x232), region = 36  ;;  %5025 = vmatprep.subr.msk.mxu1 (!%p202_p3), %vm447_vm0, %v4347_v0  ;;  %5249 = vmatprep.subr.msk.mxu0 (!%p202_p3), %vm447_vm0, %v5918_v1  ;;  %v299_v2 = vld [vmem:[%s7039_s1] sm:$0xf] (!%p202_p3)  ;;  %v4536_v3 = vld [vmem:[%s7039_s1 + $0x14] sm:$0xf] (!%p202_p3)  ;;  %vm338_vm1 = vcmask (!%p202_p3), 31744  }
   0x8   : > { %5026 = vmatpush3.msk.msra.mxu1 (!%p202_p3), %vm447_vm0, %v4347_v0  ;;  %5250 = vmatpush3.msk.msra.mxu0 (!%p202_p3), %vm447_vm0, %v5918_v1  ;;  %v5955_v10 = vld [vmem:[%s7039_s1 + $0x18] sm:$0xf] (!%p202_p3)  ;;  %v5960_v11 = vld [vmem:[%s7039_s1 + $0x8] sm:$0xf] (!%p202_p3)  ;;  %v6043_v48 = vld [vmem:[%s7039_s1 + $0x1c] sm:$0xf] (!%p202_p3) }
   0x9   : > { %5081 = vmatprep.subr.msk.mxu1 (!%p202_p3), %vm447_vm0, %v299_v2  ;;  %5305 = vmatprep.subr.msk.mxu0 (!%p202_p3), %vm447_vm0, %v4536_v3 }
   0xe   : > { %s7048_s15 = smov (!%p240_p4, %s5859_s15), 1 }
   0xf   : > { %s5819_s27 = smul.u32 344, %s7048_s15 }
  0x10   : > { %s5820_s21 = smul.u32 288, %s7048_s15 }
  0x11   : > { %s5940_s30 = scalar_lea.vmem %s7038_s0, %s5819_s27 }
  0x12   : > { %v300_v4 = vld [vmem:[%s5940_s30 + $0x1] sm:$0xff]  ;;  %v1912_v5 = vld [vmem:[%s5940_s30 + $0x13] sm:$0xff]  ;;  %v301_v6 = vld [vmem:[%s5940_s30 + $0x9] sm:$0xff]  ;;  %s6878_s26 = scalar_lea.vmem %s7042_s4, %s5820_s21 }
  0x13   : > { %5027 = vmatprep.mubr.msk.f32.mxu1 %vm338_vm1, %v300_v4  ;;  %5251 = vmatprep.mubr.msk.f32.mxu0 %vm338_vm1, %v1912_v5  ;;  %v1913_v7 = vld [vmem:[%s5940_s30 + $0x1b] sm:$0xff]  ;;  %v302_v8 = vld [vmem:[%s5940_s30 + $0x11] sm:$0xff]  ;;  %v1914_v9 = vld [vmem:[%s5940_s30 + $0x23] sm:$0xff] }
  0x14   : > { %5028 = vmatmul.mubr.msk.f32.vlgmr.msra.gmra.mrb[0].mxu1 %vm338_vm1, %v301_v6  ;;  %5252 = vmatmul.mubr.msk.f32.vlgmr.msra.gmra.mrb[0].mxu0 %vm338_vm1, %v1913_v7  ;;  %v303_v12 = vld [vmem:[%s5940_s30 + $0x19] sm:$0xff]  ;;  %v1915_v13 = vld [vmem:[%s5940_s30 + $0x2b] sm:$0xff]  ;;  %v304_v14 = vld [vmem:[%s5940_s30 + $0x21] sm:$0xff] }
  0x15   : > { %5082 = vmatpush3.msk.msra.mxu1 %vm447_vm0, %v299_v2  ;;  %5306 = vmatpush3.msk.msra.mxu0 %vm447_vm0, %v4536_v3  ;;  %v1916_v15 = vld [vmem:[%s5940_s30 + $0x33] sm:$0xff]  ;;  %v305_v16 = vld [vmem:[%s5940_s30 + $0x29] sm:$0xff]  ;;  %v1917_v17 = vld [vmem:[%s5940_s30 + $0x3b] sm:$0xff] }
  0x16   : > { %5030 = vmatprep.mubr.msk.f32.mxu1 %vm338_vm1, %v302_v8  ;;  %5254 = vmatprep.mubr.msk.f32.mxu0 %vm338_vm1, %v1914_v9  ;;  %v306_v18 = vld [vmem:[%s5940_s30 + $0x31] sm:$0xff]  ;;  %v1918_v19 = vld [vmem:[%s5940_s30 + $0x43] sm:$0xff]  ;;  %v307_v20 = vld [vmem:[%s5940_s30 + $0x39] sm:$0xff] }
  0x17   : > { %5361 = vmatprep.subr.msk.mxu0 %vm447_vm0, %v5955_v10  ;;  %5137 = vmatprep.subr.msk.mxu1 %vm447_vm0, %v5960_v11  ;;  %v1919_v21 = vld [vmem:[%s5940_s30 + $0x4b] sm:$0xff]  ;;  %v308_v22 = vld [vmem:[%s5940_s30 + $0x41] sm:$0xff]  ;;  %v1920_v23 = vld [vmem:[%s5940_s30 + $0x53] sm:$0xff] }
  0x18   : > { %5031 = vmatmul.mubr.msk.f32.gmra.mrb[2].mxu1 %vm338_vm1, %v303_v12  ;;  %5255 = vmatmul.mubr.msk.f32.gmra.mrb[2].mxu0 %vm338_vm1, %v1915_v13  ;;  %v309_v24 = vld [vmem:[%s5940_s30 + $0x49] sm:$0xff]  ;;  %v1921_v25 = vld [vmem:[%s5940_s30 + $0x5b] sm:$0xff]  ;;  %v310_v26 = vld [vmem:[%s5940_s30 + $0x51] sm:$0xff] }
  0x19   : > { %5033 = vmatprep.mubr.msk.f32.mxu1 %vm338_vm1, %v304_v14  ;;  %5257 = vmatprep.mubr.msk.f32.mxu0 %vm338_vm1, %v1916_v15  ;;  %v1922_v27 = vld [vmem:[%s5940_s30 + $0x63] sm:$0xff]  ;;  %v311_v28 = vld [vmem:[%s5940_s30 + $0x59] sm:$0xff]  ;;  %v1923_v29 = vld [vmem:[%s5940_s30 + $0x6b] sm:$0xff] }
  0x1a   : > { %v312_v30 = vld [vmem:[%s5940_s30 + $0x61] sm:$0xff]  ;;  %v1924_v31 = vld [vmem:[%s5940_s30 + $0x73] sm:$0xff]  ;;  %v313_v32 = vld [vmem:[%s5940_s30 + $0x69] sm:$0xff] }
  0x1b   : > { %v1925_v33 = vld [vmem:[%s5940_s30 + $0x7b] sm:$0xff]  ;;  %v314_v34 = vld [vmem:[%s5940_s30 + $0x71] sm:$0xff]  ;;  %v1926_v35 = vld [vmem:[%s5940_s30 + $0x83] sm:$0xff] }
  0x1c   : > { %5034 = vmatmul.mubr.msk.f32.gmra.mrb[4].mxu1 %vm338_vm1, %v305_v16  ;;  %5258 = vmatmul.mubr.msk.f32.gmra.mrb[4].mxu0 %vm338_vm1, %v1917_v17  ;;  %v315_v36 = vld [vmem:[%s5940_s30 + $0x79] sm:$0xff]  ;;  %v1927_v37 = vld [vmem:[%s5940_s30 + $0x8b] sm:$0xff]  ;;  %v316_v38 = vld [vmem:[%s5940_s30 + $0x81] sm:$0xff] }
  0x1d   : > { %5036 = vmatprep.mubr.msk.f32.mxu1 %vm338_vm1, %v306_v18  ;;  %5260 = vmatprep.mubr.msk.f32.mxu0 %vm338_vm1, %v1918_v19  ;;  %v1928_v39 = vld [vmem:[%s5940_s30 + $0x93] sm:$0xff]  ;;  %v317_v40 = vld [vmem:[%s5940_s30 + $0x89] sm:$0xff]  ;;  %v1929_v41 = vld [vmem:[%s5940_s30 + $0x9b] sm:$0xff] }
  0x1e   : > { %v318_v42 = vld [vmem:[%s5940_s30 + $0x91] sm:$0xff]  ;;  %v319_v44 = vld [vmem:[%s5940_s30 + $0x99] sm:$0xff]  ;;  %v320_v46 = vld [vmem:[%s5940_s30 + $0xa1] sm:$0xff] }
  0x1f   : > { %v2342_v43 = vld [vmem:[%s5940_s30 + $0x14] sm:$0xff]  ;;  %v2343_v45 = vld [vmem:[%s5940_s30 + $0x1c] sm:$0xff]  ;;  %v6038_v47 = vld [vmem:[%s5940_s30 + $0x24] sm:$0xff] }
  0x20   : > { %5037 = vmatmul.mubr.msk.f32.gmra.mrb[6].mxu1 %vm338_vm1, %v307_v20  ;;  %5261 = vmatmul.mubr.msk.f32.gmra.mrb[6].mxu0 %vm338_vm1, %v1919_v21  ;;  %v321_v49 = vld [vmem:[%s5940_s30 + $0xa9] sm:$0xff]  ;;  %v322_v51 = vld [vmem:[%s5940_s30 + $0xb1] sm:$0xff]  ;;  %v323_v53 = vld [vmem:[%s5940_s30 + $0xb9] sm:$0xff] }
  0x21   : > { %5039 = vmatprep.mubr.msk.f32.mxu1 %vm338_vm1, %v308_v22  ;;  %5263 = vmatprep.mubr.msk.f32.mxu0 %vm338_vm1, %v1920_v23  ;;  %v6052_v50 = vld [vmem:[%s5940_s30 + $0x2c] sm:$0xff]  ;;  %v6058_v52 = vld [vmem:[%s5940_s30 + $0x34] sm:$0xff]  ;;  %v6070_v54 = vld [vmem:[%s5940_s30 + $0x3c] sm:$0xff] }
  0x22   : > { %v324_v55 = vld [vmem:[%s5940_s30 + $0xc1] sm:$0xff]  ;;  %v325_v57 = vld [vmem:[%s5940_s30 + $0xc9] sm:$0xff]  ;;  %v326_v59 = vld [vmem:[%s5940_s30 + $0xd1] sm:$0xff] }
  0x23   : > { %v6074_v56 = vld [vmem:[%s5940_s30 + $0x44] sm:$0xff]  ;;  %v6084_v58 = vld [vmem:[%s5940_s30 + $0x4c] sm:$0xff]  ;;  %v6088_v60 = vld [vmem:[%s5940_s30 + $0x54] sm:$0xff] }
  0x24   : > { %5040 = vmatmul.mubr.msk.f32.gmra.mrb[8].mxu1 %vm338_vm1, %v309_v24  ;;  %5264 = vmatmul.mubr.msk.f32.gmra.mrb[8].mxu0 %vm338_vm1, %v1921_v25  ;;  %v327_v61 = vld [vmem:[%s5940_s30 + $0xd9] sm:$0xff]  ;;  %v328_v63 = vld [vmem:[%s5940_s30 + $0xe1] sm:$0xff]  ;;  %v329_v2 = vld [vmem:[%s5940_s30 + $0xe9] sm:$0xff] }
  0x25   : > { %5042 = vmatprep.mubr.msk.f32.mxu1 %vm338_vm1, %v310_v26  ;;  %5266 = vmatprep.mubr.msk.f32.mxu0 %vm338_vm1, %v1922_v27  ;;  %v6098_v62 = vld [vmem:[%s5940_s30 + $0x5c] sm:$0xff]  ;;  %v6102_v0 = vld [vmem:[%s5940_s30 + $0x64] sm:$0xff]  ;;  %v6112_v3 = vld [vmem:[%s5940_s30 + $0x6c] sm:$0xff] }
  0x26   : > { %v330_v4 = vld [vmem:[%s5940_s30 + $0xf1] sm:$0xff]  ;;  %v331_v6 = vld [vmem:[%s5940_s30 + $0xf9] sm:$0xff]  ;;  %v332_v8 = vld [vmem:[%s5940_s30 + $0x101] sm:$0xff] }
  0x27   : > { %v6116_v5 = vld [vmem:[%s5940_s30 + $0x74] sm:$0xff]  ;;  %v6126_v7 = vld [vmem:[%s5940_s30 + $0x7c] sm:$0xff]  ;;  %v6130_v9 = vld [vmem:[%s5940_s30 + $0x84] sm:$0xff] }
  0x28   : > { %5043 = vmatmul.mubr.msk.f32.gmra.mrb[10].mxu1 %vm338_vm1, %v311_v28  ;;  %5267 = vmatmul.mubr.msk.f32.gmra.mrb[10].mxu0 %vm338_vm1, %v1923_v29  ;;  %v6140_v12 = vld [vmem:[%s5940_s30 + $0x8c] sm:$0xff]  ;;  %v6144_v14 = vld [vmem:[%s5940_s30 + $0x94] sm:$0xff]  ;;  %v6154_v16 = vld [vmem:[%s5940_s30 + $0x9c] sm:$0xff] }
  0x29   : > { %5045 = vmatprep.mubr.msk.f32.mxu1 %vm338_vm1, %v312_v30  ;;  %5269 = vmatprep.mubr.msk.f32.mxu0 %vm338_vm1, %v1924_v31  ;;  %v334_v13 = vld [vmem:[%s5940_s30 + $0x111] sm:$0xff]  ;;  %v335_v15 = vld [vmem:[%s5940_s30 + $0x119] sm:$0xff]  ;;  %v6158_v18 = vld [vmem:[%s5940_s30 + $0xa4] sm:$0xff] }
  0x2a   : > { %v263_v17 = vld [vmem:[%s5940_s30] sm:$0xff]  ;;  %v264_v19 = vld [vmem:[%s5940_s30 + $0x8] sm:$0xff]  ;;  %v265_v21 = vld [vmem:[%s5940_s30 + $0x10] sm:$0xff] }
  0x2b   : > { %v6168_v20 = vld [vmem:[%s5940_s30 + $0xac] sm:$0xff]  ;;  %v6172_v22 = vld [vmem:[%s5940_s30 + $0xb4] sm:$0xff]  ;;  %v6187_v25 = vld [vmem:[%s5940_s30 + $0xbc] sm:$0xff] }
  0x2c   : > { %5046 = vmatmul.mubr.msk.f32.gmra.mrb[12].mxu1 %vm338_vm1, %v313_v32  ;;  %5270 = vmatmul.mubr.msk.f32.gmra.mrb[12].mxu0 %vm338_vm1, %v1925_v33  ;;  %v6177_v23 = vld [vmem:[%s7039_s1 + $0xc] sm:$0xf]  ;;  %v266_v24 = vld [vmem:[%s5940_s30 + $0x18] sm:$0xff]  ;;  %v267_v26 = vld [vmem:[%s5940_s30 + $0x20] sm:$0xff] }
  0x2d   : > { %5048 = vmatprep.mubr.msk.f32.mxu1 %vm338_vm1, %v314_v34  ;;  %5272 = vmatprep.mubr.msk.f32.mxu0 %vm338_vm1, %v1926_v35  ;;  %v6193_v27 = vld [vmem:[%s5940_s30 + $0xc4] sm:$0xff]  ;;  %v6205_v28 = vld [vmem:[%s5940_s30 + $0xcc] sm:$0xff]  ;;  %v6209_v30 = vld [vmem:[%s5940_s30 + $0xd4] sm:$0xff] }
  0x2e   : > { %v269_v29 = vld [vmem:[%s5940_s30 + $0x30] sm:$0xff]  ;;  %v270_v31 = vld [vmem:[%s5940_s30 + $0x38] sm:$0xff]  ;;  %v271_v33 = vld [vmem:[%s5940_s30 + $0x40] sm:$0xff] }
  0x2f   : > { %v6219_v32 = vld [vmem:[%s5940_s30 + $0xdc] sm:$0xff]  ;;  %v6223_v34 = vld [vmem:[%s5940_s30 + $0xe4] sm:$0xff] }
  0x30   : > { %5049 = vmatmul.mubr.msk.f32.gmra.mrb[14].mxu1 %vm338_vm1, %v315_v36  ;;  %5273 = vmatmul.mubr.msk.f32.gmra.mrb[14].mxu0 %vm338_vm1, %v1927_v37  ;;  %v272_v35 = vld [vmem:[%s5940_s30 + $0x48] sm:$0xff]  ;;  %v273_v37 = vld [vmem:[%s5940_s30 + $0x50] sm:$0xff] }
  0x31   : > { %5051 = vmatprep.mubr.msk.f32.mxu1 %vm338_vm1, %v316_v38  ;;  %5275 = vmatprep.mubr.msk.f32.mxu0 %vm338_vm1, %v1928_v39  ;;  %v6233_v36 = vld [vmem:[%s5940_s30 + $0xec] sm:$0xff]  ;;  %v6237_v38 = vld [vmem:[%s5940_s30 + $0xf4] sm:$0xff] }
  0x32   : > { %v274_v39 = vld [vmem:[%s5940_s30 + $0x58] sm:$0xff] }
  0x34   : > { %5052 = vmatmul.mubr.msk.f32.gmra.mrb[16].mxu1 %vm338_vm1, %v317_v40  ;;  %5276 = vmatmul.mubr.msk.f32.gmra.mrb[16].mxu0 %vm338_vm1, %v1929_v41  ;;  %v6247_v40 = vld [vmem:[%s5940_s30 + $0xfc] sm:$0xff] }
  0x35   : > { %5054 = vmatprep.mubr.msk.f32.mxu1 %vm338_vm1, %v318_v42  ;;  %5307 = vmatprep.mubr.msk.f32.mxu0 %vm338_vm1, %v2342_v43  ;;  %v275_v41 = vld [vmem:[%s5940_s30 + $0x60] sm:$0xff]  ;;  %v276_v43 = vld [vmem:[%s5940_s30 + $0x68] sm:$0xff] }
  0x36   : > { %v6251_v42 = vld [vmem:[%s5940_s30 + $0x104] sm:$0xff] }
  0x38   : > { %5055 = vmatmul.mubr.msk.f32.gmra.mrb[18].mxu1 %vm338_vm1, %v319_v44  ;;  %5308 = vmatmul.mubr.msk.f32.vlgmr.msra.gmra.mrb[0].mxu0 %vm338_vm1, %v2343_v45  ;;  %v6261_v44 = vld [vmem:[%s5940_s30 + $0x10c] sm:$0xff] }
  0x39   : > { %5362 = vmatpush3.msk.msra.mxu0 %vm447_vm0, %v5955_v10  ;;  %5057 = vmatprep.mubr.msk.f32.mxu1 %vm338_vm1, %v320_v46  ;;  %v333_v10 = vld [vmem:[%s5940_s30 + $0x109] sm:$0xff]  ;;  %v6265_v46 = vld [vmem:[%s5940_s30 + $0x114] sm:$0xff] }
  0x3a   : > { %5310 = vmatprep.mubr.msk.f32.mxu0 %vm338_vm1, %v6038_v47  ;;  %5417 = vmatprep.subr.msk.mxu0 %vm447_vm0, %v6043_v48  ;;  %v277_v45 = vld [vmem:[%s5940_s30 + $0x70] sm:$0xff] }
  0x3c   : > { %5058 = vmatmul.mubr.msk.f32.gmra.mrb[20].mxu1 %vm338_vm1, %v321_v49  ;;  %5311 = vmatmul.mubr.msk.f32.gmra.mrb[2].mxu0 %vm338_vm1, %v6052_v50  ;;  %v278_v49 = vld [vmem:[%s5940_s30 + $0x78] sm:$0xff] }
  0x3d   : > { %5060 = vmatprep.mubr.msk.f32.mxu1 %vm338_vm1, %v322_v51  ;;  %5313 = vmatprep.mubr.msk.f32.mxu0 %vm338_vm1, %v6058_v52  ;;  %v6275_v51 = vld [vmem:[%s5940_s30 + $0x11c] sm:$0xff] }
  0x40   : > { %5061 = vmatmul.mubr.msk.f32.gmra.mrb[22].mxu1 %vm338_vm1, %v323_v53  ;;  %5314 = vmatmul.mubr.msk.f32.gmra.mrb[4].mxu0 %vm338_vm1, %v6070_v54  ;;  %v279_v53 = vld [vmem:[%s5940_s30 + $0x80] sm:$0xff] }
  0x41   : > { %5063 = vmatprep.mubr.msk.f32.mxu1 %vm338_vm1, %v324_v55  ;;  %5316 = vmatprep.mubr.msk.f32.mxu0 %vm338_vm1, %v6074_v56  ;;  %v6279_v55 = vld [vmem:[%s5940_s30 + $0x124] sm:$0xff] }
  0x44   : > { %5064 = vmatmul.mubr.msk.f32.gmra.mrb[24].mxu1 %vm338_vm1, %v325_v57  ;;  %5317 = vmatmul.mubr.msk.f32.gmra.mrb[6].mxu0 %vm338_vm1, %v6084_v58  ;;  %v280_v57 = vld [vmem:[%s5940_s30 + $0x88] sm:$0xff] }
  0x45   : > { %5066 = vmatprep.mubr.msk.f32.mxu1 %vm338_vm1, %v326_v59  ;;  %5319 = vmatprep.mubr.msk.f32.mxu0 %vm338_vm1, %v6088_v60  ;;  %v6289_v59 = vld [vmem:[%s5940_s30 + $0x12c] sm:$0xff] }
  0x48   : > { %5067 = vmatmul.mubr.msk.f32.gmra.mrb[26].mxu1 %vm338_vm1, %v327_v61  ;;  %5320 = vmatmul.mubr.msk.f32.gmra.mrb[8].mxu0 %vm338_vm1, %v6098_v62  ;;  %v281_v61 = vld [vmem:[%s5940_s30 + $0x90] sm:$0xff] }
  0x49   : > { %5069 = vmatprep.mubr.msk.f32.mxu1 %vm338_vm1, %v328_v63  ;;  %5322 = vmatprep.mubr.msk.f32.mxu0 %vm338_vm1, %v6102_v0  ;;  %v282_v63 = vld [vmem:[%s5940_s30 + $0x98] sm:$0xff] }
  0x4c   : > { %5070 = vmatmul.mubr.msk.f32.gmra.mrb[28].mxu1 %vm338_vm1, %v329_v2  ;;  %5323 = vmatmul.mubr.msk.f32.gmra.mrb[10].mxu0 %vm338_vm1, %v6112_v3  ;;  %v283_v2 = vld [vmem:[%s5940_s30 + $0xa0] sm:$0xff] }
  0x4d   : > { %5072 = vmatprep.mubr.msk.f32.mxu1 %vm338_vm1, %v330_v4  ;;  %5325 = vmatprep.mubr.msk.f32.mxu0 %vm338_vm1, %v6116_v5  ;;  %v6303_v4 = vld [vmem:[%s7039_s1 + $0x20] sm:$0xf] }
  0x50   : > { %5073 = vmatmul.mubr.msk.f32.gmra.mrb[30].mxu1 %vm338_vm1, %v331_v6  ;;  %5326 = vmatmul.mubr.msk.f32.gmra.mrb[12].mxu0 %vm338_vm1, %v6126_v7  ;;  %v285_v6 = vld [vmem:[%s5940_s30 + $0xb0] sm:$0xff] }
  0x51   : > { %5075 = vmatprep.mubr.msk.f32.mxu1 %vm338_vm1, %v332_v8  ;;  %5328 = vmatprep.mubr.msk.f32.mxu0 %vm338_vm1, %v6130_v9  ;;  %v298_v8 = vld [vmem:[%s5940_s30 + $0x118] sm:$0xff] }
  0x54   : > { %5076 = vmatmul.mubr.msk.f32.gmra.mrb[32].mxu1 %vm338_vm1, %v333_v10  ;;  %5329 = vmatmul.mubr.msk.f32.gmra.mrb[14].mxu0 %vm338_vm1, %v6140_v12  ;;  %v1053_v10 = vld [vmem:[%s5940_s30 + $0xa] sm:$0xff] }
  0x55   : > { %5078 = vmatprep.mubr.msk.f32.mxu1 %vm338_vm1, %v334_v13  ;;  %5331 = vmatprep.mubr.msk.f32.mxu0 %vm338_vm1, %v6144_v14  ;;  %v6391_v13 = vld [vmem:[%s5940_s30 + $0x1a] sm:$0xff] }
  0x58   : > { %5079 = vmatmul.mubr.msk.f32.gmra.mrb[34].mxu1 %vm338_vm1, %v335_v15  ;;  %5332 = vmatmul.mubr.msk.f32.gmra.mrb[16].mxu0 %vm338_vm1, %v6154_v16  ;;  %v6409_v15 = vld [vmem:[%s5940_s30 + $0x2a] sm:$0xff] }
  0x59   : > { %5083 = vmatprep.mubr.msk.f32.mxu1 %vm338_vm1, %v263_v17  ;;  %5334 = vmatprep.mubr.msk.f32.mxu0 %vm338_vm1, %v6158_v18  ;;  %v6423_v17 = vld [vmem:[%s5940_s30 + $0x3a] sm:$0xff] }
  0x5c   : > { %5084 = vmatmul.mubr.msk.f32.vlgmr.msra.gmra.mrb[0].mxu1 %vm338_vm1, %v264_v19  ;;  %5335 = vmatmul.mubr.msk.f32.gmra.mrb[18].mxu0 %vm338_vm1, %v6168_v20  ;;  %v6437_v19 = vld [vmem:[%s5940_s30 + $0x4a] sm:$0xff] }
  0x5d   : > { %5138 = vmatpush3.msk.msra.mxu1 %vm447_vm0, %v5960_v11  ;;  %5086 = vmatprep.mubr.msk.f32.mxu1 %vm338_vm1, %v265_v21  ;;  %v268_v11 = vld [vmem:[%s5940_s30 + $0x28] sm:$0xff]  ;;  %v6451_v21 = vld [vmem:[%s5940_s30 + $0x5a] sm:$0xff] }
  0x5e   : > { %5337 = vmatprep.mubr.msk.f32.mxu0 %vm338_vm1, %v6172_v22  ;;  %5193 = vmatprep.subr.msk.mxu1 %vm447_vm0, %v6177_v23 }
  0x60   : > { %5087 = vmatmul.mubr.msk.f32.gmra.mrb[2].mxu1 %vm338_vm1, %v266_v24  ;;  %5338 = vmatmul.mubr.msk.f32.gmra.mrb[20].mxu0 %vm338_vm1, %v6187_v25  ;;  %v6468_v24 = vld [vmem:[%s5940_s30 + $0x72] sm:$0xff] }
  0x61   : > { %5089 = vmatprep.mubr.msk.f32.mxu1 %vm338_vm1, %v267_v26  ;;  %5340 = vmatprep.mubr.msk.f32.mxu0 %vm338_vm1, %v6193_v27  ;;  %v6482_v26 = vld [vmem:[%s5940_s30 + $0x82] sm:$0xff] }
  0x64   : > { %5090 = vmatmul.mubr.msk.f32.gmra.mrb[4].mxu1 %vm338_vm1, %v268_v11  ;;  %5341 = vmatmul.mubr.msk.f32.gmra.mrb[22].mxu0 %vm338_vm1, %v6205_v28  ;;  %v6493_v11 = vld [vmem:[%s5940_s30 + $0x8a] sm:$0xff] }
  0x65   : > { %5092 = vmatprep.mubr.msk.f32.mxu1 %vm338_vm1, %v269_v29  ;;  %5343 = vmatprep.mubr.msk.f32.mxu0 %vm338_vm1, %v6209_v30  ;;  %v6497_v29 = vld [vmem:[%s5940_s30 + $0x92] sm:$0xff] }
  0x68   : > { %5093 = vmatmul.mubr.msk.f32.gmra.mrb[6].mxu1 %vm338_vm1, %v270_v31  ;;  %5344 = vmatmul.mubr.msk.f32.gmra.mrb[24].mxu0 %vm338_vm1, %v6219_v32  ;;  %v6507_v31 = vld [vmem:[%s5940_s30 + $0x9a] sm:$0xff] }
  0x69   : > { %5095 = vmatprep.mubr.msk.f32.mxu1 %vm338_vm1, %v271_v33  ;;  %5346 = vmatprep.mubr.msk.f32.mxu0 %vm338_vm1, %v6223_v34  ;;  %v6511_v33 = vld [vmem:[%s5940_s30 + $0xa2] sm:$0xff] }
  0x6c   : > { %5096 = vmatmul.mubr.msk.f32.gmra.mrb[8].mxu1 %vm338_vm1, %v272_v35  ;;  %5347 = vmatmul.mubr.msk.f32.gmra.mrb[26].mxu0 %vm338_vm1, %v6233_v36  ;;  %v6522_v35 = vld [vmem:[%s5940_s30 + $0xaa] sm:$0xff] }
  0x6d   : > { %5098 = vmatprep.mubr.msk.f32.mxu1 %vm338_vm1, %v273_v37  ;;  %5349 = vmatprep.mubr.msk.f32.mxu0 %vm338_vm1, %v6237_v38  ;;  %v6527_v37 = vld [vmem:[%s5940_s30 + $0xb2] sm:$0xff] }
  0x70   : > { %5099 = vmatmul.mubr.msk.f32.gmra.mrb[10].mxu1 %vm338_vm1, %v274_v39  ;;  %5350 = vmatmul.mubr.msk.f32.gmra.mrb[28].mxu0 %vm338_vm1, %v6247_v40  ;;  %v6537_v39 = vld [vmem:[%s5940_s30 + $0xba] sm:$0xff] }
  0x71   : > { %5101 = vmatprep.mubr.msk.f32.mxu1 %vm338_vm1, %v275_v41  ;;  %5352 = vmatprep.mubr.msk.f32.mxu0 %vm338_vm1, %v6251_v42  ;;  %v6541_v41 = vld [vmem:[%s5940_s30 + $0xc2] sm:$0xff] }
  0x74   : > { %5102 = vmatmul.mubr.msk.f32.gmra.mrb[12].mxu1 %vm338_vm1, %v276_v43  ;;  %5353 = vmatmul.mubr.msk.f32.gmra.mrb[30].mxu0 %vm338_vm1, %v6261_v44  ;;  %v6551_v43 = vld [vmem:[%s5940_s30 + $0xca] sm:$0xff] }
  0x75   : > { %5104 = vmatprep.mubr.msk.f32.mxu1 %vm338_vm1, %v277_v45  ;;  %5355 = vmatprep.mubr.msk.f32.mxu0 %vm338_vm1, %v6265_v46  ;;  %v6555_v45 = vld [vmem:[%s5940_s30 + $0xd2] sm:$0xff] }
  0x78   : > { %5105 = vmatmul.mubr.msk.f32.gmra.mrb[14].mxu1 %vm338_vm1, %v278_v49  ;;  %5356 = vmatmul.mubr.msk.f32.gmra.mrb[32].mxu0 %vm338_vm1, %v6275_v51  ;;  %v6565_v49 = vld [vmem:[%s5940_s30 + $0xda] sm:$0xff] }
  0x79   : > { %5107 = vmatprep.mubr.msk.f32.mxu1 %vm338_vm1, %v279_v53  ;;  %5358 = vmatprep.mubr.msk.f32.mxu0 %vm338_vm1, %v6279_v55  ;;  %v6569_v53 = vld [vmem:[%s5940_s30 + $0xe2] sm:$0xff] }
  0x7c   : > { %5108 = vmatmul.mubr.msk.f32.gmra.mrb[16].mxu1 %vm338_vm1, %v280_v57  ;;  %5359 = vmatmul.mubr.msk.f32.gmra.mrb[34].mxu0 %vm338_vm1, %v6289_v59  ;;  %v6579_v57 = vld [vmem:[%s5940_s30 + $0xea] sm:$0xff] }
  0x7d   : > { %5110 = vmatprep.mubr.msk.f32.mxu1 %vm338_vm1, %v281_v61  ;;  %5363 = vmatprep.mubr.msk.f32.mxu0 %vm338_vm1, %v6038_v47  ;;  %v284_v47 = vld [vmem:[%s5940_s30 + $0xa8] sm:$0xff]  ;;  %v6583_v61 = vld [vmem:[%s5940_s30 + $0xf2] sm:$0xff] }
  0x80   : > { %5111 = vmatmul.mubr.msk.f32.gmra.mrb[18].mxu1 %vm338_vm1, %v282_v63  ;;  %5364 = vmatmul.mubr.msk.f32.vlgmr.msra.gmra.mrb[0].mxu0 %vm338_vm1, %v6052_v50  ;;  %v287_v50 = vld [vmem:[%s5940_s30 + $0xc0] sm:$0xff] }
  0x81   : > { %5418 = vmatpush3.msk.msra.mxu0 %vm447_vm0, %v6043_v48  ;;  %5113 = vmatprep.mubr.msk.f32.mxu1 %vm338_vm1, %v283_v2  ;;  %v286_v48 = vld [vmem:[%s5940_s30 + $0xb8] sm:$0xff]  ;;  %v3214_v63 = vld [vmem:[%s5940_s30 + $0x85] sm:$0xff] }
  0x82   : > { %5366 = vmatprep.mubr.msk.f32.mxu0 %vm338_vm1, %v6058_v52  ;;  %5473 = vmatprep.subr.msk.mxu0 %vm447_vm0, %v6303_v4  ;;  %v288_v52 = vld [vmem:[%s5940_s30 + $0xc8] sm:$0xff]  ;;  %v6593_v2 = vld [vmem:[%s5940_s30 + $0xfa] sm:$0xff] }
  0x84   : > { %5114 = vmatmul.mubr.msk.f32.gmra.mrb[20].mxu1 %vm338_vm1, %v284_v47  ;;  %5367 = vmatmul.mubr.msk.f32.gmra.mrb[2].mxu0 %vm338_vm1, %v6070_v54  ;;  %v289_v54 = vld [vmem:[%s5940_s30 + $0xd0] sm:$0xff]  ;;  %v6597_v47 = vld [vmem:[%s5940_s30 + $0x102] sm:$0xff] }
  0x85   : > { %5116 = vmatprep.mubr.msk.f32.mxu1 %vm338_vm1, %v285_v6  ;;  %5369 = vmatprep.mubr.msk.f32.mxu0 %vm338_vm1, %v6074_v56  ;;  %v290_v56 = vld [vmem:[%s5940_s30 + $0xd8] sm:$0xff] }
  0x86   : > { %v3216_v6 = vld [vmem:[%s5940_s30 + $0x95] sm:$0xff] }
  0x88   : > { %5117 = vmatmul.mubr.msk.f32.gmra.mrb[22].mxu1 %vm338_vm1, %v286_v48  ;;  %5370 = vmatmul.mubr.msk.f32.gmra.mrb[4].mxu0 %vm338_vm1, %v6084_v58  ;;  %v291_v58 = vld [vmem:[%s5940_s30 + $0xe0] sm:$0xff]  ;;  %v6607_v48 = vld [vmem:[%s5940_s30 + $0x10a] sm:$0xff] }
  0x89   : > { %5119 = vmatprep.mubr.msk.f32.mxu1 %vm338_vm1, %v287_v50  ;;  %5372 = vmatprep.mubr.msk.f32.mxu0 %vm338_vm1, %v6088_v60  ;;  %v292_v60 = vld [vmem:[%s5940_s30 + $0xe8] sm:$0xff]  ;;  %v3217_v50 = vld [vmem:[%s5940_s30 + $0x9d] sm:$0xff] }
  0x8c   : > { %5120 = vmatmul.mubr.msk.f32.gmra.mrb[24].mxu1 %vm338_vm1, %v288_v52  ;;  %5373 = vmatmul.mubr.msk.f32.gmra.mrb[6].mxu0 %vm338_vm1, %v6098_v62  ;;  %v293_v62 = vld [vmem:[%s5940_s30 + $0xf0] sm:$0xff] }
  0x8d   : > { %5122 = vmatprep.mubr.msk.f32.mxu1 %vm338_vm1, %v289_v54  ;;  %5375 = vmatprep.mubr.msk.f32.mxu0 %vm338_vm1, %v6102_v0  ;;  %v294_v0 = vld [vmem:[%s5940_s30 + $0xf8] sm:$0xff]  ;;  %v3218_v54 = vld [vmem:[%s5940_s30 + $0xa5] sm:$0xff] }
  0x8e   : > { %v6611_v52 = vld [vmem:[%s5940_s30 + $0x112] sm:$0xff] }
  0x90   : > { %5123 = vmatmul.mubr.msk.f32.gmra.mrb[26].mxu1 %vm338_vm1, %v290_v56  ;;  %5376 = vmatmul.mubr.msk.f32.gmra.mrb[8].mxu0 %vm338_vm1, %v6112_v3  ;;  %v295_v3 = vld [vmem:[%s5940_s30 + $0x100] sm:$0xff] }
  0x91   : > { %5125 = vmatprep.mubr.msk.f32.mxu1 %vm338_vm1, %v291_v58  ;;  %5378 = vmatprep.mubr.msk.f32.mxu0 %vm338_vm1, %v6116_v5  ;;  %v296_v5 = vld [vmem:[%s5940_s30 + $0x108] sm:$0xff]  ;;  %v6621_v56 = vld [vmem:[%s5940_s30 + $0x11a] sm:$0xff] }
  0x92   : > { %v3219_v58 = vld [vmem:[%s5940_s30 + $0xad] sm:$0xff] }
  0x94   : > { %5126 = vmatmul.mubr.msk.f32.gmra.mrb[28].mxu1 %vm338_vm1, %v292_v60  ;;  %5379 = vmatmul.mubr.msk.f32.gmra.mrb[10].mxu0 %vm338_vm1, %v6126_v7  ;;  %v297_v7 = vld [vmem:[%s5940_s30 + $0x110] sm:$0xff] }
  0x95   : > { %5128 = vmatprep.mubr.msk.f32.mxu1 %vm338_vm1, %v293_v62  ;;  %5381 = vmatprep.mubr.msk.f32.mxu0 %vm338_vm1, %v6130_v9  ;;  %v1052_v9 = vld [vmem:[%s5940_s30 + $0x2] sm:$0xff]  ;;  %v3220_v60 = vld [vmem:[%s5940_s30 + $0xb5] sm:$0xff] }
  0x96   : > { %v3221_v62 = vld [vmem:[%s5940_s30 + $0xbd] sm:$0xff] }
  0x98   : > { %5129 = vmatmul.mubr.msk.f32.gmra.mrb[30].mxu1 %vm338_vm1, %v294_v0  ;;  %5382 = vmatmul.mubr.msk.f32.gmra.mrb[12].mxu0 %vm338_vm1, %v6140_v12  ;;  %v6381_v12 = vld [vmem:[%s5940_s30 + $0x12] sm:$0xff]  ;;  %v3222_v0 = vld [vmem:[%s5940_s30 + $0xc5] sm:$0xff] }
  0x99   : > { %5131 = vmatprep.mubr.msk.f32.mxu1 %vm338_vm1, %v295_v3  ;;  %5384 = vmatprep.mubr.msk.f32.mxu0 %vm338_vm1, %v6144_v14  ;;  %v6396_v14 = vld [vmem:[%s5940_s30 + $0x22] sm:$0xff]  ;;  %v3223_v3 = vld [vmem:[%s5940_s30 + $0xcd] sm:$0xff] }
  0x9c   : > { %5132 = vmatmul.mubr.msk.f32.gmra.mrb[32].mxu1 %vm338_vm1, %v296_v5  ;;  %5385 = vmatmul.mubr.msk.f32.gmra.mrb[14].mxu0 %vm338_vm1, %v6154_v16  ;;  %v6412_v16 = vld [vmem:[%s5940_s30 + $0x32] sm:$0xff] }
  0x9d   : > { %5134 = vmatprep.mubr.msk.f32.mxu1 %vm338_vm1, %v297_v7  ;;  %5387 = vmatprep.mubr.msk.f32.mxu0 %vm338_vm1, %v6158_v18  ;;  %v6426_v18 = vld [vmem:[%s5940_s30 + $0x42] sm:$0xff]  ;;  %v3224_v5 = vld [vmem:[%s5940_s30 + $0xd5] sm:$0xff] }
  0x9e   : > { %v3226_v7 = vld [vmem:[%s5940_s30 + $0xe5] sm:$0xff] }
  0xa0   : > { %5135 = vmatmul.mubr.msk.f32.gmra.mrb[34].mxu1 %vm338_vm1, %v298_v8  ;;  %5388 = vmatmul.mubr.msk.f32.gmra.mrb[16].mxu0 %vm338_vm1, %v6168_v20  ;;  %v6440_v20 = vld [vmem:[%s5940_s30 + $0x52] sm:$0xff] }
  0xa1   : > { %5139 = vmatprep.mubr.msk.f32.mxu1 %vm338_vm1, %v1052_v9  ;;  %5390 = vmatprep.mubr.msk.f32.mxu0 %vm338_vm1, %v6172_v22  ;;  %v6454_v22 = vld [vmem:[%s5940_s30 + $0x62] sm:$0xff]  ;;  %v3227_v8 = vld [vmem:[%s5940_s30 + $0xed] sm:$0xff]  ;;  %v3228_v9 = vld [vmem:[%s5940_s30 + $0xf5] sm:$0xff] }
  0xa4   : > { %5140 = vmatmul.mubr.msk.f32.vlgmr.msra.gmra.mrb[0].mxu1 %vm338_vm1, %v1053_v10  ;;  %5391 = vmatmul.mubr.msk.f32.gmra.mrb[18].mxu0 %vm338_vm1, %v6187_v25  ;;  %v6479_v25 = vld [vmem:[%s5940_s30 + $0x7a] sm:$0xff] }
  0xa5   : > { %5194 = vmatpush3.msk.msra.mxu1 %vm447_vm0, %v6177_v23  ;;  %5142 = vmatprep.mubr.msk.f32.mxu1 %vm338_vm1, %v6381_v12  ;;  %v6465_v23 = vld [vmem:[%s5940_s30 + $0x6a] sm:$0xff]  ;;  %v3229_v10 = vld [vmem:[%s5940_s30 + $0xfd] sm:$0xff] }
  0xa6   : > { %5393 = vmatprep.mubr.msk.f32.mxu0 %vm338_vm1, %v6193_v27  ;;  %5529 = vmatprep.subr.msk.mxu1 %vm447_vm0, %v5918_v1  ;;  %v2806_v27 = vld [vmem:[%s5940_s30 + $0x134] sm:$0xff] }
  0xa8   : > { %5143 = vmatmul.mubr.msk.f32.gmra.mrb[2].mxu1 %vm338_vm1, %v6391_v13  ;;  %5394 = vmatmul.mubr.msk.f32.gmra.mrb[20].mxu0 %vm338_vm1, %v6205_v28  ;;  %v2807_v28 = vld [vmem:[%s5940_s30 + $0x13c] sm:$0xff] }
  0xa9   : > { %5145 = vmatprep.mubr.msk.f32.mxu1 %vm338_vm1, %v6396_v14  ;;  %5396 = vmatprep.mubr.msk.f32.mxu0 %vm338_vm1, %v6209_v30  ;;  %v3202_v30 = vld [vmem:[%s5940_s30 + $0x25] sm:$0xff] }
  0xac   : > { %5146 = vmatmul.mubr.msk.f32.gmra.mrb[4].mxu1 %vm338_vm1, %v6409_v15  ;;  %5397 = vmatmul.mubr.msk.f32.gmra.mrb[22].mxu0 %vm338_vm1, %v6219_v32  ;;  %v3203_v32 = vld [vmem:[%s5940_s30 + $0x2d] sm:$0xff] }
  0xad   : > { %5148 = vmatprep.mubr.msk.f32.mxu1 %vm338_vm1, %v6412_v16  ;;  %5399 = vmatprep.mubr.msk.f32.mxu0 %vm338_vm1, %v6223_v34  ;;  %v3204_v34 = vld [vmem:[%s5940_s30 + $0x35] sm:$0xff] }
  0xb0   : > { %5149 = vmatmul.mubr.msk.f32.gmra.mrb[6].mxu1 %vm338_vm1, %v6423_v17  ;;  %5400 = vmatmul.mubr.msk.f32.gmra.mrb[24].mxu0 %vm338_vm1, %v6233_v36  ;;  %v3205_v36 = vld [vmem:[%s5940_s30 + $0x3d] sm:$0xff] }
  0xb1   : > { %5151 = vmatprep.mubr.msk.f32.mxu1 %vm338_vm1, %v6426_v18  ;;  %5402 = vmatprep.mubr.msk.f32.mxu0 %vm338_vm1, %v6237_v38  ;;  %v3206_v38 = vld [vmem:[%s5940_s30 + $0x45] sm:$0xff] }
  0xb4   : > { %5152 = vmatmul.mubr.msk.f32.gmra.mrb[8].mxu1 %vm338_vm1, %v6437_v19  ;;  %5403 = vmatmul.mubr.msk.f32.gmra.mrb[26].mxu0 %vm338_vm1, %v6247_v40  ;;  %v3207_v40 = vld [vmem:[%s5940_s30 + $0x4d] sm:$0xff] }
  0xb5   : > { %5154 = vmatprep.mubr.msk.f32.mxu1 %vm338_vm1, %v6440_v20  ;;  %5405 = vmatprep.mubr.msk.f32.mxu0 %vm338_vm1, %v6251_v42  ;;  %v3208_v42 = vld [vmem:[%s5940_s30 + $0x55] sm:$0xff] }
  0xb8   : > { %5155 = vmatmul.mubr.msk.f32.gmra.mrb[10].mxu1 %vm338_vm1, %v6451_v21  ;;  %5406 = vmatmul.mubr.msk.f32.gmra.mrb[28].mxu0 %vm338_vm1, %v6261_v44  ;;  %v3209_v44 = vld [vmem:[%s5940_s30 + $0x5d] sm:$0xff] }
  0xb9   : > { %5157 = vmatprep.mubr.msk.f32.mxu1 %vm338_vm1, %v6454_v22  ;;  %5408 = vmatprep.mubr.msk.f32.mxu0 %vm338_vm1, %v6265_v46  ;;  %v3210_v46 = vld [vmem:[%s5940_s30 + $0x65] sm:$0xff] }
  0xbc   : > { %5158 = vmatmul.mubr.msk.f32.gmra.mrb[12].mxu1 %vm338_vm1, %v6465_v23  ;;  %5409 = vmatmul.mubr.msk.f32.gmra.mrb[30].mxu0 %vm338_vm1, %v6275_v51  ;;  %v3211_v51 = vld [vmem:[%s5940_s30 + $0x6d] sm:$0xff] }
  0xbd   : > { %5160 = vmatprep.mubr.msk.f32.mxu1 %vm338_vm1, %v6468_v24  ;;  %5411 = vmatprep.mubr.msk.f32.mxu0 %vm338_vm1, %v6279_v55  ;;  %v3212_v55 = vld [vmem:[%s5940_s30 + $0x75] sm:$0xff] }
  0xc0   : > { %5161 = vmatmul.mubr.msk.f32.gmra.mrb[14].mxu1 %vm338_vm1, %v6479_v25  ;;  %5412 = vmatmul.mubr.msk.f32.gmra.mrb[32].mxu0 %vm338_vm1, %v6289_v59  ;;  %v3213_v59 = vld [vmem:[%s5940_s30 + $0x7d] sm:$0xff] }
  0xc1   : > { %5163 = vmatprep.mubr.msk.f32.mxu1 %vm338_vm1, %v6482_v26  ;;  %5414 = vmatprep.mubr.msk.f32.mxu0 %vm338_vm1, %v2806_v27  ;;  %v3639_v27 = vld [vmem:[%s5940_s30 + $0x5e] sm:$0xff] }
  0xc4   : > { %5164 = vmatmul.mubr.msk.f32.gmra.mrb[16].mxu1 %vm338_vm1, %v6493_v11  ;;  %5415 = vmatmul.mubr.msk.f32.gmra.mrb[34].mxu0 %vm338_vm1, %v2807_v28  ;;  %v3641_v28 = vld [vmem:[%s5940_s30 + $0x6e] sm:$0xff] }
  0xc5   : > { %5166 = vmatprep.mubr.msk.f32.mxu1 %vm338_vm1, %v6497_v29  ;;  %5419 = vmatprep.mubr.msk.f32.mxu0 %vm338_vm1, %v3202_v30  ;;  %v3643_v30 = vld [vmem:[%s5940_s30 + $0x7e] sm:$0xff] }
  0xc8   : > { %5167 = vmatmul.mubr.msk.f32.gmra.mrb[18].mxu1 %vm338_vm1, %v6507_v31  ;;  %5420 = vmatmul.mubr.msk.f32.vlgmr.msra.gmra.mrb[0].mxu0 %vm338_vm1, %v3203_v32  ;;  %v3645_v32 = vld [vmem:[%s5940_s30 + $0x8e] sm:$0xff] }
  0xc9   : > { %5474 = vmatpush3.msk.msra.mxu0 %vm447_vm0, %v6303_v4  ;;  %5169 = vmatprep.mubr.msk.f32.mxu1 %vm338_vm1, %v6511_v33  ;;  %v3215_v4 = vld [vmem:[%s5940_s30 + $0x8d] sm:$0xff] }
  0xca   : > { %5422 = vmatprep.mubr.msk.f32.mxu0 %vm338_vm1, %v3204_v34  ;;  %v3647_v34 = vld [vmem:[%s5940_s30 + $0x9e] sm:$0xff] }
  0xcc   : > { %5170 = vmatmul.mubr.msk.f32.gmra.mrb[20].mxu1 %vm338_vm1, %v6522_v35  ;;  %5423 = vmatmul.mubr.msk.f32.gmra.mrb[2].mxu0 %vm338_vm1, %v3205_v36  ;;  %v3648_v36 = vld [vmem:[%s5940_s30 + $0xa6] sm:$0xff] }
  0xcd   : > { %5172 = vmatprep.mubr.msk.f32.mxu1 %vm338_vm1, %v6527_v37  ;;  %5425 = vmatprep.mubr.msk.f32.mxu0 %vm338_vm1, %v3206_v38  ;;  %v3649_v38 = vld [vmem:[%s5940_s30 + $0xae] sm:$0xff] }
  0xd0   : > { %5173 = vmatmul.mubr.msk.f32.gmra.mrb[22].mxu1 %vm338_vm1, %v6537_v39  ;;  %5426 = vmatmul.mubr.msk.f32.gmra.mrb[4].mxu0 %vm338_vm1, %v3207_v40  ;;  %v3650_v40 = vld [vmem:[%s5940_s30 + $0xb6] sm:$0xff] }
  0xd1   : > { %5175 = vmatprep.mubr.msk.f32.mxu1 %vm338_vm1, %v6541_v41  ;;  %5428 = vmatprep.mubr.msk.f32.mxu0 %vm338_vm1, %v3208_v42  ;;  %v3651_v42 = vld [vmem:[%s5940_s30 + $0xbe] sm:$0xff] }
  0xd4   : > { %5176 = vmatmul.mubr.msk.f32.gmra.mrb[24].mxu1 %vm338_vm1, %v6551_v43  ;;  %5429 = vmatmul.mubr.msk.f32.gmra.mrb[6].mxu0 %vm338_vm1, %v3209_v44  ;;  %v3652_v44 = vld [vmem:[%s5940_s30 + $0xc6] sm:$0xff] }
  0xd5   : > { %5178 = vmatprep.mubr.msk.f32.mxu1 %vm338_vm1, %v6555_v45  ;;  %5431 = vmatprep.mubr.msk.f32.mxu0 %vm338_vm1, %v3210_v46  ;;  %v3653_v46 = vld [vmem:[%s5940_s30 + $0xce] sm:$0xff] }
  0xd8   : > { %5179 = vmatmul.mubr.msk.f32.gmra.mrb[26].mxu1 %vm338_vm1, %v6565_v49  ;;  %5432 = vmatmul.mubr.msk.f32.gmra.mrb[8].mxu0 %vm338_vm1, %v3211_v51  ;;  %v3654_v51 = vld [vmem:[%s5940_s30 + $0xd6] sm:$0xff] }
  0xd9   : > { %5181 = vmatprep.mubr.msk.f32.mxu1 %vm338_vm1, %v6569_v53  ;;  %5434 = vmatprep.mubr.msk.f32.mxu0 %vm338_vm1, %v3212_v55  ;;  %v3655_v55 = vld [vmem:[%s5940_s30 + $0xde] sm:$0xff] }
  0xdc   : > { %5182 = vmatmul.mubr.msk.f32.gmra.mrb[28].mxu1 %vm338_vm1, %v6579_v57  ;;  %5435 = vmatmul.mubr.msk.f32.gmra.mrb[10].mxu0 %vm338_vm1, %v3213_v59  ;;  %v3656_v59 = vld [vmem:[%s5940_s30 + $0xe6] sm:$0xff] }
  0xdd   : > { %5184 = vmatprep.mubr.msk.f32.mxu1 %vm338_vm1, %v6583_v61  ;;  %5437 = vmatprep.mubr.msk.f32.mxu0 %vm338_vm1, %v3214_v63  ;;  %v3657_v63 = vld [vmem:[%s5940_s30 + $0xee] sm:$0xff] }
  0xe0   : > { %5185 = vmatmul.mubr.msk.f32.gmra.mrb[30].mxu1 %vm338_vm1, %v6593_v2  ;;  %5438 = vmatmul.mubr.msk.f32.gmra.mrb[12].mxu0 %vm338_vm1, %v3215_v4  ;;  %v3658_v4 = vld [vmem:[%s5940_s30 + $0xf6] sm:$0xff] }
  0xe1   : > { %5187 = vmatprep.mubr.msk.f32.mxu1 %vm338_vm1, %v6597_v47  ;;  %5440 = vmatprep.mubr.msk.f32.mxu0 %vm338_vm1, %v3216_v6  ;;  %v3659_v6 = vld [vmem:[%s5940_s30 + $0xfe] sm:$0xff] }
  0xe4   : > { %5188 = vmatmul.mubr.msk.f32.gmra.mrb[32].mxu1 %vm338_vm1, %v6607_v48  ;;  %5441 = vmatmul.mubr.msk.f32.gmra.mrb[14].mxu0 %vm338_vm1, %v3217_v50  ;;  %v3660_v50 = vld [vmem:[%s5940_s30 + $0x106] sm:$0xff] }
  0xe5   : > { %5190 = vmatprep.mubr.msk.f32.mxu1 %vm338_vm1, %v6611_v52  ;;  %5443 = vmatprep.mubr.msk.f32.mxu0 %vm338_vm1, %v3218_v54  ;;  %v3661_v54 = vld [vmem:[%s5940_s30 + $0x10e] sm:$0xff] }
  0xe8   : > { %5191 = vmatmul.mubr.msk.f32.gmra.mrb[34].mxu1 %vm338_vm1, %v6621_v56  ;;  %5444 = vmatmul.mubr.msk.f32.gmra.mrb[16].mxu0 %vm338_vm1, %v3219_v58  ;;  %v3662_v58 = vld [vmem:[%s5940_s30 + $0x116] sm:$0xff] }
  0xe9   : > { %5195 = vmatprep.mubr.msk.f32.mxu1 %vm338_vm1, %v6381_v12  ;;  %5446 = vmatprep.mubr.msk.f32.mxu0 %vm338_vm1, %v3220_v60  ;;  %v3230_v12 = vld [vmem:[%s5940_s30 + $0x105] sm:$0xff] }
  0xea   : > { %v1943_v60 = vld [vmem:[%s5940_s30 + $0x10b] sm:$0xff] }
  0xec   : > { %5196 = vmatmul.mubr.msk.f32.vlgmr.msra.gmra.mrb[0].mxu1 %vm338_vm1, %v6391_v13  ;;  %5447 = vmatmul.mubr.msk.f32.gmra.mrb[18].mxu0 %vm338_vm1, %v3221_v62  ;;  %v3231_v13 = vld [vmem:[%s5940_s30 + $0x10d] sm:$0xff]  ;;  %v3663_v62 = vld [vmem:[%s5940_s30 + $0x11e] sm:$0xff] }
  0xed   : > { %5530 = vmatpush3.msk.msra.mxu1 %vm447_vm0, %v5918_v1  ;;  %5198 = vmatprep.mubr.msk.f32.mxu1 %vm338_vm1, %v6396_v14  ;;  %v3225_v1 = vld [vmem:[%s5940_s30 + $0xdd] sm:$0xff]  ;;  %v3232_v14 = vld [vmem:[%s5940_s30 + $0x115] sm:$0xff] }
  0xee   : > { %5449 = vmatprep.mubr.msk.f32.mxu0 %vm338_vm1, %v3222_v0  ;;  %v1944_v0 = vld [vmem:[%s5940_s30 + $0x113] sm:$0xff] }
  0xf0   : > { %5199 = vmatmul.mubr.msk.f32.gmra.mrb[2].mxu1 %vm338_vm1, %v6409_v15  ;;  %5450 = vmatmul.mubr.msk.f32.gmra.mrb[20].mxu0 %vm338_vm1, %v3223_v3  ;;  %v3233_v15 = vld [vmem:[%s5940_s30 + $0x11d] sm:$0xff]  ;;  %v3664_v3 = vld [vmem:[%s5940_s30 + $0x126] sm:$0xff] }
  0xf1   : > { %5201 = vmatprep.mubr.msk.f32.mxu1 %vm338_vm1, %v6412_v16  ;;  %5452 = vmatprep.mubr.msk.f32.mxu0 %vm338_vm1, %v3224_v5  ;;  %v3234_v16 = vld [vmem:[%s5940_s30 + $0x125] sm:$0xff]  ;;  %v1945_v5 = vld [vmem:[%s5940_s30 + $0x11b] sm:$0xff] }
  0xf4   : > { %5202 = vmatmul.mubr.msk.f32.gmra.mrb[4].mxu1 %vm338_vm1, %v6423_v17  ;;  %5453 = vmatmul.mubr.msk.f32.gmra.mrb[22].mxu0 %vm338_vm1, %v3225_v1  ;;  %v3235_v17 = vld [vmem:[%s5940_s30 + $0x12d] sm:$0xff] }
  0xf5   : > { %5204 = vmatprep.mubr.msk.f32.mxu1 %vm338_vm1, %v6426_v18  ;;  %5455 = vmatprep.mubr.msk.f32.mxu0 %vm338_vm1, %v3226_v7  ;;  %v3236_v18 = vld [vmem:[%s5940_s30 + $0x135] sm:$0xff]  ;;  %v1946_v7 = vld [vmem:[%s5940_s30 + $0x123] sm:$0xff] }
  0xf6   : > { %v3665_v1 = vld [vmem:[%s5940_s30 + $0x12e] sm:$0xff] }
  0xf8   : > { %5205 = vmatmul.mubr.msk.f32.gmra.mrb[6].mxu1 %vm338_vm1, %v6437_v19  ;;  %5456 = vmatmul.mubr.msk.f32.gmra.mrb[24].mxu0 %vm338_vm1, %v3227_v8  ;;  %v3237_v19 = vld [vmem:[%s5940_s30 + $0x13d] sm:$0xff] }
  0xf9   : > { %5207 = vmatprep.mubr.msk.f32.mxu1 %vm338_vm1, %v6440_v20  ;;  %5458 = vmatprep.mubr.msk.f32.mxu0 %vm338_vm1, %v3228_v9  ;;  %v3632_v20 = vld [vmem:[%s5940_s30 + $0x26] sm:$0xff]  ;;  %v3666_v8 = vld [vmem:[%s5940_s30 + $0x136] sm:$0xff] }
  0xfa   : > { %v1947_v9 = vld [vmem:[%s5940_s30 + $0x12b] sm:$0xff] }
  0xfc   : > { %5208 = vmatmul.mubr.msk.f32.gmra.mrb[8].mxu1 %vm338_vm1, %v6451_v21  ;;  %5459 = vmatmul.mubr.msk.f32.gmra.mrb[26].mxu0 %vm338_vm1, %v3229_v10  ;;  %v3633_v21 = vld [vmem:[%s5940_s30 + $0x2e] sm:$0xff]  ;;  %v3667_v10 = vld [vmem:[%s5940_s30 + $0x13e] sm:$0xff] }
  0xfd   : > { %5210 = vmatprep.mubr.msk.f32.mxu1 %vm338_vm1, %v6454_v22  ;;  %5461 = vmatprep.mubr.msk.f32.mxu0 %vm338_vm1, %v3230_v12  ;;  %v3634_v22 = vld [vmem:[%s5940_s30 + $0x36] sm:$0xff] }
 0x100   : > { %5211 = vmatmul.mubr.msk.f32.gmra.mrb[10].mxu1 %vm338_vm1, %v6465_v23  ;;  %5462 = vmatmul.mubr.msk.f32.gmra.mrb[28].mxu0 %vm338_vm1, %v3231_v13  ;;  %v3635_v23 = vld [vmem:[%s5940_s30 + $0x3e] sm:$0xff] }
 0x101   : > { %5213 = vmatprep.mubr.msk.f32.mxu1 %vm338_vm1, %v6468_v24  ;;  %5464 = vmatprep.mubr.msk.f32.mxu0 %vm338_vm1, %v3232_v14  ;;  %v3636_v24 = vld [vmem:[%s5940_s30 + $0x46] sm:$0xff] }
 0x104   : > { %5214 = vmatmul.mubr.msk.f32.gmra.mrb[12].mxu1 %vm338_vm1, %v6479_v25  ;;  %5465 = vmatmul.mubr.msk.f32.gmra.mrb[30].mxu0 %vm338_vm1, %v3233_v15  ;;  %v3637_v25 = vld [vmem:[%s5940_s30 + $0x4e] sm:$0xff] }
 0x105   : > { %5216 = vmatprep.mubr.msk.f32.mxu1 %vm338_vm1, %v6482_v26  ;;  %5467 = vmatprep.mubr.msk.f32.mxu0 %vm338_vm1, %v3234_v16  ;;  %v3638_v26 = vld [vmem:[%s5940_s30 + $0x56] sm:$0xff] }
 0x108   : > { %5217 = vmatmul.mubr.msk.f32.gmra.mrb[14].mxu1 %vm338_vm1, %v6493_v11  ;;  %5468 = vmatmul.mubr.msk.f32.gmra.mrb[32].mxu0 %vm338_vm1, %v3235_v17  ;;  %v3640_v11 = vld [vmem:[%s5940_s30 + $0x66] sm:$0xff] }
 0x109   : > { %5219 = vmatprep.mubr.msk.f32.mxu1 %vm338_vm1, %v6497_v29  ;;  %5470 = vmatprep.mubr.msk.f32.mxu0 %vm338_vm1, %v3236_v18  ;;  %v3642_v29 = vld [vmem:[%s5940_s30 + $0x76] sm:$0xff] }
 0x10c   : > { %5220 = vmatmul.mubr.msk.f32.gmra.mrb[16].mxu1 %vm338_vm1, %v6507_v31  ;;  %5471 = vmatmul.mubr.msk.f32.gmra.mrb[34].mxu0 %vm338_vm1, %v3237_v19  ;;  %v3644_v31 = vld [vmem:[%s5940_s30 + $0x86] sm:$0xff] }
 0x10d   : > { %5222 = vmatprep.mubr.msk.f32.mxu1 %vm338_vm1, %v6511_v33  ;;  %5475 = vmatprep.mubr.msk.f32.mxu0 %vm338_vm1, %v3632_v20  ;;  %v3646_v33 = vld [vmem:[%s5940_s30 + $0x96] sm:$0xff] }
 0x110   : > { %5223 = vmatmul.mubr.msk.f32.gmra.mrb[18].mxu1 %vm338_vm1, %v6522_v35  ;;  %5476 = vmatmul.mubr.msk.f32.vlgmr.msra.gmra.mrb[0].mxu0 %vm338_vm1, %v3633_v21  ;;  %v1516_v35 = vld [vmem:[%s5940_s30 + $0x122] sm:$0xff] }
 0x111   : > { %5225 = vmatprep.mubr.msk.f32.mxu1 %vm338_vm1, %v6527_v37  ;;  %5478 = vmatprep.mubr.msk.f32.mxu0 %vm338_vm1, %v3634_v22  ;;  %v1517_v37 = vld [vmem:[%s5940_s30 + $0x12a] sm:$0xff] }
 0x114   : > { %5226 = vmatmul.mubr.msk.f32.gmra.mrb[20].mxu1 %vm338_vm1, %v6537_v39  ;;  %5479 = vmatmul.mubr.msk.f32.gmra.mrb[2].mxu0 %vm338_vm1, %v3635_v23  ;;  %v1930_v39 = vld [vmem:[%s5940_s30 + $0xa3] sm:$0xff] }
 0x115   : > { %5228 = vmatprep.mubr.msk.f32.mxu1 %vm338_vm1, %v6541_v41  ;;  %5481 = vmatprep.mubr.msk.f32.mxu0 %vm338_vm1, %v3636_v24  ;;  %v1931_v41 = vld [vmem:[%s5940_s30 + $0xab] sm:$0xff] }
 0x118   : > { %5229 = vmatmul.mubr.msk.f32.gmra.mrb[22].mxu1 %vm338_vm1, %v6551_v43  ;;  %5482 = vmatmul.mubr.msk.f32.gmra.mrb[4].mxu0 %vm338_vm1, %v3637_v25  ;;  %v1932_v43 = vld [vmem:[%s5940_s30 + $0xb3] sm:$0xff] }
 0x119   : > { %5231 = vmatprep.mubr.msk.f32.mxu1 %vm338_vm1, %v6555_v45  ;;  %5484 = vmatprep.mubr.msk.f32.mxu0 %vm338_vm1, %v3638_v26  ;;  %v1933_v45 = vld [vmem:[%s5940_s30 + $0xbb] sm:$0xff] }
 0x11c   : > { %5232 = vmatmul.mubr.msk.f32.gmra.mrb[24].mxu1 %vm338_vm1, %v6565_v49  ;;  %5485 = vmatmul.mubr.msk.f32.gmra.mrb[6].mxu0 %vm338_vm1, %v3639_v27  ;;  %v1934_v49 = vld [vmem:[%s5940_s30 + $0xc3] sm:$0xff] }
 0x11d   : > { %5234 = vmatprep.mubr.msk.f32.mxu1 %vm338_vm1, %v6569_v53  ;;  %5487 = vmatprep.mubr.msk.f32.mxu0 %vm338_vm1, %v3640_v11  ;;  %v1935_v53 = vld [vmem:[%s5940_s30 + $0xcb] sm:$0xff] }
 0x120   : > { %5235 = vmatmul.mubr.msk.f32.gmra.mrb[26].mxu1 %vm338_vm1, %v6579_v57  ;;  %5488 = vmatmul.mubr.msk.f32.gmra.mrb[8].mxu0 %vm338_vm1, %v3641_v28  ;;  %v1936_v57 = vld [vmem:[%s5940_s30 + $0xd3] sm:$0xff] }
 0x121   : > { %5237 = vmatprep.mubr.msk.f32.mxu1 %vm338_vm1, %v6583_v61  ;;  %5490 = vmatprep.mubr.msk.f32.mxu0 %vm338_vm1, %v3642_v29  ;;  %v1937_v61 = vld [vmem:[%s5940_s30 + $0xdb] sm:$0xff] }
 0x124   : > { %5238 = vmatmul.mubr.msk.f32.gmra.mrb[28].mxu1 %vm338_vm1, %v6593_v2  ;;  %5491 = vmatmul.mubr.msk.f32.gmra.mrb[10].mxu0 %vm338_vm1, %v3643_v30  ;;  %v1938_v2 = vld [vmem:[%s5940_s30 + $0xe3] sm:$0xff]  ;;  %v6864_v30 = vld [vmem:[%s7040_s2] ss:$0 sm:$0xff] }
 0x125   : > { %5240 = vmatprep.mubr.msk.f32.mxu1 %vm338_vm1, %v6597_v47  ;;  %5493 = vmatprep.mubr.msk.f32.mxu0 %vm338_vm1, %v3644_v31  ;;  %v1939_v47 = vld [vmem:[%s5940_s30 + $0xeb] sm:$0xff] }
 0x128   : > { %5241 = vmatmul.mubr.msk.f32.gmra.mrb[30].mxu1 %vm338_vm1, %v6607_v48  ;;  %5494 = vmatmul.mubr.msk.f32.gmra.mrb[12].mxu0 %vm338_vm1, %v3645_v32  ;;  %v1940_v48 = vld [vmem:[%s5940_s30 + $0xf3] sm:$0xff] }
 0x129   : > { %5243 = vmatprep.mubr.msk.f32.mxu1 %vm338_vm1, %v6611_v52  ;;  %5496 = vmatprep.mubr.msk.f32.mxu0 %vm338_vm1, %v3646_v33  ;;  %v1941_v52 = vld [vmem:[%s5940_s30 + $0xfb] sm:$0xff] }
 0x12a   : > { %v6870_v33 = vld [vmem:[%s7041_s3] ss:$0 sm:$0xff] }
 0x12c   : > { %5244 = vmatmul.mubr.msk.f32.gmra.mrb[32].mxu1 %vm338_vm1, %v6621_v56  ;;  %5497 = vmatmul.mubr.msk.f32.gmra.mrb[14].mxu0 %vm338_vm1, %v3647_v34  ;;  %v1942_v56 = vld [vmem:[%s5940_s30 + $0x103] sm:$0xff] }
 0x12d   : > { %5246 = vmatprep.mubr.msk.f32.mxu1 %vm338_vm1, %v1516_v35  ;;  %5499 = vmatprep.mubr.msk.f32.mxu0 %vm338_vm1, %v3648_v36 }
 0x130   : > { %5247 = vmatmul.mubr.msk.f32.gmra.mrb[34].mxu1 %vm338_vm1, %v1517_v37  ;;  %5500 = vmatmul.mubr.msk.f32.gmra.mrb[16].mxu0 %vm338_vm1, %v3649_v38 }
 0x131   : > { %5278 = vmatprep.mubr.msk.f32.mxu1 %vm338_vm1, %v1930_v39  ;;  %5502 = vmatprep.mubr.msk.f32.mxu0 %vm338_vm1, %v3650_v40 }
 0x134   : > { %5279 = vmatmul.mubr.msk.f32.vlgmr.msra.gmra.mrb[18].mxu1 %vm338_vm1, %v1931_v41  ;;  %5503 = vmatmul.mubr.msk.f32.gmra.mrb[18].mxu0 %vm338_vm1, %v3651_v42 }
 0x135   : > { %5281 = vmatprep.mubr.msk.f32.mxu1 %vm338_vm1, %v1932_v43  ;;  %5505 = vmatprep.mubr.msk.f32.mxu0 %vm338_vm1, %v3652_v44 }
 0x138   : > { %5282 = vmatmul.mubr.msk.f32.gmra.mrb[20].mxu1 %vm338_vm1, %v1933_v45  ;;  %5506 = vmatmul.mubr.msk.f32.gmra.mrb[20].mxu0 %vm338_vm1, %v3653_v46 }
 0x139   : > { %5284 = vmatprep.mubr.msk.f32.mxu1 %vm338_vm1, %v1934_v49  ;;  %5508 = vmatprep.mubr.msk.f32.mxu0 %vm338_vm1, %v3654_v51 }
 0x13c   : > { %5285 = vmatmul.mubr.msk.f32.gmra.mrb[22].mxu1 %vm338_vm1, %v1935_v53  ;;  %5509 = vmatmul.mubr.msk.f32.gmra.mrb[22].mxu0 %vm338_vm1, %v3655_v55 }
 0x13d   : > { %5287 = vmatprep.mubr.msk.f32.mxu1 %vm338_vm1, %v1936_v57  ;;  %5511 = vmatprep.mubr.msk.f32.mxu0 %vm338_vm1, %v3656_v59 }
 0x140   : > { %5288 = vmatmul.mubr.msk.f32.gmra.mrb[24].mxu1 %vm338_vm1, %v1937_v61  ;;  %5512 = vmatmul.mubr.msk.f32.gmra.mrb[24].mxu0 %vm338_vm1, %v3657_v63 }
 0x141   : > { %5290 = vmatprep.mubr.msk.f32.mxu1 %vm338_vm1, %v1938_v2  ;;  %5514 = vmatprep.mubr.msk.f32.mxu0 %vm338_vm1, %v3658_v4 }
 0x144   : > { %5291 = vmatmul.mubr.msk.f32.gmra.mrb[26].mxu1 %vm338_vm1, %v1939_v47  ;;  %5515 = vmatmul.mubr.msk.f32.gmra.mrb[26].mxu0 %vm338_vm1, %v3659_v6 }
 0x145   : > { %5293 = vmatprep.mubr.msk.f32.mxu1 %vm338_vm1, %v1940_v48  ;;  %5517 = vmatprep.mubr.msk.f32.mxu0 %vm338_vm1, %v3660_v50 }
 0x148   : > { %5294 = vmatmul.mubr.msk.f32.gmra.mrb[28].mxu1 %vm338_vm1, %v1941_v52  ;;  %5518 = vmatmul.mubr.msk.f32.gmra.mrb[28].mxu0 %vm338_vm1, %v3661_v54 }
 0x149   : > { %5296 = vmatprep.mubr.msk.f32.mxu1 %vm338_vm1, %v1942_v56  ;;  %5520 = vmatprep.mubr.msk.f32.mxu0 %vm338_vm1, %v3662_v58 }
 0x14c   : > { %5297 = vmatmul.mubr.msk.f32.gmra.mrb[30].mxu1 %vm338_vm1, %v1943_v60  ;;  %5521 = vmatmul.mubr.msk.f32.gmra.mrb[30].mxu0 %vm338_vm1, %v3663_v62 }
 0x14d   : > { %5299 = vmatprep.mubr.msk.f32.mxu1 %vm338_vm1, %v1944_v0  ;;  %5523 = vmatprep.mubr.msk.f32.mxu0 %vm338_vm1, %v3664_v3 }
 0x150   : > { %5300 = vmatmul.mubr.msk.f32.gmra.mrb[32].mxu1 %vm338_vm1, %v1945_v5  ;;  %5524 = vmatmul.mubr.msk.f32.gmra.mrb[32].mxu0 %vm338_vm1, %v3665_v1 }
 0x151   : > { %5302 = vmatprep.mubr.msk.f32.mxu1 %vm338_vm1, %v1946_v7  ;;  %5526 = vmatprep.mubr.msk.f32.mxu0 %vm338_vm1, %v3666_v8 }
 0x154   : > { %5303 = vmatmul.mubr.msk.f32.gmra.mrb[34].mxu1 %vm338_vm1, %v1947_v9  ;;  %5527 = vmatmul.mubr.msk.f32.gmra.mrb[34].mxu0 %vm338_vm1, %v3667_v10 }
 0x1bf   : > { %v5197_v12 = vpop.f32.mrb[0].mxu1 }
 0x1c0   : > { %v1697_v13 = vpop.f32.mrb[1].mxu1 }
 0x1c3   : > { %v5200_v14 = vpop.f32.mrb[2].mxu1 }
 0x1c4   : > { %v1707_v15 = vpop.f32.mrb[3].mxu1 }
 0x1c7   : > { %v5203_v16 = vpop.f32.mrb[4].mxu1 }
 0x1c8   : > { %v1717_v17 = vpop.f32.mrb[5].mxu1 }
 0x1cb   : > { %v5206_v18 = vpop.f32.mrb[6].mxu1 }
 0x1cc   : > { %v1727_v19 = vpop.f32.mrb[7].mxu1 }
 0x1cf   : > { %v5209_v20 = vpop.f32.mrb[8].mxu1 }
 0x1d0   : > { %v1737_v21 = vpop.f32.mrb[9].mxu1 }
 0x1d3   : > { %v6845_v22 = vpop.f32.mrb[10].mxu1 }
 0x1d4   : > { %v6847_v23 = vpop.f32.mrb[11].mxu1 }
 0x1d7   : > { %v6849_v24 = vpop.f32.mrb[12].mxu1 }
 0x1d8   : > { %v6851_v25 = vpop.f32.mrb[13].mxu1 }
 0x1db   : > { %v6853_v26 = vpop.f32.mrb[14].mxu1 }
 0x1dc   : > { %v6855_v27 = vpop.f32.mrb[15].mxu1 }
 0x1df   : > { %v6857_v11 = vpop.f32.mrb[16].mxu1 }
 0x1e0   : > { %v6859_v28 = vpop.f32.mrb[17].mxu1 }
 0x1e3   : > { %v5477_v29 = vpop.f32.mrb[0].mxu0 }
 0x1e4   : > { %v5531_v31 = vadd.f32 %v5477_v29, %v5197_v12  ;;  %v3847_v32 = vpop.f32.mrb[1].mxu0 }
 0x1e5   : > { %v5532_v34 = vadd.f32 %v3847_v32, %v1697_v13 }
 0x1e6   : > { %v4070_v35 = vmul.f32 %v5531_v31, %v6864_v30 }
 0x1e7   : > { %v4069_v36 = vmul.f32 %v5532_v34, %v6864_v30  ;;  %v5480_v37 = vpop.f32.mrb[2].mxu0 }
 0x1e8   : > { %v4113_v38 = vadd.f32 %v6870_v33, %v4070_v35  ;;  %v5533_v39 = vadd.f32 %v5480_v37, %v5200_v14  ;;  %v3857_v40 = vpop.f32.mrb[3].mxu0 }
 0x1e9   : > { %v4112_v41 = vadd.f32 %v6870_v33, %v4069_v36  ;;  %v5534_v42 = vadd.f32 %v3857_v40, %v1707_v15 }
 0x1ea   : > { %v4149_v43 = vmax.f32 %v4113_v38, 0.0  ;;  %v4072_v44 = vmul.f32 %v5533_v39, %v6864_v30 }
 0x1eb   : > { %v4148_v45 = vmax.f32 %v4112_v41, 0.0  ;;  %v4071_v46 = vmul.f32 %v5534_v42, %v6864_v30  ;;  %v5483_v49 = vpop.f32.mrb[4].mxu0 }
 0x1ec   : > { %4185 = vst.msk [vmem:[%s6878_s26 + $0x8] sm:$0xff] %vm338_vm1, %v4149_v43  ;;  %v4115_v51 = vadd.f32 %v6870_v33, %v4072_v44  ;;  %v5535_v53 = vadd.f32 %v5483_v49, %v5203_v16  ;;  %v3867_v55 = vpop.f32.mrb[5].mxu0 }
 0x1ed   : > { %4184 = vst.msk [vmem:[%s6878_s26] sm:$0xff] %vm338_vm1, %v4148_v45  ;;  %v4114_v57 = vadd.f32 %v6870_v33, %v4071_v46  ;;  %v5536_v59 = vadd.f32 %v3867_v55, %v1717_v17 }
 0x1ee   : > { %v4151_v61 = vmax.f32 %v4115_v51, 0.0  ;;  %v4074_v63 = vmul.f32 %v5535_v53, %v6864_v30 }
 0x1ef   : > { %v4150_v2 = vmax.f32 %v4114_v57, 0.0  ;;  %v4073_v4 = vmul.f32 %v5536_v59, %v6864_v30  ;;  %v5486_v47 = vpop.f32.mrb[6].mxu0 }
 0x1f0   : > { %4187 = vst.msk [vmem:[%s6878_s26 + $0x18] sm:$0xff] %vm338_vm1, %v4151_v61  ;;  %v4117_v6 = vadd.f32 %v6870_v33, %v4074_v63  ;;  %v5537_v48 = vadd.f32 %v5486_v47, %v5206_v18  ;;  %v3877_v50 = vpop.f32.mrb[7].mxu0 }
 0x1f1   : > { %4186 = vst.msk [vmem:[%s6878_s26 + $0x10] sm:$0xff] %vm338_vm1, %v4150_v2  ;;  %v4116_v52 = vadd.f32 %v6870_v33, %v4073_v4  ;;  %v5538_v54 = vadd.f32 %v3877_v50, %v1727_v19 }
 0x1f2   : > { %v4153_v56 = vmax.f32 %v4117_v6, 0.0  ;;  %v4076_v58 = vmul.f32 %v5537_v48, %v6864_v30 }
 0x1f3   : > { %v4152_v60 = vmax.f32 %v4116_v52, 0.0  ;;  %v4075_v62 = vmul.f32 %v5538_v54, %v6864_v30  ;;  %v5489_v0 = vpop.f32.mrb[8].mxu0 }
 0x1f4   : > { %4189 = vst.msk [vmem:[%s6878_s26 + $0x28] sm:$0xff] %vm338_vm1, %v4153_v56  ;;  %v4119_v3 = vadd.f32 %v6870_v33, %v4076_v58  ;;  %v5539_v5 = vadd.f32 %v5489_v0, %v5209_v20  ;;  %v3887_v1 = vpop.f32.mrb[9].mxu0 }
 0x1f5   : > { %4188 = vst.msk [vmem:[%s6878_s26 + $0x20] sm:$0xff] %vm338_vm1, %v4152_v60  ;;  %v4118_v7 = vadd.f32 %v6870_v33, %v4075_v62  ;;  %v5540_v8 = vadd.f32 %v3887_v1, %v1737_v21 }
 0x1f6   : > { %v4155_v9 = vmax.f32 %v4119_v3, 0.0  ;;  %v4078_v10 = vmul.f32 %v5539_v5, %v6864_v30 }
 0x1f7   : > { %v4154_v12 = vmax.f32 %v4118_v7, 0.0  ;;  %v4077_v13 = vmul.f32 %v5540_v8, %v6864_v30  ;;  %v5492_v14 = vpop.f32.mrb[10].mxu0 }
 0x1f8   : > { %4191 = vst.msk [vmem:[%s6878_s26 + $0x38] sm:$0xff] %vm338_vm1, %v4155_v9  ;;  %v4121_v15 = vadd.f32 %v6870_v33, %v4078_v10  ;;  %v5541_v16 = vadd.f32 %v5492_v14, %v6845_v22  ;;  %v3897_v17 = vpop.f32.mrb[11].mxu0 }
 0x1f9   : > { %4190 = vst.msk [vmem:[%s6878_s26 + $0x30] sm:$0xff] %vm338_vm1, %v4154_v12  ;;  %v4120_v18 = vadd.f32 %v6870_v33, %v4077_v13  ;;  %v5542_v19 = vadd.f32 %v3897_v17, %v6847_v23 }
 0x1fa   : > { %v4157_v20 = vmax.f32 %v4121_v15, 0.0  ;;  %v4080_v21 = vmul.f32 %v5541_v16, %v6864_v30 }
 0x1fb   : > { %v4156_v29 = vmax.f32 %v4120_v18, 0.0  ;;  %v4079_v31 = vmul.f32 %v5542_v19, %v6864_v30  ;;  %v5495_v32 = vpop.f32.mrb[12].mxu0 }
 0x1fc   : > { %4193 = vst.msk [vmem:[%s6878_s26 + $0x48] sm:$0xff] %vm338_vm1, %v4157_v20  ;;  %v4123_v22 = vadd.f32 %v6870_v33, %v4080_v21  ;;  %v5543_v34 = vadd.f32 %v5495_v32, %v6849_v24  ;;  %v3907_v35 = vpop.f32.mrb[13].mxu0 }
 0x1fd   : > { %4192 = vst.msk [vmem:[%s6878_s26 + $0x40] sm:$0xff] %vm338_vm1, %v4156_v29  ;;  %v4122_v23 = vadd.f32 %v6870_v33, %v4079_v31  ;;  %v5544_v36 = vadd.f32 %v3907_v35, %v6851_v25 }
 0x1fe   : > { %v4159_v37 = vmax.f32 %v4123_v22, 0.0  ;;  %v4082_v38 = vmul.f32 %v5543_v34, %v6864_v30 }
 0x1ff   : > { %v4158_v39 = vmax.f32 %v4122_v23, 0.0  ;;  %v4081_v40 = vmul.f32 %v5544_v36, %v6864_v30  ;;  %v5498_v41 = vpop.f32.mrb[14].mxu0 }
 0x200   : > { %4195 = vst.msk [vmem:[%s6878_s26 + $0x58] sm:$0xff] %vm338_vm1, %v4159_v37  ;;  %v4125_v24 = vadd.f32 %v6870_v33, %v4082_v38  ;;  %v5545_v42 = vadd.f32 %v5498_v41, %v6853_v26  ;;  %v3917_v43 = vpop.f32.mrb[15].mxu0 }
 0x201   : > { %4194 = vst.msk [vmem:[%s6878_s26 + $0x50] sm:$0xff] %vm338_vm1, %v4158_v39  ;;  %v4124_v25 = vadd.f32 %v6870_v33, %v4081_v40  ;;  %v5546_v44 = vadd.f32 %v3917_v43, %v6855_v27 }
 0x202   : > { %v4161_v45 = vmax.f32 %v4125_v24, 0.0  ;;  %v4084_v46 = vmul.f32 %v5545_v42, %v6864_v30 }
 0x203   : > { %v4160_v49 = vmax.f32 %v4124_v25, 0.0  ;;  %v4083_v51 = vmul.f32 %v5546_v44, %v6864_v30  ;;  %v5501_v53 = vpop.f32.mrb[16].mxu0 }
 0x204   : > { %4197 = vst.msk [vmem:[%s6878_s26 + $0x68] sm:$0xff] %vm338_vm1, %v4161_v45  ;;  %v4127_v55 = vadd.f32 %v6870_v33, %v4084_v46  ;;  %v5547_v26 = vadd.f32 %v5501_v53, %v6857_v11  ;;  %v3927_v57 = vpop.f32.mrb[17].mxu0 }
 0x205   : > { %4196 = vst.msk [vmem:[%s6878_s26 + $0x60] sm:$0xff] %vm338_vm1, %v4160_v49  ;;  %v4126_v27 = vadd.f32 %v6870_v33, %v4083_v51  ;;  %v5548_v59 = vadd.f32 %v3927_v57, %v6859_v28 }
 0x206   : > { %v4163_v61 = vmax.f32 %v4127_v55, 0.0  ;;  %v4086_v63 = vmul.f32 %v5547_v26, %v6864_v30 }
 0x207   : > { %v4162_v2 = vmax.f32 %v4126_v27, 0.0  ;;  %v4085_v4 = vmul.f32 %v5548_v59, %v6864_v30  ;;  %v5280_v47 = vpop.f32.mrb[18].mxu1  ;;  %v5504_v6 = vpop.f32.mrb[18].mxu0 }
 0x208   : > { %4199 = vst.msk [vmem:[%s6878_s26 + $0x78] sm:$0xff] %vm338_vm1, %v4163_v61  ;;  %v4129_v11 = vadd.f32 %v6870_v33, %v4086_v63  ;;  %v5549_v48 = vadd.f32 %v5504_v6, %v5280_v47  ;;  %v2217_v50 = vpop.f32.mrb[19].mxu1  ;;  %v3937_v52 = vpop.f32.mrb[19].mxu0 }
 0x209   : > { %4198 = vst.msk [vmem:[%s6878_s26 + $0x70] sm:$0xff] %vm338_vm1, %v4162_v2  ;;  %v4128_v28 = vadd.f32 %v6870_v33, %v4085_v4  ;;  %v5550_v54 = vadd.f32 %v3937_v52, %v2217_v50 }
 0x20a   : > { %v4165_v56 = vmax.f32 %v4129_v11, 0.0  ;;  %v4088_v58 = vmul.f32 %v5549_v48, %v6864_v30 }
 0x20b   : > { %v4164_v60 = vmax.f32 %v4128_v28, 0.0  ;;  %v4087_v62 = vmul.f32 %v5550_v54, %v6864_v30  ;;  %v5283_v0 = vpop.f32.mrb[20].mxu1  ;;  %v5507_v3 = vpop.f32.mrb[20].mxu0 }
 0x20c   : > { %4201 = vst.msk [vmem:[%s6878_s26 + $0x88] sm:$0xff] %vm338_vm1, %v4165_v56  ;;  %v4131_v5 = vadd.f32 %v6870_v33, %v4088_v58  ;;  %v5551_v1 = vadd.f32 %v5507_v3, %v5283_v0  ;;  %v2227_v7 = vpop.f32.mrb[21].mxu1  ;;  %v3947_v8 = vpop.f32.mrb[21].mxu0 }
 0x20d   : > { %4200 = vst.msk [vmem:[%s6878_s26 + $0x80] sm:$0xff] %vm338_vm1, %v4164_v60  ;;  %v4130_v9 = vadd.f32 %v6870_v33, %v4087_v62  ;;  %v5552_v10 = vadd.f32 %v3947_v8, %v2227_v7 }
 0x20e   : > { %v4167_v12 = vmax.f32 %v4131_v5, 0.0  ;;  %v4090_v13 = vmul.f32 %v5551_v1, %v6864_v30 }
 0x20f   : > { %v4166_v14 = vmax.f32 %v4130_v9, 0.0  ;;  %v4089_v15 = vmul.f32 %v5552_v10, %v6864_v30  ;;  %v5286_v16 = vpop.f32.mrb[22].mxu1  ;;  %v5510_v17 = vpop.f32.mrb[22].mxu0 }
 0x210   : > { %4203 = vst.msk [vmem:[%s6878_s26 + $0x98] sm:$0xff] %vm338_vm1, %v4167_v12  ;;  %v4133_v18 = vadd.f32 %v6870_v33, %v4090_v13  ;;  %v5553_v19 = vadd.f32 %v5510_v17, %v5286_v16  ;;  %v2237_v20 = vpop.f32.mrb[23].mxu1  ;;  %v3957_v21 = vpop.f32.mrb[23].mxu0 }
 0x211   : > { %4202 = vst.msk [vmem:[%s6878_s26 + $0x90] sm:$0xff] %vm338_vm1, %v4166_v14  ;;  %v4132_v29 = vadd.f32 %v6870_v33, %v4089_v15  ;;  %v5554_v31 = vadd.f32 %v3957_v21, %v2237_v20 }
 0x212   : > { %v4169_v32 = vmax.f32 %v4133_v18, 0.0  ;;  %v4092_v22 = vmul.f32 %v5553_v19, %v6864_v30 }
 0x213   : > { %v4168_v34 = vmax.f32 %v4132_v29, 0.0  ;;  %v4091_v35 = vmul.f32 %v5554_v31, %v6864_v30  ;;  %v5289_v23 = vpop.f32.mrb[24].mxu1  ;;  %v5513_v36 = vpop.f32.mrb[24].mxu0 }
 0x214   : > { %4205 = vst.msk [vmem:[%s6878_s26 + $0xa8] sm:$0xff] %vm338_vm1, %v4169_v32  ;;  %v4135_v37 = vadd.f32 %v6870_v33, %v4092_v22  ;;  %v5555_v38 = vadd.f32 %v5513_v36, %v5289_v23  ;;  %v2247_v39 = vpop.f32.mrb[25].mxu1  ;;  %v3967_v40 = vpop.f32.mrb[25].mxu0 }
 0x215   : > { %4204 = vst.msk [vmem:[%s6878_s26 + $0xa0] sm:$0xff] %vm338_vm1, %v4168_v34  ;;  %v4134_v41 = vadd.f32 %v6870_v33, %v4091_v35  ;;  %v5556_v24 = vadd.f32 %v3967_v40, %v2247_v39 }
 0x216   : > { %v4171_v42 = vmax.f32 %v4135_v37, 0.0  ;;  %v4094_v43 = vmul.f32 %v5555_v38, %v6864_v30 }
 0x217   : > { %v4170_v25 = vmax.f32 %v4134_v41, 0.0  ;;  %v4093_v44 = vmul.f32 %v5556_v24, %v6864_v30  ;;  %v5292_v45 = vpop.f32.mrb[26].mxu1  ;;  %v5516_v46 = vpop.f32.mrb[26].mxu0 }
 0x218   : > { %4207 = vst.msk [vmem:[%s6878_s26 + $0xb8] sm:$0xff] %vm338_vm1, %v4171_v42  ;;  %v4137_v49 = vadd.f32 %v6870_v33, %v4094_v43  ;;  %v5557_v51 = vadd.f32 %v5516_v46, %v5292_v45  ;;  %v2257_v53 = vpop.f32.mrb[27].mxu1  ;;  %v3977_v55 = vpop.f32.mrb[27].mxu0 }
 0x219   : > { %4206 = vst.msk [vmem:[%s6878_s26 + $0xb0] sm:$0xff] %vm338_vm1, %v4170_v25  ;;  %v4136_v26 = vadd.f32 %v6870_v33, %v4093_v44  ;;  %v5558_v57 = vadd.f32 %v3977_v55, %v2257_v53 }
 0x21a   : > { %v4173_v27 = vmax.f32 %v4137_v49, 0.0  ;;  %v4096_v59 = vmul.f32 %v5557_v51, %v6864_v30 }
 0x21b   : > { %v4172_v61 = vmax.f32 %v4136_v26, 0.0  ;;  %v4095_v63 = vmul.f32 %v5558_v57, %v6864_v30  ;;  %v5295_v2 = vpop.f32.mrb[28].mxu1  ;;  %v5519_v4 = vpop.f32.mrb[28].mxu0 }
 0x21c   : > { %4209 = vst.msk [vmem:[%s6878_s26 + $0xc8] sm:$0xff] %vm338_vm1, %v4173_v27  ;;  %v4139_v47 = vadd.f32 %v6870_v33, %v4096_v59  ;;  %v5559_v6 = vadd.f32 %v5519_v4, %v5295_v2  ;;  %v2267_v11 = vpop.f32.mrb[29].mxu1  ;;  %v3987_v48 = vpop.f32.mrb[29].mxu0 }
 0x21d   : > { %4208 = vst.msk [vmem:[%s6878_s26 + $0xc0] sm:$0xff] %vm338_vm1, %v4172_v61  ;;  %v4138_v50 = vadd.f32 %v6870_v33, %v4095_v63  ;;  %v5560_v52 = vadd.f32 %v3987_v48, %v2267_v11 }
 0x21e   : > { %v4175_v28 = vmax.f32 %v4139_v47, 0.0  ;;  %v4098_v54 = vmul.f32 %v5559_v6, %v6864_v30 }
 0x21f   : > { %v4174_v56 = vmax.f32 %v4138_v50, 0.0  ;;  %v4097_v58 = vmul.f32 %v5560_v52, %v6864_v30  ;;  %v5298_v60 = vpop.f32.mrb[30].mxu1  ;;  %v5522_v62 = vpop.f32.mrb[30].mxu0 }
 0x220   : > { %4211 = vst.msk [vmem:[%s6878_s26 + $0xd8] sm:$0xff] %vm338_vm1, %v4175_v28  ;;  %v4141_v0 = vadd.f32 %v6870_v33, %v4098_v54  ;;  %v5561_v3 = vadd.f32 %v5522_v62, %v5298_v60  ;;  %v2277_v5 = vpop.f32.mrb[31].mxu1  ;;  %v3997_v1 = vpop.f32.mrb[31].mxu0 }
 0x221   : > { %4210 = vst.msk [vmem:[%s6878_s26 + $0xd0] sm:$0xff] %vm338_vm1, %v4174_v56  ;;  %v4140_v7 = vadd.f32 %v6870_v33, %v4097_v58  ;;  %v5562_v8 = vadd.f32 %v3997_v1, %v2277_v5 }
 0x222   : > { %v4177_v9 = vmax.f32 %v4141_v0, 0.0  ;;  %v4100_v10 = vmul.f32 %v5561_v3, %v6864_v30 }
 0x223   : > { %v4176_v12 = vmax.f32 %v4140_v7, 0.0  ;;  %v4099_v13 = vmul.f32 %v5562_v8, %v6864_v30  ;;  %v5301_v14 = vpop.f32.mrb[32].mxu1  ;;  %v5525_v15 = vpop.f32.mrb[32].mxu0 }
 0x224   : > { %4213 = vst.msk [vmem:[%s6878_s26 + $0xe8] sm:$0xff] %vm338_vm1, %v4177_v9  ;;  %v4143_v16 = vadd.f32 %v6870_v33, %v4100_v10  ;;  %v5563_v17 = vadd.f32 %v5525_v15, %v5301_v14  ;;  %v2287_v18 = vpop.f32.mrb[33].mxu1  ;;  %v4007_v19 = vpop.f32.mrb[33].mxu0 }
 0x225   : > { %4212 = vst.msk [vmem:[%s6878_s26 + $0xe0] sm:$0xff] %vm338_vm1, %v4176_v12  ;;  %v4142_v20 = vadd.f32 %v6870_v33, %v4099_v13  ;;  %v5564_v21 = vadd.f32 %v4007_v19, %v2287_v18 }
 0x226   : > { %v4179_v29 = vmax.f32 %v4143_v16, 0.0  ;;  %v4102_v31 = vmul.f32 %v5563_v17, %v6864_v30 }
 0x227   : > { %v4178_v32 = vmax.f32 %v4142_v20, 0.0  ;;  %v4101_v22 = vmul.f32 %v5564_v21, %v6864_v30  ;;  %v5304_v34 = vpop.f32.mrb[34].mxu1  ;;  %v5528_v35 = vpop.f32.mrb[34].mxu0 }
 0x228   : > { %4215 = vst.msk [vmem:[%s6878_s26 + $0xf8] sm:$0xff] %vm338_vm1, %v4179_v29  ;;  %v4145_v23 = vadd.f32 %v6870_v33, %v4102_v31  ;;  %v5565_v36 = vadd.f32 %v5528_v35, %v5304_v34  ;;  %v2297_v37 = vpop.f32.mrb[35].mxu1  ;;  %v4017_v38 = vpop.f32.mrb[35].mxu0 }
 0x229   : > { %4214 = vst.msk [vmem:[%s6878_s26 + $0xf0] sm:$0xff] %vm338_vm1, %v4178_v32  ;;  %v4144_v39 = vadd.f32 %v6870_v33, %v4101_v22  ;;  %v5566_v40 = vadd.f32 %v4017_v38, %v2297_v37 }
 0x22a   : > { %v4181_v41 = vmax.f32 %v4145_v23, 0.0  ;;  %v4104_v24 = vmul.f32 %v5565_v36, %v6864_v30 }
 0x22b   : > { %v4180_v42 = vmax.f32 %v4144_v39, 0.0  ;;  %v4103_v43 = vmul.f32 %v5566_v40, %v6864_v30 }
 0x22c   : > { %4217 = vst.msk [vmem:[%s6878_s26 + $0x108] sm:$0xff] %vm338_vm1, %v4181_v41  ;;  %v4147_v25 = vadd.f32 %v6870_v33, %v4104_v24 }
 0x22d   : > { %4216 = vst.msk [vmem:[%s6878_s26 + $0x100] sm:$0xff] %vm338_vm1, %v4180_v42  ;;  %v4146_v44 = vadd.f32 %v6870_v33, %v4103_v43 }
 0x22e   : > { %v4183_v45 = vmax.f32 %v4147_v25, 0.0 }
 0x22f   : > { %v4182_v46 = vmax.f32 %v4146_v44, 0.0 }
 0x230   : > { %4219 = vst.msk [vmem:[%s6878_s26 + $0x118] sm:$0xff] %vm338_vm1, %v4183_v45 }
 0x231   : > { %4218 = vst.msk [vmem:[%s6878_s26 + $0x110] sm:$0xff] %vm338_vm1, %v4182_v46 }
 0x232 PF: > { %s14_s17 = sadd.s32 1, %s5867_s17   ;;  %s7043_s15 = smov %s5863_s16 }
 0x233   : > { %p11_p5 = scmp.ge.s32.totalorder %s14_s17, 4   ;;  %s7044_s16 = smov %s7046_s18 }
 0x235   :  { %13 = sbr.rel (!%p11_p5) target bundleno = 2 (0x2), region = 83 }

// kernel: rlaus_bottleneck_forward.6
= control target key start
LH: loop header
LB: loop body
LE: loop exit
PB: predicated region body
PF: predicated region fallthrough
CT: control target
= control target key end

     0   :  { %vm292_vm0 = vcmask 1043456   ;;  %vm99_vm1 = vcmask 31744   ;;  %vm1015_vm2 = vcmask 130048   ;;  %s3912_s2 = inlined_call_operand.vmem [shape: f32[4,128], index: 2, kind: input, shape index: {}]   ;;  %s3913_s0 = inlined_call_operand.vmem [shape: f32[512,4], index: 0, kind: input, shape index: {}]   ;;  %s3914_s1 = inlined_call_operand.vmem [shape: f32[4,16], index: 1, kind: input, shape index: {}]   ;;  %s3915_s4 = inlined_call_operand.vmem [shape: f32[512,128], index: 4, kind: input, shape index: {}]   ;;  %s3916_s7 = inlined_call_operand.vmem [shape: f32[1,128], index: 7, kind: input, shape index: {}]   ;;  %s3917_s5 = inlined_call_operand.vmem [shape: f32[1,16], index: 5, kind: input, shape index: {}]   ;;  %s3918_s8 = inlined_call_operand.vmem [shape: f32[1,128], index: 8, kind: input, shape index: {}]   ;;  %s3919_s6 = inlined_call_operand.vmem [shape: f32[1,16], index: 6, kind: input, shape index: {}]   ;;  %s3920_s3 = inlined_call_operand.vmem [shape: f32[512,16], index: 3, kind: input, shape index: {}]   ;;  %s3921_s9 = inlined_call_operand.vmem [shape: f32[512,16], index: 9, kind: output, shape index: {0}]   ;;  %s3922_s10 = inlined_call_operand.vmem [shape: f32[512,128], index: 10, kind: output, shape index: {1}]  }
   0x1   :  { %v1080_v0 = vld [vmem:[%s3912_s2] sm:$0xf]  ;;  %v35_v2 = vld [vmem:[%s3913_s0 + $0x8] sm:$0xff]  ;;  %v36_v3 = vld [vmem:[%s3913_s0 + $0x10] sm:$0xff] }
   0x2   :  { %v34_v1 = vld [vmem:[%s3913_s0] sm:$0xff]  ;;  %2173 = vmatprep.subr.msk.mxu1 %vm292_vm0, %v1080_v0  ;;  %v37_v5 = vld [vmem:[%s3913_s0 + $0x18] sm:$0xff]  ;;  %v39_v7 = vld [vmem:[%s3913_s0 + $0x28] sm:$0xff] }
   0x3   :  { %2175 = vmatprep.mubr.msk.f32.mxu1 %vm99_vm1, %v34_v1  ;;  %v98_v4 = vld [vmem:[%s3914_s1] sm:$0xf]  ;;  %2174 = vmatpush3.msk.msra.mxu1 %vm292_vm0, %v1080_v0  ;;  %v40_v8 = vld [vmem:[%s3913_s0 + $0x30] sm:$0xff]  ;;  %v41_v9 = vld [vmem:[%s3913_s0 + $0x38] sm:$0xff] }
   0x4   :  { %2075 = vmatprep.subr.msk.mxu0 %vm292_vm0, %v98_v4  ;;  %2176 = vmatmul.mubr.msk.f32.vlgmr.msra.gmra.mrb[0].mxu1 %vm99_vm1, %v35_v2  ;;  %v38_v6 = vld [vmem:[%s3913_s0 + $0x20] sm:$0xff]  ;;  %v43_v11 = vld [vmem:[%s3913_s0 + $0x48] sm:$0xff]  ;;  %v44_v12 = vld [vmem:[%s3913_s0 + $0x50] sm:$0xff] }
   0x5   :  { %2076 = vmatpush3.msk.msra.mxu0 %vm292_vm0, %v98_v4  ;;  %2178 = vmatprep.mubr.msk.f32.mxu1 %vm99_vm1, %v36_v3  ;;  %v42_v10 = vld [vmem:[%s3913_s0 + $0x40] sm:$0xff]  ;;  %v45_v13 = vld [vmem:[%s3913_s0 + $0x58] sm:$0xff]  ;;  %v47_v15 = vld [vmem:[%s3913_s0 + $0x68] sm:$0xff] }
   0x6   :  { %2077 = vmatprep.mubr.msk.f32.mxu0 %vm99_vm1, %v34_v1  ;;  %v46_v14 = vld [vmem:[%s3913_s0 + $0x60] sm:$0xff]  ;;  %v48_v16 = vld [vmem:[%s3913_s0 + $0x70] sm:$0xff]  ;;  %v49_v17 = vld [vmem:[%s3913_s0 + $0x78] sm:$0xff] }
   0x7   :  { %2078 = vmatmul.mubr.msk.f32.vlgmr.msra.gmra.mrb[0].mxu0 %vm99_vm1, %v35_v2  ;;  %v50_v18 = vld [vmem:[%s3913_s0 + $0x80] sm:$0xff]  ;;  %v51_v19 = vld [vmem:[%s3913_s0 + $0x88] sm:$0xff]  ;;  %v52_v20 = vld [vmem:[%s3913_s0 + $0x90] sm:$0xff] }
   0x8   :  { %2080 = vmatprep.mubr.msk.f32.mxu0 %vm99_vm1, %v36_v3  ;;  %2179 = vmatmul.mubr.msk.f32.gmra.mrb[2].mxu1 %vm99_vm1, %v37_v5  ;;  %v53_v21 = vld [vmem:[%s3913_s0 + $0x98] sm:$0xff]  ;;  %v54_v22 = vld [vmem:[%s3913_s0 + $0xa0] sm:$0xff]  ;;  %v55_v23 = vld [vmem:[%s3913_s0 + $0xa8] sm:$0xff] }
   0x9   :  { %2181 = vmatprep.mubr.msk.f32.mxu1 %vm99_vm1, %v38_v6  ;;  %v56_v24 = vld [vmem:[%s3913_s0 + $0xb0] sm:$0xff]  ;;  %v57_v25 = vld [vmem:[%s3913_s0 + $0xb8] sm:$0xff]  ;;  %v58_v26 = vld [vmem:[%s3913_s0 + $0xc0] sm:$0xff] }
   0xa   :  { %v59_v27 = vld [vmem:[%s3913_s0 + $0xc8] sm:$0xff]  ;;  %v60_v28 = vld [vmem:[%s3913_s0 + $0xd0] sm:$0xff]  ;;  %v61_v29 = vld [vmem:[%s3913_s0 + $0xd8] sm:$0xff] }
   0xb   :  { %2081 = vmatmul.mubr.msk.f32.gmra.mrb[2].mxu0 %vm99_vm1, %v37_v5  ;;  %v62_v30 = vld [vmem:[%s3913_s0 + $0xe0] sm:$0xff]  ;;  %v63_v31 = vld [vmem:[%s3913_s0 + $0xe8] sm:$0xff]  ;;  %v64_v32 = vld [vmem:[%s3913_s0 + $0xf0] sm:$0xff] }
   0xc   :  { %2083 = vmatprep.mubr.msk.f32.mxu0 %vm99_vm1, %v38_v6  ;;  %2182 = vmatmul.mubr.msk.f32.gmra.mrb[4].mxu1 %vm99_vm1, %v39_v7  ;;  %v65_v33 = vld [vmem:[%s3913_s0 + $0xf8] sm:$0xff]  ;;  %v66_v34 = vld [vmem:[%s3913_s0 + $0x100] sm:$0xff]  ;;  %v67_v35 = vld [vmem:[%s3913_s0 + $0x108] sm:$0xff] }
   0xd   :  { %2184 = vmatprep.mubr.msk.f32.mxu1 %vm99_vm1, %v40_v8  ;;  %v68_v36 = vld [vmem:[%s3913_s0 + $0x110] sm:$0xff]  ;;  %v69_v37 = vld [vmem:[%s3913_s0 + $0x118] sm:$0xff]  ;;  %v70_v38 = vld [vmem:[%s3913_s0 + $0x120] sm:$0xff] }
   0xe   :  { %v71_v39 = vld [vmem:[%s3913_s0 + $0x128] sm:$0xff]  ;;  %v72_v40 = vld [vmem:[%s3913_s0 + $0x130] sm:$0xff]  ;;  %v73_v41 = vld [vmem:[%s3913_s0 + $0x138] sm:$0xff] }
   0xf   :  { %2084 = vmatmul.mubr.msk.f32.gmra.mrb[4].mxu0 %vm99_vm1, %v39_v7  ;;  %v74_v42 = vld [vmem:[%s3913_s0 + $0x140] sm:$0xff]  ;;  %v75_v43 = vld [vmem:[%s3913_s0 + $0x148] sm:$0xff]  ;;  %v76_v44 = vld [vmem:[%s3913_s0 + $0x150] sm:$0xff] }
  0x10   :  { %2086 = vmatprep.mubr.msk.f32.mxu0 %vm99_vm1, %v40_v8  ;;  %2185 = vmatmul.mubr.msk.f32.gmra.mrb[6].mxu1 %vm99_vm1, %v41_v9  ;;  %v77_v45 = vld [vmem:[%s3913_s0 + $0x158] sm:$0xff]  ;;  %v78_v46 = vld [vmem:[%s3913_s0 + $0x160] sm:$0xff]  ;;  %v79_v47 = vld [vmem:[%s3913_s0 + $0x168] sm:$0xff] }
  0x11   :  { %2187 = vmatprep.mubr.msk.f32.mxu1 %vm99_vm1, %v42_v10  ;;  %v80_v48 = vld [vmem:[%s3913_s0 + $0x170] sm:$0xff]  ;;  %v81_v49 = vld [vmem:[%s3913_s0 + $0x178] sm:$0xff]  ;;  %v82_v50 = vld [vmem:[%s3913_s0 + $0x180] sm:$0xff] }
  0x12   :  { %v83_v51 = vld [vmem:[%s3913_s0 + $0x188] sm:$0xff]  ;;  %v84_v52 = vld [vmem:[%s3913_s0 + $0x190] sm:$0xff]  ;;  %v85_v53 = vld [vmem:[%s3913_s0 + $0x198] sm:$0xff] }
  0x13   :  { %2087 = vmatmul.mubr.msk.f32.gmra.mrb[6].mxu0 %vm99_vm1, %v41_v9  ;;  %v86_v54 = vld [vmem:[%s3913_s0 + $0x1a0] sm:$0xff]  ;;  %v87_v55 = vld [vmem:[%s3913_s0 + $0x1a8] sm:$0xff]  ;;  %v88_v56 = vld [vmem:[%s3913_s0 + $0x1b0] sm:$0xff] }
  0x14   :  { %2089 = vmatprep.mubr.msk.f32.mxu0 %vm99_vm1, %v42_v10  ;;  %2188 = vmatmul.mubr.msk.f32.gmra.mrb[8].mxu1 %vm99_vm1, %v43_v11  ;;  %v89_v57 = vld [vmem:[%s3913_s0 + $0x1b8] sm:$0xff]  ;;  %v90_v58 = vld [vmem:[%s3913_s0 + $0x1c0] sm:$0xff]  ;;  %v91_v59 = vld [vmem:[%s3913_s0 + $0x1c8] sm:$0xff] }
  0x15   :  { %2190 = vmatprep.mubr.msk.f32.mxu1 %vm99_vm1, %v44_v12  ;;  %v92_v60 = vld [vmem:[%s3913_s0 + $0x1d0] sm:$0xff]  ;;  %v93_v61 = vld [vmem:[%s3913_s0 + $0x1d8] sm:$0xff]  ;;  %v94_v62 = vld [vmem:[%s3913_s0 + $0x1e0] sm:$0xff] }
  0x16   :  { %v95_v63 = vld [vmem:[%s3913_s0 + $0x1e8] sm:$0xff]  ;;  %v96_v0 = vld [vmem:[%s3913_s0 + $0x1f0] sm:$0xff]  ;;  %v97_v1 = vld [vmem:[%s3913_s0 + $0x1f8] sm:$0xff] }
  0x17   :  { %2090 = vmatmul.mubr.msk.f32.gmra.mrb[8].mxu0 %vm99_vm1, %v43_v11  ;;  %v1082_v2 = vld [vmem:[%s3915_s4 + $0x8] sm:$0xff]  ;;  %v1081_v3 = vld [vmem:[%s3915_s4] sm:$0xff]  ;;  %v1084_v11 = vld [vmem:[%s3915_s4 + $0x18] sm:$0xff] }
  0x18   :  { %2092 = vmatprep.mubr.msk.f32.mxu0 %vm99_vm1, %v44_v12  ;;  %2191 = vmatmul.mubr.msk.f32.gmra.mrb[10].mxu1 %vm99_vm1, %v45_v13  ;;  %v2793_v5 = vld [vmem:[%s3916_s7] ss:$0 sm:$0xff] }
  0x19   :  { %2193 = vmatprep.mubr.msk.f32.mxu1 %vm99_vm1, %v46_v14  ;;  %v2798_v6 = vld [vmem:[%s3917_s5] ss:$0 sm:$0xff] }
  0x1a   :  { %v2803_v9 = vld [vmem:[%s3918_s8] ss:$0 sm:$0xff] }
  0x1b   :  { %2093 = vmatmul.mubr.msk.f32.gmra.mrb[10].mxu0 %vm99_vm1, %v45_v13  ;;  %v2811_v13 = vld [vmem:[%s3919_s6] ss:$0 sm:$0xff] }
  0x1c   :  { %2095 = vmatprep.mubr.msk.f32.mxu0 %vm99_vm1, %v46_v14  ;;  %2194 = vmatmul.mubr.msk.f32.gmra.mrb[12].mxu1 %vm99_vm1, %v47_v15 }
  0x1d   :  { %2196 = vmatprep.mubr.msk.f32.mxu1 %vm99_vm1, %v48_v16 }
  0x1f   :  { %2096 = vmatmul.mubr.msk.f32.gmra.mrb[12].mxu0 %vm99_vm1, %v47_v15  ;;  %v1083_v15 = vld [vmem:[%s3915_s4 + $0x10] sm:$0xff] }
  0x20   :  { %2098 = vmatprep.mubr.msk.f32.mxu0 %vm99_vm1, %v48_v16  ;;  %2197 = vmatmul.mubr.msk.f32.gmra.mrb[14].mxu1 %vm99_vm1, %v49_v17 }
  0x21   :  { %2199 = vmatprep.mubr.msk.f32.mxu1 %vm99_vm1, %v50_v18 }
  0x23   :  { %2099 = vmatmul.mubr.msk.f32.gmra.mrb[14].mxu0 %vm99_vm1, %v49_v17 }
  0x24   :  { %2101 = vmatprep.mubr.msk.f32.mxu0 %vm99_vm1, %v50_v18  ;;  %2200 = vmatmul.mubr.msk.f32.gmra.mrb[16].mxu1 %vm99_vm1, %v51_v19 }
  0x25   :  { %2202 = vmatprep.mubr.msk.f32.mxu1 %vm99_vm1, %v52_v20 }
  0x27   :  { %2102 = vmatmul.mubr.msk.f32.gmra.mrb[16].mxu0 %vm99_vm1, %v51_v19 }
  0x28   :  { %2104 = vmatprep.mubr.msk.f32.mxu0 %vm99_vm1, %v52_v20  ;;  %2203 = vmatmul.mubr.msk.f32.gmra.mrb[18].mxu1 %vm99_vm1, %v53_v21  ;;  %v824_v20 = vld [vmem:[%s3920_s3 + $0x8] sm:$0xff] }
  0x29   :  { %2205 = vmatprep.mubr.msk.f32.mxu1 %vm99_vm1, %v54_v22 }
  0x2b   :  { %2105 = vmatmul.mubr.msk.f32.gmra.mrb[18].mxu0 %vm99_vm1, %v53_v21 }
  0x2c   :  { %2107 = vmatprep.mubr.msk.f32.mxu0 %vm99_vm1, %v54_v22  ;;  %2206 = vmatmul.mubr.msk.f32.gmra.mrb[20].mxu1 %vm99_vm1, %v55_v23 }
  0x2d   :  { %2208 = vmatprep.mubr.msk.f32.mxu1 %vm99_vm1, %v56_v24 }
  0x2f   :  { %2108 = vmatmul.mubr.msk.f32.gmra.mrb[20].mxu0 %vm99_vm1, %v55_v23 }
  0x30   :  { %2110 = vmatprep.mubr.msk.f32.mxu0 %vm99_vm1, %v56_v24  ;;  %2209 = vmatmul.mubr.msk.f32.gmra.mrb[22].mxu1 %vm99_vm1, %v57_v25 }
  0x31   :  { %2211 = vmatprep.mubr.msk.f32.mxu1 %vm99_vm1, %v58_v26 }
  0x33   :  { %2111 = vmatmul.mubr.msk.f32.gmra.mrb[22].mxu0 %vm99_vm1, %v57_v25 }
  0x34   :  { %2113 = vmatprep.mubr.msk.f32.mxu0 %vm99_vm1, %v58_v26  ;;  %2212 = vmatmul.mubr.msk.f32.gmra.mrb[24].mxu1 %vm99_vm1, %v59_v27  ;;  %v823_v26 = vld [vmem:[%s3920_s3] sm:$0xff] }
  0x35   :  { %2214 = vmatprep.mubr.msk.f32.mxu1 %vm99_vm1, %v60_v28 }
  0x37   :  { %2114 = vmatmul.mubr.msk.f32.gmra.mrb[24].mxu0 %vm99_vm1, %v59_v27 }
  0x38   :  { %2116 = vmatprep.mubr.msk.f32.mxu0 %vm99_vm1, %v60_v28  ;;  %2215 = vmatmul.mubr.msk.f32.gmra.mrb[26].mxu1 %vm99_vm1, %v61_v29 }
  0x39   :  { %2217 = vmatprep.mubr.msk.f32.mxu1 %vm99_vm1, %v62_v30 }
  0x3b   :  { %2117 = vmatmul.mubr.msk.f32.gmra.mrb[26].mxu0 %vm99_vm1, %v61_v29  ;;  %v1086_v29 = vld [vmem:[%s3915_s4 + $0x28] sm:$0xff] }
  0x3c   :  { %2119 = vmatprep.mubr.msk.f32.mxu0 %vm99_vm1, %v62_v30  ;;  %2218 = vmatmul.mubr.msk.f32.gmra.mrb[28].mxu1 %vm99_vm1, %v63_v31 }
  0x3d   :  { %2220 = vmatprep.mubr.msk.f32.mxu1 %vm99_vm1, %v64_v32 }
  0x3f   :  { %2120 = vmatmul.mubr.msk.f32.gmra.mrb[28].mxu0 %vm99_vm1, %v63_v31 }
  0x40   :  { %2122 = vmatprep.mubr.msk.f32.mxu0 %vm99_vm1, %v64_v32  ;;  %2221 = vmatmul.mubr.msk.f32.gmra.mrb[30].mxu1 %vm99_vm1, %v65_v33 }
  0x41   :  { %2223 = vmatprep.mubr.msk.f32.mxu1 %vm99_vm1, %v66_v34 }
  0x43   :  { %2123 = vmatmul.mubr.msk.f32.gmra.mrb[30].mxu0 %vm99_vm1, %v65_v33 }
  0x44   :  { %2125 = vmatprep.mubr.msk.f32.mxu0 %vm99_vm1, %v66_v34  ;;  %2224 = vmatmul.mubr.msk.f32.gmra.mrb[32].mxu1 %vm99_vm1, %v67_v35  ;;  %v1085_v34 = vld [vmem:[%s3915_s4 + $0x20] sm:$0xff] }
  0x45   :  { %2226 = vmatprep.mubr.msk.f32.mxu1 %vm99_vm1, %v68_v36 }
  0x47   :  { %2126 = vmatmul.mubr.msk.f32.gmra.mrb[32].mxu0 %vm99_vm1, %v67_v35 }
  0x48   :  { %2128 = vmatprep.mubr.msk.f32.mxu0 %vm99_vm1, %v68_v36  ;;  %2227 = vmatmul.mubr.msk.f32.gmra.mrb[34].mxu1 %vm99_vm1, %v69_v37 }
  0x49   :  { %2229 = vmatprep.mubr.msk.f32.mxu1 %vm99_vm1, %v70_v38 }
  0x4b   :  { %2129 = vmatmul.mubr.msk.f32.gmra.mrb[34].mxu0 %vm99_vm1, %v69_v37 }
  0x4c   :  { %2131 = vmatprep.mubr.msk.f32.mxu0 %vm99_vm1, %v70_v38  ;;  %2230 = vmatmul.mubr.msk.f32.gmra.mrb[36].mxu1 %vm99_vm1, %v71_v39 }
  0x4d   :  { %2232 = vmatprep.mubr.msk.f32.mxu1 %vm99_vm1, %v72_v40 }
  0x4f   :  { %2132 = vmatmul.mubr.msk.f32.gmra.mrb[36].mxu0 %vm99_vm1, %v71_v39 }
  0x50   :  { %2134 = vmatprep.mubr.msk.f32.mxu0 %vm99_vm1, %v72_v40  ;;  %2233 = vmatmul.mubr.msk.f32.gmra.mrb[38].mxu1 %vm99_vm1, %v73_v41  ;;  %v826_v40 = vld [vmem:[%s3920_s3 + $0x18] sm:$0xff] }
  0x51   :  { %2235 = vmatprep.mubr.msk.f32.mxu1 %vm99_vm1, %v74_v42 }
  0x53   :  { %2135 = vmatmul.mubr.msk.f32.gmra.mrb[38].mxu0 %vm99_vm1, %v73_v41 }
  0x54   :  { %2137 = vmatprep.mubr.msk.f32.mxu0 %vm99_vm1, %v74_v42  ;;  %2236 = vmatmul.mubr.msk.f32.gmra.mrb[40].mxu1 %vm99_vm1, %v75_v43 }
  0x55   :  { %2238 = vmatprep.mubr.msk.f32.mxu1 %vm99_vm1, %v76_v44 }
  0x57   :  { %2138 = vmatmul.mubr.msk.f32.gmra.mrb[40].mxu0 %vm99_vm1, %v75_v43 }
  0x58   :  { %2140 = vmatprep.mubr.msk.f32.mxu0 %vm99_vm1, %v76_v44  ;;  %2239 = vmatmul.mubr.msk.f32.gmra.mrb[42].mxu1 %vm99_vm1, %v77_v45 }
  0x59   :  { %2241 = vmatprep.mubr.msk.f32.mxu1 %vm99_vm1, %v78_v46 }
  0x5b   :  { %2141 = vmatmul.mubr.msk.f32.gmra.mrb[42].mxu0 %vm99_vm1, %v77_v45 }
  0x5c   :  { %2143 = vmatprep.mubr.msk.f32.mxu0 %vm99_vm1, %v78_v46  ;;  %2242 = vmatmul.mubr.msk.f32.gmra.mrb[44].mxu1 %vm99_vm1, %v79_v47 }
  0x5d   :  { %2244 = vmatprep.mubr.msk.f32.mxu1 %vm99_vm1, %v80_v48 }
  0x5f   :  { %2144 = vmatmul.mubr.msk.f32.gmra.mrb[44].mxu0 %vm99_vm1, %v79_v47  ;;  %v825_v47 = vld [vmem:[%s3920_s3 + $0x10] sm:$0xff] }
  0x60   :  { %2146 = vmatprep.mubr.msk.f32.mxu0 %vm99_vm1, %v80_v48  ;;  %2245 = vmatmul.mubr.msk.f32.gmra.mrb[46].mxu1 %vm99_vm1, %v81_v49 }
  0x61   :  { %2247 = vmatprep.mubr.msk.f32.mxu1 %vm99_vm1, %v82_v50 }
  0x63   :  { %2147 = vmatmul.mubr.msk.f32.gmra.mrb[46].mxu0 %vm99_vm1, %v81_v49 }
  0x64   :  { %2149 = vmatprep.mubr.msk.f32.mxu0 %vm99_vm1, %v82_v50  ;;  %2248 = vmatmul.mubr.msk.f32.gmra.mrb[48].mxu1 %vm99_vm1, %v83_v51 }
  0x65   :  { %2250 = vmatprep.mubr.msk.f32.mxu1 %vm99_vm1, %v84_v52 }
  0x67   :  { %2150 = vmatmul.mubr.msk.f32.gmra.mrb[48].mxu0 %vm99_vm1, %v83_v51  ;;  %v1088_v51 = vld [vmem:[%s3915_s4 + $0x38] sm:$0xff] }
  0x68   :  { %2152 = vmatprep.mubr.msk.f32.mxu0 %vm99_vm1, %v84_v52  ;;  %2251 = vmatmul.mubr.msk.f32.gmra.mrb[50].mxu1 %vm99_vm1, %v85_v53 }
  0x69   :  { %2253 = vmatprep.mubr.msk.f32.mxu1 %vm99_vm1, %v86_v54 }
  0x6b   :  { %2153 = vmatmul.mubr.msk.f32.gmra.mrb[50].mxu0 %vm99_vm1, %v85_v53 }
  0x6c   :  { %2155 = vmatprep.mubr.msk.f32.mxu0 %vm99_vm1, %v86_v54  ;;  %2254 = vmatmul.mubr.msk.f32.gmra.mrb[52].mxu1 %vm99_vm1, %v87_v55 }
  0x6d   :  { %2256 = vmatprep.mubr.msk.f32.mxu1 %vm99_vm1, %v88_v56 }
  0x6f   :  { %2156 = vmatmul.mubr.msk.f32.gmra.mrb[52].mxu0 %vm99_vm1, %v87_v55 }
  0x70   :  { %2158 = vmatprep.mubr.msk.f32.mxu0 %vm99_vm1, %v88_v56  ;;  %2257 = vmatmul.mubr.msk.f32.gmra.mrb[54].mxu1 %vm99_vm1, %v89_v57  ;;  %v1087_v56 = vld [vmem:[%s3915_s4 + $0x30] sm:$0xff] }
  0x71   :  { %2259 = vmatprep.mubr.msk.f32.mxu1 %vm99_vm1, %v90_v58 }
  0x73   :  { %2159 = vmatmul.mubr.msk.f32.gmra.mrb[54].mxu0 %vm99_vm1, %v89_v57 }
  0x74   :  { %2161 = vmatprep.mubr.msk.f32.mxu0 %vm99_vm1, %v90_v58  ;;  %2260 = vmatmul.mubr.msk.f32.gmra.mrb[56].mxu1 %vm99_vm1, %v91_v59 }
  0x75   :  { %2262 = vmatprep.mubr.msk.f32.mxu1 %vm99_vm1, %v92_v60 }
  0x77   :  { %2162 = vmatmul.mubr.msk.f32.gmra.mrb[56].mxu0 %vm99_vm1, %v91_v59 }
  0x78   :  { %2164 = vmatprep.mubr.msk.f32.mxu0 %vm99_vm1, %v92_v60  ;;  %2263 = vmatmul.mubr.msk.f32.gmra.mrb[58].mxu1 %vm99_vm1, %v93_v61 }
  0x79   :  { %2265 = vmatprep.mubr.msk.f32.mxu1 %vm99_vm1, %v94_v62 }
  0x7b   :  { %2165 = vmatmul.mubr.msk.f32.gmra.mrb[58].mxu0 %vm99_vm1, %v93_v61 }
  0x7c   :  { %2167 = vmatprep.mubr.msk.f32.mxu0 %vm99_vm1, %v94_v62  ;;  %2266 = vmatmul.mubr.msk.f32.gmra.mrb[60].mxu1 %vm99_vm1, %v95_v63  ;;  %v828_v62 = vld [vmem:[%s3920_s3 + $0x28] sm:$0xff] }
  0x7d   :  { %2268 = vmatprep.mubr.msk.f32.mxu1 %vm99_vm1, %v96_v0 }
  0x7f   :  { %2168 = vmatmul.mubr.msk.f32.gmra.mrb[60].mxu0 %vm99_vm1, %v95_v63 }
  0x80   :  { %2170 = vmatprep.mubr.msk.f32.mxu0 %vm99_vm1, %v96_v0  ;;  %2269 = vmatmul.mubr.msk.f32.gmra.mrb[62].mxu1 %vm99_vm1, %v97_v1 }
  0x83   :  { %2171 = vmatmul.mubr.msk.f32.gmra.mrb[62].mxu0 %vm99_vm1, %v97_v1 }
  0xd7   :  { %v2177_v4 = vpop.f32.mrb[0].mxu1 }
  0xd8   :  { %v1220_v7 = vadd.f32 %v2177_v4, %v1082_v2  ;;  %v1214_v8 = vpop.f32.mrb[1].mxu1 }
  0xd9   :  { %v1215_v10 = vadd.f32 %v1214_v8, %v1081_v3 }
  0xda   :  { %v2079_v12 = vpop.f32.mrb[0].mxu0  ;;  %v1541_v14 = vmul.f32 %v2793_v5, %v1220_v7  ;;  %v827_v7 = vld [vmem:[%s3920_s3 + $0x20] sm:$0xff] }
  0xdb   :  { %v689_v16 = vmul.f32 %v2079_v12, %v2798_v6  ;;  %v362_v17 = vpop.f32.mrb[1].mxu0  ;;  %v1540_v18 = vmul.f32 %v2793_v5, %v1215_v10  ;;  %v2180_v19 = vpop.f32.mrb[2].mxu1  ;;  %v1090_v12 = vld [vmem:[%s3915_s4 + $0x48] sm:$0xff] }
  0xdc   :  { %v688_v21 = vmul.f32 %v2798_v6, %v362_v17  ;;  %v1612_v22 = vadd.f32 %v2803_v9, %v1541_v14  ;;  %v1230_v23 = vadd.f32 %v2180_v19, %v1084_v11  ;;  %v1224_v24 = vpop.f32.mrb[3].mxu1 }
  0xdd   :  { %v760_v25 = vadd.f32 %v2811_v13, %v689_v16  ;;  %v1611_v27 = vadd.f32 %v2803_v9, %v1540_v18  ;;  %v1225_v28 = vadd.f32 %v1224_v24, %v1083_v15  ;;  %v1089_v18 = vld [vmem:[%s3915_s4 + $0x40] sm:$0xff]  ;;  %v830_v24 = vld [vmem:[%s3920_s3 + $0x38] sm:$0xff] }
  0xde   :  { %v759_v30 = vadd.f32 %v2811_v13, %v688_v21  ;;  %v2082_v31 = vpop.f32.mrb[2].mxu0  ;;  %2271 = vtanh.f32 %v1612_v22  ;;  %v1543_v32 = vmul.f32 %v2793_v5, %v1230_v23 }
  0xdf   :  { %v888_v33 = vadd.f32 %v824_v20, %v760_v25  ;;  %v691_v35 = vmul.f32 %v2082_v31, %v2798_v6  ;;  %v372_v36 = vpop.f32.mrb[3].mxu0  ;;  %2273 = vtanh.f32 %v1611_v27  ;;  %v1542_v37 = vmul.f32 %v2793_v5, %v1225_v28  ;;  %v2183_v38 = vpop.f32.mrb[4].mxu1 }
  0xe0   :  { %v887_v39 = vadd.f32 %v823_v26, %v759_v30  ;;  %v690_v41 = vmul.f32 %v2798_v6, %v372_v36  ;;  %v1614_v42 = vadd.f32 %v2803_v9, %v1543_v32  ;;  %v1240_v44 = vadd.f32 %v2183_v38, %v1086_v29  ;;  %v1234_v45 = vpop.f32.mrb[5].mxu1  ;;  %v829_v32 = vld [vmem:[%s3920_s3 + $0x30] sm:$0xff] }
  0xe1   :  { %v952_v43 = vmax.f32 %v888_v33, 0.0  ;;  %v762_v46 = vadd.f32 %v2811_v13, %v691_v35  ;;  %v1613_v48 = vadd.f32 %v2803_v9, %v1542_v37  ;;  %v1235_v50 = vadd.f32 %v1234_v45, %v1085_v34  ;;  %v1092_v37 = vld [vmem:[%s3915_s4 + $0x58] sm:$0xff] }
  0xe2   :  { %v951_v49 = vmax.f32 %v887_v39, 0.0  ;;  %v761_v52 = vadd.f32 %v2811_v13, %v690_v41  ;;  %v2085_v53 = vpop.f32.mrb[4].mxu0  ;;  %2275 = vtanh.f32 %v1614_v42  ;;  %v1545_v54 = vmul.f32 %v2793_v5, %v1240_v44  ;;  %v1091_v42 = vld [vmem:[%s3915_s4 + $0x50] sm:$0xff] }
  0xe3   :  { %1017 = vst.msk [vmem:[%s3921_s9 + $0x8] sm:$0xff] %vm1015_vm2, %v952_v43  ;;  %v890_v55 = vadd.f32 %v826_v40, %v762_v46  ;;  %v693_v57 = vmul.f32 %v2085_v53, %v2798_v6  ;;  %v382_v58 = vpop.f32.mrb[5].mxu0  ;;  %2277 = vtanh.f32 %v1613_v48  ;;  %v1544_v59 = vmul.f32 %v2793_v5, %v1235_v50  ;;  %v2186_v60 = vpop.f32.mrb[6].mxu1  ;;  %v832_v48 = vld [vmem:[%s3920_s3 + $0x48] sm:$0xff] }
  0xe4   :  { %1016 = vst.msk [vmem:[%s3921_s9] sm:$0xff] %vm1015_vm2, %v951_v49  ;;  %v889_v61 = vadd.f32 %v825_v47, %v761_v52  ;;  %v692_v63 = vmul.f32 %v2798_v6, %v382_v58  ;;  %v1616_v0 = vadd.f32 %v2803_v9, %v1545_v54  ;;  %v1250_v2 = vadd.f32 %v2186_v60, %v1088_v51  ;;  %v1244_v3 = vpop.f32.mrb[7].mxu1 }
  0xe5   :  { %v954_v1 = vmax.f32 %v890_v55, 0.0  ;;  %v764_v4 = vadd.f32 %v2811_v13, %v693_v57  ;;  %v1615_v8 = vadd.f32 %v2803_v9, %v1544_v59  ;;  %v1245_v11 = vadd.f32 %v1244_v3, %v1087_v56  ;;  %v831_v56 = vld [vmem:[%s3920_s3 + $0x40] sm:$0xff] }
  0xe6   :  { %v953_v10 = vmax.f32 %v889_v61, 0.0  ;;  %v763_v14 = vadd.f32 %v2811_v13, %v692_v63  ;;  %v2088_v15 = vpop.f32.mrb[6].mxu0  ;;  %2279 = vtanh.f32 %v1616_v0  ;;  %v1547_v16 = vmul.f32 %v2793_v5, %v1250_v2  ;;  %v1094_v61 = vld [vmem:[%s3915_s4 + $0x68] sm:$0xff]  ;;  %v1093_v2 = vld [vmem:[%s3915_s4 + $0x60] sm:$0xff] }
  0xe7   :  { %1019 = vst.msk [vmem:[%s3921_s9 + $0x18] sm:$0xff] %vm1015_vm2, %v954_v1  ;;  %v892_v17 = vadd.f32 %v828_v62, %v764_v4  ;;  %v695_v19 = vmul.f32 %v2088_v15, %v2798_v6  ;;  %v392_v20 = vpop.f32.mrb[7].mxu0  ;;  %2281 = vtanh.f32 %v1615_v8  ;;  %v1546_v21 = vmul.f32 %v2793_v5, %v1245_v11  ;;  %v2189_v22 = vpop.f32.mrb[8].mxu1  ;;  %v834_v11 = vld [vmem:[%s3920_s3 + $0x58] sm:$0xff] }
  0xe8   :  { %1018 = vst.msk [vmem:[%s3921_s9 + $0x10] sm:$0xff] %vm1015_vm2, %v953_v10  ;;  %v891_v23 = vadd.f32 %v827_v7, %v763_v14  ;;  %v694_v25 = vmul.f32 %v2798_v6, %v392_v20  ;;  %v2272_v26 = vpop.eup %2271  ;;  %v1618_v27 = vadd.f32 %v2803_v9, %v1547_v16  ;;  %v1260_v29 = vadd.f32 %v2189_v22, %v1090_v12  ;;  %v1254_v30 = vpop.f32.mrb[9].mxu1  ;;  %v833_v20 = vld [vmem:[%s3920_s3 + $0x50] sm:$0xff] }
  0xe9   :  { %v956_v28 = vmax.f32 %v892_v17, 0.0  ;;  %v766_v31 = vadd.f32 %v2811_v13, %v695_v19  ;;  %v2274_v33 = vpop.eup %2273  ;;  %1740 = vst [vmem:[%s3922_s10 + $0x8] sm:$0xff] %v2272_v26  ;;  %v1617_v34 = vadd.f32 %v2803_v9, %v1546_v21  ;;  %v1255_v36 = vadd.f32 %v1254_v30, %v1089_v18  ;;  %v1095_v30 = vld [vmem:[%s3915_s4 + $0x70] sm:$0xff] }
  0xea   :  { %v955_v35 = vmax.f32 %v891_v23, 0.0  ;;  %v765_v38 = vadd.f32 %v2811_v13, %v694_v25  ;;  %v2091_v39 = vpop.f32.mrb[8].mxu0  ;;  %1739 = vst [vmem:[%s3922_s10] sm:$0xff] %v2274_v33  ;;  %2283 = vtanh.f32 %v1618_v27  ;;  %v1549_v40 = vmul.f32 %v2793_v5, %v1260_v29  ;;  %v1096_v25 = vld [vmem:[%s3915_s4 + $0x78] sm:$0xff] }
  0xeb   :  { %1021 = vst.msk [vmem:[%s3921_s9 + $0x28] sm:$0xff] %vm1015_vm2, %v956_v28  ;;  %v894_v41 = vadd.f32 %v830_v24, %v766_v31  ;;  %v697_v43 = vmul.f32 %v2091_v39, %v2798_v6  ;;  %v402_v44 = vpop.f32.mrb[9].mxu0  ;;  %2285 = vtanh.f32 %v1617_v34  ;;  %v1548_v45 = vmul.f32 %v2793_v5, %v1255_v36  ;;  %v2192_v46 = vpop.f32.mrb[10].mxu1  ;;  %v836_v36 = vld [vmem:[%s3920_s3 + $0x68] sm:$0xff] }
  0xec   :  { %1020 = vst.msk [vmem:[%s3921_s9 + $0x20] sm:$0xff] %vm1015_vm2, %v955_v35  ;;  %v893_v47 = vadd.f32 %v829_v32, %v765_v38  ;;  %v696_v49 = vmul.f32 %v2798_v6, %v402_v44  ;;  %v2276_v50 = vpop.eup %2275  ;;  %v1620_v51 = vadd.f32 %v2803_v9, %v1549_v40  ;;  %v1270_v53 = vadd.f32 %v2192_v46, %v1092_v37  ;;  %v1264_v54 = vpop.f32.mrb[11].mxu1  ;;  %v835_v44 = vld [vmem:[%s3920_s3 + $0x60] sm:$0xff] }
  0xed   :  { %v958_v52 = vmax.f32 %v894_v41, 0.0  ;;  %v768_v55 = vadd.f32 %v2811_v13, %v697_v43  ;;  %v2278_v57 = vpop.eup %2277  ;;  %1742 = vst [vmem:[%s3922_s10 + $0x18] sm:$0xff] %v2276_v50  ;;  %v1619_v58 = vadd.f32 %v2803_v9, %v1548_v45  ;;  %v1265_v60 = vadd.f32 %v1264_v54, %v1091_v42  ;;  %v1097_v54 = vld [vmem:[%s3915_s4 + $0x80] sm:$0xff] }
  0xee   :  { %v957_v59 = vmax.f32 %v893_v47, 0.0  ;;  %v767_v62 = vadd.f32 %v2811_v13, %v696_v49  ;;  %v2094_v63 = vpop.f32.mrb[10].mxu0  ;;  %1741 = vst [vmem:[%s3922_s10 + $0x10] sm:$0xff] %v2278_v57  ;;  %2287 = vtanh.f32 %v1620_v51  ;;  %v1551_v0 = vmul.f32 %v2793_v5, %v1270_v53  ;;  %v1098_v49 = vld [vmem:[%s3915_s4 + $0x88] sm:$0xff] }
  0xef   :  { %1023 = vst.msk [vmem:[%s3921_s9 + $0x38] sm:$0xff] %vm1015_vm2, %v958_v52  ;;  %v896_v1 = vadd.f32 %v832_v48, %v768_v55  ;;  %v699_v3 = vmul.f32 %v2094_v63, %v2798_v6  ;;  %v412_v4 = vpop.f32.mrb[11].mxu0  ;;  %2289 = vtanh.f32 %v1619_v58  ;;  %v1550_v7 = vmul.f32 %v2793_v5, %v1265_v60  ;;  %v2195_v8 = vpop.f32.mrb[12].mxu1  ;;  %v838_v60 = vld [vmem:[%s3920_s3 + $0x78] sm:$0xff] }
  0xf0   :  { %1022 = vst.msk [vmem:[%s3921_s9 + $0x30] sm:$0xff] %vm1015_vm2, %v957_v59  ;;  %v895_v10 = vadd.f32 %v831_v56, %v767_v62  ;;  %v698_v12 = vmul.f32 %v2798_v6, %v412_v4  ;;  %v2280_v14 = vpop.eup %2279  ;;  %v1622_v15 = vadd.f32 %v2803_v9, %v1551_v0  ;;  %v1280_v17 = vadd.f32 %v2195_v8, %v1094_v61  ;;  %v1274_v18 = vpop.f32.mrb[13].mxu1  ;;  %v837_v4 = vld [vmem:[%s3920_s3 + $0x70] sm:$0xff] }
  0xf1   :  { %v960_v16 = vmax.f32 %v896_v1, 0.0  ;;  %v770_v19 = vadd.f32 %v2811_v13, %v699_v3  ;;  %v2282_v21 = vpop.eup %2281  ;;  %1744 = vst [vmem:[%s3922_s10 + $0x28] sm:$0xff] %v2280_v14  ;;  %v1621_v22 = vadd.f32 %v2803_v9, %v1550_v7  ;;  %v1275_v24 = vadd.f32 %v1274_v18, %v1093_v2  ;;  %v1099_v18 = vld [vmem:[%s3915_s4 + $0x90] sm:$0xff] }
  0xf2   :  { %v959_v23 = vmax.f32 %v895_v10, 0.0  ;;  %v769_v26 = vadd.f32 %v2811_v13, %v698_v12  ;;  %v2097_v27 = vpop.f32.mrb[12].mxu0  ;;  %1743 = vst [vmem:[%s3922_s10 + $0x20] sm:$0xff] %v2282_v21  ;;  %2291 = vtanh.f32 %v1622_v15  ;;  %v1553_v28 = vmul.f32 %v2793_v5, %v1280_v17  ;;  %v1100_v12 = vld [vmem:[%s3915_s4 + $0x98] sm:$0xff] }
  0xf3   :  { %1025 = vst.msk [vmem:[%s3921_s9 + $0x48] sm:$0xff] %vm1015_vm2, %v960_v16  ;;  %v898_v29 = vadd.f32 %v834_v11, %v770_v19  ;;  %v701_v31 = vmul.f32 %v2097_v27, %v2798_v6  ;;  %v422_v32 = vpop.f32.mrb[13].mxu0  ;;  %2293 = vtanh.f32 %v1621_v22  ;;  %v1552_v33 = vmul.f32 %v2793_v5, %v1275_v24  ;;  %v2198_v34 = vpop.f32.mrb[14].mxu1  ;;  %v840_v24 = vld [vmem:[%s3920_s3 + $0x88] sm:$0xff] }
  0xf4   :  { %1024 = vst.msk [vmem:[%s3921_s9 + $0x40] sm:$0xff] %vm1015_vm2, %v959_v23  ;;  %v897_v35 = vadd.f32 %v833_v20, %v769_v26  ;;  %v700_v37 = vmul.f32 %v2798_v6, %v422_v32  ;;  %v2284_v38 = vpop.eup %2283  ;;  %v1624_v39 = vadd.f32 %v2803_v9, %v1553_v28  ;;  %v1290_v41 = vadd.f32 %v2198_v34, %v1096_v25  ;;  %v1284_v42 = vpop.f32.mrb[15].mxu1  ;;  %v839_v32 = vld [vmem:[%s3920_s3 + $0x80] sm:$0xff] }
  0xf5   :  { %v962_v40 = vmax.f32 %v898_v29, 0.0  ;;  %v772_v43 = vadd.f32 %v2811_v13, %v701_v31  ;;  %v2286_v45 = vpop.eup %2285  ;;  %1746 = vst [vmem:[%s3922_s10 + $0x38] sm:$0xff] %v2284_v38  ;;  %v1623_v46 = vadd.f32 %v2803_v9, %v1552_v33  ;;  %v1285_v48 = vadd.f32 %v1284_v42, %v1095_v30  ;;  %v1101_v42 = vld [vmem:[%s3915_s4 + $0xa0] sm:$0xff] }
  0xf6   :  { %v961_v47 = vmax.f32 %v897_v35, 0.0  ;;  %v771_v50 = vadd.f32 %v2811_v13, %v700_v37  ;;  %v2100_v51 = vpop.f32.mrb[14].mxu0  ;;  %1745 = vst [vmem:[%s3922_s10 + $0x30] sm:$0xff] %v2286_v45  ;;  %2295 = vtanh.f32 %v1624_v39  ;;  %v1555_v52 = vmul.f32 %v2793_v5, %v1290_v41  ;;  %v1102_v37 = vld [vmem:[%s3915_s4 + $0xa8] sm:$0xff] }
  0xf7   :  { %1027 = vst.msk [vmem:[%s3921_s9 + $0x58] sm:$0xff] %vm1015_vm2, %v962_v40  ;;  %v900_v53 = vadd.f32 %v836_v36, %v772_v43  ;;  %v703_v55 = vmul.f32 %v2100_v51, %v2798_v6  ;;  %v432_v56 = vpop.f32.mrb[15].mxu0  ;;  %2297 = vtanh.f32 %v1623_v46  ;;  %v1554_v57 = vmul.f32 %v2793_v5, %v1285_v48  ;;  %v2201_v58 = vpop.f32.mrb[16].mxu1  ;;  %v842_v48 = vld [vmem:[%s3920_s3 + $0x98] sm:$0xff] }
  0xf8   :  { %1026 = vst.msk [vmem:[%s3921_s9 + $0x50] sm:$0xff] %vm1015_vm2, %v961_v47  ;;  %v899_v59 = vadd.f32 %v835_v44, %v771_v50  ;;  %v702_v61 = vmul.f32 %v2798_v6, %v432_v56  ;;  %v2288_v62 = vpop.eup %2287  ;;  %v1626_v63 = vadd.f32 %v2803_v9, %v1555_v52  ;;  %v1300_v1 = vadd.f32 %v2201_v58, %v1098_v49  ;;  %v1294_v2 = vpop.f32.mrb[17].mxu1  ;;  %v841_v56 = vld [vmem:[%s3920_s3 + $0x90] sm:$0xff] }
  0xf9   :  { %v964_v0 = vmax.f32 %v900_v53, 0.0  ;;  %v774_v3 = vadd.f32 %v2811_v13, %v703_v55  ;;  %v2290_v7 = vpop.eup %2289  ;;  %1748 = vst [vmem:[%s3922_s10 + $0x48] sm:$0xff] %v2288_v62  ;;  %v1625_v8 = vadd.f32 %v2803_v9, %v1554_v57  ;;  %v1295_v11 = vadd.f32 %v1294_v2, %v1097_v54  ;;  %v1103_v2 = vld [vmem:[%s3915_s4 + $0xb0] sm:$0xff] }
  0xfa   :  { %v963_v10 = vmax.f32 %v899_v59, 0.0  ;;  %v773_v14 = vadd.f32 %v2811_v13, %v702_v61  ;;  %v2103_v15 = vpop.f32.mrb[16].mxu0  ;;  %1747 = vst [vmem:[%s3922_s10 + $0x40] sm:$0xff] %v2290_v7  ;;  %2299 = vtanh.f32 %v1626_v63  ;;  %v1557_v16 = vmul.f32 %v2793_v5, %v1300_v1  ;;  %v1104_v61 = vld [vmem:[%s3915_s4 + $0xb8] sm:$0xff] }
  0xfb   :  { %1029 = vst.msk [vmem:[%s3921_s9 + $0x68] sm:$0xff] %vm1015_vm2, %v964_v0  ;;  %v902_v17 = vadd.f32 %v838_v60, %v774_v3  ;;  %v705_v19 = vmul.f32 %v2103_v15, %v2798_v6  ;;  %v442_v20 = vpop.f32.mrb[17].mxu0  ;;  %2301 = vtanh.f32 %v1625_v8  ;;  %v1556_v21 = vmul.f32 %v2793_v5, %v1295_v11  ;;  %v2204_v22 = vpop.f32.mrb[18].mxu1  ;;  %v844_v11 = vld [vmem:[%s3920_s3 + $0xa8] sm:$0xff] }
  0xfc   :  { %1028 = vst.msk [vmem:[%s3921_s9 + $0x60] sm:$0xff] %vm1015_vm2, %v963_v10  ;;  %v901_v23 = vadd.f32 %v837_v4, %v773_v14  ;;  %v704_v25 = vmul.f32 %v2798_v6, %v442_v20  ;;  %v2292_v26 = vpop.eup %2291  ;;  %v1628_v27 = vadd.f32 %v2803_v9, %v1557_v16  ;;  %v1310_v29 = vadd.f32 %v2204_v22, %v1100_v12  ;;  %v1304_v30 = vpop.f32.mrb[19].mxu1  ;;  %v843_v20 = vld [vmem:[%s3920_s3 + $0xa0] sm:$0xff] }
  0xfd   :  { %v966_v28 = vmax.f32 %v902_v17, 0.0  ;;  %v776_v31 = vadd.f32 %v2811_v13, %v705_v19  ;;  %v2294_v33 = vpop.eup %2293  ;;  %1750 = vst [vmem:[%s3922_s10 + $0x58] sm:$0xff] %v2292_v26  ;;  %v1627_v34 = vadd.f32 %v2803_v9, %v1556_v21  ;;  %v1305_v36 = vadd.f32 %v1304_v30, %v1099_v18  ;;  %v1105_v30 = vld [vmem:[%s3915_s4 + $0xc0] sm:$0xff] }
  0xfe   :  { %v965_v35 = vmax.f32 %v901_v23, 0.0  ;;  %v775_v38 = vadd.f32 %v2811_v13, %v704_v25  ;;  %v2106_v39 = vpop.f32.mrb[18].mxu0  ;;  %1749 = vst [vmem:[%s3922_s10 + $0x50] sm:$0xff] %v2294_v33  ;;  %2303 = vtanh.f32 %v1628_v27  ;;  %v1559_v40 = vmul.f32 %v2793_v5, %v1310_v29  ;;  %v1106_v25 = vld [vmem:[%s3915_s4 + $0xc8] sm:$0xff] }
  0xff   :  { %1031 = vst.msk [vmem:[%s3921_s9 + $0x78] sm:$0xff] %vm1015_vm2, %v966_v28  ;;  %v904_v41 = vadd.f32 %v840_v24, %v776_v31  ;;  %v707_v43 = vmul.f32 %v2106_v39, %v2798_v6  ;;  %v452_v44 = vpop.f32.mrb[19].mxu0  ;;  %2305 = vtanh.f32 %v1627_v34  ;;  %v1558_v45 = vmul.f32 %v2793_v5, %v1305_v36  ;;  %v2207_v46 = vpop.f32.mrb[20].mxu1  ;;  %v846_v36 = vld [vmem:[%s3920_s3 + $0xb8] sm:$0xff] }
 0x100   :  { %1030 = vst.msk [vmem:[%s3921_s9 + $0x70] sm:$0xff] %vm1015_vm2, %v965_v35  ;;  %v903_v47 = vadd.f32 %v839_v32, %v775_v38  ;;  %v706_v49 = vmul.f32 %v2798_v6, %v452_v44  ;;  %v2296_v50 = vpop.eup %2295  ;;  %v1630_v51 = vadd.f32 %v2803_v9, %v1559_v40  ;;  %v1320_v53 = vadd.f32 %v2207_v46, %v1102_v37  ;;  %v1314_v54 = vpop.f32.mrb[21].mxu1  ;;  %v845_v44 = vld [vmem:[%s3920_s3 + $0xb0] sm:$0xff] }
 0x101   :  { %v968_v52 = vmax.f32 %v904_v41, 0.0  ;;  %v778_v55 = vadd.f32 %v2811_v13, %v707_v43  ;;  %v2298_v57 = vpop.eup %2297  ;;  %1752 = vst [vmem:[%s3922_s10 + $0x68] sm:$0xff] %v2296_v50  ;;  %v1629_v58 = vadd.f32 %v2803_v9, %v1558_v45  ;;  %v1315_v60 = vadd.f32 %v1314_v54, %v1101_v42  ;;  %v1107_v54 = vld [vmem:[%s3915_s4 + $0xd0] sm:$0xff] }
 0x102   :  { %v967_v59 = vmax.f32 %v903_v47, 0.0  ;;  %v777_v62 = vadd.f32 %v2811_v13, %v706_v49  ;;  %v2109_v63 = vpop.f32.mrb[20].mxu0  ;;  %1751 = vst [vmem:[%s3922_s10 + $0x60] sm:$0xff] %v2298_v57  ;;  %2307 = vtanh.f32 %v1630_v51  ;;  %v1561_v0 = vmul.f32 %v2793_v5, %v1320_v53  ;;  %v1108_v49 = vld [vmem:[%s3915_s4 + $0xd8] sm:$0xff] }
 0x103   :  { %1033 = vst.msk [vmem:[%s3921_s9 + $0x88] sm:$0xff] %vm1015_vm2, %v968_v52  ;;  %v906_v1 = vadd.f32 %v842_v48, %v778_v55  ;;  %v709_v3 = vmul.f32 %v2109_v63, %v2798_v6  ;;  %v462_v4 = vpop.f32.mrb[21].mxu0  ;;  %2309 = vtanh.f32 %v1629_v58  ;;  %v1560_v7 = vmul.f32 %v2793_v5, %v1315_v60  ;;  %v2210_v8 = vpop.f32.mrb[22].mxu1  ;;  %v848_v60 = vld [vmem:[%s3920_s3 + $0xc8] sm:$0xff] }
 0x104   :  { %1032 = vst.msk [vmem:[%s3921_s9 + $0x80] sm:$0xff] %vm1015_vm2, %v967_v59  ;;  %v905_v10 = vadd.f32 %v841_v56, %v777_v62  ;;  %v708_v12 = vmul.f32 %v2798_v6, %v462_v4  ;;  %v2300_v14 = vpop.eup %2299  ;;  %v1632_v15 = vadd.f32 %v2803_v9, %v1561_v0  ;;  %v1330_v17 = vadd.f32 %v2210_v8, %v1104_v61  ;;  %v1324_v18 = vpop.f32.mrb[23].mxu1  ;;  %v847_v4 = vld [vmem:[%s3920_s3 + $0xc0] sm:$0xff] }
 0x105   :  { %v970_v16 = vmax.f32 %v906_v1, 0.0  ;;  %v780_v19 = vadd.f32 %v2811_v13, %v709_v3  ;;  %v2302_v21 = vpop.eup %2301  ;;  %1754 = vst [vmem:[%s3922_s10 + $0x78] sm:$0xff] %v2300_v14  ;;  %v1631_v22 = vadd.f32 %v2803_v9, %v1560_v7  ;;  %v1325_v24 = vadd.f32 %v1324_v18, %v1103_v2  ;;  %v1109_v18 = vld [vmem:[%s3915_s4 + $0xe0] sm:$0xff] }
 0x106   :  { %v969_v23 = vmax.f32 %v905_v10, 0.0  ;;  %v779_v26 = vadd.f32 %v2811_v13, %v708_v12  ;;  %v2112_v27 = vpop.f32.mrb[22].mxu0  ;;  %1753 = vst [vmem:[%s3922_s10 + $0x70] sm:$0xff] %v2302_v21  ;;  %2311 = vtanh.f32 %v1632_v15  ;;  %v1563_v28 = vmul.f32 %v2793_v5, %v1330_v17  ;;  %v1110_v12 = vld [vmem:[%s3915_s4 + $0xe8] sm:$0xff] }
 0x107   :  { %1035 = vst.msk [vmem:[%s3921_s9 + $0x98] sm:$0xff] %vm1015_vm2, %v970_v16  ;;  %v908_v29 = vadd.f32 %v844_v11, %v780_v19  ;;  %v711_v31 = vmul.f32 %v2112_v27, %v2798_v6  ;;  %v472_v32 = vpop.f32.mrb[23].mxu0  ;;  %2313 = vtanh.f32 %v1631_v22  ;;  %v1562_v33 = vmul.f32 %v2793_v5, %v1325_v24  ;;  %v2213_v34 = vpop.f32.mrb[24].mxu1  ;;  %v850_v24 = vld [vmem:[%s3920_s3 + $0xd8] sm:$0xff] }
 0x108   :  { %1034 = vst.msk [vmem:[%s3921_s9 + $0x90] sm:$0xff] %vm1015_vm2, %v969_v23  ;;  %v907_v35 = vadd.f32 %v843_v20, %v779_v26  ;;  %v710_v37 = vmul.f32 %v2798_v6, %v472_v32  ;;  %v2304_v38 = vpop.eup %2303  ;;  %v1634_v39 = vadd.f32 %v2803_v9, %v1563_v28  ;;  %v1340_v41 = vadd.f32 %v2213_v34, %v1106_v25  ;;  %v1334_v42 = vpop.f32.mrb[25].mxu1  ;;  %v849_v32 = vld [vmem:[%s3920_s3 + $0xd0] sm:$0xff] }
 0x109   :  { %v972_v40 = vmax.f32 %v908_v29, 0.0  ;;  %v782_v43 = vadd.f32 %v2811_v13, %v711_v31  ;;  %v2306_v45 = vpop.eup %2305  ;;  %1756 = vst [vmem:[%s3922_s10 + $0x88] sm:$0xff] %v2304_v38  ;;  %v1633_v46 = vadd.f32 %v2803_v9, %v1562_v33  ;;  %v1335_v48 = vadd.f32 %v1334_v42, %v1105_v30  ;;  %v1111_v42 = vld [vmem:[%s3915_s4 + $0xf0] sm:$0xff] }
 0x10a   :  { %v971_v47 = vmax.f32 %v907_v35, 0.0  ;;  %v781_v50 = vadd.f32 %v2811_v13, %v710_v37  ;;  %v2115_v51 = vpop.f32.mrb[24].mxu0  ;;  %1755 = vst [vmem:[%s3922_s10 + $0x80] sm:$0xff] %v2306_v45  ;;  %2315 = vtanh.f32 %v1634_v39  ;;  %v1565_v52 = vmul.f32 %v2793_v5, %v1340_v41  ;;  %v1112_v37 = vld [vmem:[%s3915_s4 + $0xf8] sm:$0xff] }
 0x10b   :  { %1037 = vst.msk [vmem:[%s3921_s9 + $0xa8] sm:$0xff] %vm1015_vm2, %v972_v40  ;;  %v910_v53 = vadd.f32 %v846_v36, %v782_v43  ;;  %v713_v55 = vmul.f32 %v2115_v51, %v2798_v6  ;;  %v482_v56 = vpop.f32.mrb[25].mxu0  ;;  %2317 = vtanh.f32 %v1633_v46  ;;  %v1564_v57 = vmul.f32 %v2793_v5, %v1335_v48  ;;  %v2216_v58 = vpop.f32.mrb[26].mxu1  ;;  %v852_v48 = vld [vmem:[%s3920_s3 + $0xe8] sm:$0xff] }
 0x10c   :  { %1036 = vst.msk [vmem:[%s3921_s9 + $0xa0] sm:$0xff] %vm1015_vm2, %v971_v47  ;;  %v909_v59 = vadd.f32 %v845_v44, %v781_v50  ;;  %v712_v61 = vmul.f32 %v2798_v6, %v482_v56  ;;  %v2308_v62 = vpop.eup %2307  ;;  %v1636_v63 = vadd.f32 %v2803_v9, %v1565_v52  ;;  %v1350_v1 = vadd.f32 %v2216_v58, %v1108_v49  ;;  %v1344_v2 = vpop.f32.mrb[27].mxu1  ;;  %v851_v56 = vld [vmem:[%s3920_s3 + $0xe0] sm:$0xff] }
 0x10d   :  { %v974_v0 = vmax.f32 %v910_v53, 0.0  ;;  %v784_v3 = vadd.f32 %v2811_v13, %v713_v55  ;;  %v2310_v7 = vpop.eup %2309  ;;  %1758 = vst [vmem:[%s3922_s10 + $0x98] sm:$0xff] %v2308_v62  ;;  %v1635_v8 = vadd.f32 %v2803_v9, %v1564_v57  ;;  %v1345_v11 = vadd.f32 %v1344_v2, %v1107_v54  ;;  %v1113_v2 = vld [vmem:[%s3915_s4 + $0x100] sm:$0xff] }
 0x10e   :  { %v973_v10 = vmax.f32 %v909_v59, 0.0  ;;  %v783_v14 = vadd.f32 %v2811_v13, %v712_v61  ;;  %v2118_v15 = vpop.f32.mrb[26].mxu0  ;;  %1757 = vst [vmem:[%s3922_s10 + $0x90] sm:$0xff] %v2310_v7  ;;  %2319 = vtanh.f32 %v1636_v63  ;;  %v1567_v16 = vmul.f32 %v2793_v5, %v1350_v1  ;;  %v1114_v61 = vld [vmem:[%s3915_s4 + $0x108] sm:$0xff] }
 0x10f   :  { %1039 = vst.msk [vmem:[%s3921_s9 + $0xb8] sm:$0xff] %vm1015_vm2, %v974_v0  ;;  %v912_v17 = vadd.f32 %v848_v60, %v784_v3  ;;  %v715_v19 = vmul.f32 %v2118_v15, %v2798_v6  ;;  %v492_v20 = vpop.f32.mrb[27].mxu0  ;;  %2321 = vtanh.f32 %v1635_v8  ;;  %v1566_v21 = vmul.f32 %v2793_v5, %v1345_v11  ;;  %v2219_v22 = vpop.f32.mrb[28].mxu1  ;;  %v854_v11 = vld [vmem:[%s3920_s3 + $0xf8] sm:$0xff] }
 0x110   :  { %1038 = vst.msk [vmem:[%s3921_s9 + $0xb0] sm:$0xff] %vm1015_vm2, %v973_v10  ;;  %v911_v23 = vadd.f32 %v847_v4, %v783_v14  ;;  %v714_v25 = vmul.f32 %v2798_v6, %v492_v20  ;;  %v2312_v26 = vpop.eup %2311  ;;  %v1638_v27 = vadd.f32 %v2803_v9, %v1567_v16  ;;  %v1360_v29 = vadd.f32 %v2219_v22, %v1110_v12  ;;  %v1354_v30 = vpop.f32.mrb[29].mxu1  ;;  %v853_v20 = vld [vmem:[%s3920_s3 + $0xf0] sm:$0xff] }
 0x111   :  { %v976_v28 = vmax.f32 %v912_v17, 0.0  ;;  %v786_v31 = vadd.f32 %v2811_v13, %v715_v19  ;;  %v2314_v33 = vpop.eup %2313  ;;  %1760 = vst [vmem:[%s3922_s10 + $0xa8] sm:$0xff] %v2312_v26  ;;  %v1637_v34 = vadd.f32 %v2803_v9, %v1566_v21  ;;  %v1355_v36 = vadd.f32 %v1354_v30, %v1109_v18  ;;  %v1115_v30 = vld [vmem:[%s3915_s4 + $0x110] sm:$0xff] }
 0x112   :  { %v975_v35 = vmax.f32 %v911_v23, 0.0  ;;  %v785_v38 = vadd.f32 %v2811_v13, %v714_v25  ;;  %v2121_v39 = vpop.f32.mrb[28].mxu0  ;;  %1759 = vst [vmem:[%s3922_s10 + $0xa0] sm:$0xff] %v2314_v33  ;;  %2323 = vtanh.f32 %v1638_v27  ;;  %v1569_v40 = vmul.f32 %v2793_v5, %v1360_v29  ;;  %v1116_v25 = vld [vmem:[%s3915_s4 + $0x118] sm:$0xff] }
 0x113   :  { %1041 = vst.msk [vmem:[%s3921_s9 + $0xc8] sm:$0xff] %vm1015_vm2, %v976_v28  ;;  %v914_v41 = vadd.f32 %v850_v24, %v786_v31  ;;  %v717_v43 = vmul.f32 %v2121_v39, %v2798_v6  ;;  %v502_v44 = vpop.f32.mrb[29].mxu0  ;;  %2325 = vtanh.f32 %v1637_v34  ;;  %v1568_v45 = vmul.f32 %v2793_v5, %v1355_v36  ;;  %v2222_v46 = vpop.f32.mrb[30].mxu1  ;;  %v856_v36 = vld [vmem:[%s3920_s3 + $0x108] sm:$0xff] }
 0x114   :  { %1040 = vst.msk [vmem:[%s3921_s9 + $0xc0] sm:$0xff] %vm1015_vm2, %v975_v35  ;;  %v913_v47 = vadd.f32 %v849_v32, %v785_v38  ;;  %v716_v49 = vmul.f32 %v2798_v6, %v502_v44  ;;  %v2316_v50 = vpop.eup %2315  ;;  %v1640_v51 = vadd.f32 %v2803_v9, %v1569_v40  ;;  %v1370_v53 = vadd.f32 %v2222_v46, %v1112_v37  ;;  %v1364_v54 = vpop.f32.mrb[31].mxu1  ;;  %v855_v44 = vld [vmem:[%s3920_s3 + $0x100] sm:$0xff] }
 0x115   :  { %v978_v52 = vmax.f32 %v914_v41, 0.0  ;;  %v788_v55 = vadd.f32 %v2811_v13, %v717_v43  ;;  %v2318_v57 = vpop.eup %2317  ;;  %1762 = vst [vmem:[%s3922_s10 + $0xb8] sm:$0xff] %v2316_v50  ;;  %v1639_v58 = vadd.f32 %v2803_v9, %v1568_v45  ;;  %v1365_v60 = vadd.f32 %v1364_v54, %v1111_v42  ;;  %v1117_v54 = vld [vmem:[%s3915_s4 + $0x120] sm:$0xff] }
 0x116   :  { %v977_v59 = vmax.f32 %v913_v47, 0.0  ;;  %v787_v62 = vadd.f32 %v2811_v13, %v716_v49  ;;  %v2124_v63 = vpop.f32.mrb[30].mxu0  ;;  %1761 = vst [vmem:[%s3922_s10 + $0xb0] sm:$0xff] %v2318_v57  ;;  %2327 = vtanh.f32 %v1640_v51  ;;  %v1571_v0 = vmul.f32 %v2793_v5, %v1370_v53  ;;  %v1118_v49 = vld [vmem:[%s3915_s4 + $0x128] sm:$0xff] }
 0x117   :  { %1043 = vst.msk [vmem:[%s3921_s9 + $0xd8] sm:$0xff] %vm1015_vm2, %v978_v52  ;;  %v916_v1 = vadd.f32 %v852_v48, %v788_v55  ;;  %v719_v3 = vmul.f32 %v2124_v63, %v2798_v6  ;;  %v512_v4 = vpop.f32.mrb[31].mxu0  ;;  %2329 = vtanh.f32 %v1639_v58  ;;  %v1570_v7 = vmul.f32 %v2793_v5, %v1365_v60  ;;  %v2225_v8 = vpop.f32.mrb[32].mxu1  ;;  %v858_v60 = vld [vmem:[%s3920_s3 + $0x118] sm:$0xff] }
 0x118   :  { %1042 = vst.msk [vmem:[%s3921_s9 + $0xd0] sm:$0xff] %vm1015_vm2, %v977_v59  ;;  %v915_v10 = vadd.f32 %v851_v56, %v787_v62  ;;  %v718_v12 = vmul.f32 %v2798_v6, %v512_v4  ;;  %v2320_v14 = vpop.eup %2319  ;;  %v1642_v15 = vadd.f32 %v2803_v9, %v1571_v0  ;;  %v1380_v17 = vadd.f32 %v2225_v8, %v1114_v61  ;;  %v1374_v18 = vpop.f32.mrb[33].mxu1  ;;  %v3377_v61 = vld [vmem:[%s3917_s5] ss:$0 sm:$0xff] }
 0x119   :  { %v980_v16 = vmax.f32 %v916_v1, 0.0  ;;  %v790_v19 = vadd.f32 %v2811_v13, %v719_v3  ;;  %v2322_v21 = vpop.eup %2321  ;;  %1764 = vst [vmem:[%s3922_s10 + $0xc8] sm:$0xff] %v2320_v14  ;;  %v1641_v22 = vadd.f32 %v2803_v9, %v1570_v7  ;;  %v1375_v24 = vadd.f32 %v1374_v18, %v1113_v2  ;;  %v857_v3 = vld [vmem:[%s3920_s3 + $0x110] sm:$0xff]  ;;  %v3391_v7 = vld [vmem:[%s3918_s8] ss:$0 sm:$0xff] }
 0x11a   :  { %v979_v23 = vmax.f32 %v915_v10, 0.0  ;;  %v789_v26 = vadd.f32 %v2811_v13, %v718_v12  ;;  %v2127_v27 = vpop.f32.mrb[32].mxu0  ;;  %1763 = vst [vmem:[%s3922_s10 + $0xc0] sm:$0xff] %v2322_v21  ;;  %2331 = vtanh.f32 %v1642_v15  ;;  %v1573_v28 = vmul.f32 %v2793_v5, %v1380_v17  ;;  %v3413_v15 = vld [vmem:[%s3916_s7] ss:$0 sm:$0xff]  ;;  %v1119_v18 = vld [vmem:[%s3915_s4 + $0x130] sm:$0xff] }
 0x11b   :  { %1045 = vst.msk [vmem:[%s3921_s9 + $0xe8] sm:$0xff] %vm1015_vm2, %v980_v16  ;;  %v918_v29 = vadd.f32 %v854_v11, %v790_v19  ;;  %v721_v31 = vmul.f32 %v2127_v27, %v2798_v6  ;;  %v522_v32 = vpop.f32.mrb[33].mxu0  ;;  %2333 = vtanh.f32 %v1641_v22  ;;  %v1572_v33 = vmul.f32 %v2793_v5, %v1375_v24  ;;  %v2228_v34 = vpop.f32.mrb[34].mxu1  ;;  %v3400_v11 = vld [vmem:[%s3919_s6] ss:$0 sm:$0xff]  ;;  %v860_v24 = vld [vmem:[%s3920_s3 + $0x128] sm:$0xff] }
 0x11c   :  { %1044 = vst.msk [vmem:[%s3921_s9 + $0xe0] sm:$0xff] %vm1015_vm2, %v979_v23  ;;  %v917_v35 = vadd.f32 %v853_v20, %v789_v26  ;;  %v720_v37 = vmul.f32 %v2798_v6, %v522_v32  ;;  %v2324_v38 = vpop.eup %2323  ;;  %v1644_v39 = vadd.f32 %v2803_v9, %v1573_v28  ;;  %v1390_v41 = vadd.f32 %v2228_v34, %v1116_v25  ;;  %v1384_v42 = vpop.f32.mrb[35].mxu1  ;;  %v859_v32 = vld [vmem:[%s3920_s3 + $0x120] sm:$0xff] }
 0x11d   :  { %v982_v40 = vmax.f32 %v918_v29, 0.0  ;;  %v792_v43 = vadd.f32 %v2811_v13, %v721_v31  ;;  %v2326_v45 = vpop.eup %2325  ;;  %1766 = vst [vmem:[%s3922_s10 + $0xd8] sm:$0xff] %v2324_v38  ;;  %v1643_v46 = vadd.f32 %v2803_v9, %v1572_v33  ;;  %v1385_v48 = vadd.f32 %v1384_v42, %v1115_v30  ;;  %v1121_v42 = vld [vmem:[%s3915_s4 + $0x140] sm:$0xff] }
 0x11e   :  { %v981_v47 = vmax.f32 %v917_v35, 0.0  ;;  %v791_v50 = vadd.f32 %v2811_v13, %v720_v37  ;;  %v2130_v51 = vpop.f32.mrb[34].mxu0  ;;  %1765 = vst [vmem:[%s3922_s10 + $0xd0] sm:$0xff] %v2326_v45  ;;  %2335 = vtanh.f32 %v1644_v39  ;;  %v1575_v52 = vmul.f32 %v2793_v5, %v1390_v41  ;;  %v1122_v37 = vld [vmem:[%s3915_s4 + $0x148] sm:$0xff] }
 0x11f   :  { %1047 = vst.msk [vmem:[%s3921_s9 + $0xf8] sm:$0xff] %vm1015_vm2, %v982_v40  ;;  %v920_v53 = vadd.f32 %v856_v36, %v792_v43  ;;  %v723_v55 = vmul.f32 %v2130_v51, %v2798_v6  ;;  %v532_v56 = vpop.f32.mrb[35].mxu0  ;;  %2337 = vtanh.f32 %v1643_v46  ;;  %v1574_v57 = vmul.f32 %v2793_v5, %v1385_v48  ;;  %v2231_v58 = vpop.f32.mrb[36].mxu1  ;;  %v862_v48 = vld [vmem:[%s3920_s3 + $0x138] sm:$0xff] }
 0x120   :  { %1046 = vst.msk [vmem:[%s3921_s9 + $0xf0] sm:$0xff] %vm1015_vm2, %v981_v47  ;;  %v919_v59 = vadd.f32 %v855_v44, %v791_v50  ;;  %v722_v6 = vmul.f32 %v3377_v61, %v532_v56  ;;  %v2328_v62 = vpop.eup %2327  ;;  %v1646_v63 = vadd.f32 %v2803_v9, %v1575_v52  ;;  %v1400_v1 = vadd.f32 %v2231_v58, %v1118_v49  ;;  %v1394_v2 = vpop.f32.mrb[37].mxu1  ;;  %v861_v56 = vld [vmem:[%s3920_s3 + $0x130] sm:$0xff] }
 0x121   :  { %v984_v0 = vmax.f32 %v920_v53, 0.0  ;;  %v794_v5 = vadd.f32 %v2811_v13, %v723_v55  ;;  %v2330_v4 = vpop.eup %2329  ;;  %1768 = vst [vmem:[%s3922_s10 + $0xe8] sm:$0xff] %v2328_v62  ;;  %v1645_v9 = vadd.f32 %v3391_v7, %v1574_v57  ;;  %v1395_v10 = vadd.f32 %v1394_v2, %v1117_v54  ;;  %v1120_v13 = vld [vmem:[%s3915_s4 + $0x138] sm:$0xff]  ;;  %v1123_v2 = vld [vmem:[%s3915_s4 + $0x150] sm:$0xff] }
 0x122   :  { %v983_v8 = vmax.f32 %v919_v59, 0.0  ;;  %v793_v12 = vadd.f32 %v3400_v11, %v722_v6  ;;  %v2133_v14 = vpop.f32.mrb[36].mxu0  ;;  %1767 = vst [vmem:[%s3922_s10 + $0xe0] sm:$0xff] %v2330_v4  ;;  %2339 = vtanh.f32 %v1646_v63  ;;  %v1577_v16 = vmul.f32 %v3413_v15, %v1400_v1  ;;  %v1124_v6 = vld [vmem:[%s3915_s4 + $0x158] sm:$0xff] }
 0x123   :  { %1049 = vst.msk [vmem:[%s3921_s9 + $0x108] sm:$0xff] %vm1015_vm2, %v984_v0  ;;  %v922_v17 = vadd.f32 %v858_v60, %v794_v5  ;;  %v725_v19 = vmul.f32 %v3377_v61, %v2133_v14  ;;  %v542_v20 = vpop.f32.mrb[37].mxu0  ;;  %2341 = vtanh.f32 %v1645_v9  ;;  %v1576_v21 = vmul.f32 %v3413_v15, %v1395_v10  ;;  %v2234_v22 = vpop.f32.mrb[38].mxu1  ;;  %v864_v10 = vld [vmem:[%s3920_s3 + $0x148] sm:$0xff] }
 0x124   :  { %1048 = vst.msk [vmem:[%s3921_s9 + $0x100] sm:$0xff] %vm1015_vm2, %v983_v8  ;;  %v921_v23 = vadd.f32 %v857_v3, %v793_v12  ;;  %v724_v25 = vmul.f32 %v3377_v61, %v542_v20  ;;  %v2332_v26 = vpop.eup %2331  ;;  %v1648_v27 = vadd.f32 %v3391_v7, %v1577_v16  ;;  %v1410_v29 = vadd.f32 %v2234_v22, %v1120_v13  ;;  %v1404_v30 = vpop.f32.mrb[39].mxu1  ;;  %v863_v20 = vld [vmem:[%s3920_s3 + $0x140] sm:$0xff] }
 0x125   :  { %v986_v28 = vmax.f32 %v922_v17, 0.0  ;;  %v796_v31 = vadd.f32 %v3400_v11, %v725_v19  ;;  %v2334_v33 = vpop.eup %2333  ;;  %1770 = vst [vmem:[%s3922_s10 + $0xf8] sm:$0xff] %v2332_v26  ;;  %v1647_v34 = vadd.f32 %v3391_v7, %v1576_v21  ;;  %v1405_v36 = vadd.f32 %v1404_v30, %v1119_v18  ;;  %v1125_v30 = vld [vmem:[%s3915_s4 + $0x160] sm:$0xff] }
 0x126   :  { %v985_v35 = vmax.f32 %v921_v23, 0.0  ;;  %v795_v38 = vadd.f32 %v3400_v11, %v724_v25  ;;  %v2136_v39 = vpop.f32.mrb[38].mxu0  ;;  %1769 = vst [vmem:[%s3922_s10 + $0xf0] sm:$0xff] %v2334_v33  ;;  %2343 = vtanh.f32 %v1648_v27  ;;  %v1579_v40 = vmul.f32 %v3413_v15, %v1410_v29  ;;  %v1126_v25 = vld [vmem:[%s3915_s4 + $0x168] sm:$0xff] }
 0x127   :  { %1051 = vst.msk [vmem:[%s3921_s9 + $0x118] sm:$0xff] %vm1015_vm2, %v986_v28  ;;  %v924_v41 = vadd.f32 %v860_v24, %v796_v31  ;;  %v727_v43 = vmul.f32 %v3377_v61, %v2136_v39  ;;  %v552_v44 = vpop.f32.mrb[39].mxu0  ;;  %2345 = vtanh.f32 %v1647_v34  ;;  %v1578_v45 = vmul.f32 %v3413_v15, %v1405_v36  ;;  %v2237_v46 = vpop.f32.mrb[40].mxu1  ;;  %v866_v36 = vld [vmem:[%s3920_s3 + $0x158] sm:$0xff] }
 0x128   :  { %1050 = vst.msk [vmem:[%s3921_s9 + $0x110] sm:$0xff] %vm1015_vm2, %v985_v35  ;;  %v923_v47 = vadd.f32 %v859_v32, %v795_v38  ;;  %v726_v49 = vmul.f32 %v3377_v61, %v552_v44  ;;  %v2336_v50 = vpop.eup %2335  ;;  %v1650_v51 = vadd.f32 %v3391_v7, %v1579_v40  ;;  %v1420_v53 = vadd.f32 %v2237_v46, %v1122_v37  ;;  %v1414_v54 = vpop.f32.mrb[41].mxu1  ;;  %v865_v44 = vld [vmem:[%s3920_s3 + $0x150] sm:$0xff] }
 0x129   :  { %v988_v52 = vmax.f32 %v924_v41, 0.0  ;;  %v798_v55 = vadd.f32 %v3400_v11, %v727_v43  ;;  %v2338_v57 = vpop.eup %2337  ;;  %1772 = vst [vmem:[%s3922_s10 + $0x108] sm:$0xff] %v2336_v50  ;;  %v1649_v58 = vadd.f32 %v3391_v7, %v1578_v45  ;;  %v1415_v60 = vadd.f32 %v1414_v54, %v1121_v42  ;;  %v1127_v54 = vld [vmem:[%s3915_s4 + $0x170] sm:$0xff] }
 0x12a   :  { %v987_v59 = vmax.f32 %v923_v47, 0.0  ;;  %v797_v62 = vadd.f32 %v3400_v11, %v726_v49  ;;  %v2139_v63 = vpop.f32.mrb[40].mxu0  ;;  %1771 = vst [vmem:[%s3922_s10 + $0x100] sm:$0xff] %v2338_v57  ;;  %2347 = vtanh.f32 %v1650_v51  ;;  %v1581_v0 = vmul.f32 %v3413_v15, %v1420_v53  ;;  %v1128_v49 = vld [vmem:[%s3915_s4 + $0x178] sm:$0xff] }
 0x12b   :  { %1053 = vst.msk [vmem:[%s3921_s9 + $0x128] sm:$0xff] %vm1015_vm2, %v988_v52  ;;  %v926_v1 = vadd.f32 %v862_v48, %v798_v55  ;;  %v729_v5 = vmul.f32 %v3377_v61, %v2139_v63  ;;  %v562_v3 = vpop.f32.mrb[41].mxu0  ;;  %2349 = vtanh.f32 %v1649_v58  ;;  %v1580_v4 = vmul.f32 %v3413_v15, %v1415_v60  ;;  %v2240_v9 = vpop.f32.mrb[42].mxu1  ;;  %v868_v60 = vld [vmem:[%s3920_s3 + $0x168] sm:$0xff] }
 0x12c   :  { %1052 = vst.msk [vmem:[%s3921_s9 + $0x120] sm:$0xff] %vm1015_vm2, %v987_v59  ;;  %v925_v8 = vadd.f32 %v861_v56, %v797_v62  ;;  %v728_v13 = vmul.f32 %v3377_v61, %v562_v3  ;;  %v2340_v12 = vpop.eup %2339  ;;  %v1652_v14 = vadd.f32 %v3391_v7, %v1581_v0  ;;  %v1430_v17 = vadd.f32 %v2240_v9, %v1124_v6  ;;  %v1424_v18 = vpop.f32.mrb[43].mxu1  ;;  %v867_v3 = vld [vmem:[%s3920_s3 + $0x160] sm:$0xff] }
 0x12d   :  { %v990_v16 = vmax.f32 %v926_v1, 0.0  ;;  %v800_v19 = vadd.f32 %v3400_v11, %v729_v5  ;;  %v2342_v21 = vpop.eup %2341  ;;  %1774 = vst [vmem:[%s3922_s10 + $0x118] sm:$0xff] %v2340_v12  ;;  %v1651_v22 = vadd.f32 %v3391_v7, %v1580_v4  ;;  %v1425_v24 = vadd.f32 %v1424_v18, %v1123_v2  ;;  %v1129_v18 = vld [vmem:[%s3915_s4 + $0x180] sm:$0xff] }
 0x12e   :  { %v989_v23 = vmax.f32 %v925_v8, 0.0  ;;  %v799_v26 = vadd.f32 %v3400_v11, %v728_v13  ;;  %v2142_v27 = vpop.f32.mrb[42].mxu0  ;;  %1773 = vst [vmem:[%s3922_s10 + $0x110] sm:$0xff] %v2342_v21  ;;  %2351 = vtanh.f32 %v1652_v14  ;;  %v1583_v28 = vmul.f32 %v3413_v15, %v1430_v17  ;;  %v1130_v13 = vld [vmem:[%s3915_s4 + $0x188] sm:$0xff] }
 0x12f   :  { %1055 = vst.msk [vmem:[%s3921_s9 + $0x138] sm:$0xff] %vm1015_vm2, %v990_v16  ;;  %v928_v29 = vadd.f32 %v864_v10, %v800_v19  ;;  %v731_v31 = vmul.f32 %v3377_v61, %v2142_v27  ;;  %v572_v32 = vpop.f32.mrb[43].mxu0  ;;  %2353 = vtanh.f32 %v1651_v22  ;;  %v1582_v33 = vmul.f32 %v3413_v15, %v1425_v24  ;;  %v2243_v34 = vpop.f32.mrb[44].mxu1  ;;  %v870_v24 = vld [vmem:[%s3920_s3 + $0x178] sm:$0xff] }
 0x130   :  { %1054 = vst.msk [vmem:[%s3921_s9 + $0x130] sm:$0xff] %vm1015_vm2, %v989_v23  ;;  %v927_v35 = vadd.f32 %v863_v20, %v799_v26  ;;  %v730_v37 = vmul.f32 %v3377_v61, %v572_v32  ;;  %v2344_v38 = vpop.eup %2343  ;;  %v1654_v39 = vadd.f32 %v3391_v7, %v1583_v28  ;;  %v1440_v41 = vadd.f32 %v2243_v34, %v1126_v25  ;;  %v1434_v42 = vpop.f32.mrb[45].mxu1  ;;  %v869_v32 = vld [vmem:[%s3920_s3 + $0x170] sm:$0xff] }
 0x131   :  { %v992_v40 = vmax.f32 %v928_v29, 0.0  ;;  %v802_v43 = vadd.f32 %v3400_v11, %v731_v31  ;;  %v2346_v45 = vpop.eup %2345  ;;  %1776 = vst [vmem:[%s3922_s10 + $0x128] sm:$0xff] %v2344_v38  ;;  %v1653_v46 = vadd.f32 %v3391_v7, %v1582_v33  ;;  %v1435_v48 = vadd.f32 %v1434_v42, %v1125_v30  ;;  %v1131_v42 = vld [vmem:[%s3915_s4 + $0x190] sm:$0xff] }
 0x132   :  { %v991_v47 = vmax.f32 %v927_v35, 0.0  ;;  %v801_v50 = vadd.f32 %v3400_v11, %v730_v37  ;;  %v2145_v51 = vpop.f32.mrb[44].mxu0  ;;  %1775 = vst [vmem:[%s3922_s10 + $0x120] sm:$0xff] %v2346_v45  ;;  %2355 = vtanh.f32 %v1654_v39  ;;  %v1585_v52 = vmul.f32 %v3413_v15, %v1440_v41  ;;  %v1132_v37 = vld [vmem:[%s3915_s4 + $0x198] sm:$0xff] }
 0x133   :  { %1057 = vst.msk [vmem:[%s3921_s9 + $0x148] sm:$0xff] %vm1015_vm2, %v992_v40  ;;  %v930_v53 = vadd.f32 %v866_v36, %v802_v43  ;;  %v733_v55 = vmul.f32 %v3377_v61, %v2145_v51  ;;  %v582_v56 = vpop.f32.mrb[45].mxu0  ;;  %2357 = vtanh.f32 %v1653_v46  ;;  %v1584_v57 = vmul.f32 %v3413_v15, %v1435_v48  ;;  %v2246_v58 = vpop.f32.mrb[46].mxu1  ;;  %v872_v48 = vld [vmem:[%s3920_s3 + $0x188] sm:$0xff] }
 0x134   :  { %1056 = vst.msk [vmem:[%s3921_s9 + $0x140] sm:$0xff] %vm1015_vm2, %v991_v47  ;;  %v929_v59 = vadd.f32 %v865_v44, %v801_v50  ;;  %v732_v6 = vmul.f32 %v3377_v61, %v582_v56  ;;  %v2348_v62 = vpop.eup %2347  ;;  %v1656_v63 = vadd.f32 %v3391_v7, %v1585_v52  ;;  %v1450_v1 = vadd.f32 %v2246_v58, %v1128_v49  ;;  %v1444_v2 = vpop.f32.mrb[47].mxu1  ;;  %v871_v56 = vld [vmem:[%s3920_s3 + $0x180] sm:$0xff] }
 0x135   :  { %v994_v0 = vmax.f32 %v930_v53, 0.0  ;;  %v804_v5 = vadd.f32 %v3400_v11, %v733_v55  ;;  %v2350_v4 = vpop.eup %2349  ;;  %1778 = vst [vmem:[%s3922_s10 + $0x138] sm:$0xff] %v2348_v62  ;;  %v1655_v9 = vadd.f32 %v3391_v7, %v1584_v57  ;;  %v1445_v10 = vadd.f32 %v1444_v2, %v1127_v54  ;;  %v1133_v2 = vld [vmem:[%s3915_s4 + $0x1a0] sm:$0xff] }
 0x136   :  { %v993_v8 = vmax.f32 %v929_v59, 0.0  ;;  %v803_v12 = vadd.f32 %v3400_v11, %v732_v6  ;;  %v2148_v14 = vpop.f32.mrb[46].mxu0  ;;  %1777 = vst [vmem:[%s3922_s10 + $0x130] sm:$0xff] %v2350_v4  ;;  %2359 = vtanh.f32 %v1656_v63  ;;  %v1587_v16 = vmul.f32 %v3413_v15, %v1450_v1  ;;  %v1134_v6 = vld [vmem:[%s3915_s4 + $0x1a8] sm:$0xff] }
 0x137   :  { %1059 = vst.msk [vmem:[%s3921_s9 + $0x158] sm:$0xff] %vm1015_vm2, %v994_v0  ;;  %v932_v17 = vadd.f32 %v868_v60, %v804_v5  ;;  %v735_v19 = vmul.f32 %v3377_v61, %v2148_v14  ;;  %v592_v20 = vpop.f32.mrb[47].mxu0  ;;  %2361 = vtanh.f32 %v1655_v9  ;;  %v1586_v21 = vmul.f32 %v3413_v15, %v1445_v10  ;;  %v2249_v22 = vpop.f32.mrb[48].mxu1  ;;  %v874_v10 = vld [vmem:[%s3920_s3 + $0x198] sm:$0xff] }
 0x138   :  { %1058 = vst.msk [vmem:[%s3921_s9 + $0x150] sm:$0xff] %vm1015_vm2, %v993_v8  ;;  %v931_v23 = vadd.f32 %v867_v3, %v803_v12  ;;  %v734_v25 = vmul.f32 %v3377_v61, %v592_v20  ;;  %v2352_v26 = vpop.eup %2351  ;;  %v1658_v27 = vadd.f32 %v3391_v7, %v1587_v16  ;;  %v1460_v29 = vadd.f32 %v2249_v22, %v1130_v13  ;;  %v1454_v30 = vpop.f32.mrb[49].mxu1  ;;  %v873_v20 = vld [vmem:[%s3920_s3 + $0x190] sm:$0xff] }
 0x139   :  { %v996_v28 = vmax.f32 %v932_v17, 0.0  ;;  %v806_v31 = vadd.f32 %v3400_v11, %v735_v19  ;;  %v2354_v33 = vpop.eup %2353  ;;  %1780 = vst [vmem:[%s3922_s10 + $0x148] sm:$0xff] %v2352_v26  ;;  %v1657_v34 = vadd.f32 %v3391_v7, %v1586_v21  ;;  %v1455_v36 = vadd.f32 %v1454_v30, %v1129_v18  ;;  %v1135_v30 = vld [vmem:[%s3915_s4 + $0x1b0] sm:$0xff] }
 0x13a   :  { %v995_v35 = vmax.f32 %v931_v23, 0.0  ;;  %v805_v38 = vadd.f32 %v3400_v11, %v734_v25  ;;  %v2151_v39 = vpop.f32.mrb[48].mxu0  ;;  %1779 = vst [vmem:[%s3922_s10 + $0x140] sm:$0xff] %v2354_v33  ;;  %2363 = vtanh.f32 %v1658_v27  ;;  %v1589_v40 = vmul.f32 %v3413_v15, %v1460_v29  ;;  %v1136_v25 = vld [vmem:[%s3915_s4 + $0x1b8] sm:$0xff] }
 0x13b   :  { %1061 = vst.msk [vmem:[%s3921_s9 + $0x168] sm:$0xff] %vm1015_vm2, %v996_v28  ;;  %v934_v41 = vadd.f32 %v870_v24, %v806_v31  ;;  %v737_v43 = vmul.f32 %v3377_v61, %v2151_v39  ;;  %v602_v44 = vpop.f32.mrb[49].mxu0  ;;  %2365 = vtanh.f32 %v1657_v34  ;;  %v1588_v45 = vmul.f32 %v3413_v15, %v1455_v36  ;;  %v2252_v46 = vpop.f32.mrb[50].mxu1  ;;  %v876_v36 = vld [vmem:[%s3920_s3 + $0x1a8] sm:$0xff] }
 0x13c   :  { %1060 = vst.msk [vmem:[%s3921_s9 + $0x160] sm:$0xff] %vm1015_vm2, %v995_v35  ;;  %v933_v47 = vadd.f32 %v869_v32, %v805_v38  ;;  %v736_v49 = vmul.f32 %v3377_v61, %v602_v44  ;;  %v2356_v50 = vpop.eup %2355  ;;  %v1660_v51 = vadd.f32 %v3391_v7, %v1589_v40  ;;  %v1470_v53 = vadd.f32 %v2252_v46, %v1132_v37  ;;  %v1464_v54 = vpop.f32.mrb[51].mxu1  ;;  %v875_v44 = vld [vmem:[%s3920_s3 + $0x1a0] sm:$0xff] }
 0x13d   :  { %v998_v52 = vmax.f32 %v934_v41, 0.0  ;;  %v808_v55 = vadd.f32 %v3400_v11, %v737_v43  ;;  %v2358_v57 = vpop.eup %2357  ;;  %1782 = vst [vmem:[%s3922_s10 + $0x158] sm:$0xff] %v2356_v50  ;;  %v1659_v58 = vadd.f32 %v3391_v7, %v1588_v45  ;;  %v1465_v60 = vadd.f32 %v1464_v54, %v1131_v42  ;;  %v1137_v54 = vld [vmem:[%s3915_s4 + $0x1c0] sm:$0xff] }
 0x13e   :  { %v997_v59 = vmax.f32 %v933_v47, 0.0  ;;  %v807_v62 = vadd.f32 %v3400_v11, %v736_v49  ;;  %v2154_v63 = vpop.f32.mrb[50].mxu0  ;;  %1781 = vst [vmem:[%s3922_s10 + $0x150] sm:$0xff] %v2358_v57  ;;  %2367 = vtanh.f32 %v1660_v51  ;;  %v1591_v0 = vmul.f32 %v3413_v15, %v1470_v53  ;;  %v1138_v49 = vld [vmem:[%s3915_s4 + $0x1c8] sm:$0xff] }
 0x13f   :  { %1063 = vst.msk [vmem:[%s3921_s9 + $0x178] sm:$0xff] %vm1015_vm2, %v998_v52  ;;  %v936_v1 = vadd.f32 %v872_v48, %v808_v55  ;;  %v739_v5 = vmul.f32 %v3377_v61, %v2154_v63  ;;  %v612_v3 = vpop.f32.mrb[51].mxu0  ;;  %2369 = vtanh.f32 %v1659_v58  ;;  %v1590_v4 = vmul.f32 %v3413_v15, %v1465_v60  ;;  %v2255_v9 = vpop.f32.mrb[52].mxu1  ;;  %v878_v60 = vld [vmem:[%s3920_s3 + $0x1b8] sm:$0xff] }
 0x140   :  { %1062 = vst.msk [vmem:[%s3921_s9 + $0x170] sm:$0xff] %vm1015_vm2, %v997_v59  ;;  %v935_v8 = vadd.f32 %v871_v56, %v807_v62  ;;  %v738_v13 = vmul.f32 %v3377_v61, %v612_v3  ;;  %v2360_v12 = vpop.eup %2359  ;;  %v1662_v14 = vadd.f32 %v3391_v7, %v1591_v0  ;;  %v1480_v17 = vadd.f32 %v2255_v9, %v1134_v6  ;;  %v1474_v18 = vpop.f32.mrb[53].mxu1  ;;  %v877_v3 = vld [vmem:[%s3920_s3 + $0x1b0] sm:$0xff] }
 0x141   :  { %v1000_v16 = vmax.f32 %v936_v1, 0.0  ;;  %v810_v19 = vadd.f32 %v3400_v11, %v739_v5  ;;  %v2362_v21 = vpop.eup %2361  ;;  %1784 = vst [vmem:[%s3922_s10 + $0x168] sm:$0xff] %v2360_v12  ;;  %v1661_v22 = vadd.f32 %v3391_v7, %v1590_v4  ;;  %v1475_v24 = vadd.f32 %v1474_v18, %v1133_v2  ;;  %v1139_v18 = vld [vmem:[%s3915_s4 + $0x1d0] sm:$0xff] }
 0x142   :  { %v999_v23 = vmax.f32 %v935_v8, 0.0  ;;  %v809_v26 = vadd.f32 %v3400_v11, %v738_v13  ;;  %v2157_v27 = vpop.f32.mrb[52].mxu0  ;;  %1783 = vst [vmem:[%s3922_s10 + $0x160] sm:$0xff] %v2362_v21  ;;  %2371 = vtanh.f32 %v1662_v14  ;;  %v1593_v28 = vmul.f32 %v3413_v15, %v1480_v17  ;;  %v1140_v13 = vld [vmem:[%s3915_s4 + $0x1d8] sm:$0xff] }
 0x143   :  { %1065 = vst.msk [vmem:[%s3921_s9 + $0x188] sm:$0xff] %vm1015_vm2, %v1000_v16  ;;  %v938_v29 = vadd.f32 %v874_v10, %v810_v19  ;;  %v741_v31 = vmul.f32 %v3377_v61, %v2157_v27  ;;  %v622_v32 = vpop.f32.mrb[53].mxu0  ;;  %2373 = vtanh.f32 %v1661_v22  ;;  %v1592_v33 = vmul.f32 %v3413_v15, %v1475_v24  ;;  %v2258_v34 = vpop.f32.mrb[54].mxu1  ;;  %v880_v24 = vld [vmem:[%s3920_s3 + $0x1c8] sm:$0xff] }
 0x144   :  { %1064 = vst.msk [vmem:[%s3921_s9 + $0x180] sm:$0xff] %vm1015_vm2, %v999_v23  ;;  %v937_v35 = vadd.f32 %v873_v20, %v809_v26  ;;  %v740_v37 = vmul.f32 %v3377_v61, %v622_v32  ;;  %v2364_v38 = vpop.eup %2363  ;;  %v1664_v39 = vadd.f32 %v3391_v7, %v1593_v28  ;;  %v1490_v41 = vadd.f32 %v2258_v34, %v1136_v25  ;;  %v1484_v42 = vpop.f32.mrb[55].mxu1  ;;  %v879_v32 = vld [vmem:[%s3920_s3 + $0x1c0] sm:$0xff] }
 0x145   :  { %v1002_v40 = vmax.f32 %v938_v29, 0.0  ;;  %v812_v43 = vadd.f32 %v3400_v11, %v741_v31  ;;  %v2366_v45 = vpop.eup %2365  ;;  %1786 = vst [vmem:[%s3922_s10 + $0x178] sm:$0xff] %v2364_v38  ;;  %v1663_v46 = vadd.f32 %v3391_v7, %v1592_v33  ;;  %v1485_v48 = vadd.f32 %v1484_v42, %v1135_v30  ;;  %v1141_v42 = vld [vmem:[%s3915_s4 + $0x1e0] sm:$0xff] }
 0x146   :  { %v1001_v47 = vmax.f32 %v937_v35, 0.0  ;;  %v811_v50 = vadd.f32 %v3400_v11, %v740_v37  ;;  %v2160_v51 = vpop.f32.mrb[54].mxu0  ;;  %1785 = vst [vmem:[%s3922_s10 + $0x170] sm:$0xff] %v2366_v45  ;;  %2375 = vtanh.f32 %v1664_v39  ;;  %v1595_v52 = vmul.f32 %v3413_v15, %v1490_v41  ;;  %v1142_v37 = vld [vmem:[%s3915_s4 + $0x1e8] sm:$0xff] }
 0x147   :  { %1067 = vst.msk [vmem:[%s3921_s9 + $0x198] sm:$0xff] %vm1015_vm2, %v1002_v40  ;;  %v940_v53 = vadd.f32 %v876_v36, %v812_v43  ;;  %v743_v55 = vmul.f32 %v3377_v61, %v2160_v51  ;;  %v632_v56 = vpop.f32.mrb[55].mxu0  ;;  %2377 = vtanh.f32 %v1663_v46  ;;  %v1594_v57 = vmul.f32 %v3413_v15, %v1485_v48  ;;  %v2261_v58 = vpop.f32.mrb[56].mxu1  ;;  %v882_v48 = vld [vmem:[%s3920_s3 + $0x1d8] sm:$0xff] }
 0x148   :  { %1066 = vst.msk [vmem:[%s3921_s9 + $0x190] sm:$0xff] %vm1015_vm2, %v1001_v47  ;;  %v939_v59 = vadd.f32 %v875_v44, %v811_v50  ;;  %v742_v6 = vmul.f32 %v3377_v61, %v632_v56  ;;  %v2368_v62 = vpop.eup %2367  ;;  %v1666_v63 = vadd.f32 %v3391_v7, %v1595_v52  ;;  %v1500_v1 = vadd.f32 %v2261_v58, %v1138_v49  ;;  %v1494_v2 = vpop.f32.mrb[57].mxu1  ;;  %v881_v56 = vld [vmem:[%s3920_s3 + $0x1d0] sm:$0xff] }
 0x149   :  { %v1004_v0 = vmax.f32 %v940_v53, 0.0  ;;  %v814_v5 = vadd.f32 %v3400_v11, %v743_v55  ;;  %v2370_v4 = vpop.eup %2369  ;;  %1788 = vst [vmem:[%s3922_s10 + $0x188] sm:$0xff] %v2368_v62  ;;  %v1665_v9 = vadd.f32 %v3391_v7, %v1594_v57  ;;  %v1495_v10 = vadd.f32 %v1494_v2, %v1137_v54  ;;  %v1143_v2 = vld [vmem:[%s3915_s4 + $0x1f0] sm:$0xff] }
 0x14a   :  { %v1003_v8 = vmax.f32 %v939_v59, 0.0  ;;  %v813_v12 = vadd.f32 %v3400_v11, %v742_v6  ;;  %v2163_v14 = vpop.f32.mrb[56].mxu0  ;;  %1787 = vst [vmem:[%s3922_s10 + $0x180] sm:$0xff] %v2370_v4  ;;  %2379 = vtanh.f32 %v1666_v63  ;;  %v1597_v16 = vmul.f32 %v3413_v15, %v1500_v1  ;;  %v1144_v6 = vld [vmem:[%s3915_s4 + $0x1f8] sm:$0xff] }
 0x14b   :  { %1069 = vst.msk [vmem:[%s3921_s9 + $0x1a8] sm:$0xff] %vm1015_vm2, %v1004_v0  ;;  %v942_v17 = vadd.f32 %v878_v60, %v814_v5  ;;  %v745_v19 = vmul.f32 %v3377_v61, %v2163_v14  ;;  %v642_v20 = vpop.f32.mrb[57].mxu0  ;;  %2381 = vtanh.f32 %v1665_v9  ;;  %v1596_v21 = vmul.f32 %v3413_v15, %v1495_v10  ;;  %v2264_v22 = vpop.f32.mrb[58].mxu1  ;;  %v884_v10 = vld [vmem:[%s3920_s3 + $0x1e8] sm:$0xff] }
 0x14c   :  { %1068 = vst.msk [vmem:[%s3921_s9 + $0x1a0] sm:$0xff] %vm1015_vm2, %v1003_v8  ;;  %v941_v23 = vadd.f32 %v877_v3, %v813_v12  ;;  %v744_v25 = vmul.f32 %v3377_v61, %v642_v20  ;;  %v2372_v26 = vpop.eup %2371  ;;  %v1668_v27 = vadd.f32 %v3391_v7, %v1597_v16  ;;  %v1510_v29 = vadd.f32 %v2264_v22, %v1140_v13  ;;  %v1504_v30 = vpop.f32.mrb[59].mxu1  ;;  %v883_v20 = vld [vmem:[%s3920_s3 + $0x1e0] sm:$0xff] }
 0x14d   :  { %v1006_v28 = vmax.f32 %v942_v17, 0.0  ;;  %v816_v31 = vadd.f32 %v3400_v11, %v745_v19  ;;  %v2374_v33 = vpop.eup %2373  ;;  %1790 = vst [vmem:[%s3922_s10 + $0x198] sm:$0xff] %v2372_v26  ;;  %v1667_v34 = vadd.f32 %v3391_v7, %v1596_v21  ;;  %v1505_v36 = vadd.f32 %v1504_v30, %v1139_v18 }
 0x14e   :  { %v1005_v35 = vmax.f32 %v941_v23, 0.0  ;;  %v815_v38 = vadd.f32 %v3400_v11, %v744_v25  ;;  %v2166_v39 = vpop.f32.mrb[58].mxu0  ;;  %1789 = vst [vmem:[%s3922_s10 + $0x190] sm:$0xff] %v2374_v33  ;;  %2383 = vtanh.f32 %v1668_v27  ;;  %v1599_v40 = vmul.f32 %v3413_v15, %v1510_v29  ;;  %v886_v33 = vld [vmem:[%s3920_s3 + $0x1f8] sm:$0xff] }
 0x14f   :  { %1071 = vst.msk [vmem:[%s3921_s9 + $0x1b8] sm:$0xff] %vm1015_vm2, %v1006_v28  ;;  %v944_v41 = vadd.f32 %v880_v24, %v816_v31  ;;  %v747_v43 = vmul.f32 %v3377_v61, %v2166_v39  ;;  %v652_v44 = vpop.f32.mrb[59].mxu0  ;;  %2385 = vtanh.f32 %v1667_v34  ;;  %v1598_v45 = vmul.f32 %v3413_v15, %v1505_v36  ;;  %v2267_v46 = vpop.f32.mrb[60].mxu1  ;;  %v885_v39 = vld [vmem:[%s3920_s3 + $0x1f0] sm:$0xff] }
 0x150   :  { %1070 = vst.msk [vmem:[%s3921_s9 + $0x1b0] sm:$0xff] %vm1015_vm2, %v1005_v35  ;;  %v943_v47 = vadd.f32 %v879_v32, %v815_v38  ;;  %v746_v49 = vmul.f32 %v3377_v61, %v652_v44  ;;  %v2376_v50 = vpop.eup %2375  ;;  %v1670_v51 = vadd.f32 %v3391_v7, %v1599_v40  ;;  %v1520_v53 = vadd.f32 %v2267_v46, %v1142_v37  ;;  %v1514_v54 = vpop.f32.mrb[61].mxu1 }
 0x151   :  { %v1008_v52 = vmax.f32 %v944_v41, 0.0  ;;  %v818_v55 = vadd.f32 %v3400_v11, %v747_v43  ;;  %v2378_v57 = vpop.eup %2377  ;;  %1792 = vst [vmem:[%s3922_s10 + $0x1a8] sm:$0xff] %v2376_v50  ;;  %v1669_v58 = vadd.f32 %v3391_v7, %v1598_v45  ;;  %v1515_v60 = vadd.f32 %v1514_v54, %v1141_v42 }
 0x152   :  { %v1007_v59 = vmax.f32 %v943_v47, 0.0  ;;  %v817_v62 = vadd.f32 %v3400_v11, %v746_v49  ;;  %v2169_v63 = vpop.f32.mrb[60].mxu0  ;;  %1791 = vst [vmem:[%s3922_s10 + $0x1a0] sm:$0xff] %v2378_v57  ;;  %2387 = vtanh.f32 %v1670_v51  ;;  %v1601_v0 = vmul.f32 %v3413_v15, %v1520_v53 }
 0x153   :  { %1073 = vst.msk [vmem:[%s3921_s9 + $0x1c8] sm:$0xff] %vm1015_vm2, %v1008_v52  ;;  %v946_v1 = vadd.f32 %v882_v48, %v818_v55  ;;  %v749_v5 = vmul.f32 %v3377_v61, %v2169_v63  ;;  %v662_v3 = vpop.f32.mrb[61].mxu0  ;;  %2389 = vtanh.f32 %v1669_v58  ;;  %v1600_v4 = vmul.f32 %v3413_v15, %v1515_v60  ;;  %v2270_v9 = vpop.f32.mrb[62].mxu1 }
 0x154   :  { %1072 = vst.msk [vmem:[%s3921_s9 + $0x1c0] sm:$0xff] %vm1015_vm2, %v1007_v59  ;;  %v945_v8 = vadd.f32 %v881_v56, %v817_v62  ;;  %v748_v13 = vmul.f32 %v3377_v61, %v662_v3  ;;  %v2380_v12 = vpop.eup %2379  ;;  %v1672_v14 = vadd.f32 %v3391_v7, %v1601_v0  ;;  %v1530_v17 = vadd.f32 %v2270_v9, %v1144_v6  ;;  %v1524_v18 = vpop.f32.mrb[63].mxu1 }
 0x155   :  { %v1010_v16 = vmax.f32 %v946_v1, 0.0  ;;  %v820_v19 = vadd.f32 %v3400_v11, %v749_v5  ;;  %v2382_v21 = vpop.eup %2381  ;;  %1794 = vst [vmem:[%s3922_s10 + $0x1b8] sm:$0xff] %v2380_v12  ;;  %v1671_v22 = vadd.f32 %v3391_v7, %v1600_v4  ;;  %v1525_v24 = vadd.f32 %v1524_v18, %v1143_v2 }
 0x156   :  { %v1009_v23 = vmax.f32 %v945_v8, 0.0  ;;  %v819_v25 = vadd.f32 %v3400_v11, %v748_v13  ;;  %v2172_v26 = vpop.f32.mrb[62].mxu0  ;;  %1793 = vst [vmem:[%s3922_s10 + $0x1b0] sm:$0xff] %v2382_v21  ;;  %2391 = vtanh.f32 %v1672_v14  ;;  %v1603_v27 = vmul.f32 %v3413_v15, %v1530_v17 }
 0x157   :  { %1075 = vst.msk [vmem:[%s3921_s9 + $0x1d8] sm:$0xff] %vm1015_vm2, %v1010_v16  ;;  %v948_v28 = vadd.f32 %v884_v10, %v820_v19  ;;  %v751_v29 = vmul.f32 %v3377_v61, %v2172_v26  ;;  %v672_v30 = vpop.f32.mrb[63].mxu0  ;;  %2393 = vtanh.f32 %v1671_v22  ;;  %v1602_v31 = vmul.f32 %v3413_v15, %v1525_v24 }
 0x158   :  { %1074 = vst.msk [vmem:[%s3921_s9 + $0x1d0] sm:$0xff] %vm1015_vm2, %v1009_v23  ;;  %v947_v32 = vadd.f32 %v883_v20, %v819_v25  ;;  %v750_v34 = vmul.f32 %v3377_v61, %v672_v30  ;;  %v2384_v35 = vpop.eup %2383  ;;  %v1674_v36 = vadd.f32 %v3391_v7, %v1603_v27 }
 0x159   :  { %v1012_v37 = vmax.f32 %v948_v28, 0.0  ;;  %v822_v38 = vadd.f32 %v3400_v11, %v751_v29  ;;  %v2386_v40 = vpop.eup %2385  ;;  %1796 = vst [vmem:[%s3922_s10 + $0x1c8] sm:$0xff] %v2384_v35  ;;  %v1673_v15 = vadd.f32 %v3391_v7, %v1602_v31 }
 0x15a   :  { %v1011_v41 = vmax.f32 %v947_v32, 0.0  ;;  %v821_v61 = vadd.f32 %v3400_v11, %v750_v34  ;;  %1795 = vst [vmem:[%s3922_s10 + $0x1c0] sm:$0xff] %v2386_v40  ;;  %2395 = vtanh.f32 %v1674_v36 }
 0x15b   :  { %1077 = vst.msk [vmem:[%s3921_s9 + $0x1e8] sm:$0xff] %vm1015_vm2, %v1012_v37  ;;  %v950_v42 = vadd.f32 %v886_v33, %v822_v38  ;;  %2397 = vtanh.f32 %v1673_v15 }
 0x15c   :  { %1076 = vst.msk [vmem:[%s3921_s9 + $0x1e0] sm:$0xff] %vm1015_vm2, %v1011_v41  ;;  %v949_v7 = vadd.f32 %v885_v39, %v821_v61  ;;  %v2388_v43 = vpop.eup %2387 }
 0x15d   :  { %v1014_v11 = vmax.f32 %v950_v42, 0.0  ;;  %v2390_v44 = vpop.eup %2389  ;;  %1798 = vst [vmem:[%s3922_s10 + $0x1d8] sm:$0xff] %v2388_v43 }
 0x15e   :  { %v1013_v45 = vmax.f32 %v949_v7, 0.0  ;;  %1797 = vst [vmem:[%s3922_s10 + $0x1d0] sm:$0xff] %v2390_v44 }
 0x15f   :  { %1079 = vst.msk [vmem:[%s3921_s9 + $0x1f8] sm:$0xff] %vm1015_vm2, %v1014_v11 }
 0x160   :  { %1078 = vst.msk [vmem:[%s3921_s9 + $0x1f0] sm:$0xff] %vm1015_vm2, %v1013_v45  ;;  %v2392_v46 = vpop.eup %2391 }
 0x161   :  { %v2394_v47 = vpop.eup %2393  ;;  %1800 = vst [vmem:[%s3922_s10 + $0x1e8] sm:$0xff] %v2392_v46 }
 0x162   :  { %1799 = vst [vmem:[%s3922_s10 + $0x1e0] sm:$0xff] %v2394_v47 }
 0x164   :  { %v2396_v48 = vpop.eup %2395 }
 0x165   :  { %v2398_v49 = vpop.eup %2397  ;;  %1802 = vst [vmem:[%s3922_s10 + $0x1f8] sm:$0xff] %v2396_v48 }
 0x166   :  { %1801 = vst [vmem:[%s3922_s10 + $0x1f0] sm:$0xff] %v2398_v49 }

// kernel: rlaus_bottleneck_forward.7
= control target key start
LH: loop header
LB: loop body
LE: loop exit
PB: predicated region body
PF: predicated region fallthrough
CT: control target
= control target key end

     0   :  { %s5486_s15 = smov 0   ;;  %s5488_s16 = smov 0   ;;  %s6687_s0 = inlined_call_operand.vmem [shape: f32[2,342,128], index: 0, kind: input, shape index: {}]   ;;  %s6688_s1 = inlined_call_operand.vmem [shape: f32[9,128,128], index: 1, kind: input, shape index: {}]   ;;  %s6689_s2 = inlined_call_operand.vmem [shape: f32[1,128], index: 2, kind: input, shape index: {}]   ;;  %s6690_s3 = inlined_call_operand.vmem [shape: f32[1,128], index: 3, kind: input, shape index: {}]   ;;  %s6691_s4 = inlined_call_operand.vmem [shape: f32[2,288,128], index: 4, kind: output, shape index: {}]  }
   0x1   :  { %s5490_s17 = smov 0  }
   0x2 LB: > { %s26_s18 = sadd.s32 1, %s5455_s16  ;;  %p3442_p0 = scmp.ge.s32.totalorder %s5459_s17, 1  ;;  %s5459_s17 = sphi %s5490_s17, %s14_s17   ;;  %s5455_s16 = sphi %s5488_s16, %s6693_s16   ;;  %s5451_s15 = sphi %s5486_s15, %s6692_s15  }
   0x3   : > { %p28_p1 = scmp.ge.s32.totalorder %s26_s18, 2  ;;  %p201_p2 = scmp.lt.s32.totalorder %s5459_s17, 3 }
   0x5   : > { %s6695_s18 = smov (%p28_p1, %s26_s18), 0  ;;  %p202_p3 = pnand %p3442_p0, %p201_p2 }
   0x6   : > { %v3445_v0 = vld [vmem:[%s6688_s1 + $0x80] sm:$0xff] (!%p202_p3)  ;;  %v3446_v1 = vld [vmem:[%s6688_s1 + $0x88] sm:$0xff] (!%p202_p3)  ;;  %p240_p4 = scmp.lt.s32.totalorder (!%p202_p3), %s5451_s15, 1  ;;  %v3447_v5 = vld [vmem:[%s6688_s1 + $0x90] sm:$0xff] (!%p202_p3) }
   0x7   : > { %205 = sbr.rel (%p202_p3) target bundleno = 583 (0x247), region = 36  ;;  %v3493_v2 = vld [vmem:[%s6688_s1 + $0x200] sm:$0xff] (!%p202_p3)  ;;  %v4819_v3 = vpack.c.bf16 (!%p202_p3), %v3446_v1, %v3445_v0  ;;  %v3494_v4 = vld [vmem:[%s6688_s1 + $0x208] sm:$0xff] (!%p202_p3)  ;;  %v3448_v6 = vld [vmem:[%s6688_s1 + $0x98] sm:$0xff] (!%p202_p3) }
   0x8   : > { %v5522_v7 = vpack.c.bf16 (!%p202_p3), %v3494_v4, %v3493_v2  ;;  %v4823_v8 = vpack.c.bf16 (!%p202_p3), %v3448_v6, %v3447_v5  ;;  %v3495_v9 = vld [vmem:[%s6688_s1 + $0x210] sm:$0xff] (!%p202_p3)  ;;  %v3496_v10 = vld [vmem:[%s6688_s1 + $0x218] sm:$0xff] (!%p202_p3)  ;;  %v3449_v11 = vld [vmem:[%s6688_s1 + $0xa0] sm:$0xff] (!%p202_p3) }
   0x9   : > { %4820 = vmatprep.subr.bf16.mxu1 (!%p202_p3), %v4819_v3  ;;  %v5535_v12 = vpack.c.bf16 (!%p202_p3), %v3496_v10, %v3495_v9  ;;  %v3450_v13 = vld [vmem:[%s6688_s1 + $0xa8] sm:$0xff] (!%p202_p3)  ;;  %v3497_v14 = vld [vmem:[%s6688_s1 + $0x220] sm:$0xff] (!%p202_p3)  ;;  %v3451_v18 = vld [vmem:[%s6688_s1 + $0xb0] sm:$0xff] (!%p202_p3) }
   0xa   : > { %v3498_v15 = vld [vmem:[%s6688_s1 + $0x228] sm:$0xff] (!%p202_p3)  ;;  %4948 = vmatprep.subr.bf16.mxu0 (!%p202_p3), %v5522_v7  ;;  %4822 = vmatpush3.bf16.msra.mxu1 (!%p202_p3), %v4819_v3  ;;  %v4827_v16 = vpack.c.bf16 (!%p202_p3), %v3450_v13, %v3449_v11  ;;  %v3452_v19 = vld [vmem:[%s6688_s1 + $0xb8] sm:$0xff] (!%p202_p3)  ;;  %v3499_v20 = vld [vmem:[%s6688_s1 + $0x230] sm:$0xff] (!%p202_p3) }
   0xb   : > { %4950 = vmatpush3.bf16.msra.mxu0 (!%p202_p3), %v5522_v7  ;;  %4824 = vmatprep.subr.bf16.mxu1 (!%p202_p3), %v4823_v8  ;;  %v5550_v17 = vpack.c.bf16 (!%p202_p3), %v3498_v15, %v3497_v14  ;;  %v3500_v21 = vld [vmem:[%s6688_s1 + $0x238] sm:$0xff] (!%p202_p3)  ;;  %v4831_v22 = vpack.c.bf16 (!%p202_p3), %v3452_v19, %v3451_v18  ;;  %v3453_v24 = vld [vmem:[%s6688_s1 + $0xc0] sm:$0xff] (!%p202_p3)  ;;  %v3454_v25 = vld [vmem:[%s6688_s1 + $0xc8] sm:$0xff] (!%p202_p3) }
   0xc   : > { %4952 = vmatprep.subr.bf16.mxu0 (!%p202_p3), %v5535_v12  ;;  %v5571_v23 = vpack.c.bf16 (!%p202_p3), %v3500_v21, %v3499_v20  ;;  %v3501_v27 = vld [vmem:[%s6688_s1 + $0x240] sm:$0xff] (!%p202_p3)  ;;  %v3502_v28 = vld [vmem:[%s6688_s1 + $0x248] sm:$0xff] (!%p202_p3)  ;;  %v4835_v30 = vpack.c.bf16 (!%p202_p3), %v3454_v25, %v3453_v24  ;;  %v3455_v32 = vld [vmem:[%s6688_s1 + $0xd0] sm:$0xff] (!%p202_p3) }
   0xd   : > { %v5589_v31 = vpack.c.bf16 (!%p202_p3), %v3502_v28, %v3501_v27  ;;  %v3456_v33 = vld [vmem:[%s6688_s1 + $0xd8] sm:$0xff] (!%p202_p3)  ;;  %v3503_v34 = vld [vmem:[%s6688_s1 + $0x250] sm:$0xff] (!%p202_p3)  ;;  %v3457_v38 = vld [vmem:[%s6688_s1 + $0xe0] sm:$0xff] (!%p202_p3) }
   0xe   : > { %s6697_s15 = smov (!%p240_p4, %s5451_s15), 1  ;;  %4826 = vmatpush3.bf16.msra.mxu1 %v4823_v8  ;;  %v3504_v35 = vld [vmem:[%s6688_s1 + $0x258] sm:$0xff]  ;;  %v4839_v36 = vpack.c.bf16 %v3456_v33, %v3455_v32  ;;  %v3458_v39 = vld [vmem:[%s6688_s1 + $0xe8] sm:$0xff]  ;;  %v3505_v40 = vld [vmem:[%s6688_s1 + $0x260] sm:$0xff] }
   0xf   : > { %s5411_s21 = smul.u32 344, %s6697_s15  ;;  %4954 = vmatpush3.bf16.msra.mxu0 %v5535_v12  ;;  %4828 = vmatprep.subr.bf16.mxu1 %v4827_v16  ;;  %v5605_v37 = vpack.c.bf16 %v3504_v35, %v3503_v34  ;;  %v3506_v41 = vld [vmem:[%s6688_s1 + $0x268] sm:$0xff]  ;;  %v4843_v42 = vpack.c.bf16 %v3458_v39, %v3457_v38  ;;  %v3459_v44 = vld [vmem:[%s6688_s1 + $0xf0] sm:$0xff]  ;;  %v3460_v45 = vld [vmem:[%s6688_s1 + $0xf8] sm:$0xff] }
  0x10   : > { %4956 = vmatprep.subr.bf16.mxu0 %v5550_v17  ;;  %v5621_v43 = vpack.c.bf16 %v3506_v41, %v3505_v40  ;;  %v3507_v46 = vld [vmem:[%s6688_s1 + $0x270] sm:$0xff]  ;;  %v3508_v47 = vld [vmem:[%s6688_s1 + $0x278] sm:$0xff]  ;;  %v4847_v48 = vpack.c.bf16 %v3460_v45, %v3459_v44  ;;  %v299_v50 = vld [vmem:[%s6688_s1] sm:$0xff] }
  0x11   : > { %s5567_s6 = scalar_lea.vmem %s6687_s0, %s5411_s21  ;;  %v5637_v49 = vpack.c.bf16 %v3508_v47, %v3507_v46  ;;  %v300_v51 = vld [vmem:[%s6688_s1 + $0x8] sm:$0xff]  ;;  %v3509_v52 = vld [vmem:[%s6688_s1 + $0x280] sm:$0xff]  ;;  %v3511_v56 = vld [vmem:[%s6688_s1 + $0x290] sm:$0xff] }
  0x12   : > { %v315_v26 = vld [vmem:[%s5567_s6 + $0x1] sm:$0xff]  ;;  %v1526_v29 = vld [vmem:[%s5567_s6 + $0x13] sm:$0xff]  ;;  %4830 = vmatpush3.bf16.msra.mxu1 %v4827_v16  ;;  %v4851_v54 = vpack.c.bf16 %v300_v51, %v299_v50  ;;  %v316_v58 = vld [vmem:[%s5567_s6 + $0x9] sm:$0xff] }
  0x13   : > { %4077 = vmatprep.mubr.f32.mxu1 %v315_v26  ;;  %4421 = vmatprep.mubr.f32.mxu0 %v1526_v29  ;;  %v3510_v53 = vld [vmem:[%s6688_s1 + $0x288] sm:$0xff]  ;;  %v3512_v57 = vld [vmem:[%s6688_s1 + $0x298] sm:$0xff]  ;;  %v301_v59 = vld [vmem:[%s6688_s1 + $0x10] sm:$0xff] }
  0x14   : > { %4958 = vmatpush3.bf16.msra.mxu0 %v5550_v17  ;;  %4832 = vmatprep.subr.bf16.mxu1 %v4831_v22  ;;  %v4979_v55 = vpack.c.bf16 %v3510_v53, %v3509_v52  ;;  %v302_v60 = vld [vmem:[%s6688_s1 + $0x18] sm:$0xff]  ;;  %v4983_v63 = vpack.c.bf16 %v3512_v57, %v3511_v56  ;;  %v1528_v0 = vld [vmem:[%s5567_s6 + $0x23] sm:$0xff]  ;;  %v1529_v8 = vld [vmem:[%s5567_s6 + $0x2b] sm:$0xff] }
  0x15   : > { %4960 = vmatprep.subr.bf16.mxu0 %v5571_v23  ;;  %v1527_v61 = vld [vmem:[%s5567_s6 + $0x1b] sm:$0xff]  ;;  %v317_v62 = vld [vmem:[%s5567_s6 + $0x11] sm:$0xff]  ;;  %v4855_v1 = vpack.c.bf16 %v302_v60, %v301_v59  ;;  %v3514_v3 = vld [vmem:[%s6688_s1 + $0x2a8] sm:$0xff] }
  0x16   : > { %4834 = vmatpush3.bf16.msra.mxu1 %v4831_v22  ;;  %v3513_v2 = vld [vmem:[%s6688_s1 + $0x2a0] sm:$0xff]  ;;  %v304_v6 = vld [vmem:[%s6688_s1 + $0x28] sm:$0xff]  ;;  %v1530_v10 = vld [vmem:[%s5567_s6 + $0x33] sm:$0xff] }
  0x17   : > { %4836 = vmatprep.subr.bf16.mxu1 %v4835_v30  ;;  %v318_v4 = vld [vmem:[%s5567_s6 + $0x19] sm:$0xff]  ;;  %v319_v9 = vld [vmem:[%s5567_s6 + $0x21] sm:$0xff]  ;;  %v4987_v11 = vpack.c.bf16 %v3514_v3, %v3513_v2  ;;  %v3515_v13 = vld [vmem:[%s6688_s1 + $0x2b0] sm:$0xff] }
  0x18   : > { %4962 = vmatpush3.bf16.msra.mxu0 %v5571_v23  ;;  %v303_v5 = vld [vmem:[%s6688_s1 + $0x20] sm:$0xff]  ;;  %v3516_v14 = vld [vmem:[%s6688_s1 + $0x2b8] sm:$0xff]  ;;  %v320_v16 = vld [vmem:[%s5567_s6 + $0x29] sm:$0xff] }
  0x19   : > { %4964 = vmatprep.subr.bf16.mxu0 %v5589_v31  ;;  %v4859_v15 = vpack.c.bf16 %v304_v6, %v303_v5  ;;  %v305_v18 = vld [vmem:[%s6688_s1 + $0x30] sm:$0xff]  ;;  %v306_v19 = vld [vmem:[%s6688_s1 + $0x38] sm:$0xff]  ;;  %v1532_v22 = vld [vmem:[%s5567_s6 + $0x43] sm:$0xff]  ;;  %v4991_v24 = vpack.c.bf16 %v3516_v14, %v3515_v13 }
  0x1a   : > { %4838 = vmatpush3.bf16.msra.mxu1 %v4835_v30  ;;  %v1531_v20 = vld [vmem:[%s5567_s6 + $0x3b] sm:$0xff]  ;;  %v321_v21 = vld [vmem:[%s5567_s6 + $0x31] sm:$0xff]  ;;  %v3518_v26 = vld [vmem:[%s6688_s1 + $0x2c8] sm:$0xff]  ;;  %v4863_v27 = vpack.c.bf16 %v306_v19, %v305_v18 }
  0x1b   : > { %4840 = vmatprep.subr.bf16.mxu1 %v4839_v36  ;;  %v3517_v25 = vld [vmem:[%s6688_s1 + $0x2c0] sm:$0xff]  ;;  %v308_v30 = vld [vmem:[%s6688_s1 + $0x48] sm:$0xff]  ;;  %v1534_v34 = vld [vmem:[%s5567_s6 + $0x53] sm:$0xff] }
  0x1c   : > { %4966 = vmatpush3.bf16.msra.mxu0 %v5589_v31  ;;  %v322_v28 = vld [vmem:[%s5567_s6 + $0x39] sm:$0xff]  ;;  %v1533_v32 = vld [vmem:[%s5567_s6 + $0x4b] sm:$0xff]  ;;  %v323_v33 = vld [vmem:[%s5567_s6 + $0x41] sm:$0xff]  ;;  %v4995_v35 = vpack.c.bf16 %v3518_v26, %v3517_v25 }
  0x1d   : > { %4968 = vmatprep.subr.bf16.mxu0 %v5605_v37  ;;  %v307_v29 = vld [vmem:[%s6688_s1 + $0x40] sm:$0xff]  ;;  %v3520_v38 = vld [vmem:[%s6688_s1 + $0x2d8] sm:$0xff]  ;;  %v324_v40 = vld [vmem:[%s5567_s6 + $0x49] sm:$0xff] }
  0x1e   : > { %4842 = vmatpush3.bf16.msra.mxu1 %v4839_v36  ;;  %v3519_v36 = vld [vmem:[%s6688_s1 + $0x2d0] sm:$0xff]  ;;  %v4867_v39 = vpack.c.bf16 %v308_v30, %v307_v29  ;;  %v1535_v44 = vld [vmem:[%s5567_s6 + $0x5b] sm:$0xff]  ;;  %v1536_v46 = vld [vmem:[%s5567_s6 + $0x63] sm:$0xff] }
  0x1f   : > { %4844 = vmatprep.subr.bf16.mxu1 %v4843_v42  ;;  %v309_v41 = vld [vmem:[%s6688_s1 + $0x50] sm:$0xff]  ;;  %v4999_v47 = vpack.c.bf16 %v3520_v38, %v3519_v36  ;;  %v3522_v50 = vld [vmem:[%s6688_s1 + $0x2e8] sm:$0xff]  ;;  %v326_v52 = vld [vmem:[%s5567_s6 + $0x59] sm:$0xff] }
  0x20   : > { %4970 = vmatpush3.bf16.msra.mxu0 %v5605_v37  ;;  %v325_v45 = vld [vmem:[%s5567_s6 + $0x51] sm:$0xff]  ;;  %v311_v53 = vld [vmem:[%s6688_s1 + $0x60] sm:$0xff]  ;;  %v3526_v6 = vld [vmem:[%s6688_s1 + $0x308] sm:$0xff] }
  0x21   : > { %4972 = vmatprep.subr.bf16.mxu0 %v5621_v43  ;;  %v327_v56 = vld [vmem:[%s5567_s6 + $0x61] sm:$0xff]  ;;  %v1538_v57 = vld [vmem:[%s5567_s6 + $0x73] sm:$0xff]  ;;  %v1541_v13 = vld [vmem:[%s5567_s6 + $0x8b] sm:$0xff] }
  0x22   : > { %4846 = vmatpush3.bf16.msra.mxu1 %v4843_v42  ;;  %v310_v42 = vld [vmem:[%s6688_s1 + $0x58] sm:$0xff]  ;;  %v3523_v59 = vld [vmem:[%s6688_s1 + $0x2f0] sm:$0xff]  ;;  %v1540_v3 = vld [vmem:[%s5567_s6 + $0x83] sm:$0xff] }
  0x23   : > { %4848 = vmatprep.subr.bf16.mxu1 %v4847_v48  ;;  %v4871_v51 = vpack.c.bf16 %v310_v42, %v309_v41  ;;  %v3524_v60 = vld [vmem:[%s6688_s1 + $0x2f8] sm:$0xff]  ;;  %v3525_v5 = vld [vmem:[%s6688_s1 + $0x300] sm:$0xff]  ;;  %v332_v19 = vld [vmem:[%s5567_s6 + $0x89] sm:$0xff] }
  0x24   : > { %4974 = vmatpush3.bf16.msra.mxu0 %v5621_v43  ;;  %v329_v2 = vld [vmem:[%s5567_s6 + $0x71] sm:$0xff]  ;;  %v331_v14 = vld [vmem:[%s5567_s6 + $0x81] sm:$0xff]  ;;  %v334_v26 = vld [vmem:[%s5567_s6 + $0x99] sm:$0xff] }
  0x25   : > { %4976 = vmatprep.subr.bf16.mxu0 %v5637_v49  ;;  %v3528_v25 = vld [vmem:[%s6688_s1 + $0x318] sm:$0xff]  ;;  %v5799_v29 = vld [vmem:[%s5567_s6 + $0x24] sm:$0xff] }
  0x26   : > { %4850 = vmatpush3.bf16.msra.mxu1 %v4847_v48  ;;  %v3521_v48 = vld [vmem:[%s6688_s1 + $0x2e0] sm:$0xff]  ;;  %v337_v36 = vld [vmem:[%s5567_s6 + $0xb1] sm:$0xff] }
  0x27   : > { %4852 = vmatprep.subr.bf16.mxu1 %v4851_v54  ;;  %v5814_v38 = vld [vmem:[%s5567_s6 + $0x34] sm:$0xff] }
  0x28   : > { %4978 = vmatpush3.bf16.msra.mxu0 %v5637_v49  ;;  %v3532_v41 = vld [vmem:[%s6688_s1 + $0x338] sm:$0xff] }
  0x29   : > { %4980 = vmatprep.subr.bf16.mxu0 %v4979_v55  ;;  %4078 = vmatmul.mubr.f32.vlgmr.msra.gmra.mrb[0].mxu1 %v316_v58  ;;  %v5003_v58 = vpack.c.bf16 %v3522_v50, %v3521_v48  ;;  %v338_v42 = vld [vmem:[%s5567_s6 + $0xb9] sm:$0xff]  ;;  %v3534_v50 = vld [vmem:[%s6688_s1 + $0x348] sm:$0xff] }
  0x2a   : > { %4854 = vmatpush3.bf16.msra.mxu1 %v4851_v54  ;;  %4080 = vmatprep.mubr.f32.mxu1 %v317_v62  ;;  %v312_v54 = vld [vmem:[%s6688_s1 + $0x68] sm:$0xff]  ;;  %v3533_v48 = vld [vmem:[%s6688_s1 + $0x340] sm:$0xff] }
  0x2b   : > { %4422 = vmatmul.mubr.f32.vlgmr.msra.gmra.mrb[0].mxu0 %v1527_v61  ;;  %4856 = vmatprep.subr.bf16.mxu1 %v4855_v1  ;;  %v4875_v61 = vpack.c.bf16 %v312_v54, %v311_v53  ;;  %v328_v62 = vld [vmem:[%s5567_s6 + $0x69] sm:$0xff]  ;;  %v341_v53 = vld [vmem:[%s5567_s6 + $0xd1] sm:$0xff] }
  0x2c   : > { %4982 = vmatpush3.bf16.msra.mxu0 %v4979_v55  ;;  %4424 = vmatprep.mubr.f32.mxu0 %v1528_v0  ;;  %v1537_v55 = vld [vmem:[%s5567_s6 + $0x6b] sm:$0xff]  ;;  %v314_v0 = vld [vmem:[%s6688_s1 + $0x78] sm:$0xff] }
  0x2d   : > { %4984 = vmatprep.subr.bf16.mxu0 %v4983_v63  ;;  %4081 = vmatmul.mubr.f32.gmra.mrb[2].mxu1 %v318_v4  ;;  %v5007_v4 = vpack.c.bf16 %v3524_v60, %v3523_v59  ;;  %v5846_v54 = vld [vmem:[%s5567_s6 + $0x54] sm:$0xff]  ;;  %v5858_v59 = vld [vmem:[%s5567_s6 + $0x5c] sm:$0xff] }
  0x2e   : > { %4083 = vmatprep.mubr.f32.mxu1 %v319_v9  ;;  %4858 = vmatpush3.bf16.msra.mxu1 %v4855_v1  ;;  %v1539_v1 = vld [vmem:[%s5567_s6 + $0x7b] sm:$0xff] }
  0x2f   : > { %4425 = vmatmul.mubr.f32.gmra.mrb[2].mxu0 %v1529_v8  ;;  %4860 = vmatprep.subr.bf16.mxu1 %v4859_v15  ;;  %v330_v9 = vld [vmem:[%s5567_s6 + $0x79] sm:$0xff]  ;;  %v343_v60 = vld [vmem:[%s5567_s6 + $0xe1] sm:$0xff] }
  0x30   : > { %4986 = vmatpush3.bf16.msra.mxu0 %v4983_v63  ;;  %4427 = vmatprep.mubr.f32.mxu0 %v1530_v10  ;;  %v313_v63 = vld [vmem:[%s6688_s1 + $0x70] sm:$0xff]  ;;  %v3461_v10 = vld [vmem:[%s6688_s1 + $0x100] sm:$0xff] }
  0x31   : > { %4988 = vmatprep.subr.bf16.mxu0 %v4987_v11  ;;  %4084 = vmatmul.mubr.f32.gmra.mrb[4].mxu1 %v320_v16  ;;  %v4879_v8 = vpack.c.bf16 %v314_v0, %v313_v63  ;;  %v5011_v16 = vpack.c.bf16 %v3526_v6, %v3525_v5  ;;  %v3537_v63 = vld [vmem:[%s6688_s1 + $0x360] sm:$0xff]  ;;  %v3538_v0 = vld [vmem:[%s6688_s1 + $0x368] sm:$0xff]  ;;  %v3539_v6 = vld [vmem:[%s6688_s1 + $0x370] sm:$0xff] }
  0x32   : > { %4086 = vmatprep.mubr.f32.mxu1 %v321_v21  ;;  %4862 = vmatpush3.bf16.msra.mxu1 %v4859_v15  ;;  %v1542_v15 = vld [vmem:[%s5567_s6 + $0x93] sm:$0xff]  ;;  %v5035_v5 = vpack.c.bf16 %v3538_v0, %v3537_v63  ;;  %v3470_v63 = vld [vmem:[%s6688_s1 + $0x148] sm:$0xff] }
  0x33   : > { %4428 = vmatmul.mubr.f32.gmra.mrb[4].mxu0 %v1531_v20  ;;  %4864 = vmatprep.subr.bf16.mxu1 %v4863_v27  ;;  %v1543_v20 = vld [vmem:[%s5567_s6 + $0x9b] sm:$0xff]  ;;  %v333_v21 = vld [vmem:[%s5567_s6 + $0x91] sm:$0xff] }
  0x34   : > { %4990 = vmatpush3.bf16.msra.mxu0 %v4987_v11  ;;  %4430 = vmatprep.mubr.f32.mxu0 %v1532_v22  ;;  %v3462_v11 = vld [vmem:[%s6688_s1 + $0x108] sm:$0xff]  ;;  %v1860_v22 = vld [vmem:[%s5567_s6 + $0x14] sm:$0xff] }
  0x35   : > { %4992 = vmatprep.subr.bf16.mxu0 %v4991_v24  ;;  %4087 = vmatmul.mubr.f32.gmra.mrb[6].mxu1 %v322_v28  ;;  %v5782_v18 = vpack.c.bf16 %v3462_v11, %v3461_v10  ;;  %v335_v28 = vld [vmem:[%s5567_s6 + $0xa1] sm:$0xff]  ;;  %v270_v0 = vld [vmem:[%s5567_s6 + $0x38] sm:$0xff] }
  0x36   : > { %4089 = vmatprep.mubr.f32.mxu1 %v323_v33  ;;  %4866 = vmatpush3.bf16.msra.mxu1 %v4863_v27  ;;  %v1861_v27 = vld [vmem:[%s5567_s6 + $0x1c] sm:$0xff]  ;;  %v3530_v33 = vld [vmem:[%s6688_s1 + $0x328] sm:$0xff] }
  0x37   : > { %4431 = vmatmul.mubr.f32.gmra.mrb[6].mxu0 %v1533_v32  ;;  %4868 = vmatprep.subr.bf16.mxu1 %v4867_v39  ;;  %v3529_v32 = vld [vmem:[%s6688_s1 + $0x320] sm:$0xff] }
  0x38   : > { %4433 = vmatprep.mubr.f32.mxu0 %v1534_v34  ;;  %4994 = vmatpush3.bf16.msra.mxu0 %v4991_v24  ;;  %v3527_v24 = vld [vmem:[%s6688_s1 + $0x310] sm:$0xff]  ;;  %v5890_v10 = vld [vmem:[%s5567_s6 + $0x7c] sm:$0xff] }
  0x39   : > { %4996 = vmatprep.subr.bf16.mxu0 %v4995_v35  ;;  %4090 = vmatmul.mubr.f32.gmra.mrb[8].mxu1 %v324_v40  ;;  %v5015_v30 = vpack.c.bf16 %v3528_v25, %v3527_v24  ;;  %v336_v34 = vld [vmem:[%s5567_s6 + $0xa9] sm:$0xff]  ;;  %v347_v11 = vld [vmem:[%s5567_s6 + $0x101] sm:$0xff]  ;;  %v350_v25 = vld [vmem:[%s5567_s6 + $0x119] sm:$0xff] }
  0x3a   : > { %4092 = vmatprep.mubr.f32.mxu1 %v325_v45  ;;  %4870 = vmatpush3.bf16.msra.mxu1 %v4867_v39  ;;  %v5019_v39 = vpack.c.bf16 %v3530_v33, %v3529_v32  ;;  %v3531_v40 = vld [vmem:[%s6688_s1 + $0x330] sm:$0xff]  ;;  %v339_v45 = vld [vmem:[%s5567_s6 + $0xc1] sm:$0xff]  ;;  %v3464_v32 = vld [vmem:[%s6688_s1 + $0x118] sm:$0xff] }
  0x3b   : > { %4434 = vmatmul.mubr.f32.gmra.mrb[8].mxu0 %v1535_v44  ;;  %4872 = vmatprep.subr.bf16.mxu1 %v4871_v51  ;;  %v5826_v44 = vld [vmem:[%s5567_s6 + $0x3c] sm:$0xff]  ;;  %v264_v33 = vld [vmem:[%s5567_s6 + $0x8] sm:$0xff] }
  0x3c   : > { %4436 = vmatprep.mubr.f32.mxu0 %v1536_v46  ;;  %4998 = vmatpush3.bf16.msra.mxu0 %v4995_v35  ;;  %v5810_v35 = vld [vmem:[%s5567_s6 + $0x2c] sm:$0xff]  ;;  %v5830_v46 = vld [vmem:[%s5567_s6 + $0x44] sm:$0xff] }
  0x3d   : > { %5000 = vmatprep.subr.bf16.mxu0 %v4999_v47  ;;  %4093 = vmatmul.mubr.f32.gmra.mrb[10].mxu1 %v326_v52  ;;  %v5842_v52 = vld [vmem:[%s5567_s6 + $0x4c] sm:$0xff] }
  0x3e   : > { %4095 = vmatprep.mubr.f32.mxu1 %v327_v56  ;;  %4874 = vmatpush3.bf16.msra.mxu1 %v4871_v51  ;;  %v340_v51 = vld [vmem:[%s5567_s6 + $0xc9] sm:$0xff] }
  0x3f   : > { %4437 = vmatmul.mubr.f32.gmra.mrb[10].mxu0 %v1537_v55  ;;  %4876 = vmatprep.subr.bf16.mxu1 %v4875_v61  ;;  %v5027_v55 = vpack.c.bf16 %v3534_v50, %v3533_v48  ;;  %v3535_v56 = vld [vmem:[%s6688_s1 + $0x350] sm:$0xff]  ;;  %v267_v48 = vld [vmem:[%s5567_s6 + $0x20] sm:$0xff] }
  0x40   : > { %4439 = vmatprep.mubr.f32.mxu0 %v1538_v57  ;;  %5002 = vmatpush3.bf16.msra.mxu0 %v4999_v47  ;;  %v5023_v47 = vpack.c.bf16 %v3532_v41, %v3531_v40  ;;  %v3536_v57 = vld [vmem:[%s6688_s1 + $0x358] sm:$0xff]  ;;  %v3465_v41 = vld [vmem:[%s6688_s1 + $0x120] sm:$0xff] }
  0x41   : > { %5004 = vmatprep.subr.bf16.mxu0 %v5003_v58  ;;  %4096 = vmatmul.mubr.f32.gmra.mrb[12].mxu1 %v328_v62  ;;  %v5031_v62 = vpack.c.bf16 %v3536_v57, %v3535_v56  ;;  %v5956_v50 = vld [vmem:[%s5567_s6 + $0xc4] sm:$0xff]  ;;  %v5968_v56 = vld [vmem:[%s5567_s6 + $0xcc] sm:$0xff] }
  0x42   : > { %4098 = vmatprep.mubr.f32.mxu1 %v329_v2  ;;  %4878 = vmatpush3.bf16.msra.mxu1 %v4875_v61  ;;  %v5862_v61 = vld [vmem:[%s5567_s6 + $0x64] sm:$0xff]  ;;  %v5874_v2 = vld [vmem:[%s5567_s6 + $0x6c] sm:$0xff] }
  0x43   : > { %4440 = vmatmul.mubr.f32.gmra.mrb[12].mxu0 %v1539_v1  ;;  %4880 = vmatprep.subr.bf16.mxu1 %v4879_v8  ;;  %v344_v1 = vld [vmem:[%s5567_s6 + $0xe9] sm:$0xff] }
  0x44   : > { %4442 = vmatprep.mubr.f32.mxu0 %v1540_v3  ;;  %5006 = vmatpush3.bf16.msra.mxu0 %v5003_v58  ;;  %v342_v58 = vld [vmem:[%s5567_s6 + $0xd9] sm:$0xff]  ;;  %v345_v3 = vld [vmem:[%s5567_s6 + $0xf1] sm:$0xff] }
  0x45   : > { %5008 = vmatprep.subr.bf16.mxu0 %v5007_v4  ;;  %4099 = vmatmul.mubr.f32.gmra.mrb[14].mxu1 %v330_v9  ;;  %v346_v9 = vld [vmem:[%s5567_s6 + $0xf9] sm:$0xff]  ;;  %v269_v57 = vld [vmem:[%s5567_s6 + $0x30] sm:$0xff] }
  0x46   : > { %4101 = vmatprep.mubr.f32.mxu1 %v331_v14  ;;  %4882 = vmatpush3.bf16.msra.mxu1 %v4879_v8  ;;  %v3540_v8 = vld [vmem:[%s6688_s1 + $0x378] sm:$0xff] }
  0x47   : > { %4443 = vmatmul.mubr.f32.gmra.mrb[14].mxu0 %v1541_v13  ;;  %4884 = vmatprep.subr.bf16.mxu1 %v5782_v18  ;;  %v5894_v13 = vld [vmem:[%s5567_s6 + $0x84] sm:$0xff]  ;;  %v5039_v14 = vpack.c.bf16 %v3540_v8, %v3539_v6  ;;  %v3471_v8 = vld [vmem:[%s6688_s1 + $0x150] sm:$0xff] }
  0x48   : > { %4445 = vmatprep.mubr.f32.mxu0 %v1542_v15  ;;  %5010 = vmatpush3.bf16.msra.mxu0 %v5007_v4  ;;  %v5878_v4 = vld [vmem:[%s5567_s6 + $0x74] sm:$0xff]  ;;  %v3541_v15 = vld [vmem:[%s6688_s1 + $0x380] sm:$0xff] }
  0x49   : > { %5012 = vmatprep.subr.bf16.mxu0 %v5011_v16  ;;  %4102 = vmatmul.mubr.f32.gmra.mrb[16].mxu1 %v332_v19  ;;  %v348_v19 = vld [vmem:[%s5567_s6 + $0x109] sm:$0xff] }
  0x4a   : > { %4104 = vmatprep.mubr.f32.mxu1 %v333_v21  ;;  %v349_v21 = vld [vmem:[%s5567_s6 + $0x111] sm:$0xff] }
  0x4b   : > { %4446 = vmatmul.mubr.f32.gmra.mrb[16].mxu0 %v1543_v20  ;;  %v5906_v20 = vld [vmem:[%s5567_s6 + $0x8c] sm:$0xff] }
  0x4c   : > { %4507 = vmatprep.mubr.f32.mxu0 %v1860_v22  ;;  %v5910_v22 = vld [vmem:[%s5567_s6 + $0x94] sm:$0xff] }
  0x4d   : > { %4105 = vmatmul.mubr.f32.gmra.mrb[18].mxu1 %v334_v26  ;;  %v5918_v26 = vld [vmem:[%s5567_s6 + $0x9c] sm:$0xff] }
  0x4e   : > { %4107 = vmatprep.mubr.f32.mxu1 %v335_v28  ;;  %v5922_v28 = vld [vmem:[%s5567_s6 + $0xa4] sm:$0xff] }
  0x4f   : > { %4508 = vmatmul.mubr.f32.vlgmr.msra.gmra.mrb[0].mxu0 %v1861_v27  ;;  %v263_v27 = vld [vmem:[%s5567_s6] sm:$0xff] }
  0x50   : > { %5014 = vmatpush3.bf16.msra.mxu0 %v5011_v16  ;;  %4510 = vmatprep.mubr.f32.mxu0 %v5799_v29  ;;  %v3542_v16 = vld [vmem:[%s6688_s1 + $0x388] sm:$0xff] }
  0x51   : > { %5016 = vmatprep.subr.bf16.mxu0 %v5015_v30  ;;  %4108 = vmatmul.mubr.f32.gmra.mrb[20].mxu1 %v336_v34  ;;  %v5912_v24 = vpack.c.bf16 %v3542_v16, %v3541_v15  ;;  %v5935_v34 = vld [vmem:[%s5567_s6 + $0xac] sm:$0xff]  ;;  %v6004_v16 = vld [vmem:[%s5567_s6 + $0xf4] sm:$0xff] }
  0x52   : > { %4110 = vmatprep.mubr.f32.mxu1 %v337_v36  ;;  %v265_v36 = vld [vmem:[%s5567_s6 + $0x10] sm:$0xff] }
  0x53   : > { %4511 = vmatmul.mubr.f32.gmra.mrb[2].mxu0 %v5810_v35  ;;  %v273_v15 = vld [vmem:[%s5567_s6 + $0x50] sm:$0xff] }
  0x54   : > { %4513 = vmatprep.mubr.f32.mxu0 %v5814_v38  ;;  %5018 = vmatpush3.bf16.msra.mxu0 %v5015_v30  ;;  %v3463_v30 = vld [vmem:[%s6688_s1 + $0x110] sm:$0xff] }
  0x55   : > { %5020 = vmatprep.subr.bf16.mxu0 %v5019_v39  ;;  %4111 = vmatmul.mubr.f32.gmra.mrb[22].mxu1 %v338_v42  ;;  %v4887_v40 = vpack.c.bf16 %v3464_v32, %v3463_v30  ;;  %v3466_v42 = vld [vmem:[%s6688_s1 + $0x128] sm:$0xff]  ;;  %v6016_v30 = vld [vmem:[%s5567_s6 + $0xfc] sm:$0xff] }
  0x56   : > { %4113 = vmatprep.mubr.f32.mxu1 %v339_v45  ;;  %v266_v45 = vld [vmem:[%s5567_s6 + $0x18] sm:$0xff]  ;;  %v275_v32 = vld [vmem:[%s5567_s6 + $0x60] sm:$0xff] }
  0x57   : > { %4514 = vmatmul.mubr.f32.gmra.mrb[4].mxu0 %v5826_v44 }
  0x58   : > { %4516 = vmatprep.mubr.f32.mxu0 %v5830_v46  ;;  %5022 = vmatpush3.bf16.msra.mxu0 %v5019_v39  ;;  %v5939_v39 = vld [vmem:[%s5567_s6 + $0xb4] sm:$0xff] }
  0x59   : > { %5024 = vmatprep.subr.bf16.mxu0 %v5023_v47  ;;  %4114 = vmatmul.mubr.f32.gmra.mrb[24].mxu1 %v340_v51  ;;  %v4891_v51 = vpack.c.bf16 %v3466_v42, %v3465_v41  ;;  %v3476_v41 = vld [vmem:[%s6688_s1 + $0x178] sm:$0xff]  ;;  %v276_v42 = vld [vmem:[%s5567_s6 + $0x68] sm:$0xff] }
  0x5a   : > { %4116 = vmatprep.mubr.f32.mxu1 %v341_v53  ;;  %v3467_v53 = vld [vmem:[%s6688_s1 + $0x130] sm:$0xff] }
  0x5b   : > { %4517 = vmatmul.mubr.f32.gmra.mrb[6].mxu0 %v5842_v52 }
  0x5c   : > { %4519 = vmatprep.mubr.f32.mxu0 %v5846_v54  ;;  %5026 = vmatpush3.bf16.msra.mxu0 %v5023_v47  ;;  %v5952_v47 = vld [vmem:[%s5567_s6 + $0xbc] sm:$0xff] }
  0x5d   : > { %5028 = vmatprep.subr.bf16.mxu0 %v5027_v55  ;;  %4117 = vmatmul.mubr.f32.gmra.mrb[26].mxu1 %v342_v58  ;;  %v5972_v58 = vld [vmem:[%s5567_s6 + $0xd4] sm:$0xff] }
  0x5e   : > { %4119 = vmatprep.mubr.f32.mxu1 %v343_v60 }
  0x5f   : > { %4520 = vmatmul.mubr.f32.gmra.mrb[8].mxu0 %v5858_v59 }
  0x60   : > { %4522 = vmatprep.mubr.f32.mxu0 %v5862_v61  ;;  %5030 = vmatpush3.bf16.msra.mxu0 %v5027_v55  ;;  %v268_v55 = vld [vmem:[%s5567_s6 + $0x28] sm:$0xff] }
  0x61   : > { %5032 = vmatprep.subr.bf16.mxu0 %v5031_v62  ;;  %4120 = vmatmul.mubr.f32.gmra.mrb[28].mxu1 %v344_v1  ;;  %v5984_v1 = vld [vmem:[%s5567_s6 + $0xdc] sm:$0xff] }
  0x62   : > { %4122 = vmatprep.mubr.f32.mxu1 %v345_v3  ;;  %v271_v3 = vld [vmem:[%s5567_s6 + $0x40] sm:$0xff] }
  0x63   : > { %4523 = vmatmul.mubr.f32.gmra.mrb[10].mxu0 %v5874_v2 }
  0x64   : > { %4525 = vmatprep.mubr.f32.mxu0 %v5878_v4  ;;  %5034 = vmatpush3.bf16.msra.mxu0 %v5031_v62  ;;  %v3469_v62 = vld [vmem:[%s6688_s1 + $0x140] sm:$0xff] }
  0x65   : > { %5036 = vmatprep.subr.bf16.mxu0 %v5035_v5  ;;  %4123 = vmatmul.mubr.f32.gmra.mrb[30].mxu1 %v346_v9  ;;  %v4899_v6 = vpack.c.bf16 %v3470_v63, %v3469_v62  ;;  %v3472_v9 = vld [vmem:[%s6688_s1 + $0x158] sm:$0xff]  ;;  %v279_v62 = vld [vmem:[%s5567_s6 + $0x80] sm:$0xff] }
  0x66   : > { %4125 = vmatprep.mubr.f32.mxu1 %v347_v11  ;;  %v272_v11 = vld [vmem:[%s5567_s6 + $0x48] sm:$0xff] }
  0x67   : > { %4526 = vmatmul.mubr.f32.gmra.mrb[12].mxu0 %v5890_v10  ;;  %v6052_v63 = vld [vmem:[%s5567_s6 + $0x124] sm:$0xff] }
  0x68   : > { %4528 = vmatprep.mubr.f32.mxu0 %v5894_v13  ;;  %5038 = vmatpush3.bf16.msra.mxu0 %v5035_v5  ;;  %v5988_v5 = vld [vmem:[%s5567_s6 + $0xe4] sm:$0xff] }
  0x69   : > { %5040 = vmatprep.subr.bf16.mxu0 %v5039_v14  ;;  %4126 = vmatmul.mubr.f32.gmra.mrb[32].mxu1 %v348_v19  ;;  %v4903_v19 = vpack.c.bf16 %v3472_v9, %v3471_v8  ;;  %v281_v8 = vld [vmem:[%s5567_s6 + $0x90] sm:$0xff] }
  0x6a   : > { %4128 = vmatprep.mubr.f32.mxu1 %v349_v21  ;;  %v3473_v21 = vld [vmem:[%s6688_s1 + $0x160] sm:$0xff]  ;;  %v3543_v9 = vld [vmem:[%s6688_s1 + $0x390] sm:$0xff] }
  0x6b   : > { %4529 = vmatmul.mubr.f32.gmra.mrb[14].mxu0 %v5906_v20 }
  0x6c   : > { %4531 = vmatprep.mubr.f32.mxu0 %v5910_v22  ;;  %5042 = vmatpush3.bf16.msra.mxu0 %v5039_v14  ;;  %v6000_v14 = vld [vmem:[%s5567_s6 + $0xec] sm:$0xff] }
  0x6d   : > { %5044 = vmatprep.subr.bf16.mxu0 %v5912_v24  ;;  %4129 = vmatmul.mubr.f32.gmra.mrb[34].mxu1 %v350_v25  ;;  %v3474_v25 = vld [vmem:[%s6688_s1 + $0x168] sm:$0xff] }
  0x6e   : > { %4163 = vmatprep.mubr.f32.mxu1 %v263_v27  ;;  %v274_v27 = vld [vmem:[%s5567_s6 + $0x58] sm:$0xff] }
  0x6f   : > { %4532 = vmatmul.mubr.f32.gmra.mrb[16].mxu0 %v5918_v26 }
  0x70   : > { %4534 = vmatprep.mubr.f32.mxu0 %v5922_v28 }
  0x71   : > { %4164 = vmatmul.mubr.f32.vlgmr.msra.gmra.mrb[0].mxu1 %v264_v33  ;;  %v6020_v33 = vld [vmem:[%s5567_s6 + $0x104] sm:$0xff] }
  0x72   : > { %4886 = vmatpush3.bf16.msra.mxu1 %v5782_v18  ;;  %4166 = vmatprep.mubr.f32.mxu1 %v265_v36  ;;  %v3468_v18 = vld [vmem:[%s6688_s1 + $0x138] sm:$0xff]  ;;  %v4907_v36 = vpack.c.bf16 %v3474_v25, %v3473_v21  ;;  %v3545_v25 = vld [vmem:[%s6688_s1 + $0x3a0] sm:$0xff] }
  0x73   : > { %4535 = vmatmul.mubr.f32.gmra.mrb[18].mxu0 %v5935_v34  ;;  %4888 = vmatprep.subr.bf16.mxu1 %v4887_v40  ;;  %v4895_v60 = vpack.c.bf16 %v3468_v18, %v3467_v53  ;;  %v3477_v18 = vld [vmem:[%s6688_s1 + $0x180] sm:$0xff] }
  0x74   : > { %4537 = vmatprep.mubr.f32.mxu0 %v5939_v39 }
  0x75   : > { %4167 = vmatmul.mubr.f32.gmra.mrb[2].mxu1 %v266_v45  ;;  %v6032_v45 = vld [vmem:[%s5567_s6 + $0x10c] sm:$0xff] }
  0x76   : > { %4169 = vmatprep.mubr.f32.mxu1 %v267_v48  ;;  %4890 = vmatpush3.bf16.msra.mxu1 %v4887_v40  ;;  %v3475_v40 = vld [vmem:[%s6688_s1 + $0x170] sm:$0xff] }
  0x77   : > { %4538 = vmatmul.mubr.f32.gmra.mrb[20].mxu0 %v5952_v47  ;;  %4892 = vmatprep.subr.bf16.mxu1 %v4891_v51  ;;  %v277_v48 = vld [vmem:[%s5567_s6 + $0x70] sm:$0xff]  ;;  %v4911_v53 = vpack.c.bf16 %v3476_v41, %v3475_v40 }
  0x78   : > { %4540 = vmatprep.mubr.f32.mxu0 %v5956_v50  ;;  %v3547_v40 = vld [vmem:[%s6688_s1 + $0x3b0] sm:$0xff] }
  0x79   : > { %4170 = vmatmul.mubr.f32.gmra.mrb[4].mxu1 %v268_v55  ;;  %v3478_v55 = vld [vmem:[%s6688_s1 + $0x188] sm:$0xff] }
  0x7a   : > { %4172 = vmatprep.mubr.f32.mxu1 %v269_v57  ;;  %4894 = vmatpush3.bf16.msra.mxu1 %v4891_v51  ;;  %v6036_v51 = vld [vmem:[%s5567_s6 + $0x114] sm:$0xff] }
  0x7b   : > { %4541 = vmatmul.mubr.f32.gmra.mrb[22].mxu0 %v5968_v56  ;;  %4896 = vmatprep.subr.bf16.mxu1 %v4895_v60  ;;  %v278_v57 = vld [vmem:[%s5567_s6 + $0x78] sm:$0xff] }
  0x7c   : > { %4543 = vmatprep.mubr.f32.mxu0 %v5972_v58 }
  0x7d   : > { %4173 = vmatmul.mubr.f32.gmra.mrb[6].mxu1 %v270_v0  ;;  %v6054_v0 = vpack.c.bf16 %v3478_v55, %v3477_v18  ;;  %v3551_v18 = vld [vmem:[%s6688_s1 + $0x3d0] sm:$0xff]  ;;  %v3552_v55 = vld [vmem:[%s6688_s1 + $0x3d8] sm:$0xff] }
  0x7e   : > { %4175 = vmatprep.mubr.f32.mxu1 %v271_v3  ;;  %4898 = vmatpush3.bf16.msra.mxu1 %v4895_v60  ;;  %v6048_v60 = vld [vmem:[%s5567_s6 + $0x11c] sm:$0xff]  ;;  %v280_v3 = vld [vmem:[%s5567_s6 + $0x88] sm:$0xff] }
  0x7f   : > { %4544 = vmatmul.mubr.f32.gmra.mrb[24].mxu0 %v5984_v1  ;;  %4900 = vmatprep.subr.bf16.mxu1 %v4899_v6 }
  0x80   : > { %4546 = vmatprep.mubr.f32.mxu0 %v5988_v5 }
  0x81   : > { %4176 = vmatmul.mubr.f32.gmra.mrb[8].mxu1 %v272_v11  ;;  %v3544_v11 = vld [vmem:[%s6688_s1 + $0x398] sm:$0xff] }
  0x82   : > { %4178 = vmatprep.mubr.f32.mxu1 %v273_v15  ;;  %4902 = vmatpush3.bf16.msra.mxu1 %v4899_v6  ;;  %v6060_v6 = vld [vmem:[%s5567_s6 + $0x12c] sm:$0xff]  ;;  %v282_v15 = vld [vmem:[%s5567_s6 + $0x98] sm:$0xff]  ;;  %v5047_v21 = vpack.c.bf16 %v3544_v11, %v3543_v9 }
  0x83   : > { %4547 = vmatmul.mubr.f32.gmra.mrb[26].mxu0 %v6000_v14  ;;  %4904 = vmatprep.subr.bf16.mxu1 %v4903_v19  ;;  %v3555_v9 = vld [vmem:[%s6688_s1 + $0x3f0] sm:$0xff]  ;;  %v3556_v11 = vld [vmem:[%s6688_s1 + $0x3f8] sm:$0xff] }
  0x84   : > { %4549 = vmatprep.mubr.f32.mxu0 %v6004_v16 }
  0x85   : > { %4179 = vmatmul.mubr.f32.gmra.mrb[10].mxu1 %v274_v27  ;;  %v3546_v27 = vld [vmem:[%s6688_s1 + $0x3a8] sm:$0xff] }
  0x86   : > { %4181 = vmatprep.mubr.f32.mxu1 %v275_v32  ;;  %4906 = vmatpush3.bf16.msra.mxu1 %v4903_v19  ;;  %v283_v19 = vld [vmem:[%s5567_s6 + $0xa0] sm:$0xff]  ;;  %v284_v32 = vld [vmem:[%s5567_s6 + $0xa8] sm:$0xff] }
  0x87   : > { %4550 = vmatmul.mubr.f32.gmra.mrb[28].mxu0 %v6016_v30  ;;  %4908 = vmatprep.subr.bf16.mxu1 %v4907_v36 }
  0x88   : > { %4552 = vmatprep.mubr.f32.mxu0 %v6020_v33 }
  0x89   : > { %4182 = vmatmul.mubr.f32.gmra.mrb[12].mxu1 %v276_v42  ;;  %v3549_v42 = vld [vmem:[%s6688_s1 + $0x3c0] sm:$0xff] }
  0x8a   : > { %4184 = vmatprep.mubr.f32.mxu1 %v277_v48  ;;  %4910 = vmatpush3.bf16.msra.mxu1 %v4907_v36  ;;  %v5051_v36 = vpack.c.bf16 %v3546_v27, %v3545_v25  ;;  %v3550_v48 = vld [vmem:[%s6688_s1 + $0x3c8] sm:$0xff]  ;;  %v298_v27 = vld [vmem:[%s5567_s6 + $0x118] sm:$0xff] }
  0x8b   : > { %4553 = vmatmul.mubr.f32.gmra.mrb[30].mxu0 %v6032_v45  ;;  %4912 = vmatprep.subr.bf16.mxu1 %v4911_v53 }
  0x8c   : > { %4555 = vmatprep.mubr.f32.mxu0 %v6036_v51 }
  0x8d   : > { %4185 = vmatmul.mubr.f32.gmra.mrb[14].mxu1 %v278_v57  ;;  %v5063_v57 = vpack.c.bf16 %v3552_v55, %v3551_v18  ;;  %v3489_v18 = vld [vmem:[%s6688_s1 + $0x1e0] sm:$0xff] }
  0x8e   : > { %4187 = vmatprep.mubr.f32.mxu1 %v279_v62  ;;  %4914 = vmatpush3.bf16.msra.mxu1 %v4911_v53  ;;  %v5059_v53 = vpack.c.bf16 %v3550_v48, %v3549_v42  ;;  %v3553_v62 = vld [vmem:[%s6688_s1 + $0x3e0] sm:$0xff] }
  0x8f   : > { %4556 = vmatmul.mubr.f32.gmra.mrb[32].mxu0 %v6048_v60  ;;  %4916 = vmatprep.subr.bf16.mxu1 %v6054_v0  ;;  %v6210_v42 = vld [vmem:[%s5567_s6 + $0x42] sm:$0xff] }
  0x90   : > { %4558 = vmatprep.mubr.f32.mxu0 %v6052_v63  ;;  %v6242_v55 = vld [vmem:[%s5567_s6 + $0x62] sm:$0xff] }
  0x91   : > { %4188 = vmatmul.mubr.f32.gmra.mrb[16].mxu1 %v280_v3  ;;  %v3554_v3 = vld [vmem:[%s6688_s1 + $0x3e8] sm:$0xff] }
  0x92   : > { %4190 = vmatprep.mubr.f32.mxu1 %v281_v8  ;;  %v5067_v8 = vpack.c.bf16 %v3554_v3, %v3553_v62  ;;  %v2228_v3 = vld [vmem:[%s5567_s6 + $0x134] sm:$0xff] }
  0x93   : > { %4559 = vmatmul.mubr.f32.gmra.mrb[34].mxu0 %v6060_v6 }
  0x94   : > { %4593 = vmatprep.mubr.f32.mxu0 %v5799_v29  ;;  %v285_v29 = vld [vmem:[%s5567_s6 + $0xb0] sm:$0xff] }
  0x95   : > { %4191 = vmatmul.mubr.f32.gmra.mrb[18].mxu1 %v282_v15  ;;  %v5071_v15 = vpack.c.bf16 %v3556_v11, %v3555_v9  ;;  %v6292_v9 = vld [vmem:[%s5567_s6 + $0x9a] sm:$0xff]  ;;  %v2529_v11 = vld [vmem:[%s5567_s6 + $0x2d] sm:$0xff] }
  0x96   : > { %4193 = vmatprep.mubr.f32.mxu1 %v283_v19  ;;  %v3557_v19 = vld [vmem:[%s6688_s1 + $0x400] sm:$0xff] }
  0x97   : > { %4594 = vmatmul.mubr.f32.vlgmr.msra.gmra.mrb[0].mxu0 %v5810_v35  ;;  %v3548_v35 = vld [vmem:[%s6688_s1 + $0x3b8] sm:$0xff] }
  0x98   : > { %5046 = vmatpush3.bf16.msra.mxu0 %v5912_v24  ;;  %4596 = vmatprep.mubr.f32.mxu0 %v5814_v38  ;;  %v286_v24 = vld [vmem:[%s5567_s6 + $0xb8] sm:$0xff]  ;;  %v287_v38 = vld [vmem:[%s5567_s6 + $0xc0] sm:$0xff]  ;;  %v5055_v41 = vpack.c.bf16 %v3548_v35, %v3547_v40  ;;  %v3482_v40 = vld [vmem:[%s6688_s1 + $0x1a8] sm:$0xff] }
  0x99   : > { %5048 = vmatprep.subr.bf16.mxu0 %v5047_v21  ;;  %4194 = vmatmul.mubr.f32.gmra.mrb[20].mxu1 %v284_v32  ;;  %v858_v32 = vld [vmem:[%s5567_s6 + $0x2] sm:$0xff] }
  0x9a   : > { %4196 = vmatprep.mubr.f32.mxu1 %v285_v29 }
  0x9b   : > { %4597 = vmatmul.mubr.f32.gmra.mrb[2].mxu0 %v5826_v44  ;;  %v288_v44 = vld [vmem:[%s5567_s6 + $0xc8] sm:$0xff] }
  0x9c   : > { %4599 = vmatprep.mubr.f32.mxu0 %v5830_v46  ;;  %5050 = vmatpush3.bf16.msra.mxu0 %v5047_v21  ;;  %v289_v46 = vld [vmem:[%s5567_s6 + $0xd0] sm:$0xff]  ;;  %v3558_v21 = vld [vmem:[%s6688_s1 + $0x408] sm:$0xff] }
  0x9d   : > { %5052 = vmatprep.subr.bf16.mxu0 %v5051_v36  ;;  %4197 = vmatmul.mubr.f32.gmra.mrb[22].mxu1 %v286_v24  ;;  %v6145_v25 = vpack.c.bf16 %v3558_v21, %v3557_v19  ;;  %v6194_v24 = vld [vmem:[%s5567_s6 + $0x32] sm:$0xff]  ;;  %v3561_v19 = vld [vmem:[%s6688_s1 + $0x420] sm:$0xff]  ;;  %v3562_v21 = vld [vmem:[%s6688_s1 + $0x428] sm:$0xff] }
  0x9e   : > { %4199 = vmatprep.mubr.f32.mxu1 %v287_v38 }
  0x9f   : > { %4600 = vmatmul.mubr.f32.gmra.mrb[4].mxu0 %v5842_v52  ;;  %v290_v52 = vld [vmem:[%s5567_s6 + $0xd8] sm:$0xff] }
  0xa0   : > { %4602 = vmatprep.mubr.f32.mxu0 %v5846_v54  ;;  %5054 = vmatpush3.bf16.msra.mxu0 %v5051_v36  ;;  %v291_v54 = vld [vmem:[%s5567_s6 + $0xe0] sm:$0xff] }
  0xa1   : > { %5056 = vmatprep.subr.bf16.mxu0 %v5055_v41  ;;  %4200 = vmatmul.mubr.f32.gmra.mrb[24].mxu1 %v288_v44  ;;  %v3481_v36 = vld [vmem:[%s6688_s1 + $0x1a0] sm:$0xff]  ;;  %v3487_v44 = vld [vmem:[%s6688_s1 + $0x1d0] sm:$0xff] }
  0xa2   : > { %4202 = vmatprep.mubr.f32.mxu1 %v289_v46  ;;  %v4923_v35 = vpack.c.bf16 %v3482_v40, %v3481_v36  ;;  %v6226_v46 = vld [vmem:[%s5567_s6 + $0x52] sm:$0xff]  ;;  %v6329_v36 = vld [vmem:[%s5567_s6 + $0xc2] sm:$0xff] }
  0xa3   : > { %4603 = vmatmul.mubr.f32.gmra.mrb[6].mxu0 %v5858_v59  ;;  %v292_v59 = vld [vmem:[%s5567_s6 + $0xe8] sm:$0xff]  ;;  %v2534_v40 = vld [vmem:[%s5567_s6 + $0x55] sm:$0xff] }
  0xa4   : > { %4605 = vmatprep.mubr.f32.mxu0 %v5862_v61  ;;  %5058 = vmatpush3.bf16.msra.mxu0 %v5055_v41  ;;  %v293_v61 = vld [vmem:[%s5567_s6 + $0xf0] sm:$0xff]  ;;  %v3485_v41 = vld [vmem:[%s6688_s1 + $0x1c0] sm:$0xff] }
  0xa5   : > { %5060 = vmatprep.subr.bf16.mxu0 %v5059_v53  ;;  %4203 = vmatmul.mubr.f32.gmra.mrb[26].mxu1 %v290_v52 }
  0xa6   : > { %4205 = vmatprep.mubr.f32.mxu1 %v291_v54  ;;  %v3491_v54 = vld [vmem:[%s6688_s1 + $0x1f0] sm:$0xff] }
  0xa7   : > { %4606 = vmatmul.mubr.f32.gmra.mrb[8].mxu0 %v5874_v2  ;;  %v294_v2 = vld [vmem:[%s5567_s6 + $0xf8] sm:$0xff] }
  0xa8   : > { %4608 = vmatprep.mubr.f32.mxu0 %v5878_v4  ;;  %5062 = vmatpush3.bf16.msra.mxu0 %v5059_v53  ;;  %v295_v4 = vld [vmem:[%s5567_s6 + $0x100] sm:$0xff] }
  0xa9   : > { %5064 = vmatprep.subr.bf16.mxu0 %v5063_v57  ;;  %4206 = vmatmul.mubr.f32.gmra.mrb[28].mxu1 %v292_v59  ;;  %v2229_v59 = vld [vmem:[%s5567_s6 + $0x13c] sm:$0xff] }
  0xaa   : > { %4208 = vmatprep.mubr.f32.mxu1 %v293_v61  ;;  %v2528_v61 = vld [vmem:[%s5567_s6 + $0x25] sm:$0xff] }
  0xab   : > { %4609 = vmatmul.mubr.f32.gmra.mrb[10].mxu0 %v5890_v10  ;;  %v296_v10 = vld [vmem:[%s5567_s6 + $0x108] sm:$0xff] }
  0xac   : > { %4611 = vmatprep.mubr.f32.mxu0 %v5894_v13  ;;  %5066 = vmatpush3.bf16.msra.mxu0 %v5063_v57  ;;  %v297_v13 = vld [vmem:[%s5567_s6 + $0x110] sm:$0xff] }
  0xad   : > { %5068 = vmatprep.subr.bf16.mxu0 %v5067_v8  ;;  %4209 = vmatmul.mubr.f32.gmra.mrb[30].mxu1 %v294_v2  ;;  %v6258_v57 = vld [vmem:[%s5567_s6 + $0x72] sm:$0xff]  ;;  %v6296_v2 = vld [vmem:[%s5567_s6 + $0xa2] sm:$0xff] }
  0xae   : > { %4211 = vmatprep.mubr.f32.mxu1 %v295_v4  ;;  %v2530_v4 = vld [vmem:[%s5567_s6 + $0x35] sm:$0xff] }
  0xaf   : > { %4612 = vmatmul.mubr.f32.gmra.mrb[12].mxu0 %v5906_v20  ;;  %v3479_v20 = vld [vmem:[%s6688_s1 + $0x190] sm:$0xff] }
  0xb0   : > { %4614 = vmatprep.mubr.f32.mxu0 %v5910_v22  ;;  %5070 = vmatpush3.bf16.msra.mxu0 %v5067_v8  ;;  %v3480_v22 = vld [vmem:[%s6688_s1 + $0x198] sm:$0xff] }
  0xb1   : > { %5072 = vmatprep.subr.bf16.mxu0 %v5071_v15  ;;  %4212 = vmatmul.mubr.f32.gmra.mrb[32].mxu1 %v296_v10  ;;  %v4919_v29 = vpack.c.bf16 %v3480_v22, %v3479_v20  ;;  %v3560_v8 = vld [vmem:[%s6688_s1 + $0x418] sm:$0xff]  ;;  %v6308_v10 = vld [vmem:[%s5567_s6 + $0xaa] sm:$0xff]  ;;  %v5083_v20 = vpack.c.bf16 %v3562_v21, %v3561_v19 }
  0xb2   : > { %4214 = vmatprep.mubr.f32.mxu1 %v297_v13  ;;  %v2531_v13 = vld [vmem:[%s5567_s6 + $0x3d] sm:$0xff]  ;;  %v3563_v22 = vld [vmem:[%s6688_s1 + $0x430] sm:$0xff] }
  0xb3   : > { %4615 = vmatmul.mubr.f32.gmra.mrb[14].mxu0 %v5918_v26  ;;  %v859_v26 = vld [vmem:[%s5567_s6 + $0xa] sm:$0xff]  ;;  %v6389_v19 = vld [vmem:[%s5567_s6 + $0xfa] sm:$0xff] }
  0xb4   : > { %4617 = vmatprep.mubr.f32.mxu0 %v5922_v28  ;;  %5074 = vmatpush3.bf16.msra.mxu0 %v5071_v15  ;;  %v6162_v28 = vld [vmem:[%s5567_s6 + $0x12] sm:$0xff] }
  0xb5   : > { %5076 = vmatprep.subr.bf16.mxu0 %v6145_v25  ;;  %4215 = vmatmul.mubr.f32.gmra.mrb[34].mxu1 %v298_v27  ;;  %v6313_v27 = vld [vmem:[%s5567_s6 + $0xb2] sm:$0xff] }
  0xb6   : > { %4249 = vmatprep.mubr.f32.mxu1 %v858_v32  ;;  %v2532_v32 = vld [vmem:[%s5567_s6 + $0x45] sm:$0xff]  ;;  %v2541_v21 = vld [vmem:[%s5567_s6 + $0x8d] sm:$0xff] }
  0xb7   : > { %4618 = vmatmul.mubr.f32.gmra.mrb[16].mxu0 %v5935_v34  ;;  %v6173_v34 = vld [vmem:[%s5567_s6 + $0x1a] sm:$0xff] }
  0xb8   : > { %4620 = vmatprep.mubr.f32.mxu0 %v5939_v39  ;;  %v6178_v39 = vld [vmem:[%s5567_s6 + $0x22] sm:$0xff] }
  0xb9   : > { %4250 = vmatmul.mubr.f32.vlgmr.msra.gmra.mrb[0].mxu1 %v859_v26  ;;  %v3564_v26 = vld [vmem:[%s6688_s1 + $0x438] sm:$0xff] }
  0xba   : > { %4918 = vmatpush3.bf16.msra.mxu1 %v6054_v0  ;;  %4252 = vmatprep.mubr.f32.mxu1 %v6162_v28  ;;  %v3484_v0 = vld [vmem:[%s6688_s1 + $0x1b8] sm:$0xff] }
  0xbb   : > { %4621 = vmatmul.mubr.f32.gmra.mrb[18].mxu0 %v5952_v47  ;;  %4920 = vmatprep.subr.bf16.mxu1 %v4919_v29  ;;  %v3483_v47 = vld [vmem:[%s6688_s1 + $0x1b0] sm:$0xff] }
  0xbc   : > { %4623 = vmatprep.mubr.f32.mxu0 %v5956_v50  ;;  %v6190_v50 = vld [vmem:[%s5567_s6 + $0x2a] sm:$0xff]  ;;  %v4927_v38 = vpack.c.bf16 %v3484_v0, %v3483_v47  ;;  %v3565_v47 = vld [vmem:[%s6688_s1 + $0x440] sm:$0xff] }
  0xbd   : > { %4253 = vmatmul.mubr.f32.gmra.mrb[2].mxu1 %v6173_v34  ;;  %v3566_v0 = vld [vmem:[%s6688_s1 + $0x448] sm:$0xff] }
  0xbe   : > { %4255 = vmatprep.mubr.f32.mxu1 %v6178_v39  ;;  %4922 = vmatpush3.bf16.msra.mxu1 %v4919_v29  ;;  %v2533_v29 = vld [vmem:[%s5567_s6 + $0x4d] sm:$0xff] }
  0xbf   : > { %4624 = vmatmul.mubr.f32.gmra.mrb[20].mxu0 %v5968_v56  ;;  %4924 = vmatprep.subr.bf16.mxu1 %v4923_v35  ;;  %v3486_v56 = vld [vmem:[%s6688_s1 + $0x1c8] sm:$0xff] }
  0xc0   : > { %4626 = vmatprep.mubr.f32.mxu0 %v5972_v58  ;;  %v6206_v58 = vld [vmem:[%s5567_s6 + $0x3a] sm:$0xff]  ;;  %v4931_v48 = vpack.c.bf16 %v3486_v56, %v3485_v41  ;;  %v6345_v56 = vld [vmem:[%s5567_s6 + $0xd2] sm:$0xff] }
  0xc1   : > { %4256 = vmatmul.mubr.f32.gmra.mrb[4].mxu1 %v6190_v50  ;;  %v2535_v41 = vld [vmem:[%s5567_s6 + $0x5d] sm:$0xff] }
  0xc2   : > { %4258 = vmatprep.mubr.f32.mxu1 %v6194_v24  ;;  %4926 = vmatpush3.bf16.msra.mxu1 %v4923_v35  ;;  %v5087_v35 = vpack.c.bf16 %v3564_v26, %v3563_v22  ;;  %v6399_v22 = vld [vmem:[%s5567_s6 + $0x10a] sm:$0xff]  ;;  %v2543_v26 = vld [vmem:[%s5567_s6 + $0x9d] sm:$0xff] }
  0xc3   : > { %4627 = vmatmul.mubr.f32.gmra.mrb[22].mxu0 %v5984_v1  ;;  %4928 = vmatprep.subr.bf16.mxu1 %v4927_v38  ;;  %v3488_v1 = vld [vmem:[%s6688_s1 + $0x1d8] sm:$0xff] }
  0xc4   : > { %4629 = vmatprep.mubr.f32.mxu0 %v5988_v5  ;;  %v6222_v5 = vld [vmem:[%s5567_s6 + $0x4a] sm:$0xff]  ;;  %v4935_v53 = vpack.c.bf16 %v3488_v1, %v3487_v44  ;;  %v5091_v44 = vpack.c.bf16 %v3566_v0, %v3565_v47  ;;  %v2546_v0 = vld [vmem:[%s5567_s6 + $0xb5] sm:$0xff] }
  0xc5   : > { %4259 = vmatmul.mubr.f32.gmra.mrb[6].mxu1 %v6206_v58  ;;  %v3567_v1 = vld [vmem:[%s6688_s1 + $0x450] sm:$0xff] }
  0xc6   : > { %4261 = vmatprep.mubr.f32.mxu1 %v6210_v42  ;;  %4930 = vmatpush3.bf16.msra.mxu1 %v4927_v38  ;;  %v6341_v38 = vld [vmem:[%s5567_s6 + $0xca] sm:$0xff] }
  0xc7   : > { %4630 = vmatmul.mubr.f32.gmra.mrb[24].mxu0 %v6000_v14  ;;  %4932 = vmatprep.subr.bf16.mxu1 %v4931_v48  ;;  %v3490_v14 = vld [vmem:[%s6688_s1 + $0x1e8] sm:$0xff] }
  0xc8   : > { %4632 = vmatprep.mubr.f32.mxu0 %v6004_v16  ;;  %v6238_v16 = vld [vmem:[%s5567_s6 + $0x5a] sm:$0xff]  ;;  %v4939_v52 = vpack.c.bf16 %v3490_v14, %v3489_v18  ;;  %v2537_v14 = vld [vmem:[%s5567_s6 + $0x6d] sm:$0xff] }
  0xc9   : > { %4262 = vmatmul.mubr.f32.gmra.mrb[8].mxu1 %v6222_v5  ;;  %v6357_v18 = vld [vmem:[%s5567_s6 + $0xda] sm:$0xff]  ;;  %v2545_v47 = vld [vmem:[%s5567_s6 + $0xad] sm:$0xff] }
  0xca   : > { %4264 = vmatprep.mubr.f32.mxu1 %v6226_v46  ;;  %4934 = vmatpush3.bf16.msra.mxu1 %v4931_v48  ;;  %v2536_v48 = vld [vmem:[%s5567_s6 + $0x65] sm:$0xff] }
  0xcb   : > { %4633 = vmatmul.mubr.f32.gmra.mrb[26].mxu0 %v6016_v30  ;;  %4936 = vmatprep.subr.bf16.mxu1 %v4935_v53  ;;  %v3492_v30 = vld [vmem:[%s6688_s1 + $0x1f8] sm:$0xff] }
  0xcc   : > { %4635 = vmatprep.mubr.f32.mxu0 %v6020_v33  ;;  %v6254_v33 = vld [vmem:[%s5567_s6 + $0x6a] sm:$0xff]  ;;  %v4943_v62 = vpack.c.bf16 %v3492_v30, %v3491_v54  ;;  %v2538_v54 = vld [vmem:[%s5567_s6 + $0x75] sm:$0xff] }
  0xcd   : > { %4265 = vmatmul.mubr.f32.gmra.mrb[10].mxu1 %v6238_v16 }
  0xce   : > { %4267 = vmatprep.mubr.f32.mxu1 %v6242_v55  ;;  %4938 = vmatpush3.bf16.msra.mxu1 %v4935_v53  ;;  %v3568_v53 = vld [vmem:[%s6688_s1 + $0x458] sm:$0xff] }
  0xcf   : > { %4636 = vmatmul.mubr.f32.gmra.mrb[28].mxu0 %v6032_v45  ;;  %4940 = vmatprep.subr.bf16.mxu1 %v4939_v52  ;;  %v6264_v45 = vld [vmem:[%s5567_s6 + $0x7a] sm:$0xff]  ;;  %v5095_v30 = vpack.c.bf16 %v3568_v53, %v3567_v1  ;;  %v1544_v53 = vld [vmem:[%s5567_s6 + $0xa3] sm:$0xff] }
  0xd0   : > { %4638 = vmatprep.mubr.f32.mxu0 %v6036_v51  ;;  %v6268_v51 = vld [vmem:[%s5567_s6 + $0x82] sm:$0xff]  ;;  %v2550_v1 = vld [vmem:[%s5567_s6 + $0xd5] sm:$0xff] }
  0xd1   : > { %4268 = vmatmul.mubr.f32.gmra.mrb[12].mxu1 %v6254_v33 }
  0xd2   : > { %4270 = vmatprep.mubr.f32.mxu1 %v6258_v57  ;;  %4942 = vmatpush3.bf16.msra.mxu1 %v4939_v52  ;;  %v6361_v52 = vld [vmem:[%s5567_s6 + $0xe2] sm:$0xff] }
  0xd3   : > { %4639 = vmatmul.mubr.f32.gmra.mrb[30].mxu0 %v6048_v60  ;;  %4944 = vmatprep.subr.bf16.mxu1 %v4943_v62  ;;  %v6275_v60 = vld [vmem:[%s5567_s6 + $0x8a] sm:$0xff] }
  0xd4   : > { %4641 = vmatprep.mubr.f32.mxu0 %v6052_v63  ;;  %v6279_v63 = vld [vmem:[%s5567_s6 + $0x92] sm:$0xff] }
  0xd5   : > { %4271 = vmatmul.mubr.f32.gmra.mrb[14].mxu1 %v6264_v45 }
  0xd6   : > { %4273 = vmatprep.mubr.f32.mxu1 %v6268_v51  ;;  %4946 = vmatpush3.bf16.msra.mxu1 %v4943_v62  ;;  %v3569_v62 = vld [vmem:[%s6688_s1 + $0x460] sm:$0xff] }
  0xd7   : > { %4642 = vmatmul.mubr.f32.gmra.mrb[32].mxu0 %v6060_v6  ;;  %5107 = vmatprep.subr.bf16.mxu1 %v5522_v7  ;;  %v3559_v6 = vld [vmem:[%s6688_s1 + $0x410] sm:$0xff] }
  0xd8   : > { %4644 = vmatprep.mubr.f32.mxu0 %v2228_v3  ;;  %v5079_v15 = vpack.c.bf16 %v3560_v8, %v3559_v6  ;;  %v3570_v3 = vld [vmem:[%s6688_s1 + $0x468] sm:$0xff]  ;;  %v6377_v6 = vld [vmem:[%s5567_s6 + $0xf2] sm:$0xff] }
  0xd9   : > { %4274 = vmatmul.mubr.f32.gmra.mrb[16].mxu1 %v6275_v60  ;;  %v2540_v8 = vld [vmem:[%s5567_s6 + $0x85] sm:$0xff] }
  0xda   : > { %4276 = vmatprep.mubr.f32.mxu1 %v6279_v63 }
  0xdb   : > { %4645 = vmatmul.mubr.f32.gmra.mrb[34].mxu0 %v2229_v59  ;;  %v6373_v59 = vld [vmem:[%s5567_s6 + $0xea] sm:$0xff] }
  0xdc   : > { %4679 = vmatprep.mubr.f32.mxu0 %v2528_v61  ;;  %v2539_v61 = vld [vmem:[%s5567_s6 + $0x7d] sm:$0xff] }
  0xdd   : > { %4277 = vmatmul.mubr.f32.gmra.mrb[18].mxu1 %v6292_v9 }
  0xde   : > { %4279 = vmatprep.mubr.f32.mxu1 %v6296_v2 }
  0xdf   : > { %4680 = vmatmul.mubr.f32.vlgmr.msra.gmra.mrb[0].mxu0 %v2529_v11  ;;  %v5099_v11 = vpack.c.bf16 %v3570_v3, %v3569_v62  ;;  %v1547_v62 = vld [vmem:[%s5567_s6 + $0xbb] sm:$0xff]  ;;  %v2883_v3 = vld [vmem:[%s5567_s6 + $0xce] sm:$0xff] }
  0xe0   : > { %5078 = vmatpush3.bf16.msra.mxu0 %v6145_v25  ;;  %4682 = vmatprep.mubr.f32.mxu0 %v2530_v4  ;;  %v6325_v25 = vld [vmem:[%s5567_s6 + $0xba] sm:$0xff]  ;;  %v3571_v4 = vld [vmem:[%s6688_s1 + $0x470] sm:$0xff] }
  0xe1   : > { %5080 = vmatprep.subr.bf16.mxu0 %v5079_v15  ;;  %4280 = vmatmul.mubr.f32.gmra.mrb[20].mxu1 %v6308_v10 }
  0xe2   : > { %4282 = vmatprep.mubr.f32.mxu1 %v6313_v27 }
  0xe3   : > { %4683 = vmatmul.mubr.f32.gmra.mrb[2].mxu0 %v2531_v13  ;;  %v6393_v13 = vld [vmem:[%s5567_s6 + $0x102] sm:$0xff] }
  0xe4   : > { %4685 = vmatprep.mubr.f32.mxu0 %v2532_v32  ;;  %5082 = vmatpush3.bf16.msra.mxu0 %v5079_v15  ;;  %v3572_v15 = vld [vmem:[%s6688_s1 + $0x478] sm:$0xff] }
  0xe5   : > { %5084 = vmatprep.subr.bf16.mxu0 %v5083_v20  ;;  %4283 = vmatmul.mubr.f32.gmra.mrb[22].mxu1 %v6325_v25  ;;  %v2542_v32 = vld [vmem:[%s5567_s6 + $0x95] sm:$0xff] }
  0xe6   : > { %4285 = vmatprep.mubr.f32.mxu1 %v6329_v36 }
  0xe7   : > { %4686 = vmatmul.mubr.f32.gmra.mrb[4].mxu0 %v2533_v29  ;;  %v6403_v29 = vld [vmem:[%s5567_s6 + $0x112] sm:$0xff] }
  0xe8   : > { %4688 = vmatprep.mubr.f32.mxu0 %v2534_v40  ;;  %5086 = vmatpush3.bf16.msra.mxu0 %v5083_v20  ;;  %v5103_v20 = vpack.c.bf16 %v3572_v15, %v3571_v4  ;;  %v2544_v40 = vld [vmem:[%s5567_s6 + $0xa5] sm:$0xff]  ;;  %v1551_v15 = vld [vmem:[%s5567_s6 + $0xdb] sm:$0xff] }
  0xe9   : > { %5088 = vmatprep.subr.bf16.mxu0 %v5087_v35  ;;  %4286 = vmatmul.mubr.f32.gmra.mrb[24].mxu1 %v6341_v38  ;;  %v2886_v4 = vld [vmem:[%s5567_s6 + $0xe6] sm:$0xff] }
  0xea   : > { %4288 = vmatprep.mubr.f32.mxu1 %v6345_v56 }
  0xeb   : > { %4689 = vmatmul.mubr.f32.gmra.mrb[6].mxu0 %v2535_v41  ;;  %v2547_v41 = vld [vmem:[%s5567_s6 + $0xbd] sm:$0xff] }
  0xec   : > { %4691 = vmatprep.mubr.f32.mxu0 %v2536_v48  ;;  %5090 = vmatpush3.bf16.msra.mxu0 %v5087_v35  ;;  %v6409_v35 = vld [vmem:[%s5567_s6 + $0x11a] sm:$0xff]  ;;  %v2548_v48 = vld [vmem:[%s5567_s6 + $0xc5] sm:$0xff] }
  0xed   : > { %5092 = vmatprep.subr.bf16.mxu0 %v5091_v44  ;;  %4289 = vmatmul.mubr.f32.gmra.mrb[26].mxu1 %v6357_v18 }
  0xee   : > { %4291 = vmatprep.mubr.f32.mxu1 %v6361_v52 }
  0xef   : > { %4692 = vmatmul.mubr.f32.gmra.mrb[8].mxu0 %v2537_v14  ;;  %v1545_v14 = vld [vmem:[%s5567_s6 + $0xab] sm:$0xff] }
  0xf0   : > { %4694 = vmatprep.mubr.f32.mxu0 %v2538_v54  ;;  %5094 = vmatpush3.bf16.msra.mxu0 %v5091_v44  ;;  %v2549_v44 = vld [vmem:[%s5567_s6 + $0xcd] sm:$0xff] }
  0xf1   : > { %5096 = vmatprep.subr.bf16.mxu0 %v5095_v30  ;;  %4292 = vmatmul.mubr.f32.gmra.mrb[28].mxu1 %v6373_v59  ;;  %v1546_v54 = vld [vmem:[%s5567_s6 + $0xb3] sm:$0xff] }
  0xf2   : > { %4294 = vmatprep.mubr.f32.mxu1 %v6377_v6 }
  0xf3   : > { %4695 = vmatmul.mubr.f32.gmra.mrb[10].mxu0 %v2539_v61  ;;  %v2884_v61 = vld [vmem:[%s5567_s6 + $0xd6] sm:$0xff] }
  0xf4   : > { %4697 = vmatprep.mubr.f32.mxu0 %v2540_v8  ;;  %5098 = vmatpush3.bf16.msra.mxu0 %v5095_v30  ;;  %v2882_v30 = vld [vmem:[%s5567_s6 + $0xc6] sm:$0xff]  ;;  %v2885_v8 = vld [vmem:[%s5567_s6 + $0xde] sm:$0xff] }
  0xf5   : > { %5100 = vmatprep.subr.bf16.mxu0 %v5099_v11  ;;  %4295 = vmatmul.mubr.f32.gmra.mrb[30].mxu1 %v6389_v19 }
  0xf6   : > { %4297 = vmatprep.mubr.f32.mxu1 %v6393_v13 }
  0xf7   : > { %4698 = vmatmul.mubr.f32.gmra.mrb[12].mxu0 %v2541_v21  ;;  %v1552_v21 = vld [vmem:[%s5567_s6 + $0xe3] sm:$0xff] }
  0xf8   : > { %4700 = vmatprep.mubr.f32.mxu0 %v2542_v32  ;;  %5102 = vmatpush3.bf16.msra.mxu0 %v5099_v11  ;;  %v1550_v11 = vld [vmem:[%s5567_s6 + $0xd3] sm:$0xff]  ;;  %v1553_v32 = vld [vmem:[%s5567_s6 + $0xeb] sm:$0xff] }
  0xf9   : > { %5104 = vmatprep.subr.bf16.mxu0 %v5103_v20  ;;  %4298 = vmatmul.mubr.f32.gmra.mrb[32].mxu1 %v6399_v22 }
  0xfa   : > { %4300 = vmatprep.mubr.f32.mxu1 %v6403_v29 }
  0xfb   : > { %4701 = vmatmul.mubr.f32.gmra.mrb[14].mxu0 %v2543_v26  ;;  %v2890_v26 = vld [vmem:[%s5567_s6 + $0x106] sm:$0xff] }
  0xfc   : > { %4703 = vmatprep.mubr.f32.mxu0 %v2544_v40  ;;  %5106 = vmatpush3.bf16.msra.mxu0 %v5103_v20  ;;  %v2889_v20 = vld [vmem:[%s5567_s6 + $0xfe] sm:$0xff]  ;;  %v2891_v40 = vld [vmem:[%s5567_s6 + $0x10e] sm:$0xff] }
  0xfd   : > { %4301 = vmatmul.mubr.f32.gmra.mrb[34].mxu1 %v6409_v35 }
  0xfe   : > { %4335 = vmatprep.mubr.f32.mxu1 %v6162_v28  ;;  %v2551_v28 = vld [vmem:[%s5567_s6 + $0xdd] sm:$0xff] }
  0xff   : > { %4704 = vmatmul.mubr.f32.gmra.mrb[16].mxu0 %v2545_v47  ;;  %v2892_v47 = vld [vmem:[%s5567_s6 + $0x116] sm:$0xff] }
 0x100   : > { %4706 = vmatprep.mubr.f32.mxu0 %v2546_v0  ;;  %v1557_v0 = vld [vmem:[%s5567_s6 + $0x10b] sm:$0xff] }
 0x101   : > { %4336 = vmatmul.mubr.f32.vlgmr.msra.gmra.mrb[0].mxu1 %v6173_v34  ;;  %v2553_v34 = vld [vmem:[%s5567_s6 + $0xed] sm:$0xff] }
 0x102   : > { %5115 = vmatpush3.bf16.msra.mxu1 %v5522_v7  ;;  %4338 = vmatprep.mubr.f32.mxu1 %v6178_v39  ;;  %v2552_v7 = vld [vmem:[%s5567_s6 + $0xe5] sm:$0xff]  ;;  %v2554_v39 = vld [vmem:[%s5567_s6 + $0xf5] sm:$0xff] }
 0x103   : > { %4707 = vmatmul.mubr.f32.gmra.mrb[18].mxu0 %v2547_v41  ;;  %5108 = vmatprep.subr.bf16.mxu1 %v5535_v12  ;;  %v2893_v41 = vld [vmem:[%s5567_s6 + $0x11e] sm:$0xff] }
 0x104   : > { %4709 = vmatprep.mubr.f32.mxu0 %v2548_v48  ;;  %v1558_v48 = vld [vmem:[%s5567_s6 + $0x113] sm:$0xff] }
 0x105   : > { %4339 = vmatmul.mubr.f32.gmra.mrb[2].mxu1 %v6190_v50  ;;  %v2556_v50 = vld [vmem:[%s5567_s6 + $0x105] sm:$0xff] }
 0x106   : > { %4341 = vmatprep.mubr.f32.mxu1 %v6194_v24  ;;  %5116 = vmatpush3.bf16.msra.mxu1 %v5535_v12  ;;  %v2555_v12 = vld [vmem:[%s5567_s6 + $0xfd] sm:$0xff]  ;;  %v2558_v24 = vld [vmem:[%s5567_s6 + $0x115] sm:$0xff] }
 0x107   : > { %4710 = vmatmul.mubr.f32.gmra.mrb[20].mxu0 %v2549_v44  ;;  %5109 = vmatprep.subr.bf16.mxu1 %v5550_v17  ;;  %v2894_v44 = vld [vmem:[%s5567_s6 + $0x126] sm:$0xff] }
 0x108   : > { %4712 = vmatprep.mubr.f32.mxu0 %v2550_v1  ;;  %v1559_v1 = vld [vmem:[%s5567_s6 + $0x11b] sm:$0xff] }
 0x109   : > { %4342 = vmatmul.mubr.f32.gmra.mrb[4].mxu1 %v6206_v58  ;;  %v2560_v58 = vld [vmem:[%s5567_s6 + $0x125] sm:$0xff] }
 0x10a   : > { %4344 = vmatprep.mubr.f32.mxu1 %v6210_v42  ;;  %5117 = vmatpush3.bf16.msra.mxu1 %v5550_v17  ;;  %v2557_v17 = vld [vmem:[%s5567_s6 + $0x10d] sm:$0xff]  ;;  %v2562_v42 = vld [vmem:[%s5567_s6 + $0x135] sm:$0xff] }
 0x10b   : > { %4713 = vmatmul.mubr.f32.gmra.mrb[22].mxu0 %v2551_v28  ;;  %5110 = vmatprep.subr.bf16.mxu1 %v5571_v23  ;;  %v2895_v28 = vld [vmem:[%s5567_s6 + $0x12e] sm:$0xff] }
 0x10c   : > { %4715 = vmatprep.mubr.f32.mxu0 %v2552_v7  ;;  %v1560_v7 = vld [vmem:[%s5567_s6 + $0x123] sm:$0xff] }
 0x10d   : > { %4345 = vmatmul.mubr.f32.gmra.mrb[6].mxu1 %v6222_v5  ;;  %v2862_v5 = vld [vmem:[%s5567_s6 + $0x26] sm:$0xff] }
 0x10e   : > { %4347 = vmatprep.mubr.f32.mxu1 %v6226_v46  ;;  %5118 = vmatpush3.bf16.msra.mxu1 %v5571_v23  ;;  %v2559_v23 = vld [vmem:[%s5567_s6 + $0x11d] sm:$0xff] }
 0x10f   : > { %4716 = vmatmul.mubr.f32.gmra.mrb[24].mxu0 %v2553_v34  ;;  %5111 = vmatprep.subr.bf16.mxu1 %v5589_v31  ;;  %v2864_v46 = vld [vmem:[%s5567_s6 + $0x36] sm:$0xff] }
 0x110   : > { %4718 = vmatprep.mubr.f32.mxu0 %v2554_v39  ;;  %v2896_v34 = vld [vmem:[%s5567_s6 + $0x136] sm:$0xff]  ;;  %v1561_v39 = vld [vmem:[%s5567_s6 + $0x12b] sm:$0xff] }
 0x111   : > { %4348 = vmatmul.mubr.f32.gmra.mrb[8].mxu1 %v6238_v16  ;;  %v2866_v16 = vld [vmem:[%s5567_s6 + $0x46] sm:$0xff] }
 0x112   : > { %4350 = vmatprep.mubr.f32.mxu1 %v6242_v55  ;;  %5119 = vmatpush3.bf16.msra.mxu1 %v5589_v31  ;;  %v2561_v31 = vld [vmem:[%s5567_s6 + $0x12d] sm:$0xff] }
 0x113   : > { %4719 = vmatmul.mubr.f32.gmra.mrb[26].mxu0 %v2555_v12  ;;  %5112 = vmatprep.subr.bf16.mxu1 %v5605_v37  ;;  %v2867_v55 = vld [vmem:[%s5567_s6 + $0x4e] sm:$0xff]  ;;  %v2897_v12 = vld [vmem:[%s5567_s6 + $0x13e] sm:$0xff] }
 0x114   : > { %4721 = vmatprep.mubr.f32.mxu0 %v2556_v50 }
 0x115   : > { %4351 = vmatmul.mubr.f32.gmra.mrb[10].mxu1 %v6254_v33  ;;  %v2868_v33 = vld [vmem:[%s5567_s6 + $0x56] sm:$0xff] }
 0x116   : > { %4353 = vmatprep.mubr.f32.mxu1 %v6258_v57  ;;  %5120 = vmatpush3.bf16.msra.mxu1 %v5605_v37  ;;  %v2563_v37 = vld [vmem:[%s5567_s6 + $0x13d] sm:$0xff] }
 0x117   : > { %4722 = vmatmul.mubr.f32.gmra.mrb[28].mxu0 %v2557_v17  ;;  %5113 = vmatprep.subr.bf16.mxu1 %v5621_v43  ;;  %v2869_v57 = vld [vmem:[%s5567_s6 + $0x5e] sm:$0xff] }
 0x118   : > { %4724 = vmatprep.mubr.f32.mxu0 %v2558_v24 }
 0x119   : > { %4354 = vmatmul.mubr.f32.gmra.mrb[12].mxu1 %v6264_v45  ;;  %v2870_v45 = vld [vmem:[%s5567_s6 + $0x66] sm:$0xff] }
 0x11a   : > { %4356 = vmatprep.mubr.f32.mxu1 %v6268_v51  ;;  %5121 = vmatpush3.bf16.msra.mxu1 %v5621_v43  ;;  %v2863_v43 = vld [vmem:[%s5567_s6 + $0x2e] sm:$0xff] }
 0x11b   : > { %4725 = vmatmul.mubr.f32.gmra.mrb[30].mxu0 %v2559_v23  ;;  %5114 = vmatprep.subr.bf16.mxu1 %v5637_v49  ;;  %v2871_v51 = vld [vmem:[%s5567_s6 + $0x6e] sm:$0xff] }
 0x11c   : > { %4727 = vmatprep.mubr.f32.mxu0 %v2560_v58 }
 0x11d   : > { %4357 = vmatmul.mubr.f32.gmra.mrb[14].mxu1 %v6275_v60  ;;  %v2872_v60 = vld [vmem:[%s5567_s6 + $0x76] sm:$0xff] }
 0x11e   : > { %4359 = vmatprep.mubr.f32.mxu1 %v6279_v63  ;;  %5122 = vmatpush3.bf16.msra.mxu1 %v5637_v49  ;;  %v2865_v49 = vld [vmem:[%s5567_s6 + $0x3e] sm:$0xff] }
 0x11f   : > { %4728 = vmatmul.mubr.f32.gmra.mrb[32].mxu0 %v2561_v31  ;;  %v2873_v63 = vld [vmem:[%s5567_s6 + $0x7e] sm:$0xff] }
 0x120   : > { %4730 = vmatprep.mubr.f32.mxu0 %v2562_v42 }
 0x121   : > { %4360 = vmatmul.mubr.f32.gmra.mrb[16].mxu1 %v6292_v9  ;;  %v2874_v9 = vld [vmem:[%s5567_s6 + $0x86] sm:$0xff] }
 0x122   : > { %4362 = vmatprep.mubr.f32.mxu1 %v6296_v2  ;;  %v2875_v2 = vld [vmem:[%s5567_s6 + $0x8e] sm:$0xff] }
 0x123   : > { %4731 = vmatmul.mubr.f32.gmra.mrb[34].mxu0 %v2563_v37 }
 0x124   : > { %4765 = vmatprep.mubr.f32.mxu0 %v2862_v5 }
 0x125   : > { %4363 = vmatmul.mubr.f32.gmra.mrb[18].mxu1 %v6308_v10  ;;  %v2876_v10 = vld [vmem:[%s5567_s6 + $0x96] sm:$0xff] }
 0x126   : > { %4365 = vmatprep.mubr.f32.mxu1 %v6313_v27  ;;  %v2877_v27 = vld [vmem:[%s5567_s6 + $0x9e] sm:$0xff] }
 0x127   : > { %4766 = vmatmul.mubr.f32.vlgmr.msra.gmra.mrb[0].mxu0 %v2863_v43 }
 0x128   : > { %4768 = vmatprep.mubr.f32.mxu0 %v2864_v46 }
 0x129   : > { %4366 = vmatmul.mubr.f32.gmra.mrb[20].mxu1 %v6325_v25  ;;  %v1226_v25 = vld [vmem:[%s5567_s6 + $0x122] sm:$0xff] }
 0x12a   : > { %4368 = vmatprep.mubr.f32.mxu1 %v6329_v36  ;;  %v2878_v36 = vld [vmem:[%s5567_s6 + $0xa6] sm:$0xff] }
 0x12b   : > { %4769 = vmatmul.mubr.f32.gmra.mrb[2].mxu0 %v2865_v49 }
 0x12c   : > { %4771 = vmatprep.mubr.f32.mxu0 %v2866_v16 }
 0x12d   : > { %4369 = vmatmul.mubr.f32.gmra.mrb[22].mxu1 %v6341_v38  ;;  %v1227_v38 = vld [vmem:[%s5567_s6 + $0x12a] sm:$0xff] }
 0x12e   : > { %4371 = vmatprep.mubr.f32.mxu1 %v6345_v56  ;;  %v2879_v56 = vld [vmem:[%s5567_s6 + $0xae] sm:$0xff] }
 0x12f   : > { %4772 = vmatmul.mubr.f32.gmra.mrb[4].mxu0 %v2867_v55 }
 0x130   : > { %4774 = vmatprep.mubr.f32.mxu0 %v2868_v33 }
 0x131   : > { %4372 = vmatmul.mubr.f32.gmra.mrb[24].mxu1 %v6357_v18  ;;  %v2880_v18 = vld [vmem:[%s5567_s6 + $0xb6] sm:$0xff] }
 0x132   : > { %4374 = vmatprep.mubr.f32.mxu1 %v6361_v52  ;;  %v2881_v52 = vld [vmem:[%s5567_s6 + $0xbe] sm:$0xff] }
 0x133   : > { %4775 = vmatmul.mubr.f32.gmra.mrb[6].mxu0 %v2869_v57 }
 0x134   : > { %4777 = vmatprep.mubr.f32.mxu0 %v2870_v45 }
 0x135   : > { %4375 = vmatmul.mubr.f32.gmra.mrb[26].mxu1 %v6373_v59  ;;  %v1548_v59 = vld [vmem:[%s5567_s6 + $0xc3] sm:$0xff] }
 0x136   : > { %4377 = vmatprep.mubr.f32.mxu1 %v6377_v6  ;;  %v1549_v6 = vld [vmem:[%s5567_s6 + $0xcb] sm:$0xff] }
 0x137   : > { %4778 = vmatmul.mubr.f32.gmra.mrb[8].mxu0 %v2871_v51 }
 0x138   : > { %4780 = vmatprep.mubr.f32.mxu0 %v2872_v60 }
 0x139   : > { %4378 = vmatmul.mubr.f32.gmra.mrb[28].mxu1 %v6389_v19  ;;  %v2887_v19 = vld [vmem:[%s5567_s6 + $0xee] sm:$0xff] }
 0x13a   : > { %4380 = vmatprep.mubr.f32.mxu1 %v6393_v13  ;;  %v2888_v13 = vld [vmem:[%s5567_s6 + $0xf6] sm:$0xff] }
 0x13b   : > { %4781 = vmatmul.mubr.f32.gmra.mrb[10].mxu0 %v2873_v63  ;;  %v6552_v63 = vld [vmem:[%s6689_s2] ss:$0 sm:$0xff] }
 0x13c   : > { %4783 = vmatprep.mubr.f32.mxu0 %v2874_v9 }
 0x13d   : > { %4381 = vmatmul.mubr.f32.gmra.mrb[30].mxu1 %v6399_v22  ;;  %v1554_v22 = vld [vmem:[%s5567_s6 + $0xf3] sm:$0xff] }
 0x13e   : > { %4383 = vmatprep.mubr.f32.mxu1 %v6403_v29  ;;  %v1555_v29 = vld [vmem:[%s5567_s6 + $0xfb] sm:$0xff] }
 0x13f   : > { %4784 = vmatmul.mubr.f32.gmra.mrb[12].mxu0 %v2875_v2 }
 0x140   : > { %4786 = vmatprep.mubr.f32.mxu0 %v2876_v10  ;;  %v6557_v10 = vld [vmem:[%s6690_s3] ss:$0 sm:$0xff] }
 0x141   : > { %4384 = vmatmul.mubr.f32.gmra.mrb[32].mxu1 %v6409_v35  ;;  %v1556_v35 = vld [vmem:[%s5567_s6 + $0x103] sm:$0xff]  ;;  %s5412_s6 = smul.u32 288, %s6697_s15 }
 0x142   : > { %4386 = vmatprep.mubr.f32.mxu1 %v1226_v25 }
 0x143   : > { %4787 = vmatmul.mubr.f32.gmra.mrb[14].mxu0 %v2877_v27  ;;  %s6563_s15 = scalar_lea.vmem %s6691_s4, %s5412_s6 }
 0x144   : > { %4789 = vmatprep.mubr.f32.mxu0 %v2878_v36 }
 0x145   : > { %4387 = vmatmul.mubr.f32.gmra.mrb[34].mxu1 %v1227_v38 }
 0x146   : > { %4448 = vmatprep.mubr.f32.mxu1 %v1544_v53 }
 0x147   : > { %4790 = vmatmul.mubr.f32.gmra.mrb[16].mxu0 %v2879_v56 }
 0x148   : > { %4792 = vmatprep.mubr.f32.mxu0 %v2880_v18 }
 0x149   : > { %4449 = vmatmul.mubr.f32.vlgmr.msra.gmra.mrb[18].mxu1 %v1545_v14 }
 0x14a   : > { %4451 = vmatprep.mubr.f32.mxu1 %v1546_v54 }
 0x14b   : > { %4793 = vmatmul.mubr.f32.gmra.mrb[18].mxu0 %v2881_v52 }
 0x14c   : > { %4795 = vmatprep.mubr.f32.mxu0 %v2882_v30 }
 0x14d   : > { %4452 = vmatmul.mubr.f32.gmra.mrb[20].mxu1 %v1547_v62 }
 0x14e   : > { %4454 = vmatprep.mubr.f32.mxu1 %v1548_v59 }
 0x14f   : > { %4796 = vmatmul.mubr.f32.gmra.mrb[20].mxu0 %v2883_v3 }
 0x150   : > { %4798 = vmatprep.mubr.f32.mxu0 %v2884_v61 }
 0x151   : > { %4455 = vmatmul.mubr.f32.gmra.mrb[22].mxu1 %v1549_v6 }
 0x152   : > { %4457 = vmatprep.mubr.f32.mxu1 %v1550_v11 }
 0x153   : > { %4799 = vmatmul.mubr.f32.gmra.mrb[22].mxu0 %v2885_v8 }
 0x154   : > { %4801 = vmatprep.mubr.f32.mxu0 %v2886_v4 }
 0x155   : > { %4458 = vmatmul.mubr.f32.gmra.mrb[24].mxu1 %v1551_v15 }
 0x156   : > { %4460 = vmatprep.mubr.f32.mxu1 %v1552_v21 }
 0x157   : > { %4802 = vmatmul.mubr.f32.gmra.mrb[24].mxu0 %v2887_v19 }
 0x158   : > { %4804 = vmatprep.mubr.f32.mxu0 %v2888_v13 }
 0x159   : > { %4461 = vmatmul.mubr.f32.gmra.mrb[26].mxu1 %v1553_v32 }
 0x15a   : > { %4463 = vmatprep.mubr.f32.mxu1 %v1554_v22 }
 0x15b   : > { %4805 = vmatmul.mubr.f32.gmra.mrb[26].mxu0 %v2889_v20 }
 0x15c   : > { %4807 = vmatprep.mubr.f32.mxu0 %v2890_v26 }
 0x15d   : > { %4464 = vmatmul.mubr.f32.gmra.mrb[28].mxu1 %v1555_v29 }
 0x15e   : > { %4466 = vmatprep.mubr.f32.mxu1 %v1556_v35 }
 0x15f   : > { %4808 = vmatmul.mubr.f32.gmra.mrb[28].mxu0 %v2891_v40 }
 0x160   : > { %4810 = vmatprep.mubr.f32.mxu0 %v2892_v47 }
 0x161   : > { %4467 = vmatmul.mubr.f32.gmra.mrb[30].mxu1 %v1557_v0 }
 0x162   : > { %4469 = vmatprep.mubr.f32.mxu1 %v1558_v48 }
 0x163   : > { %4811 = vmatmul.mubr.f32.gmra.mrb[30].mxu0 %v2893_v41 }
 0x164   : > { %4813 = vmatprep.mubr.f32.mxu0 %v2894_v44 }
 0x165   : > { %4470 = vmatmul.mubr.f32.gmra.mrb[32].mxu1 %v1559_v1 }
 0x166   : > { %4472 = vmatprep.mubr.f32.mxu1 %v1560_v7 }
 0x167   : > { %4814 = vmatmul.mubr.f32.gmra.mrb[32].mxu0 %v2895_v28 }
 0x168   : > { %4816 = vmatprep.mubr.f32.mxu0 %v2896_v34 }
 0x169   : > { %4473 = vmatmul.mubr.f32.gmra.mrb[34].mxu1 %v1561_v39 }
 0x16b   : > { %4817 = vmatmul.mubr.f32.gmra.mrb[34].mxu0 %v2897_v12 }
 0x1d4   : > { %v4337_v50 = vpop.f32.mrb[0].mxu1 }
 0x1d5   : > { %v1311_v17 = vpop.f32.mrb[1].mxu1 }
 0x1d8   : > { %v4340_v24 = vpop.f32.mrb[2].mxu1 }
 0x1d9   : > { %v1321_v23 = vpop.f32.mrb[3].mxu1 }
 0x1dc   : > { %v4343_v58 = vpop.f32.mrb[4].mxu1 }
 0x1dd   : > { %v1331_v31 = vpop.f32.mrb[5].mxu1 }
 0x1e0   : > { %v4346_v42 = vpop.f32.mrb[6].mxu1 }
 0x1e1   : > { %v1341_v37 = vpop.f32.mrb[7].mxu1 }
 0x1e4   : > { %v4349_v5 = vpop.f32.mrb[8].mxu1 }
 0x1e5   : > { %v1351_v43 = vpop.f32.mrb[9].mxu1 }
 0x1e8   : > { %v4352_v46 = vpop.f32.mrb[10].mxu1 }
 0x1e9   : > { %v1361_v49 = vpop.f32.mrb[11].mxu1 }
 0x1ec   : > { %v6536_v16 = vpop.f32.mrb[12].mxu1 }
 0x1ed   : > { %v6538_v55 = vpop.f32.mrb[13].mxu1 }
 0x1f0   : > { %v6540_v33 = vpop.f32.mrb[14].mxu1 }
 0x1f1   : > { %v6542_v57 = vpop.f32.mrb[15].mxu1 }
 0x1f4   : > { %v6544_v45 = vpop.f32.mrb[16].mxu1 }
 0x1f5   : > { %v6546_v51 = vpop.f32.mrb[17].mxu1 }
 0x1fa   : > { %v4767_v60 = vpop.f32.mrb[0].mxu0 }
 0x1fb   : > { %v5123_v9 = vadd.f32 %v4767_v60, %v4337_v50  ;;  %v2981_v2 = vpop.f32.mrb[1].mxu0 }
 0x1fc   : > { %v5124_v27 = vadd.f32 %v2981_v2, %v1311_v17 }
 0x1fd   : > { %v3204_v25 = vmul.f32 %v5123_v9, %v6552_v63 }
 0x1fe   : > { %v3203_v36 = vmul.f32 %v5124_v27, %v6552_v63  ;;  %v4770_v38 = vpop.f32.mrb[2].mxu0 }
 0x1ff   : > { %v3247_v56 = vadd.f32 %v6557_v10, %v3204_v25  ;;  %v5125_v53 = vadd.f32 %v4770_v38, %v4340_v24  ;;  %v2991_v18 = vpop.f32.mrb[3].mxu0 }
 0x200   : > { %v3246_v14 = vadd.f32 %v6557_v10, %v3203_v36  ;;  %v5126_v52 = vadd.f32 %v2991_v18, %v1321_v23 }
 0x201   : > { %3283 = vst [vmem:[%s6563_s15 + $0x8] sm:$0xff] %v3247_v56  ;;  %v3206_v54 = vmul.f32 %v5125_v53, %v6552_v63 }
 0x202   : > { %3282 = vst [vmem:[%s6563_s15] sm:$0xff] %v3246_v14  ;;  %v3205_v30 = vmul.f32 %v5126_v52, %v6552_v63  ;;  %v4773_v62 = vpop.f32.mrb[4].mxu0 }
 0x203   : > { %v3249_v3 = vadd.f32 %v6557_v10, %v3206_v54  ;;  %v5127_v59 = vadd.f32 %v4773_v62, %v4343_v58  ;;  %v3001_v61 = vpop.f32.mrb[5].mxu0 }
 0x204   : > { %v3248_v6 = vadd.f32 %v6557_v10, %v3205_v30  ;;  %v5128_v8 = vadd.f32 %v3001_v61, %v1331_v31 }
 0x205   : > { %3285 = vst [vmem:[%s6563_s15 + $0x18] sm:$0xff] %v3249_v3  ;;  %v3208_v11 = vmul.f32 %v5127_v59, %v6552_v63 }
 0x206   : > { %3284 = vst [vmem:[%s6563_s15 + $0x10] sm:$0xff] %v3248_v6  ;;  %v3207_v4 = vmul.f32 %v5128_v8, %v6552_v63  ;;  %v4776_v15 = vpop.f32.mrb[6].mxu0 }
 0x207   : > { %v3251_v19 = vadd.f32 %v6557_v10, %v3208_v11  ;;  %v5129_v21 = vadd.f32 %v4776_v15, %v4346_v42  ;;  %v3011_v13 = vpop.f32.mrb[7].mxu0 }
 0x208   : > { %v3250_v32 = vadd.f32 %v6557_v10, %v3207_v4  ;;  %v5130_v20 = vadd.f32 %v3011_v13, %v1341_v37 }
 0x209   : > { %3287 = vst [vmem:[%s6563_s15 + $0x28] sm:$0xff] %v3251_v19  ;;  %v3210_v22 = vmul.f32 %v5129_v21, %v6552_v63 }
 0x20a   : > { %3286 = vst [vmem:[%s6563_s15 + $0x20] sm:$0xff] %v3250_v32  ;;  %v3209_v26 = vmul.f32 %v5130_v20, %v6552_v63  ;;  %v4779_v29 = vpop.f32.mrb[8].mxu0 }
 0x20b   : > { %v3253_v40 = vadd.f32 %v6557_v10, %v3210_v22  ;;  %v5131_v35 = vadd.f32 %v4779_v29, %v4349_v5  ;;  %v3021_v47 = vpop.f32.mrb[9].mxu0 }
 0x20c   : > { %v3252_v0 = vadd.f32 %v6557_v10, %v3209_v26  ;;  %v5132_v41 = vadd.f32 %v3021_v47, %v1351_v43 }
 0x20d   : > { %3289 = vst [vmem:[%s6563_s15 + $0x38] sm:$0xff] %v3253_v40  ;;  %v3212_v48 = vmul.f32 %v5131_v35, %v6552_v63 }
 0x20e   : > { %3288 = vst [vmem:[%s6563_s15 + $0x30] sm:$0xff] %v3252_v0  ;;  %v3211_v44 = vmul.f32 %v5132_v41, %v6552_v63  ;;  %v4782_v1 = vpop.f32.mrb[10].mxu0 }
 0x20f   : > { %v3255_v28 = vadd.f32 %v6557_v10, %v3212_v48  ;;  %v5133_v7 = vadd.f32 %v4782_v1, %v4352_v46  ;;  %v3031_v34 = vpop.f32.mrb[11].mxu0 }
 0x210   : > { %v3254_v39 = vadd.f32 %v6557_v10, %v3211_v44  ;;  %v5134_v12 = vadd.f32 %v3031_v34, %v1361_v49 }
 0x211   : > { %3291 = vst [vmem:[%s6563_s15 + $0x48] sm:$0xff] %v3255_v28  ;;  %v3214_v50 = vmul.f32 %v5133_v7, %v6552_v63 }
 0x212   : > { %3290 = vst [vmem:[%s6563_s15 + $0x40] sm:$0xff] %v3254_v39  ;;  %v3213_v17 = vmul.f32 %v5134_v12, %v6552_v63  ;;  %v4785_v24 = vpop.f32.mrb[12].mxu0 }
 0x213   : > { %v3257_v23 = vadd.f32 %v6557_v10, %v3214_v50  ;;  %v5135_v58 = vadd.f32 %v4785_v24, %v6536_v16  ;;  %v3041_v31 = vpop.f32.mrb[13].mxu0 }
 0x214   : > { %v3256_v42 = vadd.f32 %v6557_v10, %v3213_v17  ;;  %v5136_v37 = vadd.f32 %v3041_v31, %v6538_v55 }
 0x215   : > { %3293 = vst [vmem:[%s6563_s15 + $0x58] sm:$0xff] %v3257_v23  ;;  %v3216_v5 = vmul.f32 %v5135_v58, %v6552_v63 }
 0x216   : > { %3292 = vst [vmem:[%s6563_s15 + $0x50] sm:$0xff] %v3256_v42  ;;  %v3215_v43 = vmul.f32 %v5136_v37, %v6552_v63  ;;  %v4788_v46 = vpop.f32.mrb[14].mxu0 }
 0x217   : > { %v3259_v49 = vadd.f32 %v6557_v10, %v3216_v5  ;;  %v5137_v60 = vadd.f32 %v4788_v46, %v6540_v33  ;;  %v3051_v9 = vpop.f32.mrb[15].mxu0 }
 0x218   : > { %v3258_v16 = vadd.f32 %v6557_v10, %v3215_v43  ;;  %v5138_v2 = vadd.f32 %v3051_v9, %v6542_v57 }
 0x219   : > { %3295 = vst [vmem:[%s6563_s15 + $0x68] sm:$0xff] %v3259_v49  ;;  %v3218_v55 = vmul.f32 %v5137_v60, %v6552_v63 }
 0x21a   : > { %3294 = vst [vmem:[%s6563_s15 + $0x60] sm:$0xff] %v3258_v16  ;;  %v3217_v27 = vmul.f32 %v5138_v2, %v6552_v63  ;;  %v4791_v25 = vpop.f32.mrb[16].mxu0 }
 0x21b   : > { %v3261_v36 = vadd.f32 %v6557_v10, %v3218_v55  ;;  %v5139_v38 = vadd.f32 %v4791_v25, %v6544_v45  ;;  %v3061_v56 = vpop.f32.mrb[17].mxu0 }
 0x21c   : > { %v3260_v33 = vadd.f32 %v6557_v10, %v3217_v27  ;;  %v5140_v53 = vadd.f32 %v3061_v56, %v6546_v51  ;;  %v4450_v18 = vpop.f32.mrb[18].mxu1 }
 0x21d   : > { %3297 = vst [vmem:[%s6563_s15 + $0x78] sm:$0xff] %v3261_v36  ;;  %v3220_v57 = vmul.f32 %v5139_v38, %v6552_v63  ;;  %v1735_v54 = vpop.f32.mrb[19].mxu1 }
 0x21e   : > { %3296 = vst [vmem:[%s6563_s15 + $0x70] sm:$0xff] %v3260_v33  ;;  %v3219_v14 = vmul.f32 %v5140_v53, %v6552_v63  ;;  %v4794_v52 = vpop.f32.mrb[18].mxu0 }
 0x21f   : > { %v3263_v30 = vadd.f32 %v6557_v10, %v3220_v57  ;;  %v5141_v62 = vadd.f32 %v4794_v52, %v4450_v18  ;;  %v3071_v45 = vpop.f32.mrb[19].mxu0 }
 0x220   : > { %v3262_v3 = vadd.f32 %v6557_v10, %v3219_v14  ;;  %v5142_v59 = vadd.f32 %v3071_v45, %v1735_v54  ;;  %v4453_v61 = vpop.f32.mrb[20].mxu1 }
 0x221   : > { %3299 = vst [vmem:[%s6563_s15 + $0x88] sm:$0xff] %v3263_v30  ;;  %v3222_v51 = vmul.f32 %v5141_v62, %v6552_v63  ;;  %v1745_v11 = vpop.f32.mrb[21].mxu1 }
 0x222   : > { %3298 = vst [vmem:[%s6563_s15 + $0x80] sm:$0xff] %v3262_v3  ;;  %v3221_v6 = vmul.f32 %v5142_v59, %v6552_v63  ;;  %v4797_v8 = vpop.f32.mrb[20].mxu0 }
 0x223   : > { %v3265_v4 = vadd.f32 %v6557_v10, %v3222_v51  ;;  %v5143_v15 = vadd.f32 %v4797_v8, %v4453_v61  ;;  %v3081_v19 = vpop.f32.mrb[21].mxu0 }
 0x224   : > { %v3264_v21 = vadd.f32 %v6557_v10, %v3221_v6  ;;  %v5144_v13 = vadd.f32 %v3081_v19, %v1745_v11  ;;  %v4456_v20 = vpop.f32.mrb[22].mxu1 }
 0x225   : > { %3301 = vst [vmem:[%s6563_s15 + $0x98] sm:$0xff] %v3265_v4  ;;  %v3224_v32 = vmul.f32 %v5143_v15, %v6552_v63  ;;  %v1755_v29 = vpop.f32.mrb[23].mxu1 }
 0x226   : > { %3300 = vst [vmem:[%s6563_s15 + $0x90] sm:$0xff] %v3264_v21  ;;  %v3223_v22 = vmul.f32 %v5144_v13, %v6552_v63  ;;  %v4800_v26 = vpop.f32.mrb[22].mxu0 }
 0x227   : > { %v3267_v40 = vadd.f32 %v6557_v10, %v3224_v32  ;;  %v5145_v35 = vadd.f32 %v4800_v26, %v4456_v20  ;;  %v3091_v47 = vpop.f32.mrb[23].mxu0 }
 0x228   : > { %v3266_v0 = vadd.f32 %v6557_v10, %v3223_v22  ;;  %v5146_v41 = vadd.f32 %v3091_v47, %v1755_v29  ;;  %v4459_v44 = vpop.f32.mrb[24].mxu1 }
 0x229   : > { %3303 = vst [vmem:[%s6563_s15 + $0xa8] sm:$0xff] %v3267_v40  ;;  %v3226_v48 = vmul.f32 %v5145_v35, %v6552_v63  ;;  %v1765_v7 = vpop.f32.mrb[25].mxu1 }
 0x22a   : > { %3302 = vst [vmem:[%s6563_s15 + $0xa0] sm:$0xff] %v3266_v0  ;;  %v3225_v1 = vmul.f32 %v5146_v41, %v6552_v63  ;;  %v4803_v28 = vpop.f32.mrb[24].mxu0 }
 0x22b   : > { %v3269_v34 = vadd.f32 %v6557_v10, %v3226_v48  ;;  %v5147_v39 = vadd.f32 %v4803_v28, %v4459_v44  ;;  %v3101_v12 = vpop.f32.mrb[25].mxu0 }
 0x22c   : > { %v3268_v50 = vadd.f32 %v6557_v10, %v3225_v1  ;;  %v5148_v17 = vadd.f32 %v3101_v12, %v1765_v7  ;;  %v4462_v23 = vpop.f32.mrb[26].mxu1 }
 0x22d   : > { %3305 = vst [vmem:[%s6563_s15 + $0xb8] sm:$0xff] %v3269_v34  ;;  %v3228_v24 = vmul.f32 %v5147_v39, %v6552_v63  ;;  %v1775_v42 = vpop.f32.mrb[27].mxu1 }
 0x22e   : > { %3304 = vst [vmem:[%s6563_s15 + $0xb0] sm:$0xff] %v3268_v50  ;;  %v3227_v58 = vmul.f32 %v5148_v17, %v6552_v63  ;;  %v4806_v31 = vpop.f32.mrb[26].mxu0 }
 0x22f   : > { %v3271_v37 = vadd.f32 %v6557_v10, %v3228_v24  ;;  %v5149_v5 = vadd.f32 %v4806_v31, %v4462_v23  ;;  %v3111_v43 = vpop.f32.mrb[27].mxu0 }
 0x230   : > { %v3270_v46 = vadd.f32 %v6557_v10, %v3227_v58  ;;  %v5150_v49 = vadd.f32 %v3111_v43, %v1775_v42  ;;  %v4465_v9 = vpop.f32.mrb[28].mxu1 }
 0x231   : > { %3307 = vst [vmem:[%s6563_s15 + $0xc8] sm:$0xff] %v3271_v37  ;;  %v3230_v60 = vmul.f32 %v5149_v5, %v6552_v63  ;;  %v1785_v55 = vpop.f32.mrb[29].mxu1 }
 0x232   : > { %3306 = vst [vmem:[%s6563_s15 + $0xc0] sm:$0xff] %v3270_v46  ;;  %v3229_v16 = vmul.f32 %v5150_v49, %v6552_v63  ;;  %v4809_v2 = vpop.f32.mrb[28].mxu0 }
 0x233   : > { %v3273_v27 = vadd.f32 %v6557_v10, %v3230_v60  ;;  %v5151_v25 = vadd.f32 %v4809_v2, %v4465_v9  ;;  %v3121_v36 = vpop.f32.mrb[29].mxu0 }
 0x234   : > { %v3272_v38 = vadd.f32 %v6557_v10, %v3229_v16  ;;  %v5152_v56 = vadd.f32 %v3121_v36, %v1785_v55  ;;  %v4468_v53 = vpop.f32.mrb[30].mxu1 }
 0x235   : > { %3309 = vst [vmem:[%s6563_s15 + $0xd8] sm:$0xff] %v3273_v27  ;;  %v3232_v33 = vmul.f32 %v5151_v25, %v6552_v63  ;;  %v1795_v14 = vpop.f32.mrb[31].mxu1 }
 0x236   : > { %3308 = vst [vmem:[%s6563_s15 + $0xd0] sm:$0xff] %v3272_v38  ;;  %v3231_v57 = vmul.f32 %v5152_v56, %v6552_v63  ;;  %v4812_v18 = vpop.f32.mrb[30].mxu0 }
 0x237   : > { %v3275_v52 = vadd.f32 %v6557_v10, %v3232_v33  ;;  %v5153_v54 = vadd.f32 %v4812_v18, %v4468_v53  ;;  %v3131_v30 = vpop.f32.mrb[31].mxu0 }
 0x238   : > { %v3274_v62 = vadd.f32 %v6557_v10, %v3231_v57  ;;  %v5154_v45 = vadd.f32 %v3131_v30, %v1795_v14  ;;  %v4471_v59 = vpop.f32.mrb[32].mxu1 }
 0x239   : > { %3311 = vst [vmem:[%s6563_s15 + $0xe8] sm:$0xff] %v3275_v52  ;;  %v3234_v3 = vmul.f32 %v5153_v54, %v6552_v63  ;;  %v1805_v6 = vpop.f32.mrb[33].mxu1 }
 0x23a   : > { %3310 = vst [vmem:[%s6563_s15 + $0xe0] sm:$0xff] %v3274_v62  ;;  %v3233_v51 = vmul.f32 %v5154_v45, %v6552_v63  ;;  %v4815_v61 = vpop.f32.mrb[32].mxu0 }
 0x23b   : > { %v3277_v8 = vadd.f32 %v6557_v10, %v3234_v3  ;;  %v5155_v11 = vadd.f32 %v4815_v61, %v4471_v59  ;;  %v3141_v4 = vpop.f32.mrb[33].mxu0 }
 0x23c   : > { %v3276_v15 = vadd.f32 %v6557_v10, %v3233_v51  ;;  %v5156_v19 = vadd.f32 %v3141_v4, %v1805_v6  ;;  %v4474_v13 = vpop.f32.mrb[34].mxu1 }
 0x23d   : > { %3313 = vst [vmem:[%s6563_s15 + $0xf8] sm:$0xff] %v3277_v8  ;;  %v3236_v21 = vmul.f32 %v5155_v11, %v6552_v63  ;;  %v1815_v22 = vpop.f32.mrb[35].mxu1 }
 0x23e   : > { %3312 = vst [vmem:[%s6563_s15 + $0xf0] sm:$0xff] %v3276_v15  ;;  %v3235_v32 = vmul.f32 %v5156_v19, %v6552_v63  ;;  %v4818_v20 = vpop.f32.mrb[34].mxu0 }
 0x23f   : > { %v3279_v26 = vadd.f32 %v6557_v10, %v3236_v21  ;;  %v5157_v29 = vadd.f32 %v4818_v20, %v4474_v13  ;;  %v3151_v40 = vpop.f32.mrb[35].mxu0 }
 0x240   : > { %v3278_v35 = vadd.f32 %v6557_v10, %v3235_v32  ;;  %v5158_v47 = vadd.f32 %v3151_v40, %v1815_v22 }
 0x241   : > { %3315 = vst [vmem:[%s6563_s15 + $0x108] sm:$0xff] %v3279_v26  ;;  %v3238_v0 = vmul.f32 %v5157_v29, %v6552_v63 }
 0x242   : > { %3314 = vst [vmem:[%s6563_s15 + $0x100] sm:$0xff] %v3278_v35  ;;  %v3237_v41 = vmul.f32 %v5158_v47, %v6552_v63 }
 0x243   : > { %v3281_v48 = vadd.f32 %v6557_v10, %v3238_v0 }
 0x244   : > { %v3280_v44 = vadd.f32 %v6557_v10, %v3237_v41 }
 0x245   : > { %3317 = vst [vmem:[%s6563_s15 + $0x118] sm:$0xff] %v3281_v48 }
 0x246   : > { %3316 = vst [vmem:[%s6563_s15 + $0x110] sm:$0xff] %v3280_v44 }
 0x247 PF: > { %s14_s17 = sadd.s32 1, %s5459_s17   ;;  %s6692_s15 = smov %s5455_s16 }
 0x248   : > { %p11_p5 = scmp.ge.s32.totalorder %s14_s17, 4   ;;  %s6693_s16 = smov %s6695_s18 }
 0x24a   :  { %13 = sbr.rel (!%p11_p5) target bundleno = 2 (0x2), region = 83 }

</bundles_post_ra>
